<compile_context>
chip_gen: v7x
topology: tpu7x:2x2x1
jax: 0.10.0
libtpu: 0.0.40
codegen_flags: <defaults>
</compile_context>

<pallas_src>
import functools

import numpy as np
import jax
import jax.numpy as jnp
from jax import lax
from jax.experimental import pallas as pl
from jax.experimental.pallas import tpu as pltpu

KERNELS = [(1, 4), (2, 4), (3, 4), (4, 5), (5, 5), (6, 5), (7, 5)]
KMAX = max(k for k, _ in KERNELS)            # 7
EMB = sum(od for _, od in KERNELS)           # 32
HIDDEN = 1000                                 # true hidden dim (no 1024 pad)
NCLASS = 10001
TN = 2560                                     # class tile (multiple of 128)
N_TILES = 4
N_PAD = N_TILES * TN                          # 10240


# ---------- single fused kernel -------------------------------------------------
def tdnn_kernel(p_ref, wconv_ref, mask_ref, w1_ref, w2_ref, o_ref,
                h_sc, logits_sc, *, batch, seq):
    # p_ref:    (B*L, KMAX*C)  im2col patches (zero padded past the word end)
    # wconv_ref:(KMAX*C, EMB)  all conv kernels packed column-blockwise
    # mask_ref: (B*L, EMB)     1.0 on valid time steps per width, else 0.0
    # w1_ref:   (EMB, HIDDEN)  first classifier layer
    # w2_ref:   (HIDDEN, TN)   bf16 class-tile j of the second classifier layer
    # h_sc:     (B, HIDDEN)    bf16 scratch, persists across grid steps
    # logits_sc:(N_TILES, B, TN) f32 scratch accumulating all logits
    j = pl.program_id(0)

    # ---- prologue (j == 0): conv(all widths)+ReLU+max-over-time + Linear+ReLU ----
    @pl.when(j == 0)
    def _():
        conv = jnp.dot(p_ref[...], wconv_ref[...],
                       preferred_element_type=jnp.float32)        # (B*L, EMB)
        conv = jnp.maximum(conv, 0.0) * mask_ref[...]              # ReLU + validity
        # max over time: ReLU guarantees max >= 0, so masked zeros never win.
        a = jnp.max(conv.reshape(batch, seq, EMB), axis=1)         # (B, EMB)
        # TODO(synk): Dropout(p=0.2) is treated as inference-mode identity.
        h = jnp.maximum(jnp.dot(a, w1_ref[...],
                                preferred_element_type=jnp.float32), 0.0)
        h_sc[...] = h.astype(jnp.bfloat16)                         # bf16 once

    # ---- every step: bf16 class matmul (f32 acc), park logits tile in VMEM ------
    logits_sc[j] = jnp.dot(h_sc[...], w2_ref[...],
                           preferred_element_type=jnp.float32)     # (B, TN)

    # ---- epilogue (last tile): masked log_softmax over all classes --------------
    @pl.when(j == N_TILES - 1)
    def _():
        neg = jnp.float32(-1e30)

        def masked_tile(t):                                        # t is static
            xt = logits_sc[t]                                      # (B, TN)
            if (t + 1) * TN > NCLASS:                              # pad lanes
                lane = lax.broadcasted_iota(jnp.int32, xt.shape, 1)
                xt = jnp.where(lane + t * TN < NCLASS, xt, neg)
            return xt

        m = masked_tile(0).max(axis=1, keepdims=True)
        for t in range(1, N_TILES):
            m = jnp.maximum(m, masked_tile(t).max(axis=1, keepdims=True))
        s = jnp.zeros_like(m)
        for t in range(N_TILES):
            s = s + jnp.sum(jnp.exp(masked_tile(t) - m), axis=1, keepdims=True)
        shift = m + jnp.log(s)
        for t in range(N_TILES):                                   # static stores
            lo = t * TN
            hi = min((t + 1) * TN, NCLASS)
            o_ref[:, lo:hi] = logits_sc[t][:, :hi - lo] - shift


# ---------- one-time parameter preparation (hoisted out of the forward path) -----
def prepare_params(conv_ws, w1, w2, L, B):
    C = conv_ws[0].shape[1]
    # pack all conv kernels into one (KMAX*C, EMB) matrix; row j*C+c <-> tap j, chan c
    w_all = np.zeros((KMAX * C, EMB), np.float32)
    off = 0
    for (kW, od), w in zip(KERNELS, conv_ws):
        w_all[:kW * C, off:off + od] = np.asarray(w).reshape(kW * C, od)
        off += od
    # validity mask over time positions, per output column
    mask = np.zeros((L, EMB), np.float32)
    off = 0
    for kW, od in KERNELS:
        mask[:L - kW + 1, off:off + od] = 1.0
        off += od
    mask2 = np.tile(mask, (B, 1))                                  # (B*L, EMB)
    w1_j = jnp.asarray(w1, jnp.float32)                            # (EMB, HIDDEN)
    # pad classes only, cast bf16 once, re-lay out tile-major -> contiguous DMAs
    w2_p = jnp.pad(jnp.asarray(w2, jnp.float32),
                   ((0, 0), (0, N_PAD - NCLASS))).astype(jnp.bfloat16)
    w2_tiles = jnp.transpose(w2_p.reshape(HIDDEN, N_TILES, TN), (1, 0, 2))
    return jnp.asarray(w_all), jnp.asarray(mask2), w1_j, w2_tiles


# ---------- forward pass (jitted; weights are pre-padded / pre-cast) --------------
@jax.jit
def tdnn_forward(x, w_all, mask2, w1, w2_tiles):
    B, C, L = x.shape
    # trace-time guards: prepared params are baked for a specific (B, L, C)
    assert mask2.shape == (B * L, EMB), "prepare_params was run for different (B, L)"
    assert w_all.shape == (KMAX * C, EMB), "prepare_params was run for different C"

    x_t = jnp.transpose(x, (0, 2, 1)).astype(jnp.float32)          # (B, L, C)
    x_pad = jnp.pad(x_t, ((0, 0), (0, KMAX - 1), (0, 0)))          # zero pad time
    patches = jnp.concatenate(
        [x_pad[:, j:j + L, :] for j in range(KMAX)], axis=-1)       # (B, L, KMAX*C)
    patches = patches.reshape(B * L, KMAX * C)

    out = pl.pallas_call(
        functools.partial(tdnn_kernel, batch=B, seq=L),
        out_shape=jax.ShapeDtypeStruct((B, NCLASS), jnp.float32),
        grid=(N_TILES,),
        in_specs=[
            pl.BlockSpec((B * L, KMAX * C), lambda j: (0, 0)),     # patches
            pl.BlockSpec((KMAX * C, EMB), lambda j: (0, 0)),       # packed conv w
            pl.BlockSpec((B * L, EMB), lambda j: (0, 0)),          # time mask
            pl.BlockSpec((EMB, HIDDEN), lambda j: (0, 0)),         # w1
            pl.BlockSpec((None, HIDDEN, TN), lambda j: (j, 0, 0)),  # w2 tile j
        ],
        out_specs=pl.BlockSpec((B, NCLASS), lambda j: (0, 0)),
        scratch_shapes=[pltpu.VMEM((B, HIDDEN), jnp.bfloat16),
                        pltpu.VMEM((N_TILES, B, TN), jnp.float32)],
        compiler_params=pltpu.CompilerParams(
            dimension_semantics=("arbitrary",),
            vmem_limit_bytes=32 << 20),
    )(patches, w_all, mask2, w1, w2_tiles)
    return out


# ---------- pure-JAX reference (same bf16 quantization of w2 as the kernel) -------
def reference(x, conv_ws, w1, w2):
    feats = []
    for (kW, od), w in zip(KERNELS, conv_ws):
        w_oik = jnp.transpose(w, (2, 1, 0))                        # (out_dim, C, kW)
        conv = lax.conv_general_dilated(
            x, w_oik, window_strides=(1,), padding="VALID",
            dimension_numbers=("NCH", "OIH", "NCH"),
            precision=lax.Precision.HIGHEST)
        feats.append(jnp.max(jnp.maximum(conv, 0.0), axis=2))
    a = jnp.concatenate(feats, axis=1)                             # (B, 32)
    h = jnp.maximum(jnp.dot(a, w1, precision=lax.Precision.HIGHEST), 0.0)
    logits = jnp.dot(h.astype(jnp.bfloat16), w2.astype(jnp.bfloat16),
                     preferred_element_type=jnp.float32)
    return jax.nn.log_softmax(logits, axis=1)


if __name__ == "__main__":
    key = jax.random.PRNGKey(0)
    B, C, L = 2, 7, 16                                             # batch, input_nchar, word length
    keys = jax.random.split(key, 3 + len(KERNELS))

    x = jax.random.normal(keys[0], (B, C, L), jnp.float32)
    conv_ws = [
        jax.random.normal(keys[3 + i], (kW, C, od), jnp.float32) * 0.05
        for i, (kW, od) in enumerate(KERNELS)
    ]
    w1 = jax.random.normal(keys[1], (EMB, HIDDEN), jnp.float32) * 0.05
    w2 = jax.random.normal(keys[2], (HIDDEN, NCLASS), jnp.float32) * 0.05

    # one-time weight prep (padding + bf16 cast + tile-major reorder)
    w_all, mask2, w1_j, w2_tiles = prepare_params(conv_ws, w1, w2, L, B)

    out = jax.block_until_ready(tdnn_forward(x, w_all, mask2, w1_j, w2_tiles))

    ref = reference(x, conv_ws, w1, w2)
    assert out.shape == (B, NCLASS)
    err = float(jnp.max(jnp.abs(out - ref)))
    if err > 5e-3:
        raise AssertionError(f"kernel/reference mismatch, max abs err = {err}")
    print("KERNEL_OK")
</pallas_src>

<mosaic_0001>
module attributes {stable_mosaic.version = 11 : i64} {
  func.func @tdnn_kernel(%arg0: i32, %arg1: memref<32x49xf32, #tpu.memory_space<vmem>>, %arg2: memref<49x32xf32, #tpu.memory_space<vmem>>, %arg3: memref<32x32xf32, #tpu.memory_space<vmem>>, %arg4: memref<32x1000xf32, #tpu.memory_space<vmem>>, %arg5: memref<1x1000x2560xbf16, #tpu.memory_space<vmem>>, %arg6: memref<2x10001xf32, #tpu.memory_space<vmem>>, %arg7: memref<2x1000xbf16, #tpu.memory_space<vmem>>, %arg8: memref<4x2x2560xf32, #tpu.memory_space<vmem>>) attributes {dimension_semantics = [#tpu.dimension_semantics<arbitrary>], iteration_bounds = array<i64: 4>, scalar_prefetch = 0 : i64, scratch_operands = 2 : i64, tpu.core_type = #tpu.core_type<tc>, window_params = [{pipeline_mode = #tpu.pipeline_mode<synchronous>, transform_indices = @transform_0, window_bounds = array<i64: 32, 49>}, {pipeline_mode = #tpu.pipeline_mode<synchronous>, transform_indices = @transform_1, window_bounds = array<i64: 49, 32>}, {pipeline_mode = #tpu.pipeline_mode<synchronous>, transform_indices = @transform_2, window_bounds = array<i64: 32, 32>}, {pipeline_mode = #tpu.pipeline_mode<synchronous>, transform_indices = @transform_3, window_bounds = array<i64: 32, 1000>}, {transform_indices = @transform_4, window_bounds = array<i64: 1, 1000, 2560>}, {pipeline_mode = #tpu.pipeline_mode<synchronous>, transform_indices = @transform_5, window_bounds = array<i64: 2, 10001>}]} {
    %c0_i32 = arith.constant 0 : i32
    %0 = arith.cmpi eq, %arg0, %c0_i32 : i32
    %1 = arith.extui %0 : i1 to i32
    %c0_i32_0 = arith.constant 0 : i32
    %2 = arith.cmpi ne, %1, %c0_i32_0 : i32
    scf.if %2 {
      %c0_8 = arith.constant 0 : index
      %c0_9 = arith.constant 0 : index
      %14 = vector.load %arg1[%c0_8, %c0_9] : memref<32x49xf32, #tpu.memory_space<vmem>>, vector<32x49xf32>
      %c0_10 = arith.constant 0 : index
      %c0_11 = arith.constant 0 : index
      %15 = vector.load %arg2[%c0_10, %c0_11] : memref<49x32xf32, #tpu.memory_space<vmem>>, vector<49x32xf32>
      %cst_12 = arith.constant dense<0.000000e+00> : vector<32x32xf32>
      %16 = tpu.matmul %14, %15, %cst_12 {dimension_numbers = #tpu.dot_dimension_numbers<[1], [0], [0], [1], [0, 0, 1, 1], [], []>} : vector<32x49xf32>, vector<49x32xf32>, vector<32x32xf32> -> vector<32x32xf32>
      %cst_13 = arith.constant 0.000000e+00 : f32
      %17 = vector.broadcast %cst_13 : f32 to vector<32x32xf32>
      %18 = arith.maximumf %16, %17 : vector<32x32xf32>
      %c0_14 = arith.constant 0 : index
      %c0_15 = arith.constant 0 : index
      %19 = vector.load %arg3[%c0_14, %c0_15] : memref<32x32xf32, #tpu.memory_space<vmem>>, vector<32x32xf32>
      %20 = arith.mulf %18, %19 : vector<32x32xf32>
      %21 = vector.shape_cast %20 : vector<32x32xf32> to vector<2x16x32xf32>
      %cst_16 = arith.constant dense<0xFF800000> : vector<2x32xf32>
      %22 = vector.multi_reduction <maximumf>, %21, %cst_16 [1] : vector<2x16x32xf32> to vector<2x32xf32>
      %c0_17 = arith.constant 0 : index
      %c0_18 = arith.constant 0 : index
      %23 = vector.load %arg4[%c0_17, %c0_18] : memref<32x1000xf32, #tpu.memory_space<vmem>>, vector<32x1000xf32>
      %cst_19 = arith.constant dense<0.000000e+00> : vector<2x1000xf32>
      %24 = tpu.matmul %22, %23, %cst_19 {dimension_numbers = #tpu.dot_dimension_numbers<[1], [0], [0], [1], [0, 0, 1, 1], [], []>} : vector<2x32xf32>, vector<32x1000xf32>, vector<2x1000xf32> -> vector<2x1000xf32>
      %cst_20 = arith.constant 0.000000e+00 : f32
      %25 = vector.broadcast %cst_20 : f32 to vector<2x1000xf32>
      %26 = arith.maximumf %24, %25 : vector<2x1000xf32>
      %27 = arith.truncf %26 : vector<2x1000xf32> to vector<2x1000xbf16>
      %c0_21 = arith.constant 0 : index
      %c0_22 = arith.constant 0 : index
      %28 = vector.load %arg7[%c0_21, %c0_22] : memref<2x1000xbf16, #tpu.memory_space<vmem>>, vector<2x1000xbf16>
      tpu.vector_store %arg7[%c0_21, %c0_22], %27 {strides = array<i32>} : memref<2x1000xbf16, #tpu.memory_space<vmem>>, vector<2x1000xbf16>,
    } else {
    }
    %c0 = arith.constant 0 : index
    %c0_1 = arith.constant 0 : index
    %3 = vector.load %arg7[%c0, %c0_1] : memref<2x1000xbf16, #tpu.memory_space<vmem>>, vector<2x1000xbf16>
    %c0_2 = arith.constant 0 : index
    %c0_3 = arith.constant 0 : index
    %c0_4 = arith.constant 0 : index
    %4 = vector.load %arg5[%c0_2, %c0_3, %c0_4] : memref<1x1000x2560xbf16, #tpu.memory_space<vmem>>, vector<1x1000x2560xbf16>
    %5 = vector.shape_cast %4 : vector<1x1000x2560xbf16> to vector<1000x2560xbf16>
    %cst = arith.constant dense<0.000000e+00> : vector<2x2560xf32>
    %6 = tpu.matmul %3, %5, %cst {dimension_numbers = #tpu.dot_dimension_numbers<[1], [0], [0], [1], [0, 0, 1, 1], [], []>} : vector<2x1000xbf16>, vector<1000x2560xbf16>, vector<2x2560xf32> -> vector<2x2560xf32>
    %7 = arith.index_cast %arg0 : i32 to index
    %c0_5 = arith.constant 0 : index
    %c0_6 = arith.constant 0 : index
    %8 = vector.load %arg8[%7, %c0_5, %c0_6] : memref<4x2x2560xf32, #tpu.memory_space<vmem>>, vector<1x2x2560xf32>
    %9 = vector.shape_cast %8 : vector<1x2x2560xf32> to vector<2x2560xf32>
    %10 = vector.shape_cast %6 : vector<2x2560xf32> to vector<1x2x2560xf32>
    tpu.vector_store %arg8[%7, %c0_5, %c0_6], %10 {strides = array<i32>} : memref<4x2x2560xf32, #tpu.memory_space<vmem>>, vector<1x2x2560xf32>,
    %c3_i32 = arith.constant 3 : i32
    %11 = arith.cmpi eq, %arg0, %c3_i32 : i32
    %12 = arith.extui %11 : i1 to i32
    %c0_i32_7 = arith.constant 0 : i32
    %13 = arith.cmpi ne, %12, %c0_i32_7 : i32
    scf.if %13 {
      %c0_8 = arith.constant 0 : index
      %c0_9 = arith.constant 0 : index
      %c0_10 = arith.constant 0 : index
      %14 = vector.load %arg8[%c0_8, %c0_9, %c0_10] : memref<4x2x2560xf32, #tpu.memory_space<vmem>>, vector<1x2x2560xf32>
      %15 = vector.shape_cast %14 : vector<1x2x2560xf32> to vector<2x2560xf32>
      %cst_11 = arith.constant dense<0xFF800000> : vector<2xf32>
      %16 = vector.multi_reduction <maximumf>, %15, %cst_11 [1] : vector<2x2560xf32> to vector<2xf32>
      %17 = vector.shape_cast %16 : vector<2xf32> to vector<2x1xf32>
      %c1 = arith.constant 1 : index
      %c0_12 = arith.constant 0 : index
      %c0_13 = arith.constant 0 : index
      %18 = vector.load %arg8[%c1, %c0_12, %c0_13] : memref<4x2x2560xf32, #tpu.memory_space<vmem>>, vector<1x2x2560xf32>
      %19 = vector.shape_cast %18 : vector<1x2x2560xf32> to vector<2x2560xf32>
      %cst_14 = arith.constant dense<0xFF800000> : vector<2xf32>
      %20 = vector.multi_reduction <maximumf>, %19, %cst_14 [1] : vector<2x2560xf32> to vector<2xf32>
      %21 = vector.shape_cast %20 : vector<2xf32> to vector<2x1xf32>
      %22 = arith.maximumf %17, %21 : vector<2x1xf32>
      %c2 = arith.constant 2 : index
      %c0_15 = arith.constant 0 : index
      %c0_16 = arith.constant 0 : index
      %23 = vector.load %arg8[%c2, %c0_15, %c0_16] : memref<4x2x2560xf32, #tpu.memory_space<vmem>>, vector<1x2x2560xf32>
      %24 = vector.shape_cast %23 : vector<1x2x2560xf32> to vector<2x2560xf32>
      %cst_17 = arith.constant dense<0xFF800000> : vector<2xf32>
      %25 = vector.multi_reduction <maximumf>, %24, %cst_17 [1] : vector<2x2560xf32> to vector<2xf32>
      %26 = vector.shape_cast %25 : vector<2xf32> to vector<2x1xf32>
      %27 = arith.maximumf %22, %26 : vector<2x1xf32>
      %c3 = arith.constant 3 : index
      %c0_18 = arith.constant 0 : index
      %c0_19 = arith.constant 0 : index
      %28 = vector.load %arg8[%c3, %c0_18, %c0_19] : memref<4x2x2560xf32, #tpu.memory_space<vmem>>, vector<1x2x2560xf32>
      %29 = vector.shape_cast %28 : vector<1x2x2560xf32> to vector<2x2560xf32>
      %30 = tpu.iota {dimensions = array<i32: 1>} : vector<2x2560xi32>
      %c7680_i32 = arith.constant 7680 : i32
      %31 = vector.broadcast %c7680_i32 : i32 to vector<2x2560xi32>
      %32 = arith.addi %30, %31 : vector<2x2560xi32>
      %c10001_i32 = arith.constant 10001 : i32
      %33 = vector.broadcast %c10001_i32 : i32 to vector<2x2560xi32>
      %34 = arith.cmpi slt, %32, %33 : vector<2x2560xi32>
      %cst_20 = arith.constant -1.000000e+30 : f32
      %35 = vector.broadcast %cst_20 : f32 to vector<2x2560xf32>
      %36 = arith.select %34, %29, %35 : vector<2x2560xi1>, vector<2x2560xf32>
      %cst_21 = arith.constant dense<0xFF800000> : vector<2xf32>
      %37 = vector.multi_reduction <maximumf>, %36, %cst_21 [1] : vector<2x2560xf32> to vector<2xf32>
      %38 = vector.shape_cast %37 : vector<2xf32> to vector<2x1xf32>
      %39 = arith.maximumf %27, %38 : vector<2x1xf32>
      %cst_22 = arith.constant 0.000000e+00 : f32
      %40 = vector.broadcast %cst_22 : f32 to vector<2x1xf32>
      %c0_23 = arith.constant 0 : index
      %c0_24 = arith.constant 0 : index
      %c0_25 = arith.constant 0 : index
      %41 = vector.load %arg8[%c0_23, %c0_24, %c0_25] : memref<4x2x2560xf32, #tpu.memory_space<vmem>>, vector<1x2x2560xf32>
      %42 = vector.shape_cast %41 : vector<1x2x2560xf32> to vector<2x2560xf32>
      %43 = vector.broadcast %39 : vector<2x1xf32> to vector<2x2560xf32>
      %44 = arith.subf %42, %43 : vector<2x2560xf32>
      %45 = math.exp %44 : vector<2x2560xf32>
      %cst_26 = arith.constant dense<0.000000e+00> : vector<2xf32>
      %46 = vector.multi_reduction <add>, %45, %cst_26 [1] : vector<2x2560xf32> to vector<2xf32>
      %47 = vector.shape_cast %46 : vector<2xf32> to vector<2x1xf32>
      %48 = arith.addf %40, %47 : vector<2x1xf32>
      %c1_27 = arith.constant 1 : index
      %c0_28 = arith.constant 0 : index
      %c0_29 = arith.constant 0 : index
      %49 = vector.load %arg8[%c1_27, %c0_28, %c0_29] : memref<4x2x2560xf32, #tpu.memory_space<vmem>>, vector<1x2x2560xf32>
      %50 = vector.shape_cast %49 : vector<1x2x2560xf32> to vector<2x2560xf32>
      %51 = vector.broadcast %39 : vector<2x1xf32> to vector<2x2560xf32>
      %52 = arith.subf %50, %51 : vector<2x2560xf32>
      %53 = math.exp %52 : vector<2x2560xf32>
      %cst_30 = arith.constant dense<0.000000e+00> : vector<2xf32>
      %54 = vector.multi_reduction <add>, %53, %cst_30 [1] : vector<2x2560xf32> to vector<2xf32>
      %55 = vector.shape_cast %54 : vector<2xf32> to vector<2x1xf32>
      %56 = arith.addf %48, %55 : vector<2x1xf32>
      %c2_31 = arith.constant 2 : index
      %c0_32 = arith.constant 0 : index
      %c0_33 = arith.constant 0 : index
      %57 = vector.load %arg8[%c2_31, %c0_32, %c0_33] : memref<4x2x2560xf32, #tpu.memory_space<vmem>>, vector<1x2x2560xf32>
      %58 = vector.shape_cast %57 : vector<1x2x2560xf32> to vector<2x2560xf32>
      %59 = vector.broadcast %39 : vector<2x1xf32> to vector<2x2560xf32>
      %60 = arith.subf %58, %59 : vector<2x2560xf32>
      %61 = math.exp %60 : vector<2x2560xf32>
      %cst_34 = arith.constant dense<0.000000e+00> : vector<2xf32>
      %62 = vector.multi_reduction <add>, %61, %cst_34 [1] : vector<2x2560xf32> to vector<2xf32>
      %63 = vector.shape_cast %62 : vector<2xf32> to vector<2x1xf32>
      %64 = arith.addf %56, %63 : vector<2x1xf32>
      %c3_35 = arith.constant 3 : index
      %c0_36 = arith.constant 0 : index
      %c0_37 = arith.constant 0 : index
      %65 = vector.load %arg8[%c3_35, %c0_36, %c0_37] : memref<4x2x2560xf32, #tpu.memory_space<vmem>>, vector<1x2x2560xf32>
      %66 = vector.shape_cast %65 : vector<1x2x2560xf32> to vector<2x2560xf32>
      %67 = tpu.iota {dimensions = array<i32: 1>} : vector<2x2560xi32>
      %c7680_i32_38 = arith.constant 7680 : i32
      %68 = vector.broadcast %c7680_i32_38 : i32 to vector<2x2560xi32>
      %69 = arith.addi %67, %68 : vector<2x2560xi32>
      %c10001_i32_39 = arith.constant 10001 : i32
      %70 = vector.broadcast %c10001_i32_39 : i32 to vector<2x2560xi32>
      %71 = arith.cmpi slt, %69, %70 : vector<2x2560xi32>
      %cst_40 = arith.constant -1.000000e+30 : f32
      %72 = vector.broadcast %cst_40 : f32 to vector<2x2560xf32>
      %73 = arith.select %71, %66, %72 : vector<2x2560xi1>, vector<2x2560xf32>
      %74 = vector.broadcast %39 : vector<2x1xf32> to vector<2x2560xf32>
      %75 = arith.subf %73, %74 : vector<2x2560xf32>
      %76 = math.exp %75 : vector<2x2560xf32>
      %cst_41 = arith.constant dense<0.000000e+00> : vector<2xf32>
      %77 = vector.multi_reduction <add>, %76, %cst_41 [1] : vector<2x2560xf32> to vector<2xf32>
      %78 = vector.shape_cast %77 : vector<2xf32> to vector<2x1xf32>
      %79 = arith.addf %64, %78 : vector<2x1xf32>
      %80 = math.log %79 : vector<2x1xf32>
      %81 = arith.addf %39, %80 : vector<2x1xf32>
      %c0_42 = arith.constant 0 : index
      %c0_43 = arith.constant 0 : index
      %c0_44 = arith.constant 0 : index
      %82 = vector.load %arg8[%c0_42, %c0_43, %c0_44] : memref<4x2x2560xf32, #tpu.memory_space<vmem>>, vector<1x2x2560xf32>
      %83 = vector.shape_cast %82 : vector<1x2x2560xf32> to vector<2x2560xf32>
      %84 = vector.broadcast %81 : vector<2x1xf32> to vector<2x2560xf32>
      %85 = arith.subf %83, %84 : vector<2x2560xf32>
      %c0_45 = arith.constant 0 : index
      %c0_46 = arith.constant 0 : index
      %86 = vector.load %arg6[%c0_45, %c0_46] : memref<2x10001xf32, #tpu.memory_space<vmem>>, vector<2x2560xf32>
      tpu.vector_store %arg6[%c0_45, %c0_46], %85 {strides = array<i32>} : memref<2x10001xf32, #tpu.memory_space<vmem>>, vector<2x2560xf32>,
      %c1_47 = arith.constant 1 : index
      %c0_48 = arith.constant 0 : index
      %c0_49 = arith.constant 0 : index
      %87 = vector.load %arg8[%c1_47, %c0_48, %c0_49] : memref<4x2x2560xf32, #tpu.memory_space<vmem>>, vector<1x2x2560xf32>
      %88 = vector.shape_cast %87 : vector<1x2x2560xf32> to vector<2x2560xf32>
      %89 = vector.broadcast %81 : vector<2x1xf32> to vector<2x2560xf32>
      %90 = arith.subf %88, %89 : vector<2x2560xf32>
      %c0_50 = arith.constant 0 : index
      %c2560 = arith.constant 2560 : index
      %91 = vector.load %arg6[%c0_50, %c2560] : memref<2x10001xf32, #tpu.memory_space<vmem>>, vector<2x2560xf32>
      tpu.vector_store %arg6[%c0_50, %c2560], %90 {strides = array<i32>} : memref<2x10001xf32, #tpu.memory_space<vmem>>, vector<2x2560xf32>,
      %c2_51 = arith.constant 2 : index
      %c0_52 = arith.constant 0 : index
      %c0_53 = arith.constant 0 : index
      %92 = vector.load %arg8[%c2_51, %c0_52, %c0_53] : memref<4x2x2560xf32, #tpu.memory_space<vmem>>, vector<1x2x2560xf32>
      %93 = vector.shape_cast %92 : vector<1x2x2560xf32> to vector<2x2560xf32>
      %94 = vector.broadcast %81 : vector<2x1xf32> to vector<2x2560xf32>
      %95 = arith.subf %93, %94 : vector<2x2560xf32>
      %c0_54 = arith.constant 0 : index
      %c5120 = arith.constant 5120 : index
      %96 = vector.load %arg6[%c0_54, %c5120] : memref<2x10001xf32, #tpu.memory_space<vmem>>, vector<2x2560xf32>
      tpu.vector_store %arg6[%c0_54, %c5120], %95 {strides = array<i32>} : memref<2x10001xf32, #tpu.memory_space<vmem>>, vector<2x2560xf32>,
      %c3_55 = arith.constant 3 : index
      %c0_56 = arith.constant 0 : index
      %c0_57 = arith.constant 0 : index
      %97 = vector.load %arg8[%c3_55, %c0_56, %c0_57] : memref<4x2x2560xf32, #tpu.memory_space<vmem>>, vector<1x2x2560xf32>
      %98 = vector.shape_cast %97 : vector<1x2x2560xf32> to vector<2x2560xf32>
      %99 = vector.extract_strided_slice %98 {offsets = [0, 0], sizes = [2, 2321], strides = [1, 1]} : vector<2x2560xf32> to vector<2x2321xf32>
      %100 = vector.broadcast %81 : vector<2x1xf32> to vector<2x2321xf32>
      %101 = arith.subf %99, %100 : vector<2x2321xf32>
      %c0_58 = arith.constant 0 : index
      %c7680 = arith.constant 7680 : index
      %102 = vector.load %arg6[%c0_58, %c7680] : memref<2x10001xf32, #tpu.memory_space<vmem>>, vector<2x2321xf32>
      tpu.vector_store %arg6[%c0_58, %c7680], %101 {strides = array<i32>} : memref<2x10001xf32, #tpu.memory_space<vmem>>, vector<2x2321xf32>,
    } else {
    }
    return
  }
  func.func @transform_0(%arg0: i32) -> (i32, i32) {
    %c0_i32 = arith.constant 0 : i32
    %c0_i32_0 = arith.constant 0 : i32
    %c0_i32_1 = arith.constant 0 : i32
    return %c0_i32, %c0_i32_0 : i32, i32
  }
  func.func @transform_1(%arg0: i32) -> (i32, i32) {
    %c0_i32 = arith.constant 0 : i32
    %c0_i32_0 = arith.constant 0 : i32
    %c0_i32_1 = arith.constant 0 : i32
    return %c0_i32, %c0_i32_0 : i32, i32
  }
  func.func @transform_2(%arg0: i32) -> (i32, i32) {
    %c0_i32 = arith.constant 0 : i32
    %c0_i32_0 = arith.constant 0 : i32
    %c0_i32_1 = arith.constant 0 : i32
    return %c0_i32, %c0_i32_0 : i32, i32
  }
  func.func @transform_3(%arg0: i32) -> (i32, i32) {
    %c0_i32 = arith.constant 0 : i32
    %c0_i32_0 = arith.constant 0 : i32
    %c0_i32_1 = arith.constant 0 : i32
    return %c0_i32, %c0_i32_0 : i32, i32
  }
  func.func @transform_4(%arg0: i32) -> (i32, i32, i32) {
    %c0_i32 = arith.constant 0 : i32
    %c0_i32_0 = arith.constant 0 : i32
    %c0_i32_1 = arith.constant 0 : i32
    return %arg0, %c0_i32, %c0_i32_0 : i32, i32, i32
  }
  func.func @transform_5(%arg0: i32) -> (i32, i32) {
    %c0_i32 = arith.constant 0 : i32
    %c0_i32_0 = arith.constant 0 : i32
    %c0_i32_1 = arith.constant 0 : i32
    return %c0_i32, %c0_i32_0 : i32, i32
  }
}

</mosaic_0001>

<bundles_post_ra>
// kernel: tdnn_forward.1
= control target key start
LH: loop header
LB: loop body
LE: loop exit
PB: predicated region body
PF: predicated region fallthrough
CT: control target
= control target key end

     0   :  { %10 = vsyncpa [#allocation5], 0  ;;  %s17681_s0 = inlined_call_operand.vmem [shape: f32[32,49], index: 0, kind: input, shape index: {}]   ;;  %s17682_s1 = inlined_call_operand.vmem [shape: f32[49,32], index: 1, kind: input, shape index: {}]   ;;  %s17683_s2 = inlined_call_operand.hbm [shape: f32[32,32], index: 2, kind: input, shape index: {}]   ;;  %s17684_s3 = inlined_call_operand.hbm [shape: f32[32,1000], index: 3, kind: input, shape index: {}]   ;;  %s17685_s4 = inlined_call_operand.hbm [shape: bf16[4,1000,2560], index: 4, kind: input, shape index: {}]   ;;  %s17686_s5 = inlined_call_operand.hbm [shape: f32[2,10001], index: 5, kind: output, shape index: {}]  }
   0x1   :  { %11 = vsyncpa [#allocation8], 0 }
   0x2   :  { %12 = vsyncpa [#allocation6], 0  ;;  %s15455_s18 = smov 0   ;;  %s15457_s19 = smov 0  }
   0x3   :  { %s15459_s20 = smov 0   ;;  %s15461_s21 = smov 0  }
   0x4 LB: > { %s15474_s22 = sadd.s32 4294967295, %s15407_s21   ;;  %s15477_s23 = sadd.s32 1, %s15407_s21   ;;  %s15407_s21 = sphi %s15461_s21, %s17711_s21   ;;  %s15403_s20 = sphi %s15459_s20, %s17710_s20   ;;  %s15399_s19 = sphi %s15457_s19, %s17709_s19   ;;  %s15395_s18 = sphi %s15455_s18, %s17708_s18  }
   0x5   : > { %s106_s24 = ssub.s32 %s15407_s21, %s15477_s23  ;;  %s109_s25 = sadd.s32 1, %s15403_s20 }
   0x6   : > { %p107_p0 = scmp.eq.s32.totalorder %s106_s24, 0  ;;  %p116_p1 = scmp.ne.s32.totalorder %s15403_s20, %s15399_s19 }
   0x7   : > { %p117_p2 = scmp.eq.s32.totalorder %s15407_s21, 0  ;;  %p122_p3 = scmp.ne.s32.totalorder %s15399_s19, %s15395_s18 }
   0x8   : > { %s15487_s26 = scalar_select %p107_p0, %s15403_s20, %s109_s25  }
   0x9   : > { %p15489_p4 = por %p117_p2, %p116_p1  ;;  %p17687_p5 = scmp.eq.s32.totalorder %s15474_s22, 0 }
   0xa   : > { %p11676_p6 = scmp.ge.s32.totalorder %s15407_s21, 1  ;;  %p154_p7 = scmp.lt.s32.totalorder %s15407_s21, 5 }
   0xb   : > { %p15498_p8 = por %p17687_p5, %p122_p3  ;;  %s15409_s30 = smov [#allocation4]  }
   0xc   : > { %p15503_p10 = pnand %p11676_p6, %p154_p7  ;;  %s172_s6 = sshll.u32 %s15409_s30, 4  ;;  %s173_s6 = int_to_ptr.vmem [resolvable:$true] %s172_s6 }
   0xd   : > { %s17692_s28 = scalar_select %p15498_p8, 1, 0 }
   0xe   : > { %s17693_s29 = scalar_select %p15503_p10, 1, 0 }
   0xf   : > { %p13197_p11 = pneg %p15503_p10  ;;  %p13210_p13 = scmp.lt.s32.totalorder %s15407_s21, 4 }
  0x10   : > { %s15249_s11 = scalar_lea.hbm %s17683_s2, 512 }
  0x11   : > { %p15511_p12 = pnand %p13197_p11, %p17687_p5  ;;  %p15518_p0 = pnand %p13210_p13, %p15489_p4 }
  0x12   : > { %p15250_p1 = scmp.ne.s32.totalorder %s17683_s2, %s15249_s11  ;;  %p15256_p4 = scmp.lt.u32.totalorder %s15249_s11, %s17683_s2 }
  0x13   : > { %s17695_s8 = scalar_select %p15518_p0, 1, 0 }
  0x14   : > { %p15251_p2 = pneg %p15511_p12 }
  0x16   : > { %p15252_p3 = pnand %p15251_p2, %p15250_p1 }
  0x18   : > { %p15253_p6 = pneg %p15252_p3 }
  0x1a   : > { %p15258_p7 = pnand %p15256_p4, %p15253_p6 }
  0x1c   : > { %15261 = shalt.err (!%p15258_p7)
}
  0x1d   : > { %s15262_s16 = scalar_lea.vmem %s173_s6, 512  ;;  %p15270_p5 = scmp.lt.s32.totalorder %s173_s6, %s173_s6 }
  0x1e   : > { %p15263_p11 = scmp.ne.s32.totalorder %s173_s6, %s15262_s16  ;;  %p15271_p8 = scmp.lt.s32.totalorder %s15262_s16, %s15262_s16 }
  0x20   : > { %p15265_p13 = pnand %p15263_p11, %p15251_p2  ;;  %p15272_p10 = por %p15271_p8, %p15270_p5 }
  0x22   : > { %p15266_p9 = pneg %p15265_p13 }
  0x24   : > { %p15273_p0 = pnand %p15272_p10, %p15266_p9 }
  0x26   : > { %15276 = shalt.err (!%p15273_p0)
}
  0x27   : > { %s15410_s17 = smov 128   ;;  %s15411_s18 = smov 8  }
  0x28   : > { %13200 = dma.hbm_to_vmem [thread:$0]  (!%p15511_p12), %s17683_s2, 512, %s173_s6, [#allocation5], %s15410_s17, %s15410_s17, %s15411_s18  }
  0x29   : > { %s15412_s27 = smov [#allocation7]   ;;  %s15277_s11 = scalar_lea.hbm %s17684_s3, 4096 }
  0x2a   : > { %s185_s30 = sshll.u32 %s15412_s27, 4  ;;  %p15278_p5 = scmp.ne.s32.totalorder %s17684_s3, %s15277_s11  ;;  %s186_s30 = int_to_ptr.vmem [resolvable:$true] %s185_s30 }
  0x2b   : > { %p15284_p10 = scmp.lt.u32.totalorder %s15277_s11, %s17684_s3 }
  0x2c   : > { %p15280_p8 = pnand %p15278_p5, %p15251_p2 }
  0x2e   : > { %p15281_p9 = pneg %p15280_p8 }
  0x30   : > { %p15286_p0 = pnand %p15284_p10, %p15281_p9 }
  0x32   : > { %15289 = shalt.err (!%p15286_p0)
}
  0x33   : > { %s15290_s6 = scalar_lea.vmem %s186_s30, 4096  ;;  %p15298_p4 = scmp.lt.s32.totalorder %s186_s30, %s186_s30 }
  0x34   : > { %p15291_p1 = scmp.ne.s32.totalorder %s186_s30, %s15290_s6  ;;  %p15299_p7 = scmp.lt.s32.totalorder %s15290_s6, %s15290_s6 }
  0x36   : > { %p15293_p3 = pnand %p15291_p1, %p15251_p2  ;;  %p15300_p11 = por %p15299_p7, %p15298_p4 }
  0x38   : > { %p15294_p6 = pneg %p15293_p3 }
  0x3a   : > { %p15301_p13 = pnand %p15300_p11, %p15294_p6 }
  0x3c   : > { %15304 = shalt.err (!%p15301_p13)
}
  0x3d   : > { %s15413_s16 = smov 1024   ;;  %s15414_s17 = smov 64  }
  0x3e   : > { %13203 = dma.hbm_to_vmem [thread:$0]  (!%p15511_p12), %s17684_s3, 4096, %s186_s30, [#allocation8], %s15413_s16, %s15413_s16, %s15414_s17  }
  0x3f   : > { %s199_s25 = sand.u32 1, %s15407_s21   ;;  %s201_s27 = sand.u32 1, %s15403_s20  }
  0x40   : > { %s13180_s9 = smul.u32 10000, %s201_s27  ;;  %s15574_s7 = scalar_lea.sflag [#allocation5], %s199_s25 }
  0x41   : > { %s13181_s10 = smul.u32 160000, %s15407_s21  ;;  %p17696_p2 = scmp.ne.s32.totalorder %s17695_s8, 0 }
  0x42   : > { %s203_s14 = scalar_lea.vmem [#allocation9], %s13180_s9  ;;  %s15310_s16 = scalar_lea.hbm %s17685_s4, 640000 }
  0x43   : > { %s15570_s13 = scalar_lea.hbm %s17685_s4, %s13181_s10  ;;  %s210_s15 = sshll.u32 %s203_s14, 4  ;;  %s15572_s15 = int_to_ptr.vmem [resolvable:$true] %s210_s15 }
  0x44   : > { %s15305_s30 = scalar_lea.hbm %s15570_s13, 160000  ;;  %p15307_p5 = pneg %p17696_p2 }
  0x45   : > { %p15306_p12 = scmp.ne.s32.totalorder %s15570_s13, %s15305_s30  ;;  %p15311_p10 = scmp.lt.u32.totalorder %s15570_s13, %s17685_s4 }
  0x46   : > { %p15312_p0 = scmp.lt.u32.totalorder %s15310_s16, %s15305_s30  ;;  %p15314_p3 = scmp.lt.u32.totalorder %s15305_s30, %s15570_s13 }
  0x47   : > { %p15308_p8 = pnand %p15307_p5, %p15306_p12 }
  0x48   : > { %p15313_p1 = por %p15312_p0, %p15311_p10 }
  0x49   : > { %p15309_p9 = pneg %p15308_p8 }
  0x4a   : > { %p15315_p6 = por %p15314_p3, %p15313_p1 }
  0x4c   : > { %p15316_p4 = pnand %p15315_p6, %p15309_p9 }
  0x4e   : > { %15319 = shalt.err (!%p15316_p4)
}
  0x4f   : > { %s15320_s24 = scalar_lea.vmem %s15572_s15, 160000  ;;  %s15415_s25 = smov [#allocation9]  }
  0x50   : > { %p15321_p7 = scmp.ne.s32.totalorder %s15572_s15, %s15320_s24  ;;  %s15325_s27 = sshll.u32 %s15415_s25, 4  ;;  %s15326_s27 = int_to_ptr.vmem [resolvable:$false] %s15325_s27 }
  0x51   : > { %s15327_s9 = scalar_lea.vmem %s15326_s27, 320000  ;;  %p15328_p12 = scmp.lt.s32.totalorder %s15572_s15, %s15326_s27 }
  0x52   : > { %p15323_p11 = pnand %p15321_p7, %p15307_p5  ;;  %p15329_p8 = scmp.lt.s32.totalorder %s15327_s9, %s15320_s24 }
  0x54   : > { %p15324_p13 = pneg %p15323_p11  ;;  %p15330_p10 = por %p15329_p8, %p15328_p12 }
  0x56   : > { %p15331_p0 = pnand %p15330_p10, %p15324_p13 }
  0x58   : > { %15334 = shalt.err (!%p15331_p0)
}
  0x59   : > { %s15416_s10 = smov 1280   ;;  %s15417_s11 = smov 80  }
  0x5a   : > { %13207 = dma.hbm_to_vmem [thread:$0]  (!%p17696_p2), %s15570_s13, 160000, %s15572_s15, %s15574_s7, %s15416_s10, %s15416_s10, %s15417_s11  }
  0x5b   : > { %p17697_p5 = scmp.ne.s32.totalorder %s17693_s29, 0 }
  0x5c   : > { %p17698_p9 = scmp.eq.s32.totalorder (!%p17697_p5), %s15474_s22, 0 }
  0x5d   : > { %222 = sbr.rel (%p17697_p5) target bundleno = 2616 (0xa38), region = 40 }
  0x64   : > { %15378 = dma.done.wait (%p17698_p9), [#allocation5], 512   ;;  %p17699_p1 = pmov %p17698_p9 }
  0x66   : > { %15380 = vsyncadd (%p17699_p1), [#allocation5], 4294966784  ;;  %p17700_p3 = pmov %p17699_p1 }
  0x67   : > { %p17701_p6 = pmov %p17699_p1 }
  0x68   : > { %15382 = dma.done.wait (%p17700_p3), [#allocation8], 4096  }
  0x69   : > { %15384 = vsyncadd (%p17701_p6), [#allocation8], 4294963200  ;;  %s232_s8 = sand.u32 1, %s15474_s22   ;;  %s234_s12 = sand.u32 1, %s15399_s19  }
  0x6a   : > { %s13182_s13 = smul.u32 10000, %s234_s12  ;;  %s233_s29 = scalar_lea.sflag [#allocation5], %s232_s8 }
  0x6b   : > { %p17702_p2 = scmp.ne.s32.totalorder %s17692_s28, 0 }
  0x6c   : > { %s15614_s14 = scalar_lea.vmem [#allocation9], %s13182_s13 }
  0x6d   : > { %15386 = dma.done.wait (%p17702_p2), %s233_s29, 160000  }
  0x6e   : > { %15388 = vsyncadd (%p17702_p2), %s233_s29, 4294807296  ;;  %p17703_p4 = scmp.ne.s32.totalorder %s15474_s22, 0 }
  0x6f   : > { %v267_v0 = vld [vmem:[%s17682_s1] sm:$0xff] (!%p17703_p4)  ;;  %v268_v1 = vld [vmem:[%s17682_s1 + $0x8] sm:$0xff] (!%p17703_p4)  ;;  %v269_v2 = vld [vmem:[%s17682_s1 + $0x10] sm:$0xff] (!%p17703_p4)  ;;  %vm274_vm0 = vcmask (!%p17703_p4), 400384   ;;  %vm287_vm1 = vcmask (!%p17703_p4), 1040384   ;;  %v15418_v36 = vmov (!%p17703_p4), 0.0  }
  0x70   : > { %262 = sbr.rel (%p17703_p4) target bundleno = 607 (0x25f), region = 56  ;;  %v13016_v3 = vpack.c.bf16 (!%p17703_p4), %v268_v1, %v267_v0  ;;  %v270_v4 = vld [vmem:[%s17682_s1 + $0x18] sm:$0xff] (!%p17703_p4)  ;;  %v271_v6 = vld [vmem:[%s17682_s1 + $0x20] sm:$0xff] (!%p17703_p4)  ;;  %v272_v7 = vld [vmem:[%s17682_s1 + $0x28] sm:$0xff] (!%p17703_p4)  ;;  %509 = vmatprep.mubr.f32.mxu1 (!%p17703_p4), %v15418_v36  ;;  %vm388_vm2 = vcmask (!%p17703_p4), 261120   ;;  %vm441_vm3 = vcmask (!%p17703_p4), 1041409  }
  0x71   : > { %v13020_v5 = vpack.c.bf16 (!%p17703_p4), %v270_v4, %v269_v2  ;;  %v263_v8 = vld [vmem:[%s17681_s0] sm:$0xff] (!%p17703_p4)  ;;  %v13024_v9 = vpack.c.bf16 (!%p17703_p4), %v272_v7, %v271_v6  ;;  %v273_v10 = vld [vmem:[%s17682_s1 + $0x30] sm:$0x1] (!%p17703_p4)  ;;  %v264_v11 = vld [vmem:[%s17681_s0 + $0x8] sm:$0xff] (!%p17703_p4)  ;;  %vm804_vm5 = vcmask (!%p17703_p4), 1042434   ;;  %vm806_vm7 = vcmask (!%p17703_p4), 1043459  }
  0x72   : > { %13017 = vmatprep.subr.bf16.mxu0 (!%p17703_p4), %v13016_v3  ;;  %13010 = vmatprep.mubr.msk.f32.mxu0 (!%p17703_p4), %vm274_vm0, %v263_v8  ;;  %v265_v12 = vld [vmem:[%s17681_s0 + $0x10] sm:$0xff] (!%p17703_p4)  ;;  %v266_v13 = vld [vmem:[%s17681_s0 + $0x18] sm:$0xff] (!%p17703_p4)  ;;  %v407_v17 = vld [vmem:[#allocation7] sm:$0xff] (!%p17703_p4)  ;;  %vm808_vm9 = vcmask (!%p17703_p4), 1044484   ;;  %vm810_vm11 = vcmask (!%p17703_p4), 1045509   ;;  %vm812_vm13 = vcmask (!%p17703_p4), 1046534  }
  0x73   : > { %13019 = vmatpush3.bf16.msra.mxu0 (!%p17703_p4), %v13016_v3  ;;  %v408_v14 = vld [vmem:[#allocation7 + $0x8] sm:$0xff] (!%p17703_p4)  ;;  %v415_v18 = vld [vmem:[#allocation7 + $0x40] sm:$0xff] (!%p17703_p4)  ;;  %v410_v39 = vld [vmem:[#allocation7 + $0x18] sm:$0xff] (!%p17703_p4)  ;;  %vm814_vm15 = vcmask (!%p17703_p4), 850951  }
  0x74   : > { %13021 = vmatprep.subr.bf16.mxu0 (!%p17703_p4), %v13020_v5  ;;  %v416_v15 = vld [vmem:[#allocation7 + $0x48] sm:$0xff] (!%p17703_p4)  ;;  %v13030_v20 = vpack.c.bf16 (!%p17703_p4), %v415_v18, %v407_v17  ;;  %v411_v22 = vld [vmem:[#allocation7 + $0x20] sm:$0xff] (!%p17703_p4)  ;;  %v418_v40 = vld [vmem:[#allocation7 + $0x58] sm:$0xff] (!%p17703_p4) }
  0x75   : > { %v13028_v16 = vpack.c.bf16 (!%p17703_p4), %v416_v15, %v408_v14  ;;  %v412_v19 = vld [vmem:[#allocation7 + $0x28] sm:$0xff] (!%p17703_p4)  ;;  %v419_v23 = vld [vmem:[#allocation7 + $0x60] sm:$0xff] (!%p17703_p4)  ;;  %v13036_v41 = vpack.c.bf16 (!%p17703_p4), %v418_v40, %v410_v39  ;;  %v383_v51 = vld [vmem:[#allocation4 + $0x18] sm:$0xff] (!%p17703_p4) }
  0x76   : > { %v420_v21 = vld [vmem:[#allocation7 + $0x68] sm:$0xff] (!%p17703_p4)  ;;  %v13046_v25 = vpack.c.bf16 (!%p17703_p4), %v419_v23, %v411_v22  ;;  %v423_v29 = vld [vmem:[#allocation7 + $0x80] sm:$0xff] (!%p17703_p4)  ;;  %v382_v55 = vld [vmem:[#allocation4 + $0x10] sm:$0xff] (!%p17703_p4) }
  0x77   : > { %13023 = vmatpush3.bf16.msra.mxu0 %v13020_v5  ;;  %13029 = vmatprep.subr.bf16.mxu1 %v13028_v16  ;;  %v13044_v24 = vpack.c.bf16 %v420_v21, %v412_v19  ;;  %v424_v26 = vld [vmem:[#allocation7 + $0x88] sm:$0xff]  ;;  %v431_v30 = vld [vmem:[#allocation7 + $0xc0] sm:$0xff]  ;;  %v425_v18 = vld [vmem:[#allocation7 + $0x90] sm:$0xff] }
  0x78   : > { %13025 = vmatprep.subr.bf16.mxu0 %v13024_v9  ;;  %13031 = vmatpush1.bf16.msra.mxu1 %v13030_v20  ;;  %v432_v27 = vld [vmem:[#allocation7 + $0xc8] sm:$0xff]  ;;  %v13034_v32 = vpack.c.bf16 %v431_v30, %v423_v29  ;;  %v427_v34 = vld [vmem:[#allocation7 + $0xa0] sm:$0xff]  ;;  %v433_v19 = vld [vmem:[#allocation7 + $0xd0] sm:$0xff] }
  0x79   : > { %v13032_v28 = vpack.c.bf16 %v432_v27, %v424_v26  ;;  %v428_v31 = vld [vmem:[#allocation7 + $0xa8] sm:$0xff]  ;;  %v435_v35 = vld [vmem:[#allocation7 + $0xe0] sm:$0xff]  ;;  %v414_v21 = vld [vmem:[#allocation7 + $0x38] sm:$0xff]  ;;  %v13042_v23 = vpack.c.bf16 %v433_v19, %v425_v18 }
  0x7a   : > { %v436_v33 = vld [vmem:[#allocation7 + $0xe8] sm:$0xff]  ;;  %v13050_v38 = vpack.c.bf16 %v435_v35, %v427_v34  ;;  %v380_v46 = vld [vmem:[#allocation4] sm:$0xff]  ;;  %v422_v22 = vld [vmem:[#allocation7 + $0x78] sm:$0xff] }
  0x7b   : > { %13027 = vmatpush3.bf16.msra.mxu0 %v13024_v9  ;;  %13033 = vmatprep.subr.bf16.mxu1 %v13032_v28  ;;  %v13048_v37 = vpack.c.bf16 %v436_v33, %v428_v31  ;;  %v381_v43 = vld [vmem:[#allocation4 + $0x8] sm:$0xff]  ;;  %v409_v9 = vld [vmem:[#allocation7 + $0x10] sm:$0xff]  ;;  %v430_v27 = vld [vmem:[#allocation7 + $0xb8] sm:$0xff] }
  0x7c   : > { %13008 = vmatprep.subr.msk.mxu0 %vm287_vm1, %v273_v10  ;;  %13035 = vmatpush1.bf16.msra.mxu1 %v13034_v32  ;;  %v421_v26 = vld [vmem:[#allocation7 + $0x70] sm:$0xff]  ;;  %v438_v28 = vld [vmem:[#allocation7 + $0xf8] sm:$0xff]  ;;  %vm803_vm4 = vmor %vm441_vm3, %vm287_vm1 }
  0x7d   : > { %13037 = vmatprep.subr.bf16.mxu1 %v13036_v41  ;;  %v13056_v30 = vpack.c.bf16 %v438_v28, %v430_v27  ;;  %v429_v31 = vld [vmem:[#allocation7 + $0xb0] sm:$0xff]  ;;  %vm805_vm6 = vmor %vm804_vm5, %vm803_vm4 }
  0x7e   : > { %v437_v32 = vld [vmem:[#allocation7 + $0xf0] sm:$0xff]  ;;  %vm807_vm8 = vmor %vm806_vm7, %vm805_vm6 }
  0x7f   : > { %13009 = vmatpush3.msk.msra.mxu0 %vm287_vm1, %v273_v10  ;;  %v417_v10 = vld [vmem:[#allocation7 + $0x50] sm:$0xff]  ;;  %v13058_v33 = vpack.c.bf16 %v437_v32, %v429_v31  ;;  %vm809_vm10 = vmor %vm808_vm9, %vm807_vm8 }
  0x80   : > { %13011 = vmatmul.mubr.msk.f32.vlgmr.msra.gmra.mrb[0].mxu0 %vm274_vm0, %v264_v11  ;;  %13045 = vmatprep.subr.bf16.mxu0 %v13044_v24  ;;  %v13038_v16 = vpack.c.bf16 %v417_v10, %v409_v9  ;;  %v13052_v24 = vpack.c.bf16 %v422_v22, %v414_v21  ;;  %vm811_vm12 = vmor %vm810_vm11, %vm809_vm10 }
  0x81   : > { %13013 = vmatprep.mubr.msk.f32.mxu0 %vm274_vm0, %v265_v12  ;;  %13047 = vmatpush1.bf16.msra.mxu0 %v13046_v25  ;;  %v426_v12 = vld [vmem:[#allocation7 + $0x98] sm:$0xff]  ;;  %v413_v25 = vld [vmem:[#allocation7 + $0x30] sm:$0xff]  ;;  %vm813_vm14 = vmor %vm812_vm13, %vm811_vm12 }
  0x82   : > { %13049 = vmatprep.subr.bf16.mxu0 %v13048_v37  ;;  %v13054_v29 = vpack.c.bf16 %v421_v26, %v413_v25 }
  0x84   : > { %13014 = vmatmul.mubr.msk.f32.gmra.mrb[2].mxu0 %vm274_vm0, %v266_v13  ;;  %v434_v13 = vld [vmem:[#allocation7 + $0xd8] sm:$0xff]  ;;  %vm815_vm0 = vmor %vm814_vm15, %vm813_vm14 }
  0x85   : > { %651 = vmatprep.mubr.f32.mxu0 %v15418_v36  ;;  %13051 = vmatpush1.bf16.msra.mxu0 %v13050_v38  ;;  %v13040_v17 = vpack.c.bf16 %v434_v13, %v426_v12 }
 0x153   : > { %v13012_v42 = vpop.f32.mrb[0].mxu0 }
 0x154   : > { %v377_v44 = vmax.f32 %v13012_v42, 0.0  ;;  %v357_v45 = vpop.f32.mrb[1].mxu0  ;;  %v15419_v42 = vmov 1966171168  }
 0x155   : > { %v376_v47 = vmax.f32 %v357_v45, 0.0 }
 0x156   : > { %v385_v48 = vmul.f32 %v381_v43, %v377_v44  ;;  %v758_v43 = vunpack.c.l.s4 %v15419_v42  ;;  %v760_v44 = vlaneseq }
 0x157   : > { %v384_v49 = vmul.f32 %v380_v46, %v376_v47  ;;  %v13015_v50 = vpop.f32.mrb[2].mxu0 }
 0x158   : > { %v390_v52 = vsel %vm388_vm2, %v385_v48, -inf  ;;  %v379_v53 = vmax.f32 %v13015_v50, 0.0  ;;  %v367_v54 = vpop.f32.mrb[3].mxu0  ;;  %v759_v48 = vunpack.c.0.s8 %v758_v43 }
 0x159   : > { %v389_v56 = vsel %vm388_vm2, %v384_v49, -inf  ;;  %v378_v57 = vmax.f32 %v367_v54, 0.0  ;;  %v761_v49 = vshrl.u32 %v760_v44, 7 }
 0x15a   : > { %v391_v58 = vmax.f32 %v389_v56, %v390_v52  ;;  %v387_v59 = vmul.f32 %v383_v51, %v379_v53 }
 0x15b   : > { %v386_v60 = vmul.f32 %v382_v55, %v378_v57  ;;  %v762_v52 = vsub.s32 %v759_v48, %v761_v49 }
 0x15c   : > { %v392_v61 = vrot.slane %v391_v58, 4  ;;  %v399_v62 = vsel %vm388_vm2, %v387_v59, -inf }
 0x15d   : > { %v398_v63 = vsel %vm388_vm2, %v386_v60, -inf }
 0x15e   : > { %v393_v0 = vmax.f32 %v391_v58, %v392_v61  ;;  %v400_v1 = vmax.f32 %v398_v63, %v399_v62 }
 0x160   : > { %v394_v2 = vrot.slane %v393_v0, 2  ;;  %v401_v3 = vrot.slane %v400_v1, 4 }
 0x162   : > { %v395_v4 = vmax.f32 %v393_v0, %v394_v2  ;;  %v402_v5 = vmax.f32 %v400_v1, %v401_v3 }
 0x164   : > { %v403_v6 = vrot.slane %v402_v5, 2  ;;  %v396_v8 = vrot.slane %v395_v4, 1 }
 0x166   : > { %v404_v7 = vmax.f32 %v402_v5, %v403_v6  ;;  %v397_v14 = vmax.f32 %v395_v4, %v396_v8 }
 0x168   : > { %v405_v11 = vrot.slane %v404_v7, 1 }
 0x16a   : > { %v406_v15 = vmax.f32 %v404_v7, %v405_v11 }
 0x16c   : > { %v442_v20 = vsel %vm441_vm3, %v406_v15, %v397_v14 }
 0x16d   : > { %11690 = vmatmul.mubr.msk.f32.vlgmr.msra.gmra.mrb[0].mxu1 %vm388_vm2, %v442_v20  ;;  %11692 = vmatmul.mubr.msk.f32.vlgmr.msra.gmra.mrb[4].mxu0 %vm388_vm2, %v442_v20 }
 0x16e   : > { %13039 = vmatpush1.bf16.msra.mxu1 %v13038_v16  ;;  %580 = vmatprep.mubr.f32.mxu1 %v15418_v36 }
 0x16f   : > { %13041 = vmatprep.subr.bf16.mxu1 %v13040_v17 }
 0x172   : > { %13043 = vmatpush1.bf16.msra.mxu1 %v13042_v23 }
 0x173   : > { %13053 = vmatprep.subr.bf16.mxu1 %v13052_v24 }
 0x175   : > { %11691 = vmatmul.mubr.msk.f32.vlgmr.msra.gmra.mrb[2].mxu1 %vm388_vm2, %v442_v20 }
 0x176   : > { %13055 = vmatpush1.bf16.msra.mxu1 %v13054_v29  ;;  %722 = vmatprep.mubr.f32.mxu1 %v15418_v36 }
 0x177   : > { %13057 = vmatprep.subr.bf16.mxu1 %v13056_v30 }
 0x17a   : > { %13059 = vmatpush1.bf16.msra.mxu1 %v13058_v33 }
 0x17d   : > { %11693 = vmatmul.mubr.msk.f32.vlgmr.msra.gmra.mrb[4].mxu1 %vm388_vm2, %v442_v20 }
 0x240   : > { %v511_v34 = vpop.f32.mrb[0].mxu1  ;;  %v653_v35 = vpop.f32.mrb[4].mxu0 }
 0x241   : > { %v729_v37 = vmax.f32 %v511_v34, 0.0  ;;  %v733_v38 = vmax.f32 %v653_v35, 0.0  ;;  %v513_v39 = vpop.f32.mrb[1].mxu1  ;;  %v655_v40 = vpop.f32.mrb[5].mxu0 }
 0x242   : > { %v730_v41 = vmax.f32 %v513_v39, 0.0  ;;  %v734_v45 = vmax.f32 %v655_v40, 0.0 }
 0x244   : > { %v11694_v46 = vpack.c.bf16 %v730_v41, %v729_v37  ;;  %v11696_v47 = vpack.c.bf16 %v734_v45, %v733_v38 }
 0x246   : > { %v763_v55 = vrot.slane %v11694_v46, %v762_v52  ;;  %v777_v63 = vrot.slane %v11696_v47, %v762_v52 }
 0x248   : > { %v582_v36 = vpop.f32.mrb[2].mxu1 }
 0x249   : > { %v731_v50 = vmax.f32 %v582_v36, 0.0  ;;  %v584_v51 = vpop.f32.mrb[3].mxu1 }
 0x24a   : > { %v732_v53 = vmax.f32 %v584_v51, 0.0 }
 0x24c   : > { %v11695_v54 = vpack.c.bf16 %v732_v53, %v731_v50 }
 0x24e   : > { %v770_v56 = vrot.slane %v11695_v54, %v762_v52 }
 0x250   : > { %v785_v57 = vcombine.low %v763_v55, %v770_v56  ;;  %v724_v58 = vpop.f32.mrb[4].mxu1 }
 0x251   : > { %v735_v59 = vmax.f32 %v724_v58, 0.0  ;;  %v726_v60 = vpop.f32.mrb[5].mxu1 }
 0x252   : > { %v736_v61 = vmax.f32 %v726_v60, 0.0  ;;  %v793_v2 = vrot.slane %v785_v57, %v762_v52 }
 0x254   : > { %v11697_v62 = vpack.c.bf16 %v736_v61, %v735_v59 }
 0x256   : > { %v784_v0 = vrot.slane %v11697_v62, %v762_v52 }
 0x258   : > { %v786_v1 = vcombine.low %v777_v63, %v784_v0 }
 0x25a   : > { %v800_v3 = vrot.slane %v786_v1, %v762_v52 }
 0x25c   : > { %v801_v4 = vcombine.low %v793_v2, %v800_v3 }
 0x25e   : > { %816 = vst.msk [vmem:[#allocation2] sm:$0xff] %vm815_vm0, %v801_v4 }
 0x25f PF: > { %v13262_v5 = vld [vmem:[%s15614_s14 + $0x4] ss:$80 sps:$4 sm:$0xff]   ;;  %v13264_v6 = vld [vmem:[%s15614_s14 + $0xc] ss:$80 sps:$4 sm:$0xff]   ;;  %v13266_v7 = vld [vmem:[%s15614_s14] ss:$80 sps:$4 sm:$0xff]   ;;  %v2073_v44 = vlaneseq }
 0x260   : > { %8440 = vmatprep.subr.bf16.mxu0 %v13262_v5  ;;  %v13267_v8 = vld [vmem:[%s15614_s14 + $0x8] ss:$80 sps:$4 sm:$0xff]   ;;  %8604 = vmatprep.subr.bf16.mxu1 %v13264_v6  ;;  %v13268_v9 = vld [vmem:[%s15614_s14 + $0xa4] ss:$80 sps:$4 sm:$0xff]   ;;  %v13270_v10 = vld [vmem:[%s15614_s14 + $0xac] ss:$80 sps:$4 sm:$0xff]  }
 0x261   : > { %8441 = vmatpush1.bf16.msra.mxu0 %v13266_v7  ;;  %8605 = vmatpush1.bf16.msra.mxu1 %v13267_v8  ;;  %v13272_v11 = vld [vmem:[%s15614_s14 + $0xa0] ss:$80 sps:$4 sm:$0xff]   ;;  %v13273_v12 = vld [vmem:[%s15614_s14 + $0xa8] ss:$80 sps:$4 sm:$0xff]   ;;  %v13274_v13 = vld [vmem:[%s15614_s14 + $0x144] ss:$80 sps:$4 sm:$0xff]  }
 0x262   : > { %8442 = vmatprep.subr.bf16.mxu0 %v13268_v9  ;;  %8606 = vmatprep.subr.bf16.mxu1 %v13270_v10  ;;  %v13276_v14 = vld [vmem:[%s15614_s14 + $0x14c] ss:$80 sps:$4 sm:$0xff]   ;;  %v13278_v15 = vld [vmem:[%s15614_s14 + $0x140] ss:$80 sps:$4 sm:$0xff]   ;;  %v13279_v16 = vld [vmem:[%s15614_s14 + $0x148] ss:$80 sps:$4 sm:$0xff]  }
 0x263   : > { %v13280_v17 = vld [vmem:[%s15614_s14 + $0x1e4] ss:$80 sps:$4 sm:$0xff]   ;;  %v13282_v18 = vld [vmem:[%s15614_s14 + $0x1ec] ss:$80 sps:$4 sm:$0xff]   ;;  %v13284_v19 = vld [vmem:[%s15614_s14 + $0x1e0] ss:$80 sps:$4 sm:$0xff]  }
 0x264   : > { %v13285_v20 = vld [vmem:[%s15614_s14 + $0x1e8] ss:$80 sps:$4 sm:$0xff]   ;;  %v13286_v21 = vld [vmem:[%s15614_s14 + $0x284] ss:$80 sps:$4 sm:$0xff]   ;;  %v13288_v22 = vld [vmem:[%s15614_s14 + $0x28c] ss:$80 sps:$4 sm:$0xff]  }
 0x265   : > { %8443 = vmatpush1.bf16.msra.mxu0 %v13272_v11  ;;  %8607 = vmatpush1.bf16.msra.mxu1 %v13273_v12  ;;  %v13290_v23 = vld [vmem:[%s15614_s14 + $0x280] ss:$80 sps:$4 sm:$0xff]   ;;  %v13291_v24 = vld [vmem:[%s15614_s14 + $0x288] ss:$80 sps:$4 sm:$0xff]   ;;  %v13292_v25 = vld [vmem:[%s15614_s14 + $0x324] ss:$80 sps:$4 sm:$0xff]  }
 0x266   : > { %8444 = vmatprep.subr.bf16.mxu0 %v13274_v13  ;;  %8608 = vmatprep.subr.bf16.mxu1 %v13276_v14  ;;  %v13294_v26 = vld [vmem:[%s15614_s14 + $0x32c] ss:$80 sps:$4 sm:$0xff]   ;;  %v13296_v27 = vld [vmem:[%s15614_s14 + $0x320] ss:$80 sps:$4 sm:$0xff]   ;;  %v13297_v28 = vld [vmem:[%s15614_s14 + $0x328] ss:$80 sps:$4 sm:$0xff]  }
 0x267   : > { %v13298_v29 = vld [vmem:[%s15614_s14 + $0x3c4] ss:$80 sps:$4 sm:$0xff]   ;;  %v13300_v30 = vld [vmem:[%s15614_s14 + $0x3cc] ss:$80 sps:$4 sm:$0xff]   ;;  %v13302_v31 = vld [vmem:[%s15614_s14 + $0x3c0] ss:$80 sps:$4 sm:$0xff]  }
 0x268   : > { %v13303_v32 = vld [vmem:[%s15614_s14 + $0x3c8] ss:$80 sps:$4 sm:$0xff]   ;;  %v13304_v33 = vld [vmem:[%s15614_s14 + $0x464] ss:$80 sps:$4 sm:$0xff]   ;;  %v13306_v34 = vld [vmem:[%s15614_s14 + $0x46c] ss:$80 sps:$4 sm:$0xff]  }
 0x269   : > { %8445 = vmatpush1.bf16.msra.mxu0 %v13278_v15  ;;  %8609 = vmatpush1.bf16.msra.mxu1 %v13279_v16  ;;  %v13308_v35 = vld [vmem:[%s15614_s14 + $0x460] ss:$80 sps:$4 sm:$0xff]   ;;  %v13309_v37 = vld [vmem:[%s15614_s14 + $0x468] ss:$80 sps:$4 sm:$0xff]   ;;  %v13310_v38 = vld [vmem:[%s15614_s14 + $0x504] ss:$80 sps:$4 sm:$0xff]  }
 0x26a   : > { %8446 = vmatprep.subr.bf16.mxu0 %v13280_v17  ;;  %8610 = vmatprep.subr.bf16.mxu1 %v13282_v18  ;;  %v13312_v39 = vld [vmem:[%s15614_s14 + $0x50c] ss:$80 sps:$4 sm:$0xff]   ;;  %v13314_v40 = vld [vmem:[%s15614_s14 + $0x500] ss:$80 sps:$4 sm:$0xff]   ;;  %v13315_v41 = vld [vmem:[%s15614_s14 + $0x508] ss:$80 sps:$4 sm:$0xff]  }
 0x26b   : > { %v15420_v42 = vmov 1966171168   ;;  %v13316_v45 = vld [vmem:[%s15614_s14 + $0x5a4] ss:$80 sps:$4 sm:$0xff]   ;;  %v13318_v46 = vld [vmem:[%s15614_s14 + $0x5ac] ss:$80 sps:$4 sm:$0xff]  }
 0x26c   : > { %v2071_v43 = vunpack.c.l.s4 %v15420_v42  ;;  %v13320_v47 = vld [vmem:[%s15614_s14 + $0x5a0] ss:$80 sps:$4 sm:$0xff]   ;;  %v15716_v49 = vshrl.u32 %v2073_v44, 7  ;;  %v13321_v36 = vld [vmem:[%s15614_s14 + $0x5a8] ss:$80 sps:$4 sm:$0xff]   ;;  %vm8375_vm1 = vcmask 850944  }
 0x26d   : > { %8447 = vmatpush1.bf16.msra.mxu0 %v13284_v19  ;;  %8611 = vmatpush1.bf16.msra.mxu1 %v13285_v20  ;;  %v13322_v50 = vld [vmem:[%s15614_s14 + $0x644] ss:$80 sps:$4 sm:$0xff]   ;;  %v13324_v51 = vld [vmem:[%s15614_s14 + $0x64c] ss:$80 sps:$4 sm:$0xff]   ;;  %v13326_v52 = vld [vmem:[%s15614_s14 + $0x640] ss:$80 sps:$4 sm:$0xff]  }
 0x26e   : > { %8448 = vmatprep.subr.bf16.mxu0 %v13286_v21  ;;  %8612 = vmatprep.subr.bf16.mxu1 %v13288_v22  ;;  %v2072_v48 = vunpack.c.0.s8 %v2071_v43  ;;  %v13327_v53 = vld [vmem:[%s15614_s14 + $0x648] ss:$80 sps:$4 sm:$0xff]   ;;  %v13328_v55 = vld [vmem:[%s15614_s14 + $0x6e4] ss:$80 sps:$4 sm:$0xff]   ;;  %v13330_v56 = vld [vmem:[%s15614_s14 + $0x6ec] ss:$80 sps:$4 sm:$0xff]  }
 0x26f   : > { %v817_v57 = vld [vmem:[#allocation2] sm:$0xff]  ;;  %v13332_v58 = vld [vmem:[%s15614_s14 + $0x6e0] ss:$80 sps:$4 sm:$0xff]   ;;  %v13334_v61 = vld [vmem:[%s15614_s14 + $0x784] ss:$80 sps:$4 sm:$0xff]   ;;  %vm8379_vm2 = vcmask 1043456  }
 0x270   : > { %v15724_v54 = vsub.s32 %v2072_v48, %v15716_v49  ;;  %v13333_v60 = vld [vmem:[%s15614_s14 + $0x6e8] ss:$80 sps:$4 sm:$0xff]   ;;  %v13336_v62 = vld [vmem:[%s15614_s14 + $0x78c] ss:$80 sps:$4 sm:$0xff]   ;;  %v13338_v0 = vld [vmem:[%s15614_s14 + $0x780] ss:$80 sps:$4 sm:$0xff]   ;;  %v2069_v14 = vcombine.high %v817_v57, %v817_v57 }
 0x271   : > { %8449 = vmatpush1.bf16.msra.mxu0 %v13290_v23  ;;  %8613 = vmatpush1.bf16.msra.mxu1 %v13291_v24  ;;  %v13339_v2 = vld [vmem:[%s15614_s14 + $0x788] ss:$80 sps:$4 sm:$0xff]   ;;  %v13340_v3 = vld [vmem:[%s15614_s14 + $0x824] ss:$80 sps:$4 sm:$0xff]   ;;  %v13342_v4 = vld [vmem:[%s15614_s14 + $0x82c] ss:$80 sps:$4 sm:$0xff]  }
 0x272   : > { %8450 = vmatprep.subr.bf16.mxu0 %v13292_v25  ;;  %8614 = vmatprep.subr.bf16.mxu1 %v13294_v26  ;;  %v2076_v59 = vrot.slane %v817_v57, %v15724_v54  ;;  %v13344_v5 = vld [vmem:[%s15614_s14 + $0x820] ss:$80 sps:$4 sm:$0xff]   ;;  %v13345_v6 = vld [vmem:[%s15614_s14 + $0x828] ss:$80 sps:$4 sm:$0xff]   ;;  %v13346_v7 = vld [vmem:[%s15614_s14 + $0x8c4] ss:$80 sps:$4 sm:$0xff]   ;;  %v2083_v18 = vrot.slane %v2069_v14, %v15724_v54 }
 0x273   : > { %v13348_v8 = vld [vmem:[%s15614_s14 + $0x8cc] ss:$80 sps:$4 sm:$0xff]   ;;  %v13350_v9 = vld [vmem:[%s15614_s14 + $0x8c0] ss:$80 sps:$4 sm:$0xff]   ;;  %v13351_v10 = vld [vmem:[%s15614_s14 + $0x8c8] ss:$80 sps:$4 sm:$0xff]  }
 0x274   : > { %v2084_v63 = vcombine.high %v2076_v59, %v2076_v59  ;;  %v13352_v11 = vld [vmem:[%s15614_s14 + $0x964] ss:$80 sps:$4 sm:$0xff]   ;;  %v13354_v12 = vld [vmem:[%s15614_s14 + $0x96c] ss:$80 sps:$4 sm:$0xff]   ;;  %v13356_v13 = vld [vmem:[%s15614_s14 + $0x960] ss:$80 sps:$4 sm:$0xff]   ;;  %v15757_v20 = vrot.slane %v2076_v59, %v15724_v54  ;;  %v2085_v21 = vcombine.high %v2083_v18, %v2083_v18  ;;  %v15766_v26 = vrot.slane %v2083_v18, %v15724_v54 }
 0x275   : > { %8451 = vmatpush1.bf16.msra.mxu0 %v13296_v27  ;;  %8615 = vmatpush1.bf16.msra.mxu1 %v13297_v28  ;;  %v13357_v15 = vld [vmem:[%s15614_s14 + $0x968] ss:$80 sps:$4 sm:$0xff]   ;;  %v13360_v16 = vld [vmem:[%s15614_s14 + $0xa04] ss:$80 sps:$4 sm:$0xff]   ;;  %v13363_v17 = vld [vmem:[%s15614_s14 + $0xa0c] ss:$80 sps:$4 sm:$0xff]  }
 0x276   : > { %8452 = vmatprep.subr.bf16.mxu0 %v13298_v29  ;;  %8616 = vmatprep.subr.bf16.mxu1 %v13300_v30  ;;  %v15735_v1 = vrot.slane %v2084_v63, %v15724_v54  ;;  %v13358_v19 = vld [vmem:[%s15614_s14 + $0xa00] ss:$80 sps:$4 sm:$0xff]   ;;  %v13361_v22 = vld [vmem:[%s15614_s14 + $0xa08] ss:$80 sps:$4 sm:$0xff]   ;;  %v13366_v23 = vld [vmem:[%s15614_s14 + $0xaa4] ss:$80 sps:$4 sm:$0xff]   ;;  %v15763_v25 = vrot.slane %v2085_v21, %v15724_v54 }
 0x277   : > { %v13369_v24 = vld [vmem:[%s15614_s14 + $0xaac] ss:$80 sps:$4 sm:$0xff]   ;;  %v13364_v28 = vld [vmem:[%s15614_s14 + $0xaa0] ss:$80 sps:$4 sm:$0xff]   ;;  %v13367_v29 = vld [vmem:[%s15614_s14 + $0xaa8] ss:$80 sps:$4 sm:$0xff]  }
 0x278   : > { %8472 = vmatprep.mubr.bf16.mxu0 %v15735_v1  ;;  %8636 = vmatprep.mubr.bf16.mxu1 %v15735_v1  ;;  %v15770_v27 = vcombine.high %v15735_v1, %v15735_v1  ;;  %v13372_v30 = vld [vmem:[%s15614_s14 + $0xb44] ss:$80 sps:$4 sm:$0xff]   ;;  %v13385_v42 = vld [vmem:[%s15614_s14 + $0xc88] ss:$80 sps:$4 sm:$0xff]   ;;  %v13400_v54 = vld [vmem:[%s15614_s14 + $0xe60] ss:$80 sps:$4 sm:$0xff]  }
 0x279   : > { %8453 = vmatpush1.bf16.msra.mxu0 %v13302_v31  ;;  %8617 = vmatpush1.bf16.msra.mxu1 %v13303_v32  ;;  %v13375_v31 = vld [vmem:[%s15614_s14 + $0xb4c] ss:$80 sps:$4 sm:$0xff]   ;;  %v13370_v32 = vld [vmem:[%s15614_s14 + $0xb40] ss:$80 sps:$4 sm:$0xff]   ;;  %v13390_v43 = vld [vmem:[%s15614_s14 + $0xd24] ss:$80 sps:$4 sm:$0xff]  }
 0x27a   : > { %8454 = vmatprep.subr.bf16.mxu0 %v13304_v33  ;;  %8618 = vmatprep.subr.bf16.mxu1 %v13306_v34  ;;  %v13373_v33 = vld [vmem:[%s15614_s14 + $0xb48] ss:$80 sps:$4 sm:$0xff]   ;;  %v13378_v34 = vld [vmem:[%s15614_s14 + $0xbe4] ss:$80 sps:$4 sm:$0xff]   ;;  %v13411_v57 = vld [vmem:[%s15614_s14 + $0xf0c] ss:$80 sps:$4 sm:$0xff]  }
 0x27b   : > { %v13396_v48 = vld [vmem:[%s15614_s14 + $0xdc4] ss:$80 sps:$4 sm:$0xff]   ;;  %v13409_v59 = vld [vmem:[%s15614_s14 + $0xf08] ss:$80 sps:$4 sm:$0xff]   ;;  %v13441_v14 = vld [vmem:[%s15614_s14 + $0x122c] ss:$80 sps:$4 sm:$0xff]  }
 0x27c   : > { %v13415_v63 = vld [vmem:[%s15614_s14 + $0xfa8] ss:$80 sps:$4 sm:$0xff]   ;;  %v13447_v18 = vld [vmem:[%s15614_s14 + $0x12cc] ss:$80 sps:$4 sm:$0xff]   ;;  %s12984_s21 = smul.u32 40, %s15474_s22  ;;  %p12979_p7 = scmp.ne.s32.totalorder %s15474_s22, 3 }
 0x27d   : > { %8455 = vmatpush1.bf16.msra.mxu0 %v13308_v35  ;;  %8619 = vmatpush1.bf16.msra.mxu1 %v13309_v37  ;;  %v13381_v35 = vld [vmem:[%s15614_s14 + $0xbec] ss:$80 sps:$4 sm:$0xff]   ;;  %v13376_v37 = vld [vmem:[%s15614_s14 + $0xbe0] ss:$80 sps:$4 sm:$0xff]   ;;  %v13445_v21 = vld [vmem:[%s15614_s14 + $0x12c8] ss:$80 sps:$4 sm:$0xff]  }
 0x27e   : > { %8456 = vmatprep.subr.bf16.mxu0 %v13310_v38  ;;  %8620 = vmatprep.subr.bf16.mxu1 %v13312_v39  ;;  %v13379_v38 = vld [vmem:[%s15614_s14 + $0xbe8] ss:$80 sps:$4 sm:$0xff]   ;;  %v13384_v39 = vld [vmem:[%s15614_s14 + $0xc84] ss:$80 sps:$4 sm:$0xff]   ;;  %s16232_s6 = scalar_lea.vmem [#allocation3], %s12984_s21  ;;  %vm10317_vm3 = vcmask (!%p12979_p7), 1041408  }
 0x27f   : > { %vm11592_vm5 = vcmask (!%p12979_p7), 1043458   ;;  %vm11594_vm6 = vcmask (!%p12979_p7), 136196  }
 0x280   : > { %vm17630_vm7 = vmor (!%p12979_p7), %vm11592_vm5, %vm10317_vm3 }
 0x281   : > { %8457 = vmatpush1.bf16.msra.mxu0 %v13314_v40  ;;  %8621 = vmatpush1.bf16.msra.mxu1 %v13315_v41  ;;  %v13387_v40 = vld [vmem:[%s15614_s14 + $0xc8c] ss:$80 sps:$4 sm:$0xff]   ;;  %v13382_v41 = vld [vmem:[%s15614_s14 + $0xc80] ss:$80 sps:$4 sm:$0xff]   ;;  %vm17637_vm8 = vmor (!%p12979_p7), %vm11594_vm6, %vm17630_vm7 }
 0x282   : > { %8458 = vmatprep.subr.bf16.mxu0 %v13316_v45  ;;  %8622 = vmatprep.subr.bf16.mxu1 %v13318_v46  ;;  %v13393_v45 = vld [vmem:[%s15614_s14 + $0xd2c] ss:$80 sps:$4 sm:$0xff]   ;;  %v13388_v46 = vld [vmem:[%s15614_s14 + $0xd20] ss:$80 sps:$4 sm:$0xff]  }
 0x285   : > { %8459 = vmatpush1.bf16.msra.mxu0 %v13320_v47  ;;  %8623 = vmatpush1.bf16.msra.mxu1 %v13321_v36  ;;  %v13391_v47 = vld [vmem:[%s15614_s14 + $0xd28] ss:$80 sps:$4 sm:$0xff]   ;;  %v13399_v36 = vld [vmem:[%s15614_s14 + $0xdcc] ss:$80 sps:$4 sm:$0xff]  }
 0x286   : > { %8460 = vmatprep.subr.bf16.mxu0 %v13322_v50  ;;  %8624 = vmatprep.subr.bf16.mxu1 %v13324_v51  ;;  %v13394_v50 = vld [vmem:[%s15614_s14 + $0xdc0] ss:$80 sps:$4 sm:$0xff]   ;;  %v13397_v51 = vld [vmem:[%s15614_s14 + $0xdc8] ss:$80 sps:$4 sm:$0xff]  }
 0x289   : > { %8461 = vmatpush1.bf16.msra.mxu0 %v13326_v52  ;;  %8625 = vmatpush1.bf16.msra.mxu1 %v13327_v53  ;;  %v13402_v52 = vld [vmem:[%s15614_s14 + $0xe64] ss:$80 sps:$4 sm:$0xff]   ;;  %v13405_v53 = vld [vmem:[%s15614_s14 + $0xe6c] ss:$80 sps:$4 sm:$0xff]  }
 0x28a   : > { %8462 = vmatprep.subr.bf16.mxu0 %v13328_v55  ;;  %8626 = vmatprep.subr.bf16.mxu1 %v13330_v56  ;;  %v13403_v55 = vld [vmem:[%s15614_s14 + $0xe68] ss:$80 sps:$4 sm:$0xff]   ;;  %v13408_v56 = vld [vmem:[%s15614_s14 + $0xf04] ss:$80 sps:$4 sm:$0xff]  }
 0x28d   : > { %8463 = vmatpush1.bf16.msra.mxu0 %v13332_v58  ;;  %8627 = vmatpush1.bf16.msra.mxu1 %v13333_v60  ;;  %v13406_v58 = vld [vmem:[%s15614_s14 + $0xf00] ss:$80 sps:$4 sm:$0xff]   ;;  %v13414_v60 = vld [vmem:[%s15614_s14 + $0xfa4] ss:$80 sps:$4 sm:$0xff]  }
 0x28e   : > { %8464 = vmatprep.subr.bf16.mxu0 %v13334_v61  ;;  %8628 = vmatprep.subr.bf16.mxu1 %v13336_v62  ;;  %v13417_v61 = vld [vmem:[%s15614_s14 + $0xfac] ss:$80 sps:$4 sm:$0xff]   ;;  %v13412_v62 = vld [vmem:[%s15614_s14 + $0xfa0] ss:$80 sps:$4 sm:$0xff]  }
 0x291   : > { %8465 = vmatpush1.bf16.msra.mxu0 %v13338_v0  ;;  %8629 = vmatpush1.bf16.msra.mxu1 %v13339_v2  ;;  %v13420_v0 = vld [vmem:[%s15614_s14 + $0x1044] ss:$80 sps:$4 sm:$0xff]   ;;  %v13423_v2 = vld [vmem:[%s15614_s14 + $0x104c] ss:$80 sps:$4 sm:$0xff]  }
 0x292   : > { %8466 = vmatprep.subr.bf16.mxu0 %v13340_v3  ;;  %8630 = vmatprep.subr.bf16.mxu1 %v13342_v4  ;;  %v13418_v3 = vld [vmem:[%s15614_s14 + $0x1040] ss:$80 sps:$4 sm:$0xff]   ;;  %v13421_v4 = vld [vmem:[%s15614_s14 + $0x1048] ss:$80 sps:$4 sm:$0xff]  }
 0x295   : > { %8467 = vmatpush1.bf16.msra.mxu0 %v13344_v5  ;;  %8631 = vmatpush1.bf16.msra.mxu1 %v13345_v6  ;;  %v13426_v5 = vld [vmem:[%s15614_s14 + $0x10e4] ss:$80 sps:$4 sm:$0xff]   ;;  %v13429_v6 = vld [vmem:[%s15614_s14 + $0x10ec] ss:$80 sps:$4 sm:$0xff]  }
 0x296   : > { %8468 = vmatprep.subr.bf16.mxu0 %v13346_v7  ;;  %8632 = vmatprep.subr.bf16.mxu1 %v13348_v8  ;;  %v13424_v7 = vld [vmem:[%s15614_s14 + $0x10e0] ss:$80 sps:$4 sm:$0xff]   ;;  %v13427_v8 = vld [vmem:[%s15614_s14 + $0x10e8] ss:$80 sps:$4 sm:$0xff]  }
 0x299   : > { %8469 = vmatpush1.bf16.msra.mxu0 %v13350_v9  ;;  %8633 = vmatpush1.bf16.msra.mxu1 %v13351_v10  ;;  %v13432_v9 = vld [vmem:[%s15614_s14 + $0x1184] ss:$80 sps:$4 sm:$0xff]   ;;  %v13435_v10 = vld [vmem:[%s15614_s14 + $0x118c] ss:$80 sps:$4 sm:$0xff]  }
 0x29a   : > { %8470 = vmatprep.subr.bf16.mxu0 %v13352_v11  ;;  %8634 = vmatprep.subr.bf16.mxu1 %v13354_v12  ;;  %v13430_v11 = vld [vmem:[%s15614_s14 + $0x1180] ss:$80 sps:$4 sm:$0xff]   ;;  %v13433_v12 = vld [vmem:[%s15614_s14 + $0x1188] ss:$80 sps:$4 sm:$0xff]  }
 0x29d   : > { %8471 = vmatpush1.bf16.msra.mxu0 %v13356_v13  ;;  %8635 = vmatpush1.bf16.msra.mxu1 %v13357_v15  ;;  %v13438_v13 = vld [vmem:[%s15614_s14 + $0x1224] ss:$80 sps:$4 sm:$0xff]   ;;  %v13436_v15 = vld [vmem:[%s15614_s14 + $0x1220] ss:$80 sps:$4 sm:$0xff]  }
 0x29e   : > { %8481 = vmatprep.subr.bf16.mxu0 %v13360_v16  ;;  %8645 = vmatprep.subr.bf16.mxu1 %v13363_v17  ;;  %v13439_v16 = vld [vmem:[%s15614_s14 + $0x1228] ss:$80 sps:$4 sm:$0xff]   ;;  %v13444_v17 = vld [vmem:[%s15614_s14 + $0x12c4] ss:$80 sps:$4 sm:$0xff]  }
 0x2a0   : > { %8473 = vmatmul.mubr.bf16.vlgmr.msra.gmra.mrb[0].mxu0 %v15757_v20  ;;  %8637 = vmatmul.mubr.bf16.vlgmr.msra.gmra.mrb[0].mxu1 %v15757_v20 }
 0x2a1   : > { %8482 = vmatpush1.bf16.msra.mxu0 %v13358_v19  ;;  %8646 = vmatpush1.bf16.msra.mxu1 %v13361_v22  ;;  %v13442_v19 = vld [vmem:[%s15614_s14 + $0x12c0] ss:$80 sps:$4 sm:$0xff]   ;;  %v13450_v22 = vld [vmem:[%s15614_s14 + $0x1364] ss:$80 sps:$4 sm:$0xff]  }
 0x2a2   : > { %8483 = vmatprep.subr.bf16.mxu0 %v13366_v23  ;;  %8647 = vmatprep.subr.bf16.mxu1 %v13369_v24  ;;  %v13453_v23 = vld [vmem:[%s15614_s14 + $0x136c] ss:$80 sps:$4 sm:$0xff]   ;;  %v13448_v24 = vld [vmem:[%s15614_s14 + $0x1360] ss:$80 sps:$4 sm:$0xff]  }
 0x2a3   : > { %8513 = vmatprep.mubr.bf16.mxu0 %v15770_v27  ;;  %8677 = vmatprep.mubr.bf16.mxu1 %v15770_v27 }
 0x2a5   : > { %8484 = vmatpush1.bf16.msra.mxu0 %v13364_v28  ;;  %8648 = vmatpush1.bf16.msra.mxu1 %v13367_v29  ;;  %v13451_v28 = vld [vmem:[%s15614_s14 + $0x1368] ss:$80 sps:$4 sm:$0xff]   ;;  %v13456_v29 = vld [vmem:[%s15614_s14 + $0x1404] ss:$80 sps:$4 sm:$0xff]  }
 0x2a6   : > { %8485 = vmatprep.subr.bf16.mxu0 %v13372_v30  ;;  %8649 = vmatprep.subr.bf16.mxu1 %v13375_v31  ;;  %v13459_v30 = vld [vmem:[%s15614_s14 + $0x140c] ss:$80 sps:$4 sm:$0xff]   ;;  %v13454_v31 = vld [vmem:[%s15614_s14 + $0x1400] ss:$80 sps:$4 sm:$0xff]  }
 0x2a9   : > { %8486 = vmatpush1.bf16.msra.mxu0 %v13370_v32  ;;  %8650 = vmatpush1.bf16.msra.mxu1 %v13373_v33  ;;  %v15839_v32 = vcombine.high %v15757_v20, %v15757_v20  ;;  %v13457_v33 = vld [vmem:[%s15614_s14 + $0x1408] ss:$80 sps:$4 sm:$0xff]  }
 0x2aa   : > { %8487 = vmatprep.subr.bf16.mxu0 %v13378_v34  ;;  %8651 = vmatprep.subr.bf16.mxu1 %v13381_v35  ;;  %v13462_v34 = vld [vmem:[%s15614_s14 + $0x14a4] ss:$80 sps:$4 sm:$0xff]   ;;  %v13465_v35 = vld [vmem:[%s15614_s14 + $0x14ac] ss:$80 sps:$4 sm:$0xff]  }
 0x2ad   : > { %8488 = vmatpush1.bf16.msra.mxu0 %v13376_v37  ;;  %8652 = vmatpush1.bf16.msra.mxu1 %v13379_v38  ;;  %v13460_v37 = vld [vmem:[%s15614_s14 + $0x14a0] ss:$80 sps:$4 sm:$0xff]   ;;  %v13463_v38 = vld [vmem:[%s15614_s14 + $0x14a8] ss:$80 sps:$4 sm:$0xff]  }
 0x2ae   : > { %8489 = vmatprep.subr.bf16.mxu0 %v13384_v39  ;;  %8653 = vmatprep.subr.bf16.mxu1 %v13387_v40  ;;  %v13468_v39 = vld [vmem:[%s15614_s14 + $0x1544] ss:$80 sps:$4 sm:$0xff]   ;;  %v13471_v40 = vld [vmem:[%s15614_s14 + $0x154c] ss:$80 sps:$4 sm:$0xff]  }
 0x2b1   : > { %8490 = vmatpush1.bf16.msra.mxu0 %v13382_v41  ;;  %8654 = vmatpush1.bf16.msra.mxu1 %v13385_v42  ;;  %v13466_v41 = vld [vmem:[%s15614_s14 + $0x1540] ss:$80 sps:$4 sm:$0xff]   ;;  %v13469_v42 = vld [vmem:[%s15614_s14 + $0x1548] ss:$80 sps:$4 sm:$0xff]  }
 0x2b2   : > { %8491 = vmatprep.subr.bf16.mxu0 %v13390_v43  ;;  %8655 = vmatprep.subr.bf16.mxu1 %v13393_v45  ;;  %v13474_v43 = vld [vmem:[%s15614_s14 + $0x15e4] ss:$80 sps:$4 sm:$0xff]   ;;  %v13477_v45 = vld [vmem:[%s15614_s14 + $0x15ec] ss:$80 sps:$4 sm:$0xff]  }
 0x2b5   : > { %8492 = vmatpush1.bf16.msra.mxu0 %v13388_v46  ;;  %8656 = vmatpush1.bf16.msra.mxu1 %v13391_v47  ;;  %v13472_v46 = vld [vmem:[%s15614_s14 + $0x15e0] ss:$80 sps:$4 sm:$0xff]   ;;  %v13475_v47 = vld [vmem:[%s15614_s14 + $0x15e8] ss:$80 sps:$4 sm:$0xff]  }
 0x2b6   : > { %8493 = vmatprep.subr.bf16.mxu0 %v13396_v48  ;;  %8657 = vmatprep.subr.bf16.mxu1 %v13399_v36  ;;  %v13480_v48 = vld [vmem:[%s15614_s14 + $0x1684] ss:$80 sps:$4 sm:$0xff]   ;;  %v13483_v36 = vld [vmem:[%s15614_s14 + $0x168c] ss:$80 sps:$4 sm:$0xff]  }
 0x2b9   : > { %8494 = vmatpush1.bf16.msra.mxu0 %v13394_v50  ;;  %8658 = vmatpush1.bf16.msra.mxu1 %v13397_v51  ;;  %v13478_v50 = vld [vmem:[%s15614_s14 + $0x1680] ss:$80 sps:$4 sm:$0xff]   ;;  %v13481_v51 = vld [vmem:[%s15614_s14 + $0x1688] ss:$80 sps:$4 sm:$0xff]  }
 0x2ba   : > { %8495 = vmatprep.subr.bf16.mxu0 %v13402_v52  ;;  %8659 = vmatprep.subr.bf16.mxu1 %v13405_v53  ;;  %v13486_v52 = vld [vmem:[%s15614_s14 + $0x1724] ss:$80 sps:$4 sm:$0xff]   ;;  %v13489_v53 = vld [vmem:[%s15614_s14 + $0x172c] ss:$80 sps:$4 sm:$0xff]  }
 0x2bd   : > { %8496 = vmatpush1.bf16.msra.mxu0 %v13400_v54  ;;  %8660 = vmatpush1.bf16.msra.mxu1 %v13403_v55  ;;  %v13484_v54 = vld [vmem:[%s15614_s14 + $0x1720] ss:$80 sps:$4 sm:$0xff]   ;;  %v13487_v55 = vld [vmem:[%s15614_s14 + $0x1728] ss:$80 sps:$4 sm:$0xff]  }
 0x2be   : > { %8497 = vmatprep.subr.bf16.mxu0 %v13408_v56  ;;  %8661 = vmatprep.subr.bf16.mxu1 %v13411_v57  ;;  %v13492_v56 = vld [vmem:[%s15614_s14 + $0x17c4] ss:$80 sps:$4 sm:$0xff]   ;;  %v13495_v57 = vld [vmem:[%s15614_s14 + $0x17cc] ss:$80 sps:$4 sm:$0xff]  }
 0x2c1   : > { %8498 = vmatpush1.bf16.msra.mxu0 %v13406_v58  ;;  %8662 = vmatpush1.bf16.msra.mxu1 %v13409_v59  ;;  %v13490_v58 = vld [vmem:[%s15614_s14 + $0x17c0] ss:$80 sps:$4 sm:$0xff]   ;;  %v13493_v59 = vld [vmem:[%s15614_s14 + $0x17c8] ss:$80 sps:$4 sm:$0xff]  }
 0x2c2   : > { %8499 = vmatprep.subr.bf16.mxu0 %v13414_v60  ;;  %8663 = vmatprep.subr.bf16.mxu1 %v13417_v61  ;;  %v13498_v60 = vld [vmem:[%s15614_s14 + $0x1864] ss:$80 sps:$4 sm:$0xff]   ;;  %v13501_v61 = vld [vmem:[%s15614_s14 + $0x186c] ss:$80 sps:$4 sm:$0xff]  }
 0x2c5   : > { %8500 = vmatpush1.bf16.msra.mxu0 %v13412_v62  ;;  %8664 = vmatpush1.bf16.msra.mxu1 %v13415_v63  ;;  %v13496_v62 = vld [vmem:[%s15614_s14 + $0x1860] ss:$80 sps:$4 sm:$0xff]   ;;  %v13499_v63 = vld [vmem:[%s15614_s14 + $0x1868] ss:$80 sps:$4 sm:$0xff]  }
 0x2c6   : > { %8501 = vmatprep.subr.bf16.mxu0 %v13420_v0  ;;  %8665 = vmatprep.subr.bf16.mxu1 %v13423_v2  ;;  %v13504_v0 = vld [vmem:[%s15614_s14 + $0x1904] ss:$80 sps:$4 sm:$0xff]   ;;  %v13507_v2 = vld [vmem:[%s15614_s14 + $0x190c] ss:$80 sps:$4 sm:$0xff]  }
 0x2c9   : > { %8502 = vmatpush1.bf16.msra.mxu0 %v13418_v3  ;;  %8666 = vmatpush1.bf16.msra.mxu1 %v13421_v4  ;;  %v13502_v3 = vld [vmem:[%s15614_s14 + $0x1900] ss:$80 sps:$4 sm:$0xff]   ;;  %v13505_v4 = vld [vmem:[%s15614_s14 + $0x1908] ss:$80 sps:$4 sm:$0xff]  }
 0x2ca   : > { %8503 = vmatprep.subr.bf16.mxu0 %v13426_v5  ;;  %8667 = vmatprep.subr.bf16.mxu1 %v13429_v6  ;;  %v13510_v5 = vld [vmem:[%s15614_s14 + $0x19a4] ss:$80 sps:$4 sm:$0xff]   ;;  %v13513_v6 = vld [vmem:[%s15614_s14 + $0x19ac] ss:$80 sps:$4 sm:$0xff]  }
 0x2cd   : > { %8504 = vmatpush1.bf16.msra.mxu0 %v13424_v7  ;;  %8668 = vmatpush1.bf16.msra.mxu1 %v13427_v8  ;;  %v13508_v7 = vld [vmem:[%s15614_s14 + $0x19a0] ss:$80 sps:$4 sm:$0xff]   ;;  %v13511_v8 = vld [vmem:[%s15614_s14 + $0x19a8] ss:$80 sps:$4 sm:$0xff]  }
 0x2ce   : > { %8505 = vmatprep.subr.bf16.mxu0 %v13432_v9  ;;  %8669 = vmatprep.subr.bf16.mxu1 %v13435_v10  ;;  %v13516_v9 = vld [vmem:[%s15614_s14 + $0x1a44] ss:$80 sps:$4 sm:$0xff]   ;;  %v13519_v10 = vld [vmem:[%s15614_s14 + $0x1a4c] ss:$80 sps:$4 sm:$0xff]  }
 0x2d1   : > { %8506 = vmatpush1.bf16.msra.mxu0 %v13430_v11  ;;  %8670 = vmatpush1.bf16.msra.mxu1 %v13433_v12  ;;  %v13514_v11 = vld [vmem:[%s15614_s14 + $0x1a40] ss:$80 sps:$4 sm:$0xff]   ;;  %v13517_v12 = vld [vmem:[%s15614_s14 + $0x1a48] ss:$80 sps:$4 sm:$0xff]  }
 0x2d2   : > { %8507 = vmatprep.subr.bf16.mxu0 %v13438_v13  ;;  %8671 = vmatprep.subr.bf16.mxu1 %v13441_v14  ;;  %v13522_v13 = vld [vmem:[%s15614_s14 + $0x1ae4] ss:$80 sps:$4 sm:$0xff]   ;;  %v13525_v14 = vld [vmem:[%s15614_s14 + $0x1aec] ss:$80 sps:$4 sm:$0xff]  }
 0x2d5   : > { %8508 = vmatpush1.bf16.msra.mxu0 %v13436_v15  ;;  %8672 = vmatpush1.bf16.msra.mxu1 %v13439_v16  ;;  %v13520_v15 = vld [vmem:[%s15614_s14 + $0x1ae0] ss:$80 sps:$4 sm:$0xff]   ;;  %v13523_v16 = vld [vmem:[%s15614_s14 + $0x1ae8] ss:$80 sps:$4 sm:$0xff]  }
 0x2d6   : > { %8509 = vmatprep.subr.bf16.mxu0 %v13444_v17  ;;  %8673 = vmatprep.subr.bf16.mxu1 %v13447_v18  ;;  %v13528_v17 = vld [vmem:[%s15614_s14 + $0x1b84] ss:$80 sps:$4 sm:$0xff]   ;;  %v13531_v18 = vld [vmem:[%s15614_s14 + $0x1b8c] ss:$80 sps:$4 sm:$0xff]  }
 0x2d9   : > { %8510 = vmatpush1.bf16.msra.mxu0 %v13442_v19  ;;  %8674 = vmatpush1.bf16.msra.mxu1 %v13445_v21  ;;  %v13526_v19 = vld [vmem:[%s15614_s14 + $0x1b80] ss:$80 sps:$4 sm:$0xff]   ;;  %v13529_v21 = vld [vmem:[%s15614_s14 + $0x1b88] ss:$80 sps:$4 sm:$0xff]  }
 0x2da   : > { %8511 = vmatprep.subr.bf16.mxu0 %v13450_v22  ;;  %8675 = vmatprep.subr.bf16.mxu1 %v13453_v23  ;;  %v13534_v22 = vld [vmem:[%s15614_s14 + $0x1c24] ss:$80 sps:$4 sm:$0xff]   ;;  %v13537_v23 = vld [vmem:[%s15614_s14 + $0x1c2c] ss:$80 sps:$4 sm:$0xff]  }
 0x2dd   : > { %8512 = vmatpush1.bf16.msra.mxu0 %v13448_v24  ;;  %8676 = vmatpush1.bf16.msra.mxu1 %v13451_v28  ;;  %v13532_v24 = vld [vmem:[%s15614_s14 + $0x1c20] ss:$80 sps:$4 sm:$0xff]   ;;  %v13535_v28 = vld [vmem:[%s15614_s14 + $0x1c28] ss:$80 sps:$4 sm:$0xff]  }
 0x2de   : > { %8522 = vmatprep.subr.bf16.mxu0 %v13456_v29  ;;  %8686 = vmatprep.subr.bf16.mxu1 %v13459_v30  ;;  %v13540_v29 = vld [vmem:[%s15614_s14 + $0x1cc4] ss:$80 sps:$4 sm:$0xff]   ;;  %v13543_v30 = vld [vmem:[%s15614_s14 + $0x1ccc] ss:$80 sps:$4 sm:$0xff]  }
 0x2e0   : > { %8514 = vmatmul.mubr.bf16.vlgmr.msra.gmra.mrb[0].mxu0 %v15839_v32  ;;  %8678 = vmatmul.mubr.bf16.vlgmr.msra.gmra.mrb[0].mxu1 %v15839_v32 }
 0x2e1   : > { %8523 = vmatpush1.bf16.msra.mxu0 %v13454_v31  ;;  %8687 = vmatpush1.bf16.msra.mxu1 %v13457_v33  ;;  %v13538_v31 = vld [vmem:[%s15614_s14 + $0x1cc0] ss:$80 sps:$4 sm:$0xff]   ;;  %v13541_v33 = vld [vmem:[%s15614_s14 + $0x1cc8] ss:$80 sps:$4 sm:$0xff]  }
 0x2e2   : > { %8524 = vmatprep.subr.bf16.mxu0 %v13462_v34  ;;  %8688 = vmatprep.subr.bf16.mxu1 %v13465_v35  ;;  %v13546_v34 = vld [vmem:[%s15614_s14 + $0x1d64] ss:$80 sps:$4 sm:$0xff]   ;;  %v13549_v35 = vld [vmem:[%s15614_s14 + $0x1d6c] ss:$80 sps:$4 sm:$0xff]  }
 0x2e3   : > { %8554 = vmatprep.mubr.bf16.mxu0 %v15763_v25  ;;  %8718 = vmatprep.mubr.bf16.mxu1 %v15763_v25 }
 0x2e5   : > { %8525 = vmatpush1.bf16.msra.mxu0 %v13460_v37  ;;  %8689 = vmatpush1.bf16.msra.mxu1 %v13463_v38  ;;  %v13544_v37 = vld [vmem:[%s15614_s14 + $0x1d60] ss:$80 sps:$4 sm:$0xff]   ;;  %v13547_v38 = vld [vmem:[%s15614_s14 + $0x1d68] ss:$80 sps:$4 sm:$0xff]  }
 0x2e6   : > { %8526 = vmatprep.subr.bf16.mxu0 %v13468_v39  ;;  %8690 = vmatprep.subr.bf16.mxu1 %v13471_v40  ;;  %v13553_v39 = vld [vmem:[%s15614_s14 + $0x1e04] ss:$80 sps:$4 sm:$0xff]   ;;  %v13556_v40 = vld [vmem:[%s15614_s14 + $0x1e0c] ss:$80 sps:$4 sm:$0xff]  }
 0x2e9   : > { %8527 = vmatpush1.bf16.msra.mxu0 %v13466_v41  ;;  %8691 = vmatpush1.bf16.msra.mxu1 %v13469_v42  ;;  %v13551_v41 = vld [vmem:[%s15614_s14 + $0x1e00] ss:$80 sps:$4 sm:$0xff]   ;;  %v13554_v42 = vld [vmem:[%s15614_s14 + $0x1e08] ss:$80 sps:$4 sm:$0xff]  }
 0x2ea   : > { %8528 = vmatprep.subr.bf16.mxu0 %v13474_v43  ;;  %8692 = vmatprep.subr.bf16.mxu1 %v13477_v45  ;;  %v13559_v43 = vld [vmem:[%s15614_s14 + $0x1ea4] ss:$80 sps:$4 sm:$0xff]   ;;  %v13562_v45 = vld [vmem:[%s15614_s14 + $0x1eac] ss:$80 sps:$4 sm:$0xff]  }
 0x2ed   : > { %8529 = vmatpush1.bf16.msra.mxu0 %v13472_v46  ;;  %8693 = vmatpush1.bf16.msra.mxu1 %v13475_v47  ;;  %v15914_v46 = vcombine.high %v15763_v25, %v15763_v25  ;;  %v13557_v47 = vld [vmem:[%s15614_s14 + $0x1ea0] ss:$80 sps:$4 sm:$0xff]  }
 0x2ee   : > { %8530 = vmatprep.subr.bf16.mxu0 %v13480_v48  ;;  %8694 = vmatprep.subr.bf16.mxu1 %v13483_v36  ;;  %v13560_v48 = vld [vmem:[%s15614_s14 + $0x1ea8] ss:$80 sps:$4 sm:$0xff]   ;;  %v13565_v36 = vld [vmem:[%s15614_s14 + $0x1f44] ss:$80 sps:$4 sm:$0xff]  }
 0x2f1   : > { %8531 = vmatpush1.bf16.msra.mxu0 %v13478_v50  ;;  %8695 = vmatpush1.bf16.msra.mxu1 %v13481_v51  ;;  %v13568_v50 = vld [vmem:[%s15614_s14 + $0x1f4c] ss:$80 sps:$4 sm:$0xff]   ;;  %v13563_v51 = vld [vmem:[%s15614_s14 + $0x1f40] ss:$80 sps:$4 sm:$0xff]  }
 0x2f2   : > { %8532 = vmatprep.subr.bf16.mxu0 %v13486_v52  ;;  %8696 = vmatprep.subr.bf16.mxu1 %v13489_v53  ;;  %v13566_v52 = vld [vmem:[%s15614_s14 + $0x1f48] ss:$80 sps:$4 sm:$0xff]   ;;  %v13571_v53 = vld [vmem:[%s15614_s14 + $0x1fe4] ss:$80 sps:$4 sm:$0xff]  }
 0x2f5   : > { %8533 = vmatpush1.bf16.msra.mxu0 %v13484_v54  ;;  %8697 = vmatpush1.bf16.msra.mxu1 %v13487_v55  ;;  %v13574_v54 = vld [vmem:[%s15614_s14 + $0x1fec] ss:$80 sps:$4 sm:$0xff]   ;;  %v13569_v55 = vld [vmem:[%s15614_s14 + $0x1fe0] ss:$80 sps:$4 sm:$0xff]  }
 0x2f6   : > { %8534 = vmatprep.subr.bf16.mxu0 %v13492_v56  ;;  %8698 = vmatprep.subr.bf16.mxu1 %v13495_v57  ;;  %v13572_v56 = vld [vmem:[%s15614_s14 + $0x1fe8] ss:$80 sps:$4 sm:$0xff]   ;;  %v13577_v57 = vld [vmem:[%s15614_s14 + $0x2084] ss:$80 sps:$4 sm:$0xff]  }
 0x2f9   : > { %8535 = vmatpush1.bf16.msra.mxu0 %v13490_v58  ;;  %8699 = vmatpush1.bf16.msra.mxu1 %v13493_v59  ;;  %v13580_v58 = vld [vmem:[%s15614_s14 + $0x208c] ss:$80 sps:$4 sm:$0xff]   ;;  %v13575_v59 = vld [vmem:[%s15614_s14 + $0x2080] ss:$80 sps:$4 sm:$0xff]  }
 0x2fa   : > { %8536 = vmatprep.subr.bf16.mxu0 %v13498_v60  ;;  %8700 = vmatprep.subr.bf16.mxu1 %v13501_v61  ;;  %v13578_v60 = vld [vmem:[%s15614_s14 + $0x2088] ss:$80 sps:$4 sm:$0xff]   ;;  %v13583_v61 = vld [vmem:[%s15614_s14 + $0x2124] ss:$80 sps:$4 sm:$0xff]  }
 0x2fd   : > { %8537 = vmatpush1.bf16.msra.mxu0 %v13496_v62  ;;  %8701 = vmatpush1.bf16.msra.mxu1 %v13499_v63  ;;  %v13586_v62 = vld [vmem:[%s15614_s14 + $0x212c] ss:$80 sps:$4 sm:$0xff]   ;;  %v13581_v63 = vld [vmem:[%s15614_s14 + $0x2120] ss:$80 sps:$4 sm:$0xff]  }
 0x2fe   : > { %8538 = vmatprep.subr.bf16.mxu0 %v13504_v0  ;;  %8702 = vmatprep.subr.bf16.mxu1 %v13507_v2  ;;  %v13584_v0 = vld [vmem:[%s15614_s14 + $0x2128] ss:$80 sps:$4 sm:$0xff]   ;;  %v13589_v2 = vld [vmem:[%s15614_s14 + $0x21c4] ss:$80 sps:$4 sm:$0xff]  }
 0x301   : > { %8539 = vmatpush1.bf16.msra.mxu0 %v13502_v3  ;;  %8703 = vmatpush1.bf16.msra.mxu1 %v13505_v4  ;;  %v13592_v3 = vld [vmem:[%s15614_s14 + $0x21cc] ss:$80 sps:$4 sm:$0xff]   ;;  %v13587_v4 = vld [vmem:[%s15614_s14 + $0x21c0] ss:$80 sps:$4 sm:$0xff]  }
 0x302   : > { %8540 = vmatprep.subr.bf16.mxu0 %v13510_v5  ;;  %8704 = vmatprep.subr.bf16.mxu1 %v13513_v6  ;;  %v13590_v5 = vld [vmem:[%s15614_s14 + $0x21c8] ss:$80 sps:$4 sm:$0xff]   ;;  %v13595_v6 = vld [vmem:[%s15614_s14 + $0x2264] ss:$80 sps:$4 sm:$0xff]  }
 0x305   : > { %8541 = vmatpush1.bf16.msra.mxu0 %v13508_v7  ;;  %8705 = vmatpush1.bf16.msra.mxu1 %v13511_v8  ;;  %v13598_v7 = vld [vmem:[%s15614_s14 + $0x226c] ss:$80 sps:$4 sm:$0xff]   ;;  %v13593_v8 = vld [vmem:[%s15614_s14 + $0x2260] ss:$80 sps:$4 sm:$0xff]  }
 0x306   : > { %8542 = vmatprep.subr.bf16.mxu0 %v13516_v9  ;;  %8706 = vmatprep.subr.bf16.mxu1 %v13519_v10  ;;  %v13596_v9 = vld [vmem:[%s15614_s14 + $0x2268] ss:$80 sps:$4 sm:$0xff]   ;;  %v13601_v10 = vld [vmem:[%s15614_s14 + $0x2304] ss:$80 sps:$4 sm:$0xff]  }
 0x309   : > { %8543 = vmatpush1.bf16.msra.mxu0 %v13514_v11  ;;  %8707 = vmatpush1.bf16.msra.mxu1 %v13517_v12  ;;  %v13604_v11 = vld [vmem:[%s15614_s14 + $0x230c] ss:$80 sps:$4 sm:$0xff]   ;;  %v13599_v12 = vld [vmem:[%s15614_s14 + $0x2300] ss:$80 sps:$4 sm:$0xff]  }
 0x30a   : > { %8544 = vmatprep.subr.bf16.mxu0 %v13522_v13  ;;  %8708 = vmatprep.subr.bf16.mxu1 %v13525_v14  ;;  %v13602_v13 = vld [vmem:[%s15614_s14 + $0x2308] ss:$80 sps:$4 sm:$0xff]   ;;  %v13607_v14 = vld [vmem:[%s15614_s14 + $0x23a4] ss:$80 sps:$4 sm:$0xff]  }
 0x30d   : > { %8545 = vmatpush1.bf16.msra.mxu0 %v13520_v15  ;;  %8709 = vmatpush1.bf16.msra.mxu1 %v13523_v16  ;;  %v13610_v15 = vld [vmem:[%s15614_s14 + $0x23ac] ss:$80 sps:$4 sm:$0xff]   ;;  %v13605_v16 = vld [vmem:[%s15614_s14 + $0x23a0] ss:$80 sps:$4 sm:$0xff]  }
 0x30e   : > { %8546 = vmatprep.subr.bf16.mxu0 %v13528_v17  ;;  %8710 = vmatprep.subr.bf16.mxu1 %v13531_v18  ;;  %v13608_v17 = vld [vmem:[%s15614_s14 + $0x23a8] ss:$80 sps:$4 sm:$0xff]   ;;  %v13613_v18 = vld [vmem:[%s15614_s14 + $0x2444] ss:$80 sps:$4 sm:$0xff]  }
 0x311   : > { %8547 = vmatpush1.bf16.msra.mxu0 %v13526_v19  ;;  %8711 = vmatpush1.bf16.msra.mxu1 %v13529_v21  ;;  %v13616_v19 = vld [vmem:[%s15614_s14 + $0x244c] ss:$80 sps:$4 sm:$0xff]   ;;  %v13611_v21 = vld [vmem:[%s15614_s14 + $0x2440] ss:$80 sps:$4 sm:$0xff]  }
 0x312   : > { %8548 = vmatprep.subr.bf16.mxu0 %v13534_v22  ;;  %8712 = vmatprep.subr.bf16.mxu1 %v13537_v23  ;;  %v13614_v22 = vld [vmem:[%s15614_s14 + $0x2448] ss:$80 sps:$4 sm:$0xff]   ;;  %v13619_v23 = vld [vmem:[%s15614_s14 + $0x24e4] ss:$80 sps:$4 sm:$0xff]  }
 0x315   : > { %8549 = vmatpush1.bf16.msra.mxu0 %v13532_v24  ;;  %8713 = vmatpush1.bf16.msra.mxu1 %v13535_v28  ;;  %v13622_v24 = vld [vmem:[%s15614_s14 + $0x24ec] ss:$80 sps:$4 sm:$0xff]   ;;  %v13617_v28 = vld [vmem:[%s15614_s14 + $0x24e0] ss:$80 sps:$4 sm:$0xff]  }
 0x316   : > { %8550 = vmatprep.subr.bf16.mxu0 %v13540_v29  ;;  %8714 = vmatprep.subr.bf16.mxu1 %v13543_v30  ;;  %v13620_v29 = vld [vmem:[%s15614_s14 + $0x24e8] ss:$80 sps:$4 sm:$0xff]   ;;  %v13625_v30 = vld [vmem:[%s15614_s14 + $0x2584] ss:$80 sps:$4 sm:$0xff]  }
 0x319   : > { %8551 = vmatpush1.bf16.msra.mxu0 %v13538_v31  ;;  %8715 = vmatpush1.bf16.msra.mxu1 %v13541_v33  ;;  %v13628_v31 = vld [vmem:[%s15614_s14 + $0x258c] ss:$80 sps:$4 sm:$0xff]   ;;  %v13623_v33 = vld [vmem:[%s15614_s14 + $0x2580] ss:$80 sps:$4 sm:$0xff]  }
 0x31a   : > { %8552 = vmatprep.subr.bf16.mxu0 %v13546_v34  ;;  %8716 = vmatprep.subr.bf16.mxu1 %v13549_v35  ;;  %v13626_v34 = vld [vmem:[%s15614_s14 + $0x2588] ss:$80 sps:$4 sm:$0xff]   ;;  %v13631_v35 = vld [vmem:[%s15614_s14 + $0x2624] ss:$80 sps:$4 sm:$0xff]  }
 0x31d   : > { %8553 = vmatpush1.bf16.msra.mxu0 %v13544_v37  ;;  %8717 = vmatpush1.bf16.msra.mxu1 %v13547_v38  ;;  %v13634_v37 = vld [vmem:[%s15614_s14 + $0x262c] ss:$80 sps:$4 sm:$0xff]   ;;  %v2058_v38 = vld [vmem:[%s15614_s14 + $0x26c0] sm:$0xff] }
 0x31e   : > { %8563 = vmatprep.subr.bf16.mxu0 %v13553_v39  ;;  %8727 = vmatprep.subr.bf16.mxu1 %v13556_v40  ;;  %v2059_v39 = vld [vmem:[%s15614_s14 + $0x26c8] sm:$0xff]  ;;  %v13629_v40 = vld [vmem:[%s15614_s14 + $0x2620] ss:$80 sps:$4 sm:$0xff]  }
 0x320   : > { %8555 = vmatmul.mubr.bf16.vlgmr.msra.gmra.mrb[0].mxu0 %v15766_v26  ;;  %8719 = vmatmul.mubr.bf16.vlgmr.msra.gmra.mrb[0].mxu1 %v15766_v26 }
 0x321   : > { %8564 = vmatpush1.bf16.msra.mxu0 %v13551_v41  ;;  %8728 = vmatpush1.bf16.msra.mxu1 %v13554_v42  ;;  %v13632_v41 = vld [vmem:[%s15614_s14 + $0x2628] ss:$80 sps:$4 sm:$0xff]   ;;  %v12939_v42 = vcombine.high %v2058_v38, %v2058_v38 }
 0x322   : > { %8565 = vmatprep.subr.bf16.mxu0 %v13559_v43  ;;  %8729 = vmatprep.subr.bf16.mxu1 %v13562_v45  ;;  %v12941_v43 = vcombine.high %v2059_v39, %v2059_v39  ;;  %v12938_v45 = vcombine.low %v2058_v38, %v2058_v38  ;;  %v13707_v38 = vld [vmem:[%s15614_s14 + $0x6f4] ss:$80 sps:$4 sm:$0xff]  }
 0x323   : > { %12959 = vmatprep.mubr.msk.bf16.mxu0 %vm8375_vm1, %v15914_v46  ;;  %12961 = vmatprep.mubr.msk.bf16.mxu1 %vm8375_vm1, %v15914_v46 }
 0x325   : > { %8566 = vmatpush1.bf16.msra.mxu0 %v13557_v47  ;;  %8730 = vmatpush1.bf16.msra.mxu1 %v13560_v48  ;;  %v12940_v47 = vcombine.low %v2059_v39, %v2059_v39  ;;  %v13641_v48 = vld [vmem:[%s15614_s14 + $0x14] ss:$80 sps:$4 sm:$0xff]   ;;  %v13710_v39 = vld [vmem:[%s15614_s14 + $0x6fc] ss:$80 sps:$4 sm:$0xff]  }
 0x326   : > { %8567 = vmatprep.subr.bf16.mxu0 %v13565_v36  ;;  %8731 = vmatprep.subr.bf16.mxu1 %v13568_v50  ;;  %v8381_v36 = vsel %vm8379_vm2, %v12938_v45, 0  ;;  %v13711_v45 = vld [vmem:[%s15614_s14 + $0x790] ss:$80 sps:$4 sm:$0xff]  }
 0x327   : > { %v8387_v50 = vsel %vm8379_vm2, %v12940_v47, 0  ;;  %v13714_v47 = vld [vmem:[%s15614_s14 + $0x798] ss:$80 sps:$4 sm:$0xff]  }
 0x329   : > { %8568 = vmatpush1.bf16.msra.mxu0 %v13563_v51  ;;  %8732 = vmatpush1.bf16.msra.mxu1 %v13566_v52  ;;  %v13644_v51 = vld [vmem:[%s15614_s14 + $0x1c] ss:$80 sps:$4 sm:$0xff]   ;;  %v15982_v52 = vcombine.high %v15766_v26, %v15766_v26 }
 0x32a   : > { %8569 = vmatprep.subr.bf16.mxu0 %v13571_v53  ;;  %8733 = vmatprep.subr.bf16.mxu1 %v13574_v54  ;;  %v13639_v53 = vld [vmem:[%s15614_s14 + $0x10] ss:$80 sps:$4 sm:$0xff]   ;;  %v13642_v54 = vld [vmem:[%s15614_s14 + $0x18] ss:$80 sps:$4 sm:$0xff]  }
 0x32d   : > { %8570 = vmatpush1.bf16.msra.mxu0 %v13569_v55  ;;  %8734 = vmatpush1.bf16.msra.mxu1 %v13572_v56  ;;  %v13647_v55 = vld [vmem:[%s15614_s14 + $0xb4] ss:$80 sps:$4 sm:$0xff]   ;;  %v13650_v56 = vld [vmem:[%s15614_s14 + $0xbc] ss:$80 sps:$4 sm:$0xff]  }
 0x32e   : > { %8571 = vmatprep.subr.bf16.mxu0 %v13577_v57  ;;  %8735 = vmatprep.subr.bf16.mxu1 %v13580_v58  ;;  %v13645_v57 = vld [vmem:[%s15614_s14 + $0xb0] ss:$80 sps:$4 sm:$0xff]   ;;  %v13648_v58 = vld [vmem:[%s15614_s14 + $0xb8] ss:$80 sps:$4 sm:$0xff]  }
 0x331   : > { %8572 = vmatpush1.bf16.msra.mxu0 %v13575_v59  ;;  %8736 = vmatpush1.bf16.msra.mxu1 %v13578_v60  ;;  %v13653_v59 = vld [vmem:[%s15614_s14 + $0x154] ss:$80 sps:$4 sm:$0xff]   ;;  %v13656_v60 = vld [vmem:[%s15614_s14 + $0x15c] ss:$80 sps:$4 sm:$0xff]  }
 0x332   : > { %8573 = vmatprep.subr.bf16.mxu0 %v13583_v61  ;;  %8737 = vmatprep.subr.bf16.mxu1 %v13586_v62  ;;  %v13651_v61 = vld [vmem:[%s15614_s14 + $0x150] ss:$80 sps:$4 sm:$0xff]   ;;  %v13654_v62 = vld [vmem:[%s15614_s14 + $0x158] ss:$80 sps:$4 sm:$0xff]  }
 0x335   : > { %8574 = vmatpush1.bf16.msra.mxu0 %v13581_v63  ;;  %8738 = vmatpush1.bf16.msra.mxu1 %v13584_v0  ;;  %v13659_v63 = vld [vmem:[%s15614_s14 + $0x1f4] ss:$80 sps:$4 sm:$0xff]   ;;  %v13662_v0 = vld [vmem:[%s15614_s14 + $0x1fc] ss:$80 sps:$4 sm:$0xff]  }
 0x336   : > { %8575 = vmatprep.subr.bf16.mxu0 %v13589_v2  ;;  %8739 = vmatprep.subr.bf16.mxu1 %v13592_v3  ;;  %v13657_v2 = vld [vmem:[%s15614_s14 + $0x1f0] ss:$80 sps:$4 sm:$0xff]   ;;  %v13660_v3 = vld [vmem:[%s15614_s14 + $0x1f8] ss:$80 sps:$4 sm:$0xff]  }
 0x339   : > { %8576 = vmatpush1.bf16.msra.mxu0 %v13587_v4  ;;  %8740 = vmatpush1.bf16.msra.mxu1 %v13590_v5  ;;  %v13665_v4 = vld [vmem:[%s15614_s14 + $0x294] ss:$80 sps:$4 sm:$0xff]   ;;  %v13668_v5 = vld [vmem:[%s15614_s14 + $0x29c] ss:$80 sps:$4 sm:$0xff]  }
 0x33a   : > { %8577 = vmatprep.subr.bf16.mxu0 %v13595_v6  ;;  %8741 = vmatprep.subr.bf16.mxu1 %v13598_v7  ;;  %v13663_v6 = vld [vmem:[%s15614_s14 + $0x290] ss:$80 sps:$4 sm:$0xff]   ;;  %v13666_v7 = vld [vmem:[%s15614_s14 + $0x298] ss:$80 sps:$4 sm:$0xff]  }
 0x33d   : > { %8578 = vmatpush1.bf16.msra.mxu0 %v13593_v8  ;;  %8742 = vmatpush1.bf16.msra.mxu1 %v13596_v9  ;;  %v13671_v8 = vld [vmem:[%s15614_s14 + $0x334] ss:$80 sps:$4 sm:$0xff]   ;;  %v13674_v9 = vld [vmem:[%s15614_s14 + $0x33c] ss:$80 sps:$4 sm:$0xff]  }
 0x33e   : > { %8579 = vmatprep.subr.bf16.mxu0 %v13601_v10  ;;  %8743 = vmatprep.subr.bf16.mxu1 %v13604_v11  ;;  %v13669_v10 = vld [vmem:[%s15614_s14 + $0x330] ss:$80 sps:$4 sm:$0xff]   ;;  %v13672_v11 = vld [vmem:[%s15614_s14 + $0x338] ss:$80 sps:$4 sm:$0xff]  }
 0x341   : > { %8580 = vmatpush1.bf16.msra.mxu0 %v13599_v12  ;;  %8744 = vmatpush1.bf16.msra.mxu1 %v13602_v13  ;;  %v13677_v12 = vld [vmem:[%s15614_s14 + $0x3d4] ss:$80 sps:$4 sm:$0xff]   ;;  %v13680_v13 = vld [vmem:[%s15614_s14 + $0x3dc] ss:$80 sps:$4 sm:$0xff]  }
 0x342   : > { %8581 = vmatprep.subr.bf16.mxu0 %v13607_v14  ;;  %8745 = vmatprep.subr.bf16.mxu1 %v13610_v15  ;;  %v13675_v14 = vld [vmem:[%s15614_s14 + $0x3d0] ss:$80 sps:$4 sm:$0xff]   ;;  %v13678_v15 = vld [vmem:[%s15614_s14 + $0x3d8] ss:$80 sps:$4 sm:$0xff]  }
 0x345   : > { %8582 = vmatpush1.bf16.msra.mxu0 %v13605_v16  ;;  %8746 = vmatpush1.bf16.msra.mxu1 %v13608_v17  ;;  %v13683_v16 = vld [vmem:[%s15614_s14 + $0x474] ss:$80 sps:$4 sm:$0xff]   ;;  %v13686_v17 = vld [vmem:[%s15614_s14 + $0x47c] ss:$80 sps:$4 sm:$0xff]  }
 0x346   : > { %8583 = vmatprep.subr.bf16.mxu0 %v13613_v18  ;;  %8747 = vmatprep.subr.bf16.mxu1 %v13616_v19  ;;  %v13681_v18 = vld [vmem:[%s15614_s14 + $0x470] ss:$80 sps:$4 sm:$0xff]   ;;  %v13684_v19 = vld [vmem:[%s15614_s14 + $0x478] ss:$80 sps:$4 sm:$0xff]  }
 0x349   : > { %8584 = vmatpush1.bf16.msra.mxu0 %v13611_v21  ;;  %8748 = vmatpush1.bf16.msra.mxu1 %v13614_v22  ;;  %v13689_v21 = vld [vmem:[%s15614_s14 + $0x514] ss:$80 sps:$4 sm:$0xff]   ;;  %v13692_v22 = vld [vmem:[%s15614_s14 + $0x51c] ss:$80 sps:$4 sm:$0xff]  }
 0x34a   : > { %8585 = vmatprep.subr.bf16.mxu0 %v13619_v23  ;;  %8749 = vmatprep.subr.bf16.mxu1 %v13622_v24  ;;  %v13687_v23 = vld [vmem:[%s15614_s14 + $0x510] ss:$80 sps:$4 sm:$0xff]   ;;  %v13690_v24 = vld [vmem:[%s15614_s14 + $0x518] ss:$80 sps:$4 sm:$0xff]  }
 0x34d   : > { %8586 = vmatpush1.bf16.msra.mxu0 %v13617_v28  ;;  %8750 = vmatpush1.bf16.msra.mxu1 %v13620_v29  ;;  %v13695_v28 = vld [vmem:[%s15614_s14 + $0x5b4] ss:$80 sps:$4 sm:$0xff]   ;;  %v13698_v29 = vld [vmem:[%s15614_s14 + $0x5bc] ss:$80 sps:$4 sm:$0xff]  }
 0x34e   : > { %8587 = vmatprep.subr.bf16.mxu0 %v13625_v30  ;;  %8751 = vmatprep.subr.bf16.mxu1 %v13628_v31  ;;  %v13693_v30 = vld [vmem:[%s15614_s14 + $0x5b0] ss:$80 sps:$4 sm:$0xff]   ;;  %v13696_v31 = vld [vmem:[%s15614_s14 + $0x5b8] ss:$80 sps:$4 sm:$0xff]  }
 0x351   : > { %8588 = vmatpush1.bf16.msra.mxu0 %v13623_v33  ;;  %8752 = vmatpush1.bf16.msra.mxu1 %v13626_v34  ;;  %v13701_v33 = vld [vmem:[%s15614_s14 + $0x654] ss:$80 sps:$4 sm:$0xff]   ;;  %v13704_v34 = vld [vmem:[%s15614_s14 + $0x65c] ss:$80 sps:$4 sm:$0xff]  }
 0x352   : > { %8589 = vmatprep.subr.bf16.mxu0 %v13631_v35  ;;  %8753 = vmatprep.subr.bf16.mxu1 %v13634_v37  ;;  %v13699_v35 = vld [vmem:[%s15614_s14 + $0x650] ss:$80 sps:$4 sm:$0xff]   ;;  %v13702_v37 = vld [vmem:[%s15614_s14 + $0x658] ss:$80 sps:$4 sm:$0xff]  }
 0x355   : > { %8590 = vmatpush1.bf16.msra.mxu0 %v13629_v40  ;;  %8754 = vmatpush1.bf16.msra.mxu1 %v13632_v41  ;;  %v13705_v40 = vld [vmem:[%s15614_s14 + $0x6f0] ss:$80 sps:$4 sm:$0xff]   ;;  %v13708_v41 = vld [vmem:[%s15614_s14 + $0x6f8] ss:$80 sps:$4 sm:$0xff]  }
 0x356   : > { %12958 = vmatprep.subr.msk.bf16.mxu0 %vm8379_vm2, %v12939_v42  ;;  %12960 = vmatprep.subr.msk.bf16.mxu1 %vm8379_vm2, %v12941_v43  ;;  %v13713_v42 = vld [vmem:[%s15614_s14 + $0x794] ss:$80 sps:$4 sm:$0xff]   ;;  %v13716_v43 = vld [vmem:[%s15614_s14 + $0x79c] ss:$80 sps:$4 sm:$0xff]  }
 0x359   : > { %8592 = vmatpush1.bf16.msra.mxu0 %v8381_v36  ;;  %8756 = vmatpush1.bf16.msra.mxu1 %v8387_v50  ;;  %v13722_v36 = vld [vmem:[%s15614_s14 + $0x83c] ss:$80 sps:$4 sm:$0xff]   ;;  %v13717_v50 = vld [vmem:[%s15614_s14 + $0x830] ss:$80 sps:$4 sm:$0xff]  }
 0x35a   : > { %8768 = vmatprep.subr.bf16.mxu0 %v13641_v48  ;;  %8932 = vmatprep.subr.bf16.mxu1 %v13644_v51  ;;  %v13719_v48 = vld [vmem:[%s15614_s14 + $0x834] ss:$80 sps:$4 sm:$0xff]   ;;  %v13720_v51 = vld [vmem:[%s15614_s14 + $0x838] ss:$80 sps:$4 sm:$0xff]  }
 0x35c   : > { %8596 = vmatmul.mubr.bf16.vlgmr.msra.gmra.mrb[0].mxu0 %v15982_v52  ;;  %8760 = vmatmul.mubr.bf16.vlgmr.msra.gmra.mrb[0].mxu1 %v15982_v52 }
 0x35d   : > { %8769 = vmatpush1.bf16.msra.mxu0 %v13639_v53  ;;  %8933 = vmatpush1.bf16.msra.mxu1 %v13642_v54  ;;  %v13725_v53 = vld [vmem:[%s15614_s14 + $0x8d4] ss:$80 sps:$4 sm:$0xff]   ;;  %v13728_v54 = vld [vmem:[%s15614_s14 + $0x8dc] ss:$80 sps:$4 sm:$0xff]  }
 0x35e   : > { %8770 = vmatprep.subr.bf16.mxu0 %v13647_v55  ;;  %8934 = vmatprep.subr.bf16.mxu1 %v13650_v56  ;;  %v13723_v55 = vld [vmem:[%s15614_s14 + $0x8d0] ss:$80 sps:$4 sm:$0xff]   ;;  %v13726_v56 = vld [vmem:[%s15614_s14 + $0x8d8] ss:$80 sps:$4 sm:$0xff]  }
 0x35f   : > { %8800 = vmatprep.mubr.bf16.mxu0 %v15735_v1  ;;  %8964 = vmatprep.mubr.bf16.mxu1 %v15735_v1 }
 0x361   : > { %8771 = vmatpush1.bf16.msra.mxu0 %v13645_v57  ;;  %8935 = vmatpush1.bf16.msra.mxu1 %v13648_v58  ;;  %v13731_v57 = vld [vmem:[%s15614_s14 + $0x974] ss:$80 sps:$4 sm:$0xff]   ;;  %v13734_v58 = vld [vmem:[%s15614_s14 + $0x97c] ss:$80 sps:$4 sm:$0xff]  }
 0x362   : > { %8772 = vmatprep.subr.bf16.mxu0 %v13653_v59  ;;  %8936 = vmatprep.subr.bf16.mxu1 %v13656_v60  ;;  %v13729_v59 = vld [vmem:[%s15614_s14 + $0x970] ss:$80 sps:$4 sm:$0xff]   ;;  %v13732_v60 = vld [vmem:[%s15614_s14 + $0x978] ss:$80 sps:$4 sm:$0xff]  }
 0x365   : > { %8773 = vmatpush1.bf16.msra.mxu0 %v13651_v61  ;;  %8937 = vmatpush1.bf16.msra.mxu1 %v13654_v62  ;;  %v13737_v61 = vld [vmem:[%s15614_s14 + $0xa14] ss:$80 sps:$4 sm:$0xff]   ;;  %v13740_v62 = vld [vmem:[%s15614_s14 + $0xa1c] ss:$80 sps:$4 sm:$0xff]  }
 0x366   : > { %8774 = vmatprep.subr.bf16.mxu0 %v13659_v63  ;;  %8938 = vmatprep.subr.bf16.mxu1 %v13662_v0  ;;  %v13735_v63 = vld [vmem:[%s15614_s14 + $0xa10] ss:$80 sps:$4 sm:$0xff]   ;;  %v13738_v0 = vld [vmem:[%s15614_s14 + $0xa18] ss:$80 sps:$4 sm:$0xff]  }
 0x369   : > { %8775 = vmatpush1.bf16.msra.mxu0 %v13657_v2  ;;  %8939 = vmatpush1.bf16.msra.mxu1 %v13660_v3  ;;  %v13743_v2 = vld [vmem:[%s15614_s14 + $0xab4] ss:$80 sps:$4 sm:$0xff]   ;;  %v13746_v3 = vld [vmem:[%s15614_s14 + $0xabc] ss:$80 sps:$4 sm:$0xff]  }
 0x36a   : > { %8776 = vmatprep.subr.bf16.mxu0 %v13665_v4  ;;  %8940 = vmatprep.subr.bf16.mxu1 %v13668_v5  ;;  %v13741_v4 = vld [vmem:[%s15614_s14 + $0xab0] ss:$80 sps:$4 sm:$0xff]   ;;  %v13744_v5 = vld [vmem:[%s15614_s14 + $0xab8] ss:$80 sps:$4 sm:$0xff]  }
 0x36d   : > { %8777 = vmatpush1.bf16.msra.mxu0 %v13663_v6  ;;  %8941 = vmatpush1.bf16.msra.mxu1 %v13666_v7  ;;  %v13749_v6 = vld [vmem:[%s15614_s14 + $0xb54] ss:$80 sps:$4 sm:$0xff]   ;;  %v13752_v7 = vld [vmem:[%s15614_s14 + $0xb5c] ss:$80 sps:$4 sm:$0xff]  }
 0x36e   : > { %8778 = vmatprep.subr.bf16.mxu0 %v13671_v8  ;;  %8942 = vmatprep.subr.bf16.mxu1 %v13674_v9  ;;  %v13747_v8 = vld [vmem:[%s15614_s14 + $0xb50] ss:$80 sps:$4 sm:$0xff]   ;;  %v13750_v9 = vld [vmem:[%s15614_s14 + $0xb58] ss:$80 sps:$4 sm:$0xff]  }
 0x371   : > { %8779 = vmatpush1.bf16.msra.mxu0 %v13669_v10  ;;  %8943 = vmatpush1.bf16.msra.mxu1 %v13672_v11  ;;  %v13755_v10 = vld [vmem:[%s15614_s14 + $0xbf4] ss:$80 sps:$4 sm:$0xff]   ;;  %v13758_v11 = vld [vmem:[%s15614_s14 + $0xbfc] ss:$80 sps:$4 sm:$0xff]  }
 0x372   : > { %8780 = vmatprep.subr.bf16.mxu0 %v13677_v12  ;;  %8944 = vmatprep.subr.bf16.mxu1 %v13680_v13  ;;  %v13753_v12 = vld [vmem:[%s15614_s14 + $0xbf0] ss:$80 sps:$4 sm:$0xff]   ;;  %v13756_v13 = vld [vmem:[%s15614_s14 + $0xbf8] ss:$80 sps:$4 sm:$0xff]  }
 0x375   : > { %8781 = vmatpush1.bf16.msra.mxu0 %v13675_v14  ;;  %8945 = vmatpush1.bf16.msra.mxu1 %v13678_v15  ;;  %v13761_v14 = vld [vmem:[%s15614_s14 + $0xc94] ss:$80 sps:$4 sm:$0xff]   ;;  %v13764_v15 = vld [vmem:[%s15614_s14 + $0xc9c] ss:$80 sps:$4 sm:$0xff]  }
 0x376   : > { %8782 = vmatprep.subr.bf16.mxu0 %v13683_v16  ;;  %8946 = vmatprep.subr.bf16.mxu1 %v13686_v17  ;;  %v13759_v16 = vld [vmem:[%s15614_s14 + $0xc90] ss:$80 sps:$4 sm:$0xff]   ;;  %v13762_v17 = vld [vmem:[%s15614_s14 + $0xc98] ss:$80 sps:$4 sm:$0xff]  }
 0x379   : > { %8783 = vmatpush1.bf16.msra.mxu0 %v13681_v18  ;;  %8947 = vmatpush1.bf16.msra.mxu1 %v13684_v19  ;;  %v13767_v18 = vld [vmem:[%s15614_s14 + $0xd34] ss:$80 sps:$4 sm:$0xff]   ;;  %v13770_v19 = vld [vmem:[%s15614_s14 + $0xd3c] ss:$80 sps:$4 sm:$0xff]  }
 0x37a   : > { %8784 = vmatprep.subr.bf16.mxu0 %v13689_v21  ;;  %8948 = vmatprep.subr.bf16.mxu1 %v13692_v22  ;;  %v13765_v21 = vld [vmem:[%s15614_s14 + $0xd30] ss:$80 sps:$4 sm:$0xff]   ;;  %v13768_v22 = vld [vmem:[%s15614_s14 + $0xd38] ss:$80 sps:$4 sm:$0xff]  }
 0x37d   : > { %8785 = vmatpush1.bf16.msra.mxu0 %v13687_v23  ;;  %8949 = vmatpush1.bf16.msra.mxu1 %v13690_v24  ;;  %v13773_v23 = vld [vmem:[%s15614_s14 + $0xdd4] ss:$80 sps:$4 sm:$0xff]   ;;  %v13776_v24 = vld [vmem:[%s15614_s14 + $0xddc] ss:$80 sps:$4 sm:$0xff]  }
 0x37e   : > { %8786 = vmatprep.subr.bf16.mxu0 %v13695_v28  ;;  %8950 = vmatprep.subr.bf16.mxu1 %v13698_v29  ;;  %v13771_v28 = vld [vmem:[%s15614_s14 + $0xdd0] ss:$80 sps:$4 sm:$0xff]   ;;  %v13774_v29 = vld [vmem:[%s15614_s14 + $0xdd8] ss:$80 sps:$4 sm:$0xff]  }
 0x381   : > { %8787 = vmatpush1.bf16.msra.mxu0 %v13693_v30  ;;  %8951 = vmatpush1.bf16.msra.mxu1 %v13696_v31  ;;  %v13779_v30 = vld [vmem:[%s15614_s14 + $0xe74] ss:$80 sps:$4 sm:$0xff]   ;;  %v13782_v31 = vld [vmem:[%s15614_s14 + $0xe7c] ss:$80 sps:$4 sm:$0xff]  }
 0x382   : > { %8788 = vmatprep.subr.bf16.mxu0 %v13701_v33  ;;  %8952 = vmatprep.subr.bf16.mxu1 %v13704_v34  ;;  %v13777_v33 = vld [vmem:[%s15614_s14 + $0xe70] ss:$80 sps:$4 sm:$0xff]   ;;  %v13780_v34 = vld [vmem:[%s15614_s14 + $0xe78] ss:$80 sps:$4 sm:$0xff]  }
 0x385   : > { %8789 = vmatpush1.bf16.msra.mxu0 %v13699_v35  ;;  %8953 = vmatpush1.bf16.msra.mxu1 %v13702_v37  ;;  %v13785_v35 = vld [vmem:[%s15614_s14 + $0xf14] ss:$80 sps:$4 sm:$0xff]   ;;  %v13788_v37 = vld [vmem:[%s15614_s14 + $0xf1c] ss:$80 sps:$4 sm:$0xff]  }
 0x386   : > { %8790 = vmatprep.subr.bf16.mxu0 %v13707_v38  ;;  %8954 = vmatprep.subr.bf16.mxu1 %v13710_v39  ;;  %v13783_v38 = vld [vmem:[%s15614_s14 + $0xf10] ss:$80 sps:$4 sm:$0xff]   ;;  %v13786_v39 = vld [vmem:[%s15614_s14 + $0xf18] ss:$80 sps:$4 sm:$0xff]  }
 0x389   : > { %8791 = vmatpush1.bf16.msra.mxu0 %v13705_v40  ;;  %8955 = vmatpush1.bf16.msra.mxu1 %v13708_v41  ;;  %v13791_v40 = vld [vmem:[%s15614_s14 + $0xfb4] ss:$80 sps:$4 sm:$0xff]   ;;  %v13794_v41 = vld [vmem:[%s15614_s14 + $0xfbc] ss:$80 sps:$4 sm:$0xff]  }
 0x38a   : > { %8792 = vmatprep.subr.bf16.mxu0 %v13713_v42  ;;  %8956 = vmatprep.subr.bf16.mxu1 %v13716_v43  ;;  %v13789_v42 = vld [vmem:[%s15614_s14 + $0xfb0] ss:$80 sps:$4 sm:$0xff]   ;;  %v13792_v43 = vld [vmem:[%s15614_s14 + $0xfb8] ss:$80 sps:$4 sm:$0xff]  }
 0x38d   : > { %8793 = vmatpush1.bf16.msra.mxu0 %v13711_v45  ;;  %8957 = vmatpush1.bf16.msra.mxu1 %v13714_v47  ;;  %v13797_v45 = vld [vmem:[%s15614_s14 + $0x1054] ss:$80 sps:$4 sm:$0xff]   ;;  %v13800_v47 = vld [vmem:[%s15614_s14 + $0x105c] ss:$80 sps:$4 sm:$0xff]  }
 0x38e   : > { %8794 = vmatprep.subr.bf16.mxu0 %v13719_v48  ;;  %8958 = vmatprep.subr.bf16.mxu1 %v13722_v36  ;;  %v13795_v48 = vld [vmem:[%s15614_s14 + $0x1050] ss:$80 sps:$4 sm:$0xff]   ;;  %v13798_v36 = vld [vmem:[%s15614_s14 + $0x1058] ss:$80 sps:$4 sm:$0xff]  }
 0x391   : > { %8795 = vmatpush1.bf16.msra.mxu0 %v13717_v50  ;;  %8959 = vmatpush1.bf16.msra.mxu1 %v13720_v51  ;;  %v13803_v50 = vld [vmem:[%s15614_s14 + $0x10f4] ss:$80 sps:$4 sm:$0xff]   ;;  %v13806_v51 = vld [vmem:[%s15614_s14 + $0x10fc] ss:$80 sps:$4 sm:$0xff]  }
 0x392   : > { %8796 = vmatprep.subr.bf16.mxu0 %v13725_v53  ;;  %8960 = vmatprep.subr.bf16.mxu1 %v13728_v54  ;;  %v13801_v53 = vld [vmem:[%s15614_s14 + $0x10f0] ss:$80 sps:$4 sm:$0xff]   ;;  %v13804_v54 = vld [vmem:[%s15614_s14 + $0x10f8] ss:$80 sps:$4 sm:$0xff]  }
 0x395   : > { %8797 = vmatpush1.bf16.msra.mxu0 %v13723_v55  ;;  %8961 = vmatpush1.bf16.msra.mxu1 %v13726_v56  ;;  %v13809_v55 = vld [vmem:[%s15614_s14 + $0x1194] ss:$80 sps:$4 sm:$0xff]   ;;  %v13812_v56 = vld [vmem:[%s15614_s14 + $0x119c] ss:$80 sps:$4 sm:$0xff]  }
 0x396   : > { %8798 = vmatprep.subr.bf16.mxu0 %v13731_v57  ;;  %8962 = vmatprep.subr.bf16.mxu1 %v13734_v58  ;;  %v13807_v57 = vld [vmem:[%s15614_s14 + $0x1190] ss:$80 sps:$4 sm:$0xff]   ;;  %v13810_v58 = vld [vmem:[%s15614_s14 + $0x1198] ss:$80 sps:$4 sm:$0xff]  }
 0x399   : > { %8799 = vmatpush1.bf16.msra.mxu0 %v13729_v59  ;;  %8963 = vmatpush1.bf16.msra.mxu1 %v13732_v60  ;;  %v13815_v59 = vld [vmem:[%s15614_s14 + $0x1234] ss:$80 sps:$4 sm:$0xff]   ;;  %v13818_v60 = vld [vmem:[%s15614_s14 + $0x123c] ss:$80 sps:$4 sm:$0xff]  }
 0x39a   : > { %8809 = vmatprep.subr.bf16.mxu0 %v13737_v61  ;;  %8973 = vmatprep.subr.bf16.mxu1 %v13740_v62  ;;  %v13813_v61 = vld [vmem:[%s15614_s14 + $0x1230] ss:$80 sps:$4 sm:$0xff]   ;;  %v13816_v62 = vld [vmem:[%s15614_s14 + $0x1238] ss:$80 sps:$4 sm:$0xff]  }
 0x39c   : > { %8801 = vmatmul.mubr.bf16.vlgmr.msra.gmra.mrb[4].mxu0 %v15757_v20  ;;  %8965 = vmatmul.mubr.bf16.vlgmr.msra.gmra.mrb[4].mxu1 %v15757_v20 }
 0x39d   : > { %8810 = vmatpush1.bf16.msra.mxu0 %v13735_v63  ;;  %8974 = vmatpush1.bf16.msra.mxu1 %v13738_v0  ;;  %v13821_v63 = vld [vmem:[%s15614_s14 + $0x12d4] ss:$80 sps:$4 sm:$0xff]   ;;  %v13824_v0 = vld [vmem:[%s15614_s14 + $0x12dc] ss:$80 sps:$4 sm:$0xff]  }
 0x39e   : > { %8811 = vmatprep.subr.bf16.mxu0 %v13743_v2  ;;  %8975 = vmatprep.subr.bf16.mxu1 %v13746_v3  ;;  %v13819_v2 = vld [vmem:[%s15614_s14 + $0x12d0] ss:$80 sps:$4 sm:$0xff]   ;;  %v13822_v3 = vld [vmem:[%s15614_s14 + $0x12d8] ss:$80 sps:$4 sm:$0xff]  }
 0x39f   : > { %8841 = vmatprep.mubr.bf16.mxu0 %v15770_v27  ;;  %9005 = vmatprep.mubr.bf16.mxu1 %v15770_v27 }
 0x3a1   : > { %8812 = vmatpush1.bf16.msra.mxu0 %v13741_v4  ;;  %8976 = vmatpush1.bf16.msra.mxu1 %v13744_v5  ;;  %v13827_v4 = vld [vmem:[%s15614_s14 + $0x1374] ss:$80 sps:$4 sm:$0xff]   ;;  %v13830_v5 = vld [vmem:[%s15614_s14 + $0x137c] ss:$80 sps:$4 sm:$0xff]  }
 0x3a2   : > { %8813 = vmatprep.subr.bf16.mxu0 %v13749_v6  ;;  %8977 = vmatprep.subr.bf16.mxu1 %v13752_v7  ;;  %v13825_v6 = vld [vmem:[%s15614_s14 + $0x1370] ss:$80 sps:$4 sm:$0xff]   ;;  %v13828_v7 = vld [vmem:[%s15614_s14 + $0x1378] ss:$80 sps:$4 sm:$0xff]  }
 0x3a5   : > { %8814 = vmatpush1.bf16.msra.mxu0 %v13747_v8  ;;  %8978 = vmatpush1.bf16.msra.mxu1 %v13750_v9  ;;  %v13833_v8 = vld [vmem:[%s15614_s14 + $0x1414] ss:$80 sps:$4 sm:$0xff]   ;;  %v13836_v9 = vld [vmem:[%s15614_s14 + $0x141c] ss:$80 sps:$4 sm:$0xff]  }
 0x3a6   : > { %8815 = vmatprep.subr.bf16.mxu0 %v13755_v10  ;;  %8979 = vmatprep.subr.bf16.mxu1 %v13758_v11  ;;  %v13831_v10 = vld [vmem:[%s15614_s14 + $0x1410] ss:$80 sps:$4 sm:$0xff]   ;;  %v13834_v11 = vld [vmem:[%s15614_s14 + $0x1418] ss:$80 sps:$4 sm:$0xff]  }
 0x3a9   : > { %8816 = vmatpush1.bf16.msra.mxu0 %v13753_v12  ;;  %8980 = vmatpush1.bf16.msra.mxu1 %v13756_v13  ;;  %v13839_v12 = vld [vmem:[%s15614_s14 + $0x14b4] ss:$80 sps:$4 sm:$0xff]   ;;  %v13842_v13 = vld [vmem:[%s15614_s14 + $0x14bc] ss:$80 sps:$4 sm:$0xff]  }
 0x3aa   : > { %8817 = vmatprep.subr.bf16.mxu0 %v13761_v14  ;;  %8981 = vmatprep.subr.bf16.mxu1 %v13764_v15  ;;  %v13837_v14 = vld [vmem:[%s15614_s14 + $0x14b0] ss:$80 sps:$4 sm:$0xff]   ;;  %v13840_v15 = vld [vmem:[%s15614_s14 + $0x14b8] ss:$80 sps:$4 sm:$0xff]  }
 0x3ad   : > { %8818 = vmatpush1.bf16.msra.mxu0 %v13759_v16  ;;  %8982 = vmatpush1.bf16.msra.mxu1 %v13762_v17  ;;  %v13845_v16 = vld [vmem:[%s15614_s14 + $0x1554] ss:$80 sps:$4 sm:$0xff]   ;;  %v13848_v17 = vld [vmem:[%s15614_s14 + $0x155c] ss:$80 sps:$4 sm:$0xff]  }
 0x3ae   : > { %8819 = vmatprep.subr.bf16.mxu0 %v13767_v18  ;;  %8983 = vmatprep.subr.bf16.mxu1 %v13770_v19  ;;  %v13843_v18 = vld [vmem:[%s15614_s14 + $0x1550] ss:$80 sps:$4 sm:$0xff]   ;;  %v13846_v19 = vld [vmem:[%s15614_s14 + $0x1558] ss:$80 sps:$4 sm:$0xff]  }
 0x3b1   : > { %8820 = vmatpush1.bf16.msra.mxu0 %v13765_v21  ;;  %8984 = vmatpush1.bf16.msra.mxu1 %v13768_v22  ;;  %v13851_v21 = vld [vmem:[%s15614_s14 + $0x15f4] ss:$80 sps:$4 sm:$0xff]   ;;  %v13854_v22 = vld [vmem:[%s15614_s14 + $0x15fc] ss:$80 sps:$4 sm:$0xff]  }
 0x3b2   : > { %8821 = vmatprep.subr.bf16.mxu0 %v13773_v23  ;;  %8985 = vmatprep.subr.bf16.mxu1 %v13776_v24  ;;  %v13849_v23 = vld [vmem:[%s15614_s14 + $0x15f0] ss:$80 sps:$4 sm:$0xff]   ;;  %v13852_v24 = vld [vmem:[%s15614_s14 + $0x15f8] ss:$80 sps:$4 sm:$0xff]  }
 0x3b5   : > { %8822 = vmatpush1.bf16.msra.mxu0 %v13771_v28  ;;  %8986 = vmatpush1.bf16.msra.mxu1 %v13774_v29  ;;  %v13857_v28 = vld [vmem:[%s15614_s14 + $0x1694] ss:$80 sps:$4 sm:$0xff]   ;;  %v13860_v29 = vld [vmem:[%s15614_s14 + $0x169c] ss:$80 sps:$4 sm:$0xff]  }
 0x3b6   : > { %8823 = vmatprep.subr.bf16.mxu0 %v13779_v30  ;;  %8987 = vmatprep.subr.bf16.mxu1 %v13782_v31  ;;  %v13855_v30 = vld [vmem:[%s15614_s14 + $0x1690] ss:$80 sps:$4 sm:$0xff]   ;;  %v13858_v31 = vld [vmem:[%s15614_s14 + $0x1698] ss:$80 sps:$4 sm:$0xff]  }
 0x3b9   : > { %8824 = vmatpush1.bf16.msra.mxu0 %v13777_v33  ;;  %8988 = vmatpush1.bf16.msra.mxu1 %v13780_v34  ;;  %v13863_v33 = vld [vmem:[%s15614_s14 + $0x1734] ss:$80 sps:$4 sm:$0xff]   ;;  %v13866_v34 = vld [vmem:[%s15614_s14 + $0x173c] ss:$80 sps:$4 sm:$0xff]  }
 0x3ba   : > { %8825 = vmatprep.subr.bf16.mxu0 %v13785_v35  ;;  %8989 = vmatprep.subr.bf16.mxu1 %v13788_v37  ;;  %v13861_v35 = vld [vmem:[%s15614_s14 + $0x1730] ss:$80 sps:$4 sm:$0xff]   ;;  %v13864_v37 = vld [vmem:[%s15614_s14 + $0x1738] ss:$80 sps:$4 sm:$0xff]  }
 0x3bd   : > { %8826 = vmatpush1.bf16.msra.mxu0 %v13783_v38  ;;  %8990 = vmatpush1.bf16.msra.mxu1 %v13786_v39  ;;  %v13869_v38 = vld [vmem:[%s15614_s14 + $0x17d4] ss:$80 sps:$4 sm:$0xff]   ;;  %v13872_v39 = vld [vmem:[%s15614_s14 + $0x17dc] ss:$80 sps:$4 sm:$0xff]  }
 0x3be   : > { %8827 = vmatprep.subr.bf16.mxu0 %v13791_v40  ;;  %8991 = vmatprep.subr.bf16.mxu1 %v13794_v41  ;;  %v13867_v40 = vld [vmem:[%s15614_s14 + $0x17d0] ss:$80 sps:$4 sm:$0xff]   ;;  %v13870_v41 = vld [vmem:[%s15614_s14 + $0x17d8] ss:$80 sps:$4 sm:$0xff]  }
 0x3c1   : > { %8828 = vmatpush1.bf16.msra.mxu0 %v13789_v42  ;;  %8992 = vmatpush1.bf16.msra.mxu1 %v13792_v43  ;;  %v13875_v42 = vld [vmem:[%s15614_s14 + $0x1874] ss:$80 sps:$4 sm:$0xff]   ;;  %v13878_v43 = vld [vmem:[%s15614_s14 + $0x187c] ss:$80 sps:$4 sm:$0xff]  }
 0x3c2   : > { %8829 = vmatprep.subr.bf16.mxu0 %v13797_v45  ;;  %8993 = vmatprep.subr.bf16.mxu1 %v13800_v47  ;;  %v13873_v45 = vld [vmem:[%s15614_s14 + $0x1870] ss:$80 sps:$4 sm:$0xff]   ;;  %v13876_v47 = vld [vmem:[%s15614_s14 + $0x1878] ss:$80 sps:$4 sm:$0xff]  }
 0x3c5   : > { %8830 = vmatpush1.bf16.msra.mxu0 %v13795_v48  ;;  %8994 = vmatpush1.bf16.msra.mxu1 %v13798_v36  ;;  %v13881_v48 = vld [vmem:[%s15614_s14 + $0x1914] ss:$80 sps:$4 sm:$0xff]   ;;  %v13884_v36 = vld [vmem:[%s15614_s14 + $0x191c] ss:$80 sps:$4 sm:$0xff]  }
 0x3c6   : > { %8831 = vmatprep.subr.bf16.mxu0 %v13803_v50  ;;  %8995 = vmatprep.subr.bf16.mxu1 %v13806_v51  ;;  %v13879_v50 = vld [vmem:[%s15614_s14 + $0x1910] ss:$80 sps:$4 sm:$0xff]   ;;  %v13882_v51 = vld [vmem:[%s15614_s14 + $0x1918] ss:$80 sps:$4 sm:$0xff]  }
 0x3c9   : > { %8832 = vmatpush1.bf16.msra.mxu0 %v13801_v53  ;;  %8996 = vmatpush1.bf16.msra.mxu1 %v13804_v54  ;;  %v13887_v53 = vld [vmem:[%s15614_s14 + $0x19b4] ss:$80 sps:$4 sm:$0xff]   ;;  %v13890_v54 = vld [vmem:[%s15614_s14 + $0x19bc] ss:$80 sps:$4 sm:$0xff]  }
 0x3ca   : > { %8833 = vmatprep.subr.bf16.mxu0 %v13809_v55  ;;  %8997 = vmatprep.subr.bf16.mxu1 %v13812_v56  ;;  %v13885_v55 = vld [vmem:[%s15614_s14 + $0x19b0] ss:$80 sps:$4 sm:$0xff]   ;;  %v13888_v56 = vld [vmem:[%s15614_s14 + $0x19b8] ss:$80 sps:$4 sm:$0xff]  }
 0x3cd   : > { %8834 = vmatpush1.bf16.msra.mxu0 %v13807_v57  ;;  %8998 = vmatpush1.bf16.msra.mxu1 %v13810_v58  ;;  %v13893_v57 = vld [vmem:[%s15614_s14 + $0x1a54] ss:$80 sps:$4 sm:$0xff]   ;;  %v13896_v58 = vld [vmem:[%s15614_s14 + $0x1a5c] ss:$80 sps:$4 sm:$0xff]  }
 0x3ce   : > { %8835 = vmatprep.subr.bf16.mxu0 %v13815_v59  ;;  %8999 = vmatprep.subr.bf16.mxu1 %v13818_v60  ;;  %v13891_v59 = vld [vmem:[%s15614_s14 + $0x1a50] ss:$80 sps:$4 sm:$0xff]   ;;  %v13894_v60 = vld [vmem:[%s15614_s14 + $0x1a58] ss:$80 sps:$4 sm:$0xff]  }
 0x3d1   : > { %8836 = vmatpush1.bf16.msra.mxu0 %v13813_v61  ;;  %9000 = vmatpush1.bf16.msra.mxu1 %v13816_v62  ;;  %v13899_v61 = vld [vmem:[%s15614_s14 + $0x1af4] ss:$80 sps:$4 sm:$0xff]   ;;  %v13902_v62 = vld [vmem:[%s15614_s14 + $0x1afc] ss:$80 sps:$4 sm:$0xff]  }
 0x3d2   : > { %8837 = vmatprep.subr.bf16.mxu0 %v13821_v63  ;;  %9001 = vmatprep.subr.bf16.mxu1 %v13824_v0  ;;  %v13897_v63 = vld [vmem:[%s15614_s14 + $0x1af0] ss:$80 sps:$4 sm:$0xff]   ;;  %v13900_v0 = vld [vmem:[%s15614_s14 + $0x1af8] ss:$80 sps:$4 sm:$0xff]  }
 0x3d5   : > { %8838 = vmatpush1.bf16.msra.mxu0 %v13819_v2  ;;  %9002 = vmatpush1.bf16.msra.mxu1 %v13822_v3  ;;  %v13905_v2 = vld [vmem:[%s15614_s14 + $0x1b94] ss:$80 sps:$4 sm:$0xff]   ;;  %v13908_v3 = vld [vmem:[%s15614_s14 + $0x1b9c] ss:$80 sps:$4 sm:$0xff]  }
 0x3d6   : > { %8839 = vmatprep.subr.bf16.mxu0 %v13827_v4  ;;  %9003 = vmatprep.subr.bf16.mxu1 %v13830_v5  ;;  %v13903_v4 = vld [vmem:[%s15614_s14 + $0x1b90] ss:$80 sps:$4 sm:$0xff]   ;;  %v13906_v5 = vld [vmem:[%s15614_s14 + $0x1b98] ss:$80 sps:$4 sm:$0xff]  }
 0x3d9   : > { %8840 = vmatpush1.bf16.msra.mxu0 %v13825_v6  ;;  %9004 = vmatpush1.bf16.msra.mxu1 %v13828_v7  ;;  %v13911_v6 = vld [vmem:[%s15614_s14 + $0x1c34] ss:$80 sps:$4 sm:$0xff]   ;;  %v13914_v7 = vld [vmem:[%s15614_s14 + $0x1c3c] ss:$80 sps:$4 sm:$0xff]  }
 0x3da   : > { %8850 = vmatprep.subr.bf16.mxu0 %v13833_v8  ;;  %9014 = vmatprep.subr.bf16.mxu1 %v13836_v9  ;;  %v13909_v8 = vld [vmem:[%s15614_s14 + $0x1c30] ss:$80 sps:$4 sm:$0xff]   ;;  %v13912_v9 = vld [vmem:[%s15614_s14 + $0x1c38] ss:$80 sps:$4 sm:$0xff]  }
 0x3dc   : > { %8842 = vmatmul.mubr.bf16.vlgmr.msra.gmra.mrb[4].mxu0 %v15839_v32  ;;  %9006 = vmatmul.mubr.bf16.vlgmr.msra.gmra.mrb[4].mxu1 %v15839_v32 }
 0x3dd   : > { %8851 = vmatpush1.bf16.msra.mxu0 %v13831_v10  ;;  %9015 = vmatpush1.bf16.msra.mxu1 %v13834_v11  ;;  %v13917_v10 = vld [vmem:[%s15614_s14 + $0x1cd4] ss:$80 sps:$4 sm:$0xff]   ;;  %v13920_v11 = vld [vmem:[%s15614_s14 + $0x1cdc] ss:$80 sps:$4 sm:$0xff]  }
 0x3de   : > { %8852 = vmatprep.subr.bf16.mxu0 %v13839_v12  ;;  %9016 = vmatprep.subr.bf16.mxu1 %v13842_v13  ;;  %v13915_v12 = vld [vmem:[%s15614_s14 + $0x1cd0] ss:$80 sps:$4 sm:$0xff]   ;;  %v13918_v13 = vld [vmem:[%s15614_s14 + $0x1cd8] ss:$80 sps:$4 sm:$0xff]  }
 0x3df   : > { %8882 = vmatprep.mubr.bf16.mxu0 %v15763_v25  ;;  %9046 = vmatprep.mubr.bf16.mxu1 %v15763_v25 }
 0x3e1   : > { %8853 = vmatpush1.bf16.msra.mxu0 %v13837_v14  ;;  %9017 = vmatpush1.bf16.msra.mxu1 %v13840_v15  ;;  %v13923_v14 = vld [vmem:[%s15614_s14 + $0x1d74] ss:$80 sps:$4 sm:$0xff]   ;;  %v13926_v15 = vld [vmem:[%s15614_s14 + $0x1d7c] ss:$80 sps:$4 sm:$0xff]  }
 0x3e2   : > { %8854 = vmatprep.subr.bf16.mxu0 %v13845_v16  ;;  %9018 = vmatprep.subr.bf16.mxu1 %v13848_v17  ;;  %v13921_v16 = vld [vmem:[%s15614_s14 + $0x1d70] ss:$80 sps:$4 sm:$0xff]   ;;  %v13924_v17 = vld [vmem:[%s15614_s14 + $0x1d78] ss:$80 sps:$4 sm:$0xff]  }
 0x3e5   : > { %8855 = vmatpush1.bf16.msra.mxu0 %v13843_v18  ;;  %9019 = vmatpush1.bf16.msra.mxu1 %v13846_v19  ;;  %v13929_v18 = vld [vmem:[%s15614_s14 + $0x1e14] ss:$80 sps:$4 sm:$0xff]   ;;  %v13932_v19 = vld [vmem:[%s15614_s14 + $0x1e1c] ss:$80 sps:$4 sm:$0xff]  }
 0x3e6   : > { %8856 = vmatprep.subr.bf16.mxu0 %v13851_v21  ;;  %9020 = vmatprep.subr.bf16.mxu1 %v13854_v22  ;;  %v13927_v21 = vld [vmem:[%s15614_s14 + $0x1e10] ss:$80 sps:$4 sm:$0xff]   ;;  %v13930_v22 = vld [vmem:[%s15614_s14 + $0x1e18] ss:$80 sps:$4 sm:$0xff]  }
 0x3e9   : > { %8857 = vmatpush1.bf16.msra.mxu0 %v13849_v23  ;;  %9021 = vmatpush1.bf16.msra.mxu1 %v13852_v24  ;;  %v13935_v23 = vld [vmem:[%s15614_s14 + $0x1eb4] ss:$80 sps:$4 sm:$0xff]   ;;  %v13938_v24 = vld [vmem:[%s15614_s14 + $0x1ebc] ss:$80 sps:$4 sm:$0xff]  }
 0x3ea   : > { %8858 = vmatprep.subr.bf16.mxu0 %v13857_v28  ;;  %9022 = vmatprep.subr.bf16.mxu1 %v13860_v29  ;;  %v13933_v28 = vld [vmem:[%s15614_s14 + $0x1eb0] ss:$80 sps:$4 sm:$0xff]   ;;  %v13936_v29 = vld [vmem:[%s15614_s14 + $0x1eb8] ss:$80 sps:$4 sm:$0xff]  }
 0x3ed   : > { %8859 = vmatpush1.bf16.msra.mxu0 %v13855_v30  ;;  %9023 = vmatpush1.bf16.msra.mxu1 %v13858_v31  ;;  %v13941_v30 = vld [vmem:[%s15614_s14 + $0x1f54] ss:$80 sps:$4 sm:$0xff]   ;;  %v13944_v31 = vld [vmem:[%s15614_s14 + $0x1f5c] ss:$80 sps:$4 sm:$0xff]  }
 0x3ee   : > { %8860 = vmatprep.subr.bf16.mxu0 %v13863_v33  ;;  %9024 = vmatprep.subr.bf16.mxu1 %v13866_v34  ;;  %v13939_v33 = vld [vmem:[%s15614_s14 + $0x1f50] ss:$80 sps:$4 sm:$0xff]   ;;  %v13942_v34 = vld [vmem:[%s15614_s14 + $0x1f58] ss:$80 sps:$4 sm:$0xff]  }
 0x3f1   : > { %8861 = vmatpush1.bf16.msra.mxu0 %v13861_v35  ;;  %9025 = vmatpush1.bf16.msra.mxu1 %v13864_v37  ;;  %v13947_v35 = vld [vmem:[%s15614_s14 + $0x1ff4] ss:$80 sps:$4 sm:$0xff]   ;;  %v13950_v37 = vld [vmem:[%s15614_s14 + $0x1ffc] ss:$80 sps:$4 sm:$0xff]  }
 0x3f2   : > { %8862 = vmatprep.subr.bf16.mxu0 %v13869_v38  ;;  %9026 = vmatprep.subr.bf16.mxu1 %v13872_v39  ;;  %v13945_v38 = vld [vmem:[%s15614_s14 + $0x1ff0] ss:$80 sps:$4 sm:$0xff]   ;;  %v13948_v39 = vld [vmem:[%s15614_s14 + $0x1ff8] ss:$80 sps:$4 sm:$0xff]  }
 0x3f5   : > { %8863 = vmatpush1.bf16.msra.mxu0 %v13867_v40  ;;  %9027 = vmatpush1.bf16.msra.mxu1 %v13870_v41  ;;  %v13953_v40 = vld [vmem:[%s15614_s14 + $0x2094] ss:$80 sps:$4 sm:$0xff]   ;;  %v13956_v41 = vld [vmem:[%s15614_s14 + $0x209c] ss:$80 sps:$4 sm:$0xff]  }
 0x3f6   : > { %8864 = vmatprep.subr.bf16.mxu0 %v13875_v42  ;;  %9028 = vmatprep.subr.bf16.mxu1 %v13878_v43  ;;  %v15421_v42 = vmov 1983009808  }
 0x3f7   : > { %v10103_v43 = vunpack.c.l.s4 %v15421_v42  ;;  %v2061_v42 = vld [vmem:[%s15614_s14 + $0x26d8] sm:$0xff] }
 0x3f9   : > { %8865 = vmatpush1.bf16.msra.mxu0 %v13873_v45  ;;  %9029 = vmatpush1.bf16.msra.mxu1 %v13876_v47  ;;  %v13951_v45 = vld [vmem:[%s15614_s14 + $0x2090] ss:$80 sps:$4 sm:$0xff]   ;;  %v13954_v47 = vld [vmem:[%s15614_s14 + $0x2098] ss:$80 sps:$4 sm:$0xff]  }
 0x3fa   : > { %8866 = vmatprep.subr.bf16.mxu0 %v13881_v48  ;;  %9030 = vmatprep.subr.bf16.mxu1 %v13884_v36  ;;  %v13959_v48 = vld [vmem:[%s15614_s14 + $0x2134] ss:$80 sps:$4 sm:$0xff]   ;;  %v13962_v36 = vld [vmem:[%s15614_s14 + $0x213c] ss:$80 sps:$4 sm:$0xff]  }
 0x3fd   : > { %8867 = vmatpush1.bf16.msra.mxu0 %v13879_v50  ;;  %9031 = vmatpush1.bf16.msra.mxu1 %v13882_v51  ;;  %v10104_v50 = vunpack.c.0.s8 %v10103_v43  ;;  %v13957_v51 = vld [vmem:[%s15614_s14 + $0x2130] ss:$80 sps:$4 sm:$0xff]  }
 0x3fe   : > { %8868 = vmatprep.subr.bf16.mxu0 %v13887_v53  ;;  %9032 = vmatprep.subr.bf16.mxu1 %v13890_v54  ;;  %v13960_v53 = vld [vmem:[%s15614_s14 + $0x2138] ss:$80 sps:$4 sm:$0xff]   ;;  %v13965_v54 = vld [vmem:[%s15614_s14 + $0x21d4] ss:$80 sps:$4 sm:$0xff]   ;;  %v14005_v43 = vld [vmem:[%s15614_s14 + $0x2630] ss:$80 sps:$4 sm:$0xff]  }
 0x401   : > { %8869 = vmatpush1.bf16.msra.mxu0 %v13885_v55  ;;  %9033 = vmatpush1.bf16.msra.mxu1 %v13888_v56  ;;  %v13968_v55 = vld [vmem:[%s15614_s14 + $0x21dc] ss:$80 sps:$4 sm:$0xff]  }
 0x402   : > { %8870 = vmatprep.subr.bf16.mxu0 %v13893_v57  ;;  %9034 = vmatprep.subr.bf16.mxu1 %v13896_v58  ;;  %v16219_v58 = vsub.s32 %v10104_v50, %v15716_v49  ;;  %v12944_v50 = vcombine.low %v2061_v42, %v2061_v42 }
 0x405   : > { %8871 = vmatpush1.bf16.msra.mxu0 %v13891_v59  ;;  %9035 = vmatpush1.bf16.msra.mxu1 %v13894_v60 }
 0x406   : > { %8872 = vmatprep.subr.bf16.mxu0 %v13899_v61  ;;  %9036 = vmatprep.subr.bf16.mxu1 %v13902_v62 }
 0x409   : > { %8873 = vmatpush1.bf16.msra.mxu0 %v13897_v63  ;;  %9037 = vmatpush1.bf16.msra.mxu1 %v13900_v0 }
 0x40a   : > { %8874 = vmatprep.subr.bf16.mxu0 %v13905_v2  ;;  %9038 = vmatprep.subr.bf16.mxu1 %v13908_v3  ;;  %v13963_v2 = vld [vmem:[%s15614_s14 + $0x21d0] ss:$80 sps:$4 sm:$0xff]   ;;  %v13966_v3 = vld [vmem:[%s15614_s14 + $0x21d8] ss:$80 sps:$4 sm:$0xff]  }
 0x40d   : > { %8875 = vmatpush1.bf16.msra.mxu0 %v13903_v4  ;;  %9039 = vmatpush1.bf16.msra.mxu1 %v13906_v5 }
 0x40e   : > { %8876 = vmatprep.subr.bf16.mxu0 %v13911_v6  ;;  %9040 = vmatprep.subr.bf16.mxu1 %v13914_v7  ;;  %v13971_v6 = vld [vmem:[%s15614_s14 + $0x2274] ss:$80 sps:$4 sm:$0xff]   ;;  %v13974_v7 = vld [vmem:[%s15614_s14 + $0x227c] ss:$80 sps:$4 sm:$0xff]  }
 0x411   : > { %8877 = vmatpush1.bf16.msra.mxu0 %v13909_v8  ;;  %9041 = vmatpush1.bf16.msra.mxu1 %v13912_v9 }
 0x412   : > { %8878 = vmatprep.subr.bf16.mxu0 %v13917_v10  ;;  %9042 = vmatprep.subr.bf16.mxu1 %v13920_v11  ;;  %v13969_v11 = vld [vmem:[%s15614_s14 + $0x2270] ss:$80 sps:$4 sm:$0xff]  }
 0x415   : > { %8879 = vmatpush1.bf16.msra.mxu0 %v13915_v12  ;;  %9043 = vmatpush1.bf16.msra.mxu1 %v13918_v13  ;;  %v13972_v12 = vld [vmem:[%s15614_s14 + $0x2278] ss:$80 sps:$4 sm:$0xff]   ;;  %v13977_v13 = vld [vmem:[%s15614_s14 + $0x2314] ss:$80 sps:$4 sm:$0xff]  }
 0x416   : > { %8880 = vmatprep.subr.bf16.mxu0 %v13923_v14  ;;  %9044 = vmatprep.subr.bf16.mxu1 %v13926_v15  ;;  %v13980_v14 = vld [vmem:[%s15614_s14 + $0x231c] ss:$80 sps:$4 sm:$0xff]   ;;  %v13975_v15 = vld [vmem:[%s15614_s14 + $0x2310] ss:$80 sps:$4 sm:$0xff]  }
 0x419   : > { %8881 = vmatpush1.bf16.msra.mxu0 %v13921_v16  ;;  %9045 = vmatpush1.bf16.msra.mxu1 %v13924_v17  ;;  %v13978_v16 = vld [vmem:[%s15614_s14 + $0x2318] ss:$80 sps:$4 sm:$0xff]   ;;  %v13983_v17 = vld [vmem:[%s15614_s14 + $0x23b4] ss:$80 sps:$4 sm:$0xff]  }
 0x41a   : > { %8891 = vmatprep.subr.bf16.mxu0 %v13929_v18  ;;  %9055 = vmatprep.subr.bf16.mxu1 %v13932_v19  ;;  %v13986_v18 = vld [vmem:[%s15614_s14 + $0x23bc] ss:$80 sps:$4 sm:$0xff]   ;;  %v13981_v19 = vld [vmem:[%s15614_s14 + $0x23b0] ss:$80 sps:$4 sm:$0xff]  }
 0x41c   : > { %8883 = vmatmul.mubr.bf16.vlgmr.msra.gmra.mrb[4].mxu0 %v15766_v26  ;;  %9047 = vmatmul.mubr.bf16.vlgmr.msra.gmra.mrb[4].mxu1 %v15766_v26 }
 0x41d   : > { %8892 = vmatpush1.bf16.msra.mxu0 %v13927_v21  ;;  %9056 = vmatpush1.bf16.msra.mxu1 %v13930_v22  ;;  %v13984_v21 = vld [vmem:[%s15614_s14 + $0x23b8] ss:$80 sps:$4 sm:$0xff]   ;;  %v13989_v22 = vld [vmem:[%s15614_s14 + $0x2454] ss:$80 sps:$4 sm:$0xff]  }
 0x41e   : > { %8893 = vmatprep.subr.bf16.mxu0 %v13935_v23  ;;  %9057 = vmatprep.subr.bf16.mxu1 %v13938_v24  ;;  %v13992_v23 = vld [vmem:[%s15614_s14 + $0x245c] ss:$80 sps:$4 sm:$0xff]   ;;  %v13987_v24 = vld [vmem:[%s15614_s14 + $0x2450] ss:$80 sps:$4 sm:$0xff]  }
 0x41f   : > { %12963 = vmatprep.mubr.msk.bf16.mxu0 %vm8375_vm1, %v15914_v46  ;;  %12965 = vmatprep.mubr.msk.bf16.mxu1 %vm8375_vm1, %v15914_v46 }
 0x421   : > { %8894 = vmatpush1.bf16.msra.mxu0 %v13933_v28  ;;  %9058 = vmatpush1.bf16.msra.mxu1 %v13936_v29  ;;  %v13990_v28 = vld [vmem:[%s15614_s14 + $0x2458] ss:$80 sps:$4 sm:$0xff]   ;;  %v13995_v29 = vld [vmem:[%s15614_s14 + $0x24f4] ss:$80 sps:$4 sm:$0xff]  }
 0x422   : > { %8895 = vmatprep.subr.bf16.mxu0 %v13941_v30  ;;  %9059 = vmatprep.subr.bf16.mxu1 %v13944_v31  ;;  %v13998_v30 = vld [vmem:[%s15614_s14 + $0x24fc] ss:$80 sps:$4 sm:$0xff]   ;;  %v13993_v31 = vld [vmem:[%s15614_s14 + $0x24f0] ss:$80 sps:$4 sm:$0xff]  }
 0x425   : > { %8896 = vmatpush1.bf16.msra.mxu0 %v13939_v33  ;;  %9060 = vmatpush1.bf16.msra.mxu1 %v13942_v34  ;;  %v13996_v33 = vld [vmem:[%s15614_s14 + $0x24f8] ss:$80 sps:$4 sm:$0xff]   ;;  %v14001_v34 = vld [vmem:[%s15614_s14 + $0x2594] ss:$80 sps:$4 sm:$0xff]  }
 0x426   : > { %8897 = vmatprep.subr.bf16.mxu0 %v13947_v35  ;;  %9061 = vmatprep.subr.bf16.mxu1 %v13950_v37  ;;  %v14004_v35 = vld [vmem:[%s15614_s14 + $0x259c] ss:$80 sps:$4 sm:$0xff]   ;;  %v13999_v37 = vld [vmem:[%s15614_s14 + $0x2590] ss:$80 sps:$4 sm:$0xff]  }
 0x429   : > { %8898 = vmatpush1.bf16.msra.mxu0 %v13945_v38  ;;  %9062 = vmatpush1.bf16.msra.mxu1 %v13948_v39  ;;  %v14002_v38 = vld [vmem:[%s15614_s14 + $0x2598] ss:$80 sps:$4 sm:$0xff]   ;;  %v14007_v39 = vld [vmem:[%s15614_s14 + $0x2634] ss:$80 sps:$4 sm:$0xff]  }
 0x42a   : > { %8899 = vmatprep.subr.bf16.mxu0 %v13953_v40  ;;  %9063 = vmatprep.subr.bf16.mxu1 %v13956_v41  ;;  %v14010_v40 = vld [vmem:[%s15614_s14 + $0x263c] ss:$80 sps:$4 sm:$0xff]   ;;  %v2060_v41 = vld [vmem:[%s15614_s14 + $0x26d0] sm:$0xff] }
 0x42d   : > { %8900 = vmatpush1.bf16.msra.mxu0 %v13951_v45  ;;  %9064 = vmatpush1.bf16.msra.mxu1 %v13954_v47  ;;  %v14008_v45 = vld [vmem:[%s15614_s14 + $0x2638] ss:$80 sps:$4 sm:$0xff]   ;;  %v12942_v47 = vcombine.low %v2060_v41, %v2060_v41 }
 0x42e   : > { %8901 = vmatprep.subr.bf16.mxu0 %v13959_v48  ;;  %9065 = vmatprep.subr.bf16.mxu1 %v13962_v36  ;;  %v12943_v48 = vcombine.high %v2060_v41, %v2060_v41  ;;  %v12945_v36 = vcombine.high %v2061_v42, %v2061_v42  ;;  %v14078_v41 = vld [vmem:[%s15614_s14 + $0x668] ss:$80 sps:$4 sm:$0xff]   ;;  %v14083_v42 = vld [vmem:[%s15614_s14 + $0x704] ss:$80 sps:$4 sm:$0xff]  }
 0x42f   : > { %v8597_v56 = vpop.f32.mrb[0].mxu0  ;;  %v8761_v57 = vpop.f32.mrb[0].mxu1 }
 0x430   : > { %v8599_v59 = vpop.f32.mrb[1].mxu0  ;;  %v8763_v60 = vpop.f32.mrb[1].mxu1 }
 0x431   : > { %v10100_v61 = vcombine.low %v8597_v56, %v8599_v59  ;;  %v10101_v62 = vcombine.low %v8761_v57, %v8763_v60  ;;  %v8601_v63 = vpop.f32.mrb[2].mxu0  ;;  %v8765_v0 = vpop.f32.mrb[2].mxu1  ;;  %8902 = vmatpush1.bf16.msra.mxu0 %v13957_v51  ;;  %9066 = vmatpush1.bf16.msra.mxu1 %v13960_v53  ;;  %v8393_v51 = vsel %vm8379_vm2, %v12942_v47, 0  ;;  %v8399_v53 = vsel %vm8379_vm2, %v12944_v50, 0  ;;  %v14015_v56 = vld [vmem:[%s15614_s14 + $0x20] ss:$80 sps:$4 sm:$0xff]  }
 0x432   : > { %v8602_v4 = vpop.f32.mrb[3].mxu0  ;;  %v8766_v5 = vpop.f32.mrb[3].mxu1  ;;  %8903 = vmatprep.subr.bf16.mxu0 %v13965_v54  ;;  %9067 = vmatprep.subr.bf16.mxu1 %v13968_v55  ;;  %v14017_v54 = vld [vmem:[%s15614_s14 + $0x24] ss:$80 sps:$4 sm:$0xff]   ;;  %v14020_v55 = vld [vmem:[%s15614_s14 + $0x2c] ss:$80 sps:$4 sm:$0xff]  }
 0x433   : > { %v10108_v8 = vrot.slane %v10100_v61, %v16219_v58  ;;  %v10115_v9 = vrot.slane %v10101_v62, %v16219_v58  ;;  %v14018_v57 = vld [vmem:[%s15614_s14 + $0x28] ss:$80 sps:$4 sm:$0xff]   ;;  %v14023_v59 = vld [vmem:[%s15614_s14 + $0xc4] ss:$80 sps:$4 sm:$0xff]   ;;  %v14026_v60 = vld [vmem:[%s15614_s14 + $0xcc] ss:$80 sps:$4 sm:$0xff]  }
 0x434   : > { %v14021_v61 = vld [vmem:[%s15614_s14 + $0xc0] ss:$80 sps:$4 sm:$0xff]   ;;  %v14024_v62 = vld [vmem:[%s15614_s14 + $0xc8] ss:$80 sps:$4 sm:$0xff]   ;;  %v14029_v63 = vld [vmem:[%s15614_s14 + $0x164] ss:$80 sps:$4 sm:$0xff]  }
 0x435   : > { %v10116_v10 = vcombine.low %v10108_v8, %v10115_v9  ;;  %8904 = vmatpush1.bf16.msra.mxu0 %v13963_v2  ;;  %9068 = vmatpush1.bf16.msra.mxu1 %v13966_v3  ;;  %v14032_v0 = vld [vmem:[%s15614_s14 + $0x16c] ss:$80 sps:$4 sm:$0xff]   ;;  %v14027_v2 = vld [vmem:[%s15614_s14 + $0x160] ss:$80 sps:$4 sm:$0xff]   ;;  %v14030_v3 = vld [vmem:[%s15614_s14 + $0x168] ss:$80 sps:$4 sm:$0xff]  }
 0x436   : > { %8905 = vmatprep.subr.bf16.mxu0 %v13971_v6  ;;  %9069 = vmatprep.subr.bf16.mxu1 %v13974_v7  ;;  %v14035_v4 = vld [vmem:[%s15614_s14 + $0x204] ss:$80 sps:$4 sm:$0xff]   ;;  %v14038_v5 = vld [vmem:[%s15614_s14 + $0x20c] ss:$80 sps:$4 sm:$0xff]   ;;  %v14033_v6 = vld [vmem:[%s15614_s14 + $0x200] ss:$80 sps:$4 sm:$0xff]  }
 0x437   : > { %10193 = vst [vmem:[%s16232_s6] sm:$0xff] %v10116_v10  ;;  %v14036_v7 = vld [vmem:[%s15614_s14 + $0x208] ss:$80 sps:$4 sm:$0xff]   ;;  %v14041_v8 = vld [vmem:[%s15614_s14 + $0x2a4] ss:$80 sps:$4 sm:$0xff]   ;;  %v14044_v9 = vld [vmem:[%s15614_s14 + $0x2ac] ss:$80 sps:$4 sm:$0xff]  }
 0x438   : > { %v14039_v10 = vld [vmem:[%s15614_s14 + $0x2a0] ss:$80 sps:$4 sm:$0xff]   ;;  %v14084_v47 = vld [vmem:[%s15614_s14 + $0x708] ss:$80 sps:$4 sm:$0xff]  }
 0x439   : > { %8906 = vmatpush1.bf16.msra.mxu0 %v13969_v11  ;;  %9070 = vmatpush1.bf16.msra.mxu1 %v13972_v12  ;;  %v14042_v11 = vld [vmem:[%s15614_s14 + $0x2a8] ss:$80 sps:$4 sm:$0xff]   ;;  %v14047_v12 = vld [vmem:[%s15614_s14 + $0x344] ss:$80 sps:$4 sm:$0xff]   ;;  %v14087_v50 = vld [vmem:[%s15614_s14 + $0x7a0] ss:$80 sps:$4 sm:$0xff]  }
 0x43a   : > { %8907 = vmatprep.subr.bf16.mxu0 %v13977_v13  ;;  %9071 = vmatprep.subr.bf16.mxu1 %v13980_v14  ;;  %v14050_v13 = vld [vmem:[%s15614_s14 + $0x34c] ss:$80 sps:$4 sm:$0xff]   ;;  %v14045_v14 = vld [vmem:[%s15614_s14 + $0x340] ss:$80 sps:$4 sm:$0xff]  }
 0x43d   : > { %8908 = vmatpush1.bf16.msra.mxu0 %v13975_v15  ;;  %9072 = vmatpush1.bf16.msra.mxu1 %v13978_v16  ;;  %v14048_v15 = vld [vmem:[%s15614_s14 + $0x348] ss:$80 sps:$4 sm:$0xff]   ;;  %v14053_v16 = vld [vmem:[%s15614_s14 + $0x3e4] ss:$80 sps:$4 sm:$0xff]  }
 0x43e   : > { %8909 = vmatprep.subr.bf16.mxu0 %v13983_v17  ;;  %9073 = vmatprep.subr.bf16.mxu1 %v13986_v18  ;;  %v14056_v17 = vld [vmem:[%s15614_s14 + $0x3ec] ss:$80 sps:$4 sm:$0xff]   ;;  %v14051_v18 = vld [vmem:[%s15614_s14 + $0x3e0] ss:$80 sps:$4 sm:$0xff]  }
 0x441   : > { %8910 = vmatpush1.bf16.msra.mxu0 %v13981_v19  ;;  %9074 = vmatpush1.bf16.msra.mxu1 %v13984_v21  ;;  %v14054_v19 = vld [vmem:[%s15614_s14 + $0x3e8] ss:$80 sps:$4 sm:$0xff]   ;;  %v14059_v21 = vld [vmem:[%s15614_s14 + $0x484] ss:$80 sps:$4 sm:$0xff]  }
 0x442   : > { %8911 = vmatprep.subr.bf16.mxu0 %v13989_v22  ;;  %9075 = vmatprep.subr.bf16.mxu1 %v13992_v23  ;;  %v14062_v22 = vld [vmem:[%s15614_s14 + $0x48c] ss:$80 sps:$4 sm:$0xff]   ;;  %v14057_v23 = vld [vmem:[%s15614_s14 + $0x480] ss:$80 sps:$4 sm:$0xff]  }
 0x445   : > { %8912 = vmatpush1.bf16.msra.mxu0 %v13987_v24  ;;  %9076 = vmatpush1.bf16.msra.mxu1 %v13990_v28  ;;  %v14060_v24 = vld [vmem:[%s15614_s14 + $0x488] ss:$80 sps:$4 sm:$0xff]   ;;  %v14065_v28 = vld [vmem:[%s15614_s14 + $0x524] ss:$80 sps:$4 sm:$0xff]  }
 0x446   : > { %8913 = vmatprep.subr.bf16.mxu0 %v13995_v29  ;;  %9077 = vmatprep.subr.bf16.mxu1 %v13998_v30  ;;  %v14068_v29 = vld [vmem:[%s15614_s14 + $0x52c] ss:$80 sps:$4 sm:$0xff]   ;;  %v14063_v30 = vld [vmem:[%s15614_s14 + $0x520] ss:$80 sps:$4 sm:$0xff]  }
 0x449   : > { %8914 = vmatpush1.bf16.msra.mxu0 %v13993_v31  ;;  %9078 = vmatpush1.bf16.msra.mxu1 %v13996_v33  ;;  %v14066_v31 = vld [vmem:[%s15614_s14 + $0x528] ss:$80 sps:$4 sm:$0xff]   ;;  %v14071_v33 = vld [vmem:[%s15614_s14 + $0x5c4] ss:$80 sps:$4 sm:$0xff]  }
 0x44a   : > { %8915 = vmatprep.subr.bf16.mxu0 %v14001_v34  ;;  %9079 = vmatprep.subr.bf16.mxu1 %v14004_v35  ;;  %v14074_v34 = vld [vmem:[%s15614_s14 + $0x5cc] ss:$80 sps:$4 sm:$0xff]   ;;  %v14069_v35 = vld [vmem:[%s15614_s14 + $0x5c0] ss:$80 sps:$4 sm:$0xff]  }
 0x44d   : > { %8916 = vmatpush1.bf16.msra.mxu0 %v13999_v37  ;;  %9080 = vmatpush1.bf16.msra.mxu1 %v14002_v38  ;;  %v14072_v37 = vld [vmem:[%s15614_s14 + $0x5c8] ss:$80 sps:$4 sm:$0xff]   ;;  %v14077_v38 = vld [vmem:[%s15614_s14 + $0x664] ss:$80 sps:$4 sm:$0xff]  }
 0x44e   : > { %8917 = vmatprep.subr.bf16.mxu0 %v14007_v39  ;;  %9081 = vmatprep.subr.bf16.mxu1 %v14010_v40  ;;  %v14080_v39 = vld [vmem:[%s15614_s14 + $0x66c] ss:$80 sps:$4 sm:$0xff]   ;;  %v14075_v40 = vld [vmem:[%s15614_s14 + $0x660] ss:$80 sps:$4 sm:$0xff]  }
 0x451   : > { %8918 = vmatpush1.bf16.msra.mxu0 %v14005_v43  ;;  %9082 = vmatpush1.bf16.msra.mxu1 %v14008_v45  ;;  %v14086_v43 = vld [vmem:[%s15614_s14 + $0x70c] ss:$80 sps:$4 sm:$0xff]   ;;  %v14081_v45 = vld [vmem:[%s15614_s14 + $0x700] ss:$80 sps:$4 sm:$0xff]  }
 0x452   : > { %12962 = vmatprep.subr.msk.bf16.mxu0 %vm8379_vm2, %v12943_v48  ;;  %12964 = vmatprep.subr.msk.bf16.mxu1 %vm8379_vm2, %v12945_v36  ;;  %v14089_v48 = vld [vmem:[%s15614_s14 + $0x7a4] ss:$80 sps:$4 sm:$0xff]   ;;  %v14092_v36 = vld [vmem:[%s15614_s14 + $0x7ac] ss:$80 sps:$4 sm:$0xff]  }
 0x455   : > { %8920 = vmatpush1.bf16.msra.mxu0 %v8393_v51  ;;  %9084 = vmatpush1.bf16.msra.mxu1 %v8399_v53  ;;  %v14090_v51 = vld [vmem:[%s15614_s14 + $0x7a8] ss:$80 sps:$4 sm:$0xff]   ;;  %v14095_v53 = vld [vmem:[%s15614_s14 + $0x844] ss:$80 sps:$4 sm:$0xff]  }
 0x456   : > { %9096 = vmatprep.subr.bf16.mxu0 %v14017_v54  ;;  %9260 = vmatprep.subr.bf16.mxu1 %v14020_v55  ;;  %v14098_v54 = vld [vmem:[%s15614_s14 + $0x84c] ss:$80 sps:$4 sm:$0xff]   ;;  %v14093_v55 = vld [vmem:[%s15614_s14 + $0x840] ss:$80 sps:$4 sm:$0xff]  }
 0x458   : > { %8924 = vmatmul.mubr.bf16.vlgmr.msra.gmra.mrb[4].mxu0 %v15982_v52  ;;  %9088 = vmatmul.mubr.bf16.vlgmr.msra.gmra.mrb[4].mxu1 %v15982_v52 }
 0x459   : > { %9097 = vmatpush1.bf16.msra.mxu0 %v14015_v56  ;;  %9261 = vmatpush1.bf16.msra.mxu1 %v14018_v57  ;;  %v14096_v56 = vld [vmem:[%s15614_s14 + $0x848] ss:$80 sps:$4 sm:$0xff]   ;;  %v14101_v57 = vld [vmem:[%s15614_s14 + $0x8e4] ss:$80 sps:$4 sm:$0xff]  }
 0x45a   : > { %9098 = vmatprep.subr.bf16.mxu0 %v14023_v59  ;;  %9262 = vmatprep.subr.bf16.mxu1 %v14026_v60  ;;  %v14104_v59 = vld [vmem:[%s15614_s14 + $0x8ec] ss:$80 sps:$4 sm:$0xff]   ;;  %v14099_v60 = vld [vmem:[%s15614_s14 + $0x8e0] ss:$80 sps:$4 sm:$0xff]  }
 0x45b   : > { %9128 = vmatprep.mubr.bf16.mxu0 %v15735_v1  ;;  %9292 = vmatprep.mubr.bf16.mxu1 %v15735_v1 }
 0x45d   : > { %9099 = vmatpush1.bf16.msra.mxu0 %v14021_v61  ;;  %9263 = vmatpush1.bf16.msra.mxu1 %v14024_v62  ;;  %v14102_v61 = vld [vmem:[%s15614_s14 + $0x8e8] ss:$80 sps:$4 sm:$0xff]   ;;  %v14107_v62 = vld [vmem:[%s15614_s14 + $0x984] ss:$80 sps:$4 sm:$0xff]  }
 0x45e   : > { %9100 = vmatprep.subr.bf16.mxu0 %v14029_v63  ;;  %9264 = vmatprep.subr.bf16.mxu1 %v14032_v0  ;;  %v14110_v63 = vld [vmem:[%s15614_s14 + $0x98c] ss:$80 sps:$4 sm:$0xff]   ;;  %v14105_v0 = vld [vmem:[%s15614_s14 + $0x980] ss:$80 sps:$4 sm:$0xff]  }
 0x461   : > { %9101 = vmatpush1.bf16.msra.mxu0 %v14027_v2  ;;  %9265 = vmatpush1.bf16.msra.mxu1 %v14030_v3  ;;  %v14108_v2 = vld [vmem:[%s15614_s14 + $0x988] ss:$80 sps:$4 sm:$0xff]   ;;  %v14113_v3 = vld [vmem:[%s15614_s14 + $0xa24] ss:$80 sps:$4 sm:$0xff]  }
 0x462   : > { %9102 = vmatprep.subr.bf16.mxu0 %v14035_v4  ;;  %9266 = vmatprep.subr.bf16.mxu1 %v14038_v5  ;;  %v14116_v4 = vld [vmem:[%s15614_s14 + $0xa2c] ss:$80 sps:$4 sm:$0xff]   ;;  %v14111_v5 = vld [vmem:[%s15614_s14 + $0xa20] ss:$80 sps:$4 sm:$0xff]  }
 0x465   : > { %9103 = vmatpush1.bf16.msra.mxu0 %v14033_v6  ;;  %9267 = vmatpush1.bf16.msra.mxu1 %v14036_v7  ;;  %v14114_v6 = vld [vmem:[%s15614_s14 + $0xa28] ss:$80 sps:$4 sm:$0xff]   ;;  %v14119_v7 = vld [vmem:[%s15614_s14 + $0xac4] ss:$80 sps:$4 sm:$0xff]  }
 0x466   : > { %9104 = vmatprep.subr.bf16.mxu0 %v14041_v8  ;;  %9268 = vmatprep.subr.bf16.mxu1 %v14044_v9  ;;  %v14122_v8 = vld [vmem:[%s15614_s14 + $0xacc] ss:$80 sps:$4 sm:$0xff]   ;;  %v14117_v9 = vld [vmem:[%s15614_s14 + $0xac0] ss:$80 sps:$4 sm:$0xff]  }
 0x469   : > { %9105 = vmatpush1.bf16.msra.mxu0 %v14039_v10  ;;  %9269 = vmatpush1.bf16.msra.mxu1 %v14042_v11  ;;  %v14120_v10 = vld [vmem:[%s15614_s14 + $0xac8] ss:$80 sps:$4 sm:$0xff]   ;;  %v14125_v11 = vld [vmem:[%s15614_s14 + $0xb64] ss:$80 sps:$4 sm:$0xff]  }
 0x46a   : > { %9106 = vmatprep.subr.bf16.mxu0 %v14047_v12  ;;  %9270 = vmatprep.subr.bf16.mxu1 %v14050_v13  ;;  %v14128_v12 = vld [vmem:[%s15614_s14 + $0xb6c] ss:$80 sps:$4 sm:$0xff]   ;;  %v14123_v13 = vld [vmem:[%s15614_s14 + $0xb60] ss:$80 sps:$4 sm:$0xff]  }
 0x46d   : > { %9107 = vmatpush1.bf16.msra.mxu0 %v14045_v14  ;;  %9271 = vmatpush1.bf16.msra.mxu1 %v14048_v15  ;;  %v14126_v14 = vld [vmem:[%s15614_s14 + $0xb68] ss:$80 sps:$4 sm:$0xff]   ;;  %v14131_v15 = vld [vmem:[%s15614_s14 + $0xc04] ss:$80 sps:$4 sm:$0xff]  }
 0x46e   : > { %9108 = vmatprep.subr.bf16.mxu0 %v14053_v16  ;;  %9272 = vmatprep.subr.bf16.mxu1 %v14056_v17  ;;  %v14134_v16 = vld [vmem:[%s15614_s14 + $0xc0c] ss:$80 sps:$4 sm:$0xff]   ;;  %v14129_v17 = vld [vmem:[%s15614_s14 + $0xc00] ss:$80 sps:$4 sm:$0xff]  }
 0x471   : > { %9109 = vmatpush1.bf16.msra.mxu0 %v14051_v18  ;;  %9273 = vmatpush1.bf16.msra.mxu1 %v14054_v19  ;;  %v14132_v18 = vld [vmem:[%s15614_s14 + $0xc08] ss:$80 sps:$4 sm:$0xff]   ;;  %v14137_v19 = vld [vmem:[%s15614_s14 + $0xca4] ss:$80 sps:$4 sm:$0xff]  }
 0x472   : > { %9110 = vmatprep.subr.bf16.mxu0 %v14059_v21  ;;  %9274 = vmatprep.subr.bf16.mxu1 %v14062_v22  ;;  %v14140_v21 = vld [vmem:[%s15614_s14 + $0xcac] ss:$80 sps:$4 sm:$0xff]   ;;  %v14135_v22 = vld [vmem:[%s15614_s14 + $0xca0] ss:$80 sps:$4 sm:$0xff]  }
 0x475   : > { %9111 = vmatpush1.bf16.msra.mxu0 %v14057_v23  ;;  %9275 = vmatpush1.bf16.msra.mxu1 %v14060_v24  ;;  %v14138_v23 = vld [vmem:[%s15614_s14 + $0xca8] ss:$80 sps:$4 sm:$0xff]   ;;  %v14143_v24 = vld [vmem:[%s15614_s14 + $0xd44] ss:$80 sps:$4 sm:$0xff]  }
 0x476   : > { %9112 = vmatprep.subr.bf16.mxu0 %v14065_v28  ;;  %9276 = vmatprep.subr.bf16.mxu1 %v14068_v29  ;;  %v14146_v28 = vld [vmem:[%s15614_s14 + $0xd4c] ss:$80 sps:$4 sm:$0xff]   ;;  %v14141_v29 = vld [vmem:[%s15614_s14 + $0xd40] ss:$80 sps:$4 sm:$0xff]  }
 0x479   : > { %9113 = vmatpush1.bf16.msra.mxu0 %v14063_v30  ;;  %9277 = vmatpush1.bf16.msra.mxu1 %v14066_v31  ;;  %v14144_v30 = vld [vmem:[%s15614_s14 + $0xd48] ss:$80 sps:$4 sm:$0xff]   ;;  %v14149_v31 = vld [vmem:[%s15614_s14 + $0xde4] ss:$80 sps:$4 sm:$0xff]  }
 0x47a   : > { %9114 = vmatprep.subr.bf16.mxu0 %v14071_v33  ;;  %9278 = vmatprep.subr.bf16.mxu1 %v14074_v34  ;;  %v14152_v33 = vld [vmem:[%s15614_s14 + $0xdec] ss:$80 sps:$4 sm:$0xff]   ;;  %v14147_v34 = vld [vmem:[%s15614_s14 + $0xde0] ss:$80 sps:$4 sm:$0xff]  }
 0x47d   : > { %9115 = vmatpush1.bf16.msra.mxu0 %v14069_v35  ;;  %9279 = vmatpush1.bf16.msra.mxu1 %v14072_v37  ;;  %v14150_v35 = vld [vmem:[%s15614_s14 + $0xde8] ss:$80 sps:$4 sm:$0xff]   ;;  %v14155_v37 = vld [vmem:[%s15614_s14 + $0xe84] ss:$80 sps:$4 sm:$0xff]  }
 0x47e   : > { %9116 = vmatprep.subr.bf16.mxu0 %v14077_v38  ;;  %9280 = vmatprep.subr.bf16.mxu1 %v14080_v39  ;;  %v14158_v38 = vld [vmem:[%s15614_s14 + $0xe8c] ss:$80 sps:$4 sm:$0xff]   ;;  %v14153_v39 = vld [vmem:[%s15614_s14 + $0xe80] ss:$80 sps:$4 sm:$0xff]  }
 0x481   : > { %9117 = vmatpush1.bf16.msra.mxu0 %v14075_v40  ;;  %9281 = vmatpush1.bf16.msra.mxu1 %v14078_v41  ;;  %v14156_v40 = vld [vmem:[%s15614_s14 + $0xe88] ss:$80 sps:$4 sm:$0xff]   ;;  %v14161_v41 = vld [vmem:[%s15614_s14 + $0xf24] ss:$80 sps:$4 sm:$0xff]  }
 0x482   : > { %9118 = vmatprep.subr.bf16.mxu0 %v14083_v42  ;;  %9282 = vmatprep.subr.bf16.mxu1 %v14086_v43  ;;  %v14164_v42 = vld [vmem:[%s15614_s14 + $0xf2c] ss:$80 sps:$4 sm:$0xff]   ;;  %v14159_v43 = vld [vmem:[%s15614_s14 + $0xf20] ss:$80 sps:$4 sm:$0xff]  }
 0x485   : > { %9119 = vmatpush1.bf16.msra.mxu0 %v14081_v45  ;;  %9283 = vmatpush1.bf16.msra.mxu1 %v14084_v47  ;;  %v14162_v45 = vld [vmem:[%s15614_s14 + $0xf28] ss:$80 sps:$4 sm:$0xff]   ;;  %v14167_v47 = vld [vmem:[%s15614_s14 + $0xfc4] ss:$80 sps:$4 sm:$0xff]  }
 0x486   : > { %9120 = vmatprep.subr.bf16.mxu0 %v14089_v48  ;;  %9284 = vmatprep.subr.bf16.mxu1 %v14092_v36  ;;  %v14170_v48 = vld [vmem:[%s15614_s14 + $0xfcc] ss:$80 sps:$4 sm:$0xff]   ;;  %v14165_v36 = vld [vmem:[%s15614_s14 + $0xfc0] ss:$80 sps:$4 sm:$0xff]  }
 0x489   : > { %9121 = vmatpush1.bf16.msra.mxu0 %v14087_v50  ;;  %9285 = vmatpush1.bf16.msra.mxu1 %v14090_v51  ;;  %v14168_v50 = vld [vmem:[%s15614_s14 + $0xfc8] ss:$80 sps:$4 sm:$0xff]   ;;  %v14173_v51 = vld [vmem:[%s15614_s14 + $0x1064] ss:$80 sps:$4 sm:$0xff]  }
 0x48a   : > { %9122 = vmatprep.subr.bf16.mxu0 %v14095_v53  ;;  %9286 = vmatprep.subr.bf16.mxu1 %v14098_v54  ;;  %v14176_v53 = vld [vmem:[%s15614_s14 + $0x106c] ss:$80 sps:$4 sm:$0xff]   ;;  %v14171_v54 = vld [vmem:[%s15614_s14 + $0x1060] ss:$80 sps:$4 sm:$0xff]  }
 0x48d   : > { %9123 = vmatpush1.bf16.msra.mxu0 %v14093_v55  ;;  %9287 = vmatpush1.bf16.msra.mxu1 %v14096_v56  ;;  %v14174_v55 = vld [vmem:[%s15614_s14 + $0x1068] ss:$80 sps:$4 sm:$0xff]   ;;  %v14179_v56 = vld [vmem:[%s15614_s14 + $0x1104] ss:$80 sps:$4 sm:$0xff]  }
 0x48e   : > { %9124 = vmatprep.subr.bf16.mxu0 %v14101_v57  ;;  %9288 = vmatprep.subr.bf16.mxu1 %v14104_v59  ;;  %v14182_v57 = vld [vmem:[%s15614_s14 + $0x110c] ss:$80 sps:$4 sm:$0xff]   ;;  %v14177_v59 = vld [vmem:[%s15614_s14 + $0x1100] ss:$80 sps:$4 sm:$0xff]  }
 0x491   : > { %9125 = vmatpush1.bf16.msra.mxu0 %v14099_v60  ;;  %9289 = vmatpush1.bf16.msra.mxu1 %v14102_v61  ;;  %v14180_v60 = vld [vmem:[%s15614_s14 + $0x1108] ss:$80 sps:$4 sm:$0xff]   ;;  %v14185_v61 = vld [vmem:[%s15614_s14 + $0x11a4] ss:$80 sps:$4 sm:$0xff]  }
 0x492   : > { %9126 = vmatprep.subr.bf16.mxu0 %v14107_v62  ;;  %9290 = vmatprep.subr.bf16.mxu1 %v14110_v63  ;;  %v14188_v62 = vld [vmem:[%s15614_s14 + $0x11ac] ss:$80 sps:$4 sm:$0xff]   ;;  %v14183_v63 = vld [vmem:[%s15614_s14 + $0x11a0] ss:$80 sps:$4 sm:$0xff]  }
 0x495   : > { %9127 = vmatpush1.bf16.msra.mxu0 %v14105_v0  ;;  %9291 = vmatpush1.bf16.msra.mxu1 %v14108_v2  ;;  %v14186_v0 = vld [vmem:[%s15614_s14 + $0x11a8] ss:$80 sps:$4 sm:$0xff]   ;;  %v14191_v2 = vld [vmem:[%s15614_s14 + $0x1244] ss:$80 sps:$4 sm:$0xff]  }
 0x496   : > { %9137 = vmatprep.subr.bf16.mxu0 %v14113_v3  ;;  %9301 = vmatprep.subr.bf16.mxu1 %v14116_v4  ;;  %v14194_v3 = vld [vmem:[%s15614_s14 + $0x124c] ss:$80 sps:$4 sm:$0xff]   ;;  %v14189_v4 = vld [vmem:[%s15614_s14 + $0x1240] ss:$80 sps:$4 sm:$0xff]  }
 0x498   : > { %9129 = vmatmul.mubr.bf16.vlgmr.msra.gmra.mrb[8].mxu0 %v15757_v20  ;;  %9293 = vmatmul.mubr.bf16.vlgmr.msra.gmra.mrb[8].mxu1 %v15757_v20 }
 0x499   : > { %9138 = vmatpush1.bf16.msra.mxu0 %v14111_v5  ;;  %9302 = vmatpush1.bf16.msra.mxu1 %v14114_v6  ;;  %v14192_v5 = vld [vmem:[%s15614_s14 + $0x1248] ss:$80 sps:$4 sm:$0xff]   ;;  %v14197_v6 = vld [vmem:[%s15614_s14 + $0x12e4] ss:$80 sps:$4 sm:$0xff]  }
 0x49a   : > { %9139 = vmatprep.subr.bf16.mxu0 %v14119_v7  ;;  %9303 = vmatprep.subr.bf16.mxu1 %v14122_v8  ;;  %v14200_v7 = vld [vmem:[%s15614_s14 + $0x12ec] ss:$80 sps:$4 sm:$0xff]   ;;  %v14195_v8 = vld [vmem:[%s15614_s14 + $0x12e0] ss:$80 sps:$4 sm:$0xff]  }
 0x49b   : > { %9169 = vmatprep.mubr.bf16.mxu0 %v15770_v27  ;;  %9333 = vmatprep.mubr.bf16.mxu1 %v15770_v27 }
 0x49d   : > { %9140 = vmatpush1.bf16.msra.mxu0 %v14117_v9  ;;  %9304 = vmatpush1.bf16.msra.mxu1 %v14120_v10  ;;  %v14198_v9 = vld [vmem:[%s15614_s14 + $0x12e8] ss:$80 sps:$4 sm:$0xff]   ;;  %v14203_v10 = vld [vmem:[%s15614_s14 + $0x1384] ss:$80 sps:$4 sm:$0xff]  }
 0x49e   : > { %9141 = vmatprep.subr.bf16.mxu0 %v14125_v11  ;;  %9305 = vmatprep.subr.bf16.mxu1 %v14128_v12  ;;  %v14206_v11 = vld [vmem:[%s15614_s14 + $0x138c] ss:$80 sps:$4 sm:$0xff]   ;;  %v14201_v12 = vld [vmem:[%s15614_s14 + $0x1380] ss:$80 sps:$4 sm:$0xff]  }
 0x4a1   : > { %9142 = vmatpush1.bf16.msra.mxu0 %v14123_v13  ;;  %9306 = vmatpush1.bf16.msra.mxu1 %v14126_v14  ;;  %v14204_v13 = vld [vmem:[%s15614_s14 + $0x1388] ss:$80 sps:$4 sm:$0xff]   ;;  %v14209_v14 = vld [vmem:[%s15614_s14 + $0x1424] ss:$80 sps:$4 sm:$0xff]  }
 0x4a2   : > { %9143 = vmatprep.subr.bf16.mxu0 %v14131_v15  ;;  %9307 = vmatprep.subr.bf16.mxu1 %v14134_v16  ;;  %v14212_v15 = vld [vmem:[%s15614_s14 + $0x142c] ss:$80 sps:$4 sm:$0xff]   ;;  %v14207_v16 = vld [vmem:[%s15614_s14 + $0x1420] ss:$80 sps:$4 sm:$0xff]  }
 0x4a5   : > { %9144 = vmatpush1.bf16.msra.mxu0 %v14129_v17  ;;  %9308 = vmatpush1.bf16.msra.mxu1 %v14132_v18  ;;  %v14210_v17 = vld [vmem:[%s15614_s14 + $0x1428] ss:$80 sps:$4 sm:$0xff]   ;;  %v14215_v18 = vld [vmem:[%s15614_s14 + $0x14c4] ss:$80 sps:$4 sm:$0xff]  }
 0x4a6   : > { %9145 = vmatprep.subr.bf16.mxu0 %v14137_v19  ;;  %9309 = vmatprep.subr.bf16.mxu1 %v14140_v21  ;;  %v14218_v19 = vld [vmem:[%s15614_s14 + $0x14cc] ss:$80 sps:$4 sm:$0xff]   ;;  %v14213_v21 = vld [vmem:[%s15614_s14 + $0x14c0] ss:$80 sps:$4 sm:$0xff]  }
 0x4a9   : > { %9146 = vmatpush1.bf16.msra.mxu0 %v14135_v22  ;;  %9310 = vmatpush1.bf16.msra.mxu1 %v14138_v23  ;;  %v14216_v22 = vld [vmem:[%s15614_s14 + $0x14c8] ss:$80 sps:$4 sm:$0xff]   ;;  %v14221_v23 = vld [vmem:[%s15614_s14 + $0x1564] ss:$80 sps:$4 sm:$0xff]  }
 0x4aa   : > { %9147 = vmatprep.subr.bf16.mxu0 %v14143_v24  ;;  %9311 = vmatprep.subr.bf16.mxu1 %v14146_v28  ;;  %v14224_v24 = vld [vmem:[%s15614_s14 + $0x156c] ss:$80 sps:$4 sm:$0xff]   ;;  %v14219_v28 = vld [vmem:[%s15614_s14 + $0x1560] ss:$80 sps:$4 sm:$0xff]  }
 0x4ad   : > { %9148 = vmatpush1.bf16.msra.mxu0 %v14141_v29  ;;  %9312 = vmatpush1.bf16.msra.mxu1 %v14144_v30  ;;  %v14222_v29 = vld [vmem:[%s15614_s14 + $0x1568] ss:$80 sps:$4 sm:$0xff]   ;;  %v14227_v30 = vld [vmem:[%s15614_s14 + $0x1604] ss:$80 sps:$4 sm:$0xff]  }
 0x4ae   : > { %9149 = vmatprep.subr.bf16.mxu0 %v14149_v31  ;;  %9313 = vmatprep.subr.bf16.mxu1 %v14152_v33  ;;  %v14230_v31 = vld [vmem:[%s15614_s14 + $0x160c] ss:$80 sps:$4 sm:$0xff]   ;;  %v14225_v33 = vld [vmem:[%s15614_s14 + $0x1600] ss:$80 sps:$4 sm:$0xff]  }
 0x4b1   : > { %9150 = vmatpush1.bf16.msra.mxu0 %v14147_v34  ;;  %9314 = vmatpush1.bf16.msra.mxu1 %v14150_v35  ;;  %v14228_v34 = vld [vmem:[%s15614_s14 + $0x1608] ss:$80 sps:$4 sm:$0xff]   ;;  %v14233_v35 = vld [vmem:[%s15614_s14 + $0x16a4] ss:$80 sps:$4 sm:$0xff]  }
 0x4b2   : > { %9151 = vmatprep.subr.bf16.mxu0 %v14155_v37  ;;  %9315 = vmatprep.subr.bf16.mxu1 %v14158_v38  ;;  %v14236_v37 = vld [vmem:[%s15614_s14 + $0x16ac] ss:$80 sps:$4 sm:$0xff]   ;;  %v14231_v38 = vld [vmem:[%s15614_s14 + $0x16a0] ss:$80 sps:$4 sm:$0xff]  }
 0x4b5   : > { %9152 = vmatpush1.bf16.msra.mxu0 %v14153_v39  ;;  %9316 = vmatpush1.bf16.msra.mxu1 %v14156_v40  ;;  %v14234_v39 = vld [vmem:[%s15614_s14 + $0x16a8] ss:$80 sps:$4 sm:$0xff]   ;;  %v14239_v40 = vld [vmem:[%s15614_s14 + $0x1744] ss:$80 sps:$4 sm:$0xff]  }
 0x4b6   : > { %9153 = vmatprep.subr.bf16.mxu0 %v14161_v41  ;;  %9317 = vmatprep.subr.bf16.mxu1 %v14164_v42  ;;  %v14242_v41 = vld [vmem:[%s15614_s14 + $0x174c] ss:$80 sps:$4 sm:$0xff]   ;;  %v14237_v42 = vld [vmem:[%s15614_s14 + $0x1740] ss:$80 sps:$4 sm:$0xff]  }
 0x4b9   : > { %9154 = vmatpush1.bf16.msra.mxu0 %v14159_v43  ;;  %9318 = vmatpush1.bf16.msra.mxu1 %v14162_v45  ;;  %v14240_v43 = vld [vmem:[%s15614_s14 + $0x1748] ss:$80 sps:$4 sm:$0xff]   ;;  %v14245_v45 = vld [vmem:[%s15614_s14 + $0x17e4] ss:$80 sps:$4 sm:$0xff]  }
 0x4ba   : > { %9155 = vmatprep.subr.bf16.mxu0 %v14167_v47  ;;  %9319 = vmatprep.subr.bf16.mxu1 %v14170_v48  ;;  %v14248_v47 = vld [vmem:[%s15614_s14 + $0x17ec] ss:$80 sps:$4 sm:$0xff]   ;;  %v14243_v48 = vld [vmem:[%s15614_s14 + $0x17e0] ss:$80 sps:$4 sm:$0xff]  }
 0x4bd   : > { %9156 = vmatpush1.bf16.msra.mxu0 %v14165_v36  ;;  %9320 = vmatpush1.bf16.msra.mxu1 %v14168_v50  ;;  %v14246_v36 = vld [vmem:[%s15614_s14 + $0x17e8] ss:$80 sps:$4 sm:$0xff]   ;;  %v14251_v50 = vld [vmem:[%s15614_s14 + $0x1884] ss:$80 sps:$4 sm:$0xff]  }
 0x4be   : > { %9157 = vmatprep.subr.bf16.mxu0 %v14173_v51  ;;  %9321 = vmatprep.subr.bf16.mxu1 %v14176_v53  ;;  %v14254_v51 = vld [vmem:[%s15614_s14 + $0x188c] ss:$80 sps:$4 sm:$0xff]   ;;  %v14249_v53 = vld [vmem:[%s15614_s14 + $0x1880] ss:$80 sps:$4 sm:$0xff]  }
 0x4c1   : > { %9158 = vmatpush1.bf16.msra.mxu0 %v14171_v54  ;;  %9322 = vmatpush1.bf16.msra.mxu1 %v14174_v55  ;;  %v14252_v54 = vld [vmem:[%s15614_s14 + $0x1888] ss:$80 sps:$4 sm:$0xff]   ;;  %v14257_v55 = vld [vmem:[%s15614_s14 + $0x1924] ss:$80 sps:$4 sm:$0xff]  }
 0x4c2   : > { %9159 = vmatprep.subr.bf16.mxu0 %v14179_v56  ;;  %9323 = vmatprep.subr.bf16.mxu1 %v14182_v57  ;;  %v14260_v56 = vld [vmem:[%s15614_s14 + $0x192c] ss:$80 sps:$4 sm:$0xff]   ;;  %v14255_v57 = vld [vmem:[%s15614_s14 + $0x1920] ss:$80 sps:$4 sm:$0xff]  }
 0x4c5   : > { %9160 = vmatpush1.bf16.msra.mxu0 %v14177_v59  ;;  %9324 = vmatpush1.bf16.msra.mxu1 %v14180_v60  ;;  %v14258_v59 = vld [vmem:[%s15614_s14 + $0x1928] ss:$80 sps:$4 sm:$0xff]   ;;  %v14263_v60 = vld [vmem:[%s15614_s14 + $0x19c4] ss:$80 sps:$4 sm:$0xff]  }
 0x4c6   : > { %9161 = vmatprep.subr.bf16.mxu0 %v14185_v61  ;;  %9325 = vmatprep.subr.bf16.mxu1 %v14188_v62  ;;  %v14266_v61 = vld [vmem:[%s15614_s14 + $0x19cc] ss:$80 sps:$4 sm:$0xff]   ;;  %v14261_v62 = vld [vmem:[%s15614_s14 + $0x19c0] ss:$80 sps:$4 sm:$0xff]  }
 0x4c9   : > { %9162 = vmatpush1.bf16.msra.mxu0 %v14183_v63  ;;  %9326 = vmatpush1.bf16.msra.mxu1 %v14186_v0  ;;  %v14264_v63 = vld [vmem:[%s15614_s14 + $0x19c8] ss:$80 sps:$4 sm:$0xff]   ;;  %v14269_v0 = vld [vmem:[%s15614_s14 + $0x1a64] ss:$80 sps:$4 sm:$0xff]  }
 0x4ca   : > { %9163 = vmatprep.subr.bf16.mxu0 %v14191_v2  ;;  %9327 = vmatprep.subr.bf16.mxu1 %v14194_v3  ;;  %v14272_v2 = vld [vmem:[%s15614_s14 + $0x1a6c] ss:$80 sps:$4 sm:$0xff]   ;;  %v14267_v3 = vld [vmem:[%s15614_s14 + $0x1a60] ss:$80 sps:$4 sm:$0xff]  }
 0x4cd   : > { %9164 = vmatpush1.bf16.msra.mxu0 %v14189_v4  ;;  %9328 = vmatpush1.bf16.msra.mxu1 %v14192_v5  ;;  %v14270_v4 = vld [vmem:[%s15614_s14 + $0x1a68] ss:$80 sps:$4 sm:$0xff]   ;;  %v14275_v5 = vld [vmem:[%s15614_s14 + $0x1b04] ss:$80 sps:$4 sm:$0xff]  }
 0x4ce   : > { %9165 = vmatprep.subr.bf16.mxu0 %v14197_v6  ;;  %9329 = vmatprep.subr.bf16.mxu1 %v14200_v7  ;;  %v14278_v6 = vld [vmem:[%s15614_s14 + $0x1b0c] ss:$80 sps:$4 sm:$0xff]   ;;  %v14273_v7 = vld [vmem:[%s15614_s14 + $0x1b00] ss:$80 sps:$4 sm:$0xff]  }
 0x4d1   : > { %9166 = vmatpush1.bf16.msra.mxu0 %v14195_v8  ;;  %9330 = vmatpush1.bf16.msra.mxu1 %v14198_v9  ;;  %v14276_v8 = vld [vmem:[%s15614_s14 + $0x1b08] ss:$80 sps:$4 sm:$0xff]   ;;  %v14281_v9 = vld [vmem:[%s15614_s14 + $0x1ba4] ss:$80 sps:$4 sm:$0xff]  }
 0x4d2   : > { %9167 = vmatprep.subr.bf16.mxu0 %v14203_v10  ;;  %9331 = vmatprep.subr.bf16.mxu1 %v14206_v11  ;;  %v14284_v10 = vld [vmem:[%s15614_s14 + $0x1bac] ss:$80 sps:$4 sm:$0xff]   ;;  %v14279_v11 = vld [vmem:[%s15614_s14 + $0x1ba0] ss:$80 sps:$4 sm:$0xff]  }
 0x4d5   : > { %9168 = vmatpush1.bf16.msra.mxu0 %v14201_v12  ;;  %9332 = vmatpush1.bf16.msra.mxu1 %v14204_v13  ;;  %v14282_v12 = vld [vmem:[%s15614_s14 + $0x1ba8] ss:$80 sps:$4 sm:$0xff]   ;;  %v14287_v13 = vld [vmem:[%s15614_s14 + $0x1c44] ss:$80 sps:$4 sm:$0xff]  }
 0x4d6   : > { %9178 = vmatprep.subr.bf16.mxu0 %v14209_v14  ;;  %9342 = vmatprep.subr.bf16.mxu1 %v14212_v15  ;;  %v14290_v14 = vld [vmem:[%s15614_s14 + $0x1c4c] ss:$80 sps:$4 sm:$0xff]   ;;  %v14285_v15 = vld [vmem:[%s15614_s14 + $0x1c40] ss:$80 sps:$4 sm:$0xff]  }
 0x4d8   : > { %9170 = vmatmul.mubr.bf16.vlgmr.msra.gmra.mrb[8].mxu0 %v15839_v32  ;;  %9334 = vmatmul.mubr.bf16.vlgmr.msra.gmra.mrb[8].mxu1 %v15839_v32 }
 0x4d9   : > { %9179 = vmatpush1.bf16.msra.mxu0 %v14207_v16  ;;  %9343 = vmatpush1.bf16.msra.mxu1 %v14210_v17  ;;  %v14288_v16 = vld [vmem:[%s15614_s14 + $0x1c48] ss:$80 sps:$4 sm:$0xff]   ;;  %v14293_v17 = vld [vmem:[%s15614_s14 + $0x1ce4] ss:$80 sps:$4 sm:$0xff]  }
 0x4da   : > { %9180 = vmatprep.subr.bf16.mxu0 %v14215_v18  ;;  %9344 = vmatprep.subr.bf16.mxu1 %v14218_v19  ;;  %v14296_v18 = vld [vmem:[%s15614_s14 + $0x1cec] ss:$80 sps:$4 sm:$0xff]   ;;  %v14291_v19 = vld [vmem:[%s15614_s14 + $0x1ce0] ss:$80 sps:$4 sm:$0xff]  }
 0x4db   : > { %9210 = vmatprep.mubr.bf16.mxu0 %v15763_v25  ;;  %9374 = vmatprep.mubr.bf16.mxu1 %v15763_v25 }
 0x4dd   : > { %9181 = vmatpush1.bf16.msra.mxu0 %v14213_v21  ;;  %9345 = vmatpush1.bf16.msra.mxu1 %v14216_v22  ;;  %v14294_v21 = vld [vmem:[%s15614_s14 + $0x1ce8] ss:$80 sps:$4 sm:$0xff]   ;;  %v14299_v22 = vld [vmem:[%s15614_s14 + $0x1d84] ss:$80 sps:$4 sm:$0xff]  }
 0x4de   : > { %9182 = vmatprep.subr.bf16.mxu0 %v14221_v23  ;;  %9346 = vmatprep.subr.bf16.mxu1 %v14224_v24  ;;  %v14302_v23 = vld [vmem:[%s15614_s14 + $0x1d8c] ss:$80 sps:$4 sm:$0xff]   ;;  %v14297_v24 = vld [vmem:[%s15614_s14 + $0x1d80] ss:$80 sps:$4 sm:$0xff]  }
 0x4e1   : > { %9183 = vmatpush1.bf16.msra.mxu0 %v14219_v28  ;;  %9347 = vmatpush1.bf16.msra.mxu1 %v14222_v29  ;;  %v14300_v28 = vld [vmem:[%s15614_s14 + $0x1d88] ss:$80 sps:$4 sm:$0xff]   ;;  %v14305_v29 = vld [vmem:[%s15614_s14 + $0x1e24] ss:$80 sps:$4 sm:$0xff]  }
 0x4e2   : > { %9184 = vmatprep.subr.bf16.mxu0 %v14227_v30  ;;  %9348 = vmatprep.subr.bf16.mxu1 %v14230_v31  ;;  %v14308_v30 = vld [vmem:[%s15614_s14 + $0x1e2c] ss:$80 sps:$4 sm:$0xff]   ;;  %v14303_v31 = vld [vmem:[%s15614_s14 + $0x1e20] ss:$80 sps:$4 sm:$0xff]  }
 0x4e5   : > { %9185 = vmatpush1.bf16.msra.mxu0 %v14225_v33  ;;  %9349 = vmatpush1.bf16.msra.mxu1 %v14228_v34  ;;  %v14306_v33 = vld [vmem:[%s15614_s14 + $0x1e28] ss:$80 sps:$4 sm:$0xff]   ;;  %v14311_v34 = vld [vmem:[%s15614_s14 + $0x1ec4] ss:$80 sps:$4 sm:$0xff]  }
 0x4e6   : > { %9186 = vmatprep.subr.bf16.mxu0 %v14233_v35  ;;  %9350 = vmatprep.subr.bf16.mxu1 %v14236_v37  ;;  %v14314_v35 = vld [vmem:[%s15614_s14 + $0x1ecc] ss:$80 sps:$4 sm:$0xff]   ;;  %v14309_v37 = vld [vmem:[%s15614_s14 + $0x1ec0] ss:$80 sps:$4 sm:$0xff]  }
 0x4e9   : > { %9187 = vmatpush1.bf16.msra.mxu0 %v14231_v38  ;;  %9351 = vmatpush1.bf16.msra.mxu1 %v14234_v39  ;;  %v14312_v38 = vld [vmem:[%s15614_s14 + $0x1ec8] ss:$80 sps:$4 sm:$0xff]   ;;  %v14317_v39 = vld [vmem:[%s15614_s14 + $0x1f64] ss:$80 sps:$4 sm:$0xff]  }
 0x4ea   : > { %9188 = vmatprep.subr.bf16.mxu0 %v14239_v40  ;;  %9352 = vmatprep.subr.bf16.mxu1 %v14242_v41  ;;  %v14320_v40 = vld [vmem:[%s15614_s14 + $0x1f6c] ss:$80 sps:$4 sm:$0xff]   ;;  %v14315_v41 = vld [vmem:[%s15614_s14 + $0x1f60] ss:$80 sps:$4 sm:$0xff]  }
 0x4ed   : > { %9189 = vmatpush1.bf16.msra.mxu0 %v14237_v42  ;;  %9353 = vmatpush1.bf16.msra.mxu1 %v14240_v43  ;;  %v14318_v42 = vld [vmem:[%s15614_s14 + $0x1f68] ss:$80 sps:$4 sm:$0xff]   ;;  %v14323_v43 = vld [vmem:[%s15614_s14 + $0x2004] ss:$80 sps:$4 sm:$0xff]  }
 0x4ee   : > { %9190 = vmatprep.subr.bf16.mxu0 %v14245_v45  ;;  %9354 = vmatprep.subr.bf16.mxu1 %v14248_v47  ;;  %v14326_v45 = vld [vmem:[%s15614_s14 + $0x200c] ss:$80 sps:$4 sm:$0xff]   ;;  %v14321_v47 = vld [vmem:[%s15614_s14 + $0x2000] ss:$80 sps:$4 sm:$0xff]  }
 0x4f1   : > { %9191 = vmatpush1.bf16.msra.mxu0 %v14243_v48  ;;  %9355 = vmatpush1.bf16.msra.mxu1 %v14246_v36  ;;  %v14324_v48 = vld [vmem:[%s15614_s14 + $0x2008] ss:$80 sps:$4 sm:$0xff]   ;;  %v14329_v36 = vld [vmem:[%s15614_s14 + $0x20a4] ss:$80 sps:$4 sm:$0xff]  }
 0x4f2   : > { %9192 = vmatprep.subr.bf16.mxu0 %v14251_v50  ;;  %9356 = vmatprep.subr.bf16.mxu1 %v14254_v51  ;;  %v14332_v50 = vld [vmem:[%s15614_s14 + $0x20ac] ss:$80 sps:$4 sm:$0xff]   ;;  %v14327_v51 = vld [vmem:[%s15614_s14 + $0x20a0] ss:$80 sps:$4 sm:$0xff]  }
 0x4f5   : > { %9193 = vmatpush1.bf16.msra.mxu0 %v14249_v53  ;;  %9357 = vmatpush1.bf16.msra.mxu1 %v14252_v54  ;;  %v14330_v53 = vld [vmem:[%s15614_s14 + $0x20a8] ss:$80 sps:$4 sm:$0xff]   ;;  %v14335_v54 = vld [vmem:[%s15614_s14 + $0x2144] ss:$80 sps:$4 sm:$0xff]  }
 0x4f6   : > { %9194 = vmatprep.subr.bf16.mxu0 %v14257_v55  ;;  %9358 = vmatprep.subr.bf16.mxu1 %v14260_v56  ;;  %v14338_v55 = vld [vmem:[%s15614_s14 + $0x214c] ss:$80 sps:$4 sm:$0xff]   ;;  %v14333_v56 = vld [vmem:[%s15614_s14 + $0x2140] ss:$80 sps:$4 sm:$0xff]  }
 0x4f9   : > { %9195 = vmatpush1.bf16.msra.mxu0 %v14255_v57  ;;  %9359 = vmatpush1.bf16.msra.mxu1 %v14258_v59  ;;  %v14336_v57 = vld [vmem:[%s15614_s14 + $0x2148] ss:$80 sps:$4 sm:$0xff]   ;;  %v14341_v59 = vld [vmem:[%s15614_s14 + $0x21e4] ss:$80 sps:$4 sm:$0xff]  }
 0x4fa   : > { %9196 = vmatprep.subr.bf16.mxu0 %v14263_v60  ;;  %9360 = vmatprep.subr.bf16.mxu1 %v14266_v61  ;;  %v14344_v60 = vld [vmem:[%s15614_s14 + $0x21ec] ss:$80 sps:$4 sm:$0xff]  }
 0x4fd   : > { %9197 = vmatpush1.bf16.msra.mxu0 %v14261_v62  ;;  %9361 = vmatpush1.bf16.msra.mxu1 %v14264_v63 }
 0x4fe   : > { %9198 = vmatprep.subr.bf16.mxu0 %v14269_v0  ;;  %9362 = vmatprep.subr.bf16.mxu1 %v14272_v2 }
 0x501   : > { %9199 = vmatpush1.bf16.msra.mxu0 %v14267_v3  ;;  %9363 = vmatpush1.bf16.msra.mxu1 %v14270_v4 }
 0x502   : > { %9200 = vmatprep.subr.bf16.mxu0 %v14275_v5  ;;  %9364 = vmatprep.subr.bf16.mxu1 %v14278_v6  ;;  %v14339_v6 = vld [vmem:[%s15614_s14 + $0x21e0] ss:$80 sps:$4 sm:$0xff]  }
 0x505   : > { %9201 = vmatpush1.bf16.msra.mxu0 %v14273_v7  ;;  %9365 = vmatpush1.bf16.msra.mxu1 %v14276_v8  ;;  %v14342_v7 = vld [vmem:[%s15614_s14 + $0x21e8] ss:$80 sps:$4 sm:$0xff]  }
 0x506   : > { %9202 = vmatprep.subr.bf16.mxu0 %v14281_v9  ;;  %9366 = vmatprep.subr.bf16.mxu1 %v14284_v10  ;;  %v14347_v10 = vld [vmem:[%s15614_s14 + $0x2284] ss:$80 sps:$4 sm:$0xff]  }
 0x509   : > { %9203 = vmatpush1.bf16.msra.mxu0 %v14279_v11  ;;  %9367 = vmatpush1.bf16.msra.mxu1 %v14282_v12  ;;  %v14350_v11 = vld [vmem:[%s15614_s14 + $0x228c] ss:$80 sps:$4 sm:$0xff]  }
 0x50a   : > { %9204 = vmatprep.subr.bf16.mxu0 %v14287_v13  ;;  %9368 = vmatprep.subr.bf16.mxu1 %v14290_v14 }
 0x50d   : > { %9205 = vmatpush1.bf16.msra.mxu0 %v14285_v15  ;;  %9369 = vmatpush1.bf16.msra.mxu1 %v14288_v16  ;;  %v14345_v15 = vld [vmem:[%s15614_s14 + $0x2280] ss:$80 sps:$4 sm:$0xff]   ;;  %v14348_v16 = vld [vmem:[%s15614_s14 + $0x2288] ss:$80 sps:$4 sm:$0xff]  }
 0x50e   : > { %9206 = vmatprep.subr.bf16.mxu0 %v14293_v17  ;;  %9370 = vmatprep.subr.bf16.mxu1 %v14296_v18  ;;  %v14353_v17 = vld [vmem:[%s15614_s14 + $0x2324] ss:$80 sps:$4 sm:$0xff]   ;;  %v14356_v18 = vld [vmem:[%s15614_s14 + $0x232c] ss:$80 sps:$4 sm:$0xff]  }
 0x511   : > { %9207 = vmatpush1.bf16.msra.mxu0 %v14291_v19  ;;  %9371 = vmatpush1.bf16.msra.mxu1 %v14294_v21  ;;  %v14351_v19 = vld [vmem:[%s15614_s14 + $0x2320] ss:$80 sps:$4 sm:$0xff]   ;;  %v14354_v21 = vld [vmem:[%s15614_s14 + $0x2328] ss:$80 sps:$4 sm:$0xff]  }
 0x512   : > { %9208 = vmatprep.subr.bf16.mxu0 %v14299_v22  ;;  %9372 = vmatprep.subr.bf16.mxu1 %v14302_v23  ;;  %v14359_v22 = vld [vmem:[%s15614_s14 + $0x23c4] ss:$80 sps:$4 sm:$0xff]   ;;  %v14362_v23 = vld [vmem:[%s15614_s14 + $0x23cc] ss:$80 sps:$4 sm:$0xff]  }
 0x515   : > { %9209 = vmatpush1.bf16.msra.mxu0 %v14297_v24  ;;  %9373 = vmatpush1.bf16.msra.mxu1 %v14300_v28  ;;  %v14357_v24 = vld [vmem:[%s15614_s14 + $0x23c0] ss:$80 sps:$4 sm:$0xff]   ;;  %v14360_v28 = vld [vmem:[%s15614_s14 + $0x23c8] ss:$80 sps:$4 sm:$0xff]  }
 0x516   : > { %9219 = vmatprep.subr.bf16.mxu0 %v14305_v29  ;;  %9383 = vmatprep.subr.bf16.mxu1 %v14308_v30  ;;  %v14365_v29 = vld [vmem:[%s15614_s14 + $0x2464] ss:$80 sps:$4 sm:$0xff]   ;;  %v14368_v30 = vld [vmem:[%s15614_s14 + $0x246c] ss:$80 sps:$4 sm:$0xff]  }
 0x518   : > { %9211 = vmatmul.mubr.bf16.vlgmr.msra.gmra.mrb[8].mxu0 %v15766_v26  ;;  %9375 = vmatmul.mubr.bf16.vlgmr.msra.gmra.mrb[8].mxu1 %v15766_v26 }
 0x519   : > { %9220 = vmatpush1.bf16.msra.mxu0 %v14303_v31  ;;  %9384 = vmatpush1.bf16.msra.mxu1 %v14306_v33  ;;  %v14363_v31 = vld [vmem:[%s15614_s14 + $0x2460] ss:$80 sps:$4 sm:$0xff]   ;;  %v14366_v33 = vld [vmem:[%s15614_s14 + $0x2468] ss:$80 sps:$4 sm:$0xff]  }
 0x51a   : > { %9221 = vmatprep.subr.bf16.mxu0 %v14311_v34  ;;  %9385 = vmatprep.subr.bf16.mxu1 %v14314_v35  ;;  %v14371_v34 = vld [vmem:[%s15614_s14 + $0x2504] ss:$80 sps:$4 sm:$0xff]   ;;  %v14374_v35 = vld [vmem:[%s15614_s14 + $0x250c] ss:$80 sps:$4 sm:$0xff]  }
 0x51b   : > { %12967 = vmatprep.mubr.msk.bf16.mxu0 %vm8375_vm1, %v15914_v46  ;;  %12969 = vmatprep.mubr.msk.bf16.mxu1 %vm8375_vm1, %v15914_v46 }
 0x51d   : > { %9222 = vmatpush1.bf16.msra.mxu0 %v14309_v37  ;;  %9386 = vmatpush1.bf16.msra.mxu1 %v14312_v38  ;;  %v14369_v37 = vld [vmem:[%s15614_s14 + $0x2500] ss:$80 sps:$4 sm:$0xff]   ;;  %v14372_v38 = vld [vmem:[%s15614_s14 + $0x2508] ss:$80 sps:$4 sm:$0xff]  }
 0x51e   : > { %9223 = vmatprep.subr.bf16.mxu0 %v14317_v39  ;;  %9387 = vmatprep.subr.bf16.mxu1 %v14320_v40  ;;  %v14377_v39 = vld [vmem:[%s15614_s14 + $0x25a4] ss:$80 sps:$4 sm:$0xff]   ;;  %v14380_v40 = vld [vmem:[%s15614_s14 + $0x25ac] ss:$80 sps:$4 sm:$0xff]  }
 0x521   : > { %9224 = vmatpush1.bf16.msra.mxu0 %v14315_v41  ;;  %9388 = vmatpush1.bf16.msra.mxu1 %v14318_v42  ;;  %v14375_v41 = vld [vmem:[%s15614_s14 + $0x25a0] ss:$80 sps:$4 sm:$0xff]   ;;  %v14378_v42 = vld [vmem:[%s15614_s14 + $0x25a8] ss:$80 sps:$4 sm:$0xff]  }
 0x522   : > { %9225 = vmatprep.subr.bf16.mxu0 %v14323_v43  ;;  %9389 = vmatprep.subr.bf16.mxu1 %v14326_v45  ;;  %v14383_v43 = vld [vmem:[%s15614_s14 + $0x2644] ss:$80 sps:$4 sm:$0xff]   ;;  %v14386_v45 = vld [vmem:[%s15614_s14 + $0x264c] ss:$80 sps:$4 sm:$0xff]  }
 0x525   : > { %9226 = vmatpush1.bf16.msra.mxu0 %v14321_v47  ;;  %9390 = vmatpush1.bf16.msra.mxu1 %v14324_v48  ;;  %v2062_v47 = vld [vmem:[%s15614_s14 + $0x26e0] sm:$0xff]  ;;  %v2063_v48 = vld [vmem:[%s15614_s14 + $0x26e8] sm:$0xff] }
 0x526   : > { %9227 = vmatprep.subr.bf16.mxu0 %v14329_v36  ;;  %9391 = vmatprep.subr.bf16.mxu1 %v14332_v50  ;;  %v14381_v36 = vld [vmem:[%s15614_s14 + $0x2640] ss:$80 sps:$4 sm:$0xff]   ;;  %v14384_v50 = vld [vmem:[%s15614_s14 + $0x2648] ss:$80 sps:$4 sm:$0xff]  }
 0x529   : > { %9228 = vmatpush1.bf16.msra.mxu0 %v14327_v51  ;;  %9392 = vmatpush1.bf16.msra.mxu1 %v14330_v53  ;;  %v12947_v51 = vcombine.high %v2062_v47, %v2062_v47  ;;  %v12949_v53 = vcombine.high %v2063_v48, %v2063_v48 }
 0x52a   : > { %9229 = vmatprep.subr.bf16.mxu0 %v14335_v54  ;;  %9393 = vmatprep.subr.bf16.mxu1 %v14338_v55  ;;  %v12946_v54 = vcombine.low %v2062_v47, %v2062_v47  ;;  %v12948_v55 = vcombine.low %v2063_v48, %v2063_v48  ;;  %v14454_v47 = vld [vmem:[%s15614_s14 + $0x678] ss:$80 sps:$4 sm:$0xff]   ;;  %v14459_v48 = vld [vmem:[%s15614_s14 + $0x714] ss:$80 sps:$4 sm:$0xff]  }
 0x52b   : > { %v8925_v61 = vpop.f32.mrb[4].mxu0  ;;  %v9089_v62 = vpop.f32.mrb[4].mxu1 }
 0x52c   : > { %v8927_v63 = vpop.f32.mrb[5].mxu0  ;;  %v9091_v0 = vpop.f32.mrb[5].mxu1 }
 0x52d   : > { %v10117_v2 = vcombine.low %v8925_v61, %v8927_v63  ;;  %v10118_v3 = vcombine.low %v9089_v62, %v9091_v0  ;;  %v8929_v4 = vpop.f32.mrb[6].mxu0  ;;  %v9093_v5 = vpop.f32.mrb[6].mxu1  ;;  %9230 = vmatpush1.bf16.msra.mxu0 %v14333_v56  ;;  %9394 = vmatpush1.bf16.msra.mxu1 %v14336_v57  ;;  %v8405_v56 = vsel %vm8379_vm2, %v12946_v54, 0  ;;  %v8411_v57 = vsel %vm8379_vm2, %v12948_v55, 0  ;;  %v14391_v61 = vld [vmem:[%s15614_s14 + $0x30] ss:$80 sps:$4 sm:$0xff]  }
 0x52e   : > { %v8930_v8 = vpop.f32.mrb[7].mxu0  ;;  %v9094_v9 = vpop.f32.mrb[7].mxu1  ;;  %9231 = vmatprep.subr.bf16.mxu0 %v14341_v59  ;;  %9395 = vmatprep.subr.bf16.mxu1 %v14344_v60  ;;  %v14393_v59 = vld [vmem:[%s15614_s14 + $0x34] ss:$80 sps:$4 sm:$0xff]   ;;  %v14396_v60 = vld [vmem:[%s15614_s14 + $0x3c] ss:$80 sps:$4 sm:$0xff]  }
 0x52f   : > { %v10125_v12 = vrot.slane %v10117_v2, %v16219_v58  ;;  %v10132_v13 = vrot.slane %v10118_v3, %v16219_v58  ;;  %v14394_v62 = vld [vmem:[%s15614_s14 + $0x38] ss:$80 sps:$4 sm:$0xff]   ;;  %v14399_v63 = vld [vmem:[%s15614_s14 + $0xd4] ss:$80 sps:$4 sm:$0xff]   ;;  %v14402_v0 = vld [vmem:[%s15614_s14 + $0xdc] ss:$80 sps:$4 sm:$0xff]  }
 0x530   : > { %v14397_v2 = vld [vmem:[%s15614_s14 + $0xd0] ss:$80 sps:$4 sm:$0xff]   ;;  %v14400_v3 = vld [vmem:[%s15614_s14 + $0xd8] ss:$80 sps:$4 sm:$0xff]   ;;  %v14405_v4 = vld [vmem:[%s15614_s14 + $0x174] ss:$80 sps:$4 sm:$0xff]  }
 0x531   : > { %v10133_v14 = vcombine.low %v10125_v12, %v10132_v13  ;;  %9232 = vmatpush1.bf16.msra.mxu0 %v14339_v6  ;;  %9396 = vmatpush1.bf16.msra.mxu1 %v14342_v7  ;;  %v14408_v5 = vld [vmem:[%s15614_s14 + $0x17c] ss:$80 sps:$4 sm:$0xff]   ;;  %v14403_v6 = vld [vmem:[%s15614_s14 + $0x170] ss:$80 sps:$4 sm:$0xff]   ;;  %v14406_v7 = vld [vmem:[%s15614_s14 + $0x178] ss:$80 sps:$4 sm:$0xff]  }
 0x532   : > { %9233 = vmatprep.subr.bf16.mxu0 %v14347_v10  ;;  %9397 = vmatprep.subr.bf16.mxu1 %v14350_v11  ;;  %v14411_v8 = vld [vmem:[%s15614_s14 + $0x214] ss:$80 sps:$4 sm:$0xff]   ;;  %v14414_v9 = vld [vmem:[%s15614_s14 + $0x21c] ss:$80 sps:$4 sm:$0xff]   ;;  %v14409_v10 = vld [vmem:[%s15614_s14 + $0x210] ss:$80 sps:$4 sm:$0xff]  }
 0x533   : > { %10194 = vst [vmem:[%s16232_s6 + $0x8] sm:$0xff] %v10133_v14  ;;  %v14412_v11 = vld [vmem:[%s15614_s14 + $0x218] ss:$80 sps:$4 sm:$0xff]   ;;  %v14417_v12 = vld [vmem:[%s15614_s14 + $0x2b4] ss:$80 sps:$4 sm:$0xff]  }
 0x534   : > { %v14420_v13 = vld [vmem:[%s15614_s14 + $0x2bc] ss:$80 sps:$4 sm:$0xff]   ;;  %v14415_v14 = vld [vmem:[%s15614_s14 + $0x2b0] ss:$80 sps:$4 sm:$0xff]  }
 0x535   : > { %9234 = vmatpush1.bf16.msra.mxu0 %v14345_v15  ;;  %9398 = vmatpush1.bf16.msra.mxu1 %v14348_v16  ;;  %v14418_v15 = vld [vmem:[%s15614_s14 + $0x2b8] ss:$80 sps:$4 sm:$0xff]   ;;  %v14423_v16 = vld [vmem:[%s15614_s14 + $0x354] ss:$80 sps:$4 sm:$0xff]   ;;  %v14468_v54 = vld [vmem:[%s15614_s14 + $0x7bc] ss:$80 sps:$4 sm:$0xff]  }
 0x536   : > { %9235 = vmatprep.subr.bf16.mxu0 %v14353_v17  ;;  %9399 = vmatprep.subr.bf16.mxu1 %v14356_v18  ;;  %v14426_v17 = vld [vmem:[%s15614_s14 + $0x35c] ss:$80 sps:$4 sm:$0xff]   ;;  %v14421_v18 = vld [vmem:[%s15614_s14 + $0x350] ss:$80 sps:$4 sm:$0xff]  }
 0x537   : > { %v14463_v55 = vld [vmem:[%s15614_s14 + $0x7b0] ss:$80 sps:$4 sm:$0xff]  }
 0x539   : > { %9236 = vmatpush1.bf16.msra.mxu0 %v14351_v19  ;;  %9400 = vmatpush1.bf16.msra.mxu1 %v14354_v21  ;;  %v14424_v19 = vld [vmem:[%s15614_s14 + $0x358] ss:$80 sps:$4 sm:$0xff]   ;;  %v14429_v21 = vld [vmem:[%s15614_s14 + $0x3f4] ss:$80 sps:$4 sm:$0xff]  }
 0x53a   : > { %9237 = vmatprep.subr.bf16.mxu0 %v14359_v22  ;;  %9401 = vmatprep.subr.bf16.mxu1 %v14362_v23  ;;  %v14432_v22 = vld [vmem:[%s15614_s14 + $0x3fc] ss:$80 sps:$4 sm:$0xff]   ;;  %v14427_v23 = vld [vmem:[%s15614_s14 + $0x3f0] ss:$80 sps:$4 sm:$0xff]  }
 0x53d   : > { %9238 = vmatpush1.bf16.msra.mxu0 %v14357_v24  ;;  %9402 = vmatpush1.bf16.msra.mxu1 %v14360_v28  ;;  %v14430_v24 = vld [vmem:[%s15614_s14 + $0x3f8] ss:$80 sps:$4 sm:$0xff]   ;;  %v14435_v28 = vld [vmem:[%s15614_s14 + $0x494] ss:$80 sps:$4 sm:$0xff]  }
 0x53e   : > { %9239 = vmatprep.subr.bf16.mxu0 %v14365_v29  ;;  %9403 = vmatprep.subr.bf16.mxu1 %v14368_v30  ;;  %v14438_v29 = vld [vmem:[%s15614_s14 + $0x49c] ss:$80 sps:$4 sm:$0xff]   ;;  %v14433_v30 = vld [vmem:[%s15614_s14 + $0x490] ss:$80 sps:$4 sm:$0xff]  }
 0x541   : > { %9240 = vmatpush1.bf16.msra.mxu0 %v14363_v31  ;;  %9404 = vmatpush1.bf16.msra.mxu1 %v14366_v33  ;;  %v14436_v31 = vld [vmem:[%s15614_s14 + $0x498] ss:$80 sps:$4 sm:$0xff]   ;;  %v14441_v33 = vld [vmem:[%s15614_s14 + $0x534] ss:$80 sps:$4 sm:$0xff]  }
 0x542   : > { %9241 = vmatprep.subr.bf16.mxu0 %v14371_v34  ;;  %9405 = vmatprep.subr.bf16.mxu1 %v14374_v35  ;;  %v14444_v34 = vld [vmem:[%s15614_s14 + $0x53c] ss:$80 sps:$4 sm:$0xff]   ;;  %v14439_v35 = vld [vmem:[%s15614_s14 + $0x530] ss:$80 sps:$4 sm:$0xff]  }
 0x545   : > { %9242 = vmatpush1.bf16.msra.mxu0 %v14369_v37  ;;  %9406 = vmatpush1.bf16.msra.mxu1 %v14372_v38  ;;  %v14442_v37 = vld [vmem:[%s15614_s14 + $0x538] ss:$80 sps:$4 sm:$0xff]   ;;  %v14447_v38 = vld [vmem:[%s15614_s14 + $0x5d4] ss:$80 sps:$4 sm:$0xff]  }
 0x546   : > { %9243 = vmatprep.subr.bf16.mxu0 %v14377_v39  ;;  %9407 = vmatprep.subr.bf16.mxu1 %v14380_v40  ;;  %v14450_v39 = vld [vmem:[%s15614_s14 + $0x5dc] ss:$80 sps:$4 sm:$0xff]   ;;  %v14445_v40 = vld [vmem:[%s15614_s14 + $0x5d0] ss:$80 sps:$4 sm:$0xff]  }
 0x549   : > { %9244 = vmatpush1.bf16.msra.mxu0 %v14375_v41  ;;  %9408 = vmatpush1.bf16.msra.mxu1 %v14378_v42  ;;  %v14448_v41 = vld [vmem:[%s15614_s14 + $0x5d8] ss:$80 sps:$4 sm:$0xff]   ;;  %v14453_v42 = vld [vmem:[%s15614_s14 + $0x674] ss:$80 sps:$4 sm:$0xff]  }
 0x54a   : > { %9245 = vmatprep.subr.bf16.mxu0 %v14383_v43  ;;  %9409 = vmatprep.subr.bf16.mxu1 %v14386_v45  ;;  %v14456_v43 = vld [vmem:[%s15614_s14 + $0x67c] ss:$80 sps:$4 sm:$0xff]   ;;  %v14451_v45 = vld [vmem:[%s15614_s14 + $0x670] ss:$80 sps:$4 sm:$0xff]  }
 0x54d   : > { %9246 = vmatpush1.bf16.msra.mxu0 %v14381_v36  ;;  %9410 = vmatpush1.bf16.msra.mxu1 %v14384_v50  ;;  %v14462_v36 = vld [vmem:[%s15614_s14 + $0x71c] ss:$80 sps:$4 sm:$0xff]   ;;  %v14457_v50 = vld [vmem:[%s15614_s14 + $0x710] ss:$80 sps:$4 sm:$0xff]  }
 0x54e   : > { %12966 = vmatprep.subr.msk.bf16.mxu0 %vm8379_vm2, %v12947_v51  ;;  %12968 = vmatprep.subr.msk.bf16.mxu1 %vm8379_vm2, %v12949_v53  ;;  %v14460_v51 = vld [vmem:[%s15614_s14 + $0x718] ss:$80 sps:$4 sm:$0xff]   ;;  %v14465_v53 = vld [vmem:[%s15614_s14 + $0x7b4] ss:$80 sps:$4 sm:$0xff]  }
 0x551   : > { %9248 = vmatpush1.bf16.msra.mxu0 %v8405_v56  ;;  %9412 = vmatpush1.bf16.msra.mxu1 %v8411_v57  ;;  %v14466_v56 = vld [vmem:[%s15614_s14 + $0x7b8] ss:$80 sps:$4 sm:$0xff]   ;;  %v14471_v57 = vld [vmem:[%s15614_s14 + $0x854] ss:$80 sps:$4 sm:$0xff]  }
 0x552   : > { %9424 = vmatprep.subr.bf16.mxu0 %v14393_v59  ;;  %9588 = vmatprep.subr.bf16.mxu1 %v14396_v60  ;;  %v14474_v59 = vld [vmem:[%s15614_s14 + $0x85c] ss:$80 sps:$4 sm:$0xff]   ;;  %v14469_v60 = vld [vmem:[%s15614_s14 + $0x850] ss:$80 sps:$4 sm:$0xff]  }
 0x554   : > { %9252 = vmatmul.mubr.bf16.vlgmr.msra.gmra.mrb[8].mxu0 %v15982_v52  ;;  %9416 = vmatmul.mubr.bf16.vlgmr.msra.gmra.mrb[8].mxu1 %v15982_v52 }
 0x555   : > { %9425 = vmatpush1.bf16.msra.mxu0 %v14391_v61  ;;  %9589 = vmatpush1.bf16.msra.mxu1 %v14394_v62  ;;  %v14472_v61 = vld [vmem:[%s15614_s14 + $0x858] ss:$80 sps:$4 sm:$0xff]   ;;  %v14477_v62 = vld [vmem:[%s15614_s14 + $0x8f4] ss:$80 sps:$4 sm:$0xff]  }
 0x556   : > { %9426 = vmatprep.subr.bf16.mxu0 %v14399_v63  ;;  %9590 = vmatprep.subr.bf16.mxu1 %v14402_v0  ;;  %v14480_v63 = vld [vmem:[%s15614_s14 + $0x8fc] ss:$80 sps:$4 sm:$0xff]   ;;  %v14475_v0 = vld [vmem:[%s15614_s14 + $0x8f0] ss:$80 sps:$4 sm:$0xff]  }
 0x557   : > { %9456 = vmatprep.mubr.bf16.mxu0 %v15735_v1  ;;  %9620 = vmatprep.mubr.bf16.mxu1 %v15735_v1 }
 0x559   : > { %9427 = vmatpush1.bf16.msra.mxu0 %v14397_v2  ;;  %9591 = vmatpush1.bf16.msra.mxu1 %v14400_v3  ;;  %v14478_v2 = vld [vmem:[%s15614_s14 + $0x8f8] ss:$80 sps:$4 sm:$0xff]   ;;  %v14483_v3 = vld [vmem:[%s15614_s14 + $0x994] ss:$80 sps:$4 sm:$0xff]  }
 0x55a   : > { %9428 = vmatprep.subr.bf16.mxu0 %v14405_v4  ;;  %9592 = vmatprep.subr.bf16.mxu1 %v14408_v5  ;;  %v14486_v4 = vld [vmem:[%s15614_s14 + $0x99c] ss:$80 sps:$4 sm:$0xff]   ;;  %v14481_v5 = vld [vmem:[%s15614_s14 + $0x990] ss:$80 sps:$4 sm:$0xff]  }
 0x55d   : > { %9429 = vmatpush1.bf16.msra.mxu0 %v14403_v6  ;;  %9593 = vmatpush1.bf16.msra.mxu1 %v14406_v7  ;;  %v14484_v6 = vld [vmem:[%s15614_s14 + $0x998] ss:$80 sps:$4 sm:$0xff]   ;;  %v14489_v7 = vld [vmem:[%s15614_s14 + $0xa34] ss:$80 sps:$4 sm:$0xff]  }
 0x55e   : > { %9430 = vmatprep.subr.bf16.mxu0 %v14411_v8  ;;  %9594 = vmatprep.subr.bf16.mxu1 %v14414_v9  ;;  %v14492_v8 = vld [vmem:[%s15614_s14 + $0xa3c] ss:$80 sps:$4 sm:$0xff]   ;;  %v14487_v9 = vld [vmem:[%s15614_s14 + $0xa30] ss:$80 sps:$4 sm:$0xff]  }
 0x561   : > { %9431 = vmatpush1.bf16.msra.mxu0 %v14409_v10  ;;  %9595 = vmatpush1.bf16.msra.mxu1 %v14412_v11  ;;  %v14490_v10 = vld [vmem:[%s15614_s14 + $0xa38] ss:$80 sps:$4 sm:$0xff]   ;;  %v14495_v11 = vld [vmem:[%s15614_s14 + $0xad4] ss:$80 sps:$4 sm:$0xff]  }
 0x562   : > { %9432 = vmatprep.subr.bf16.mxu0 %v14417_v12  ;;  %9596 = vmatprep.subr.bf16.mxu1 %v14420_v13  ;;  %v14498_v12 = vld [vmem:[%s15614_s14 + $0xadc] ss:$80 sps:$4 sm:$0xff]   ;;  %v14493_v13 = vld [vmem:[%s15614_s14 + $0xad0] ss:$80 sps:$4 sm:$0xff]  }
 0x565   : > { %9433 = vmatpush1.bf16.msra.mxu0 %v14415_v14  ;;  %9597 = vmatpush1.bf16.msra.mxu1 %v14418_v15  ;;  %v14496_v14 = vld [vmem:[%s15614_s14 + $0xad8] ss:$80 sps:$4 sm:$0xff]   ;;  %v14501_v15 = vld [vmem:[%s15614_s14 + $0xb74] ss:$80 sps:$4 sm:$0xff]  }
 0x566   : > { %9434 = vmatprep.subr.bf16.mxu0 %v14423_v16  ;;  %9598 = vmatprep.subr.bf16.mxu1 %v14426_v17  ;;  %v14504_v16 = vld [vmem:[%s15614_s14 + $0xb7c] ss:$80 sps:$4 sm:$0xff]   ;;  %v14499_v17 = vld [vmem:[%s15614_s14 + $0xb70] ss:$80 sps:$4 sm:$0xff]  }
 0x569   : > { %9435 = vmatpush1.bf16.msra.mxu0 %v14421_v18  ;;  %9599 = vmatpush1.bf16.msra.mxu1 %v14424_v19  ;;  %v14502_v18 = vld [vmem:[%s15614_s14 + $0xb78] ss:$80 sps:$4 sm:$0xff]   ;;  %v14507_v19 = vld [vmem:[%s15614_s14 + $0xc14] ss:$80 sps:$4 sm:$0xff]  }
 0x56a   : > { %9436 = vmatprep.subr.bf16.mxu0 %v14429_v21  ;;  %9600 = vmatprep.subr.bf16.mxu1 %v14432_v22  ;;  %v14510_v21 = vld [vmem:[%s15614_s14 + $0xc1c] ss:$80 sps:$4 sm:$0xff]   ;;  %v14505_v22 = vld [vmem:[%s15614_s14 + $0xc10] ss:$80 sps:$4 sm:$0xff]  }
 0x56d   : > { %9437 = vmatpush1.bf16.msra.mxu0 %v14427_v23  ;;  %9601 = vmatpush1.bf16.msra.mxu1 %v14430_v24  ;;  %v14508_v23 = vld [vmem:[%s15614_s14 + $0xc18] ss:$80 sps:$4 sm:$0xff]   ;;  %v14513_v24 = vld [vmem:[%s15614_s14 + $0xcb4] ss:$80 sps:$4 sm:$0xff]  }
 0x56e   : > { %9438 = vmatprep.subr.bf16.mxu0 %v14435_v28  ;;  %9602 = vmatprep.subr.bf16.mxu1 %v14438_v29  ;;  %v14516_v28 = vld [vmem:[%s15614_s14 + $0xcbc] ss:$80 sps:$4 sm:$0xff]   ;;  %v14511_v29 = vld [vmem:[%s15614_s14 + $0xcb0] ss:$80 sps:$4 sm:$0xff]  }
 0x571   : > { %9439 = vmatpush1.bf16.msra.mxu0 %v14433_v30  ;;  %9603 = vmatpush1.bf16.msra.mxu1 %v14436_v31  ;;  %v14514_v30 = vld [vmem:[%s15614_s14 + $0xcb8] ss:$80 sps:$4 sm:$0xff]   ;;  %v14519_v31 = vld [vmem:[%s15614_s14 + $0xd54] ss:$80 sps:$4 sm:$0xff]  }
 0x572   : > { %9440 = vmatprep.subr.bf16.mxu0 %v14441_v33  ;;  %9604 = vmatprep.subr.bf16.mxu1 %v14444_v34  ;;  %v14522_v33 = vld [vmem:[%s15614_s14 + $0xd5c] ss:$80 sps:$4 sm:$0xff]   ;;  %v14517_v34 = vld [vmem:[%s15614_s14 + $0xd50] ss:$80 sps:$4 sm:$0xff]  }
 0x575   : > { %9441 = vmatpush1.bf16.msra.mxu0 %v14439_v35  ;;  %9605 = vmatpush1.bf16.msra.mxu1 %v14442_v37  ;;  %v14520_v35 = vld [vmem:[%s15614_s14 + $0xd58] ss:$80 sps:$4 sm:$0xff]   ;;  %v14525_v37 = vld [vmem:[%s15614_s14 + $0xdf4] ss:$80 sps:$4 sm:$0xff]  }
 0x576   : > { %9442 = vmatprep.subr.bf16.mxu0 %v14447_v38  ;;  %9606 = vmatprep.subr.bf16.mxu1 %v14450_v39  ;;  %v14528_v38 = vld [vmem:[%s15614_s14 + $0xdfc] ss:$80 sps:$4 sm:$0xff]   ;;  %v14523_v39 = vld [vmem:[%s15614_s14 + $0xdf0] ss:$80 sps:$4 sm:$0xff]  }
 0x579   : > { %9443 = vmatpush1.bf16.msra.mxu0 %v14445_v40  ;;  %9607 = vmatpush1.bf16.msra.mxu1 %v14448_v41  ;;  %v14526_v40 = vld [vmem:[%s15614_s14 + $0xdf8] ss:$80 sps:$4 sm:$0xff]   ;;  %v14531_v41 = vld [vmem:[%s15614_s14 + $0xe94] ss:$80 sps:$4 sm:$0xff]  }
 0x57a   : > { %9444 = vmatprep.subr.bf16.mxu0 %v14453_v42  ;;  %9608 = vmatprep.subr.bf16.mxu1 %v14456_v43  ;;  %v14534_v42 = vld [vmem:[%s15614_s14 + $0xe9c] ss:$80 sps:$4 sm:$0xff]   ;;  %v14529_v43 = vld [vmem:[%s15614_s14 + $0xe90] ss:$80 sps:$4 sm:$0xff]  }
 0x57d   : > { %9445 = vmatpush1.bf16.msra.mxu0 %v14451_v45  ;;  %9609 = vmatpush1.bf16.msra.mxu1 %v14454_v47  ;;  %v14532_v45 = vld [vmem:[%s15614_s14 + $0xe98] ss:$80 sps:$4 sm:$0xff]   ;;  %v14537_v47 = vld [vmem:[%s15614_s14 + $0xf34] ss:$80 sps:$4 sm:$0xff]  }
 0x57e   : > { %9446 = vmatprep.subr.bf16.mxu0 %v14459_v48  ;;  %9610 = vmatprep.subr.bf16.mxu1 %v14462_v36  ;;  %v14540_v48 = vld [vmem:[%s15614_s14 + $0xf3c] ss:$80 sps:$4 sm:$0xff]   ;;  %v14535_v36 = vld [vmem:[%s15614_s14 + $0xf30] ss:$80 sps:$4 sm:$0xff]  }
 0x581   : > { %9447 = vmatpush1.bf16.msra.mxu0 %v14457_v50  ;;  %9611 = vmatpush1.bf16.msra.mxu1 %v14460_v51  ;;  %v14538_v50 = vld [vmem:[%s15614_s14 + $0xf38] ss:$80 sps:$4 sm:$0xff]   ;;  %v14543_v51 = vld [vmem:[%s15614_s14 + $0xfd4] ss:$80 sps:$4 sm:$0xff]  }
 0x582   : > { %9448 = vmatprep.subr.bf16.mxu0 %v14465_v53  ;;  %9612 = vmatprep.subr.bf16.mxu1 %v14468_v54  ;;  %v14546_v53 = vld [vmem:[%s15614_s14 + $0xfdc] ss:$80 sps:$4 sm:$0xff]   ;;  %v14541_v54 = vld [vmem:[%s15614_s14 + $0xfd0] ss:$80 sps:$4 sm:$0xff]  }
 0x585   : > { %9449 = vmatpush1.bf16.msra.mxu0 %v14463_v55  ;;  %9613 = vmatpush1.bf16.msra.mxu1 %v14466_v56  ;;  %v14544_v55 = vld [vmem:[%s15614_s14 + $0xfd8] ss:$80 sps:$4 sm:$0xff]   ;;  %v14549_v56 = vld [vmem:[%s15614_s14 + $0x1074] ss:$80 sps:$4 sm:$0xff]  }
 0x586   : > { %9450 = vmatprep.subr.bf16.mxu0 %v14471_v57  ;;  %9614 = vmatprep.subr.bf16.mxu1 %v14474_v59  ;;  %v14552_v57 = vld [vmem:[%s15614_s14 + $0x107c] ss:$80 sps:$4 sm:$0xff]   ;;  %v14547_v59 = vld [vmem:[%s15614_s14 + $0x1070] ss:$80 sps:$4 sm:$0xff]  }
 0x589   : > { %9451 = vmatpush1.bf16.msra.mxu0 %v14469_v60  ;;  %9615 = vmatpush1.bf16.msra.mxu1 %v14472_v61  ;;  %v14550_v60 = vld [vmem:[%s15614_s14 + $0x1078] ss:$80 sps:$4 sm:$0xff]   ;;  %v14555_v61 = vld [vmem:[%s15614_s14 + $0x1114] ss:$80 sps:$4 sm:$0xff]  }
 0x58a   : > { %9452 = vmatprep.subr.bf16.mxu0 %v14477_v62  ;;  %9616 = vmatprep.subr.bf16.mxu1 %v14480_v63  ;;  %v14558_v62 = vld [vmem:[%s15614_s14 + $0x111c] ss:$80 sps:$4 sm:$0xff]   ;;  %v14553_v63 = vld [vmem:[%s15614_s14 + $0x1110] ss:$80 sps:$4 sm:$0xff]  }
 0x58d   : > { %9453 = vmatpush1.bf16.msra.mxu0 %v14475_v0  ;;  %9617 = vmatpush1.bf16.msra.mxu1 %v14478_v2  ;;  %v14556_v0 = vld [vmem:[%s15614_s14 + $0x1118] ss:$80 sps:$4 sm:$0xff]   ;;  %v14561_v2 = vld [vmem:[%s15614_s14 + $0x11b4] ss:$80 sps:$4 sm:$0xff]  }
 0x58e   : > { %9454 = vmatprep.subr.bf16.mxu0 %v14483_v3  ;;  %9618 = vmatprep.subr.bf16.mxu1 %v14486_v4  ;;  %v14564_v3 = vld [vmem:[%s15614_s14 + $0x11bc] ss:$80 sps:$4 sm:$0xff]   ;;  %v14559_v4 = vld [vmem:[%s15614_s14 + $0x11b0] ss:$80 sps:$4 sm:$0xff]  }
 0x591   : > { %9455 = vmatpush1.bf16.msra.mxu0 %v14481_v5  ;;  %9619 = vmatpush1.bf16.msra.mxu1 %v14484_v6  ;;  %v14562_v5 = vld [vmem:[%s15614_s14 + $0x11b8] ss:$80 sps:$4 sm:$0xff]   ;;  %v14567_v6 = vld [vmem:[%s15614_s14 + $0x1254] ss:$80 sps:$4 sm:$0xff]  }
 0x592   : > { %9465 = vmatprep.subr.bf16.mxu0 %v14489_v7  ;;  %9629 = vmatprep.subr.bf16.mxu1 %v14492_v8  ;;  %v14570_v7 = vld [vmem:[%s15614_s14 + $0x125c] ss:$80 sps:$4 sm:$0xff]   ;;  %v14565_v8 = vld [vmem:[%s15614_s14 + $0x1250] ss:$80 sps:$4 sm:$0xff]  }
 0x594   : > { %9457 = vmatmul.mubr.bf16.vlgmr.msra.gmra.mrb[12].mxu0 %v15757_v20  ;;  %9621 = vmatmul.mubr.bf16.vlgmr.msra.gmra.mrb[12].mxu1 %v15757_v20 }
 0x595   : > { %9466 = vmatpush1.bf16.msra.mxu0 %v14487_v9  ;;  %9630 = vmatpush1.bf16.msra.mxu1 %v14490_v10  ;;  %v14568_v9 = vld [vmem:[%s15614_s14 + $0x1258] ss:$80 sps:$4 sm:$0xff]   ;;  %v14573_v10 = vld [vmem:[%s15614_s14 + $0x12f4] ss:$80 sps:$4 sm:$0xff]  }
 0x596   : > { %9467 = vmatprep.subr.bf16.mxu0 %v14495_v11  ;;  %9631 = vmatprep.subr.bf16.mxu1 %v14498_v12  ;;  %v14576_v11 = vld [vmem:[%s15614_s14 + $0x12fc] ss:$80 sps:$4 sm:$0xff]   ;;  %v14571_v12 = vld [vmem:[%s15614_s14 + $0x12f0] ss:$80 sps:$4 sm:$0xff]  }
 0x597   : > { %9497 = vmatprep.mubr.bf16.mxu0 %v15770_v27  ;;  %9661 = vmatprep.mubr.bf16.mxu1 %v15770_v27 }
 0x599   : > { %9468 = vmatpush1.bf16.msra.mxu0 %v14493_v13  ;;  %9632 = vmatpush1.bf16.msra.mxu1 %v14496_v14  ;;  %v14574_v13 = vld [vmem:[%s15614_s14 + $0x12f8] ss:$80 sps:$4 sm:$0xff]   ;;  %v14579_v14 = vld [vmem:[%s15614_s14 + $0x1394] ss:$80 sps:$4 sm:$0xff]  }
 0x59a   : > { %9469 = vmatprep.subr.bf16.mxu0 %v14501_v15  ;;  %9633 = vmatprep.subr.bf16.mxu1 %v14504_v16  ;;  %v14582_v15 = vld [vmem:[%s15614_s14 + $0x139c] ss:$80 sps:$4 sm:$0xff]   ;;  %v14577_v16 = vld [vmem:[%s15614_s14 + $0x1390] ss:$80 sps:$4 sm:$0xff]  }
 0x59d   : > { %9470 = vmatpush1.bf16.msra.mxu0 %v14499_v17  ;;  %9634 = vmatpush1.bf16.msra.mxu1 %v14502_v18  ;;  %v14580_v17 = vld [vmem:[%s15614_s14 + $0x1398] ss:$80 sps:$4 sm:$0xff]   ;;  %v14585_v18 = vld [vmem:[%s15614_s14 + $0x1434] ss:$80 sps:$4 sm:$0xff]  }
 0x59e   : > { %9471 = vmatprep.subr.bf16.mxu0 %v14507_v19  ;;  %9635 = vmatprep.subr.bf16.mxu1 %v14510_v21  ;;  %v14588_v19 = vld [vmem:[%s15614_s14 + $0x143c] ss:$80 sps:$4 sm:$0xff]   ;;  %v14583_v21 = vld [vmem:[%s15614_s14 + $0x1430] ss:$80 sps:$4 sm:$0xff]  }
 0x5a1   : > { %9472 = vmatpush1.bf16.msra.mxu0 %v14505_v22  ;;  %9636 = vmatpush1.bf16.msra.mxu1 %v14508_v23  ;;  %v14586_v22 = vld [vmem:[%s15614_s14 + $0x1438] ss:$80 sps:$4 sm:$0xff]   ;;  %v14591_v23 = vld [vmem:[%s15614_s14 + $0x14d4] ss:$80 sps:$4 sm:$0xff]  }
 0x5a2   : > { %9473 = vmatprep.subr.bf16.mxu0 %v14513_v24  ;;  %9637 = vmatprep.subr.bf16.mxu1 %v14516_v28  ;;  %v14594_v24 = vld [vmem:[%s15614_s14 + $0x14dc] ss:$80 sps:$4 sm:$0xff]   ;;  %v14589_v28 = vld [vmem:[%s15614_s14 + $0x14d0] ss:$80 sps:$4 sm:$0xff]  }
 0x5a5   : > { %9474 = vmatpush1.bf16.msra.mxu0 %v14511_v29  ;;  %9638 = vmatpush1.bf16.msra.mxu1 %v14514_v30  ;;  %v14592_v29 = vld [vmem:[%s15614_s14 + $0x14d8] ss:$80 sps:$4 sm:$0xff]   ;;  %v14597_v30 = vld [vmem:[%s15614_s14 + $0x1574] ss:$80 sps:$4 sm:$0xff]  }
 0x5a6   : > { %9475 = vmatprep.subr.bf16.mxu0 %v14519_v31  ;;  %9639 = vmatprep.subr.bf16.mxu1 %v14522_v33  ;;  %v14600_v31 = vld [vmem:[%s15614_s14 + $0x157c] ss:$80 sps:$4 sm:$0xff]   ;;  %v14595_v33 = vld [vmem:[%s15614_s14 + $0x1570] ss:$80 sps:$4 sm:$0xff]  }
 0x5a9   : > { %9476 = vmatpush1.bf16.msra.mxu0 %v14517_v34  ;;  %9640 = vmatpush1.bf16.msra.mxu1 %v14520_v35  ;;  %v14598_v34 = vld [vmem:[%s15614_s14 + $0x1578] ss:$80 sps:$4 sm:$0xff]   ;;  %v14603_v35 = vld [vmem:[%s15614_s14 + $0x1614] ss:$80 sps:$4 sm:$0xff]  }
 0x5aa   : > { %9477 = vmatprep.subr.bf16.mxu0 %v14525_v37  ;;  %9641 = vmatprep.subr.bf16.mxu1 %v14528_v38  ;;  %v14606_v37 = vld [vmem:[%s15614_s14 + $0x161c] ss:$80 sps:$4 sm:$0xff]   ;;  %v14601_v38 = vld [vmem:[%s15614_s14 + $0x1610] ss:$80 sps:$4 sm:$0xff]  }
 0x5ad   : > { %9478 = vmatpush1.bf16.msra.mxu0 %v14523_v39  ;;  %9642 = vmatpush1.bf16.msra.mxu1 %v14526_v40  ;;  %v14604_v39 = vld [vmem:[%s15614_s14 + $0x1618] ss:$80 sps:$4 sm:$0xff]   ;;  %v14609_v40 = vld [vmem:[%s15614_s14 + $0x16b4] ss:$80 sps:$4 sm:$0xff]  }
 0x5ae   : > { %9479 = vmatprep.subr.bf16.mxu0 %v14531_v41  ;;  %9643 = vmatprep.subr.bf16.mxu1 %v14534_v42  ;;  %v14612_v41 = vld [vmem:[%s15614_s14 + $0x16bc] ss:$80 sps:$4 sm:$0xff]   ;;  %v14607_v42 = vld [vmem:[%s15614_s14 + $0x16b0] ss:$80 sps:$4 sm:$0xff]  }
 0x5b1   : > { %9480 = vmatpush1.bf16.msra.mxu0 %v14529_v43  ;;  %9644 = vmatpush1.bf16.msra.mxu1 %v14532_v45  ;;  %v14610_v43 = vld [vmem:[%s15614_s14 + $0x16b8] ss:$80 sps:$4 sm:$0xff]   ;;  %v14615_v45 = vld [vmem:[%s15614_s14 + $0x1754] ss:$80 sps:$4 sm:$0xff]  }
 0x5b2   : > { %9481 = vmatprep.subr.bf16.mxu0 %v14537_v47  ;;  %9645 = vmatprep.subr.bf16.mxu1 %v14540_v48  ;;  %v14618_v47 = vld [vmem:[%s15614_s14 + $0x175c] ss:$80 sps:$4 sm:$0xff]   ;;  %v14613_v48 = vld [vmem:[%s15614_s14 + $0x1750] ss:$80 sps:$4 sm:$0xff]  }
 0x5b5   : > { %9482 = vmatpush1.bf16.msra.mxu0 %v14535_v36  ;;  %9646 = vmatpush1.bf16.msra.mxu1 %v14538_v50  ;;  %v14616_v36 = vld [vmem:[%s15614_s14 + $0x1758] ss:$80 sps:$4 sm:$0xff]   ;;  %v14621_v50 = vld [vmem:[%s15614_s14 + $0x17f4] ss:$80 sps:$4 sm:$0xff]  }
 0x5b6   : > { %9483 = vmatprep.subr.bf16.mxu0 %v14543_v51  ;;  %9647 = vmatprep.subr.bf16.mxu1 %v14546_v53  ;;  %v14624_v51 = vld [vmem:[%s15614_s14 + $0x17fc] ss:$80 sps:$4 sm:$0xff]   ;;  %v14619_v53 = vld [vmem:[%s15614_s14 + $0x17f0] ss:$80 sps:$4 sm:$0xff]  }
 0x5b9   : > { %9484 = vmatpush1.bf16.msra.mxu0 %v14541_v54  ;;  %9648 = vmatpush1.bf16.msra.mxu1 %v14544_v55  ;;  %v14622_v54 = vld [vmem:[%s15614_s14 + $0x17f8] ss:$80 sps:$4 sm:$0xff]   ;;  %v14627_v55 = vld [vmem:[%s15614_s14 + $0x1894] ss:$80 sps:$4 sm:$0xff]  }
 0x5ba   : > { %9485 = vmatprep.subr.bf16.mxu0 %v14549_v56  ;;  %9649 = vmatprep.subr.bf16.mxu1 %v14552_v57  ;;  %v14630_v56 = vld [vmem:[%s15614_s14 + $0x189c] ss:$80 sps:$4 sm:$0xff]   ;;  %v14625_v57 = vld [vmem:[%s15614_s14 + $0x1890] ss:$80 sps:$4 sm:$0xff]  }
 0x5bd   : > { %9486 = vmatpush1.bf16.msra.mxu0 %v14547_v59  ;;  %9650 = vmatpush1.bf16.msra.mxu1 %v14550_v60  ;;  %v14628_v59 = vld [vmem:[%s15614_s14 + $0x1898] ss:$80 sps:$4 sm:$0xff]   ;;  %v14633_v60 = vld [vmem:[%s15614_s14 + $0x1934] ss:$80 sps:$4 sm:$0xff]  }
 0x5be   : > { %9487 = vmatprep.subr.bf16.mxu0 %v14555_v61  ;;  %9651 = vmatprep.subr.bf16.mxu1 %v14558_v62  ;;  %v14636_v61 = vld [vmem:[%s15614_s14 + $0x193c] ss:$80 sps:$4 sm:$0xff]   ;;  %v14631_v62 = vld [vmem:[%s15614_s14 + $0x1930] ss:$80 sps:$4 sm:$0xff]  }
 0x5c1   : > { %9488 = vmatpush1.bf16.msra.mxu0 %v14553_v63  ;;  %9652 = vmatpush1.bf16.msra.mxu1 %v14556_v0  ;;  %v14634_v63 = vld [vmem:[%s15614_s14 + $0x1938] ss:$80 sps:$4 sm:$0xff]   ;;  %v14639_v0 = vld [vmem:[%s15614_s14 + $0x19d4] ss:$80 sps:$4 sm:$0xff]  }
 0x5c2   : > { %9489 = vmatprep.subr.bf16.mxu0 %v14561_v2  ;;  %9653 = vmatprep.subr.bf16.mxu1 %v14564_v3  ;;  %v14642_v2 = vld [vmem:[%s15614_s14 + $0x19dc] ss:$80 sps:$4 sm:$0xff]   ;;  %v14637_v3 = vld [vmem:[%s15614_s14 + $0x19d0] ss:$80 sps:$4 sm:$0xff]  }
 0x5c5   : > { %9490 = vmatpush1.bf16.msra.mxu0 %v14559_v4  ;;  %9654 = vmatpush1.bf16.msra.mxu1 %v14562_v5  ;;  %v14640_v4 = vld [vmem:[%s15614_s14 + $0x19d8] ss:$80 sps:$4 sm:$0xff]   ;;  %v14645_v5 = vld [vmem:[%s15614_s14 + $0x1a74] ss:$80 sps:$4 sm:$0xff]  }
 0x5c6   : > { %9491 = vmatprep.subr.bf16.mxu0 %v14567_v6  ;;  %9655 = vmatprep.subr.bf16.mxu1 %v14570_v7  ;;  %v14648_v6 = vld [vmem:[%s15614_s14 + $0x1a7c] ss:$80 sps:$4 sm:$0xff]   ;;  %v14643_v7 = vld [vmem:[%s15614_s14 + $0x1a70] ss:$80 sps:$4 sm:$0xff]  }
 0x5c9   : > { %9492 = vmatpush1.bf16.msra.mxu0 %v14565_v8  ;;  %9656 = vmatpush1.bf16.msra.mxu1 %v14568_v9  ;;  %v14646_v8 = vld [vmem:[%s15614_s14 + $0x1a78] ss:$80 sps:$4 sm:$0xff]   ;;  %v14651_v9 = vld [vmem:[%s15614_s14 + $0x1b14] ss:$80 sps:$4 sm:$0xff]  }
 0x5ca   : > { %9493 = vmatprep.subr.bf16.mxu0 %v14573_v10  ;;  %9657 = vmatprep.subr.bf16.mxu1 %v14576_v11  ;;  %v14654_v10 = vld [vmem:[%s15614_s14 + $0x1b1c] ss:$80 sps:$4 sm:$0xff]   ;;  %v14649_v11 = vld [vmem:[%s15614_s14 + $0x1b10] ss:$80 sps:$4 sm:$0xff]  }
 0x5cd   : > { %9494 = vmatpush1.bf16.msra.mxu0 %v14571_v12  ;;  %9658 = vmatpush1.bf16.msra.mxu1 %v14574_v13  ;;  %v14652_v12 = vld [vmem:[%s15614_s14 + $0x1b18] ss:$80 sps:$4 sm:$0xff]   ;;  %v14657_v13 = vld [vmem:[%s15614_s14 + $0x1bb4] ss:$80 sps:$4 sm:$0xff]  }
 0x5ce   : > { %9495 = vmatprep.subr.bf16.mxu0 %v14579_v14  ;;  %9659 = vmatprep.subr.bf16.mxu1 %v14582_v15  ;;  %v14660_v14 = vld [vmem:[%s15614_s14 + $0x1bbc] ss:$80 sps:$4 sm:$0xff]   ;;  %v14655_v15 = vld [vmem:[%s15614_s14 + $0x1bb0] ss:$80 sps:$4 sm:$0xff]  }
 0x5d1   : > { %9496 = vmatpush1.bf16.msra.mxu0 %v14577_v16  ;;  %9660 = vmatpush1.bf16.msra.mxu1 %v14580_v17  ;;  %v14658_v16 = vld [vmem:[%s15614_s14 + $0x1bb8] ss:$80 sps:$4 sm:$0xff]   ;;  %v14663_v17 = vld [vmem:[%s15614_s14 + $0x1c54] ss:$80 sps:$4 sm:$0xff]  }
 0x5d2   : > { %9506 = vmatprep.subr.bf16.mxu0 %v14585_v18  ;;  %9670 = vmatprep.subr.bf16.mxu1 %v14588_v19  ;;  %v14666_v18 = vld [vmem:[%s15614_s14 + $0x1c5c] ss:$80 sps:$4 sm:$0xff]   ;;  %v14661_v19 = vld [vmem:[%s15614_s14 + $0x1c50] ss:$80 sps:$4 sm:$0xff]  }
 0x5d4   : > { %9498 = vmatmul.mubr.bf16.vlgmr.msra.gmra.mrb[12].mxu0 %v15839_v32  ;;  %9662 = vmatmul.mubr.bf16.vlgmr.msra.gmra.mrb[12].mxu1 %v15839_v32 }
 0x5d5   : > { %9507 = vmatpush1.bf16.msra.mxu0 %v14583_v21  ;;  %9671 = vmatpush1.bf16.msra.mxu1 %v14586_v22  ;;  %v14664_v21 = vld [vmem:[%s15614_s14 + $0x1c58] ss:$80 sps:$4 sm:$0xff]   ;;  %v14669_v22 = vld [vmem:[%s15614_s14 + $0x1cf4] ss:$80 sps:$4 sm:$0xff]  }
 0x5d6   : > { %9508 = vmatprep.subr.bf16.mxu0 %v14591_v23  ;;  %9672 = vmatprep.subr.bf16.mxu1 %v14594_v24  ;;  %v14672_v23 = vld [vmem:[%s15614_s14 + $0x1cfc] ss:$80 sps:$4 sm:$0xff]   ;;  %v14667_v24 = vld [vmem:[%s15614_s14 + $0x1cf0] ss:$80 sps:$4 sm:$0xff]  }
 0x5d7   : > { %9538 = vmatprep.mubr.bf16.mxu0 %v15763_v25  ;;  %9702 = vmatprep.mubr.bf16.mxu1 %v15763_v25 }
 0x5d9   : > { %9509 = vmatpush1.bf16.msra.mxu0 %v14589_v28  ;;  %9673 = vmatpush1.bf16.msra.mxu1 %v14592_v29  ;;  %v14670_v28 = vld [vmem:[%s15614_s14 + $0x1cf8] ss:$80 sps:$4 sm:$0xff]   ;;  %v14675_v29 = vld [vmem:[%s15614_s14 + $0x1d94] ss:$80 sps:$4 sm:$0xff]  }
 0x5da   : > { %9510 = vmatprep.subr.bf16.mxu0 %v14597_v30  ;;  %9674 = vmatprep.subr.bf16.mxu1 %v14600_v31  ;;  %v14678_v30 = vld [vmem:[%s15614_s14 + $0x1d9c] ss:$80 sps:$4 sm:$0xff]   ;;  %v14673_v31 = vld [vmem:[%s15614_s14 + $0x1d90] ss:$80 sps:$4 sm:$0xff]  }
 0x5dd   : > { %9511 = vmatpush1.bf16.msra.mxu0 %v14595_v33  ;;  %9675 = vmatpush1.bf16.msra.mxu1 %v14598_v34  ;;  %v14676_v33 = vld [vmem:[%s15614_s14 + $0x1d98] ss:$80 sps:$4 sm:$0xff]   ;;  %v14681_v34 = vld [vmem:[%s15614_s14 + $0x1e34] ss:$80 sps:$4 sm:$0xff]  }
 0x5de   : > { %9512 = vmatprep.subr.bf16.mxu0 %v14603_v35  ;;  %9676 = vmatprep.subr.bf16.mxu1 %v14606_v37  ;;  %v14684_v35 = vld [vmem:[%s15614_s14 + $0x1e3c] ss:$80 sps:$4 sm:$0xff]   ;;  %v14679_v37 = vld [vmem:[%s15614_s14 + $0x1e30] ss:$80 sps:$4 sm:$0xff]  }
 0x5e1   : > { %9513 = vmatpush1.bf16.msra.mxu0 %v14601_v38  ;;  %9677 = vmatpush1.bf16.msra.mxu1 %v14604_v39  ;;  %v14682_v38 = vld [vmem:[%s15614_s14 + $0x1e38] ss:$80 sps:$4 sm:$0xff]   ;;  %v14687_v39 = vld [vmem:[%s15614_s14 + $0x1ed4] ss:$80 sps:$4 sm:$0xff]  }
 0x5e2   : > { %9514 = vmatprep.subr.bf16.mxu0 %v14609_v40  ;;  %9678 = vmatprep.subr.bf16.mxu1 %v14612_v41  ;;  %v14690_v40 = vld [vmem:[%s15614_s14 + $0x1edc] ss:$80 sps:$4 sm:$0xff]   ;;  %v14685_v41 = vld [vmem:[%s15614_s14 + $0x1ed0] ss:$80 sps:$4 sm:$0xff]  }
 0x5e5   : > { %9515 = vmatpush1.bf16.msra.mxu0 %v14607_v42  ;;  %9679 = vmatpush1.bf16.msra.mxu1 %v14610_v43  ;;  %v14688_v42 = vld [vmem:[%s15614_s14 + $0x1ed8] ss:$80 sps:$4 sm:$0xff]   ;;  %v14693_v43 = vld [vmem:[%s15614_s14 + $0x1f74] ss:$80 sps:$4 sm:$0xff]  }
 0x5e6   : > { %9516 = vmatprep.subr.bf16.mxu0 %v14615_v45  ;;  %9680 = vmatprep.subr.bf16.mxu1 %v14618_v47  ;;  %v14696_v45 = vld [vmem:[%s15614_s14 + $0x1f7c] ss:$80 sps:$4 sm:$0xff]   ;;  %v14691_v47 = vld [vmem:[%s15614_s14 + $0x1f70] ss:$80 sps:$4 sm:$0xff]  }
 0x5e9   : > { %9517 = vmatpush1.bf16.msra.mxu0 %v14613_v48  ;;  %9681 = vmatpush1.bf16.msra.mxu1 %v14616_v36  ;;  %v14694_v48 = vld [vmem:[%s15614_s14 + $0x1f78] ss:$80 sps:$4 sm:$0xff]   ;;  %v14699_v36 = vld [vmem:[%s15614_s14 + $0x2014] ss:$80 sps:$4 sm:$0xff]  }
 0x5ea   : > { %9518 = vmatprep.subr.bf16.mxu0 %v14621_v50  ;;  %9682 = vmatprep.subr.bf16.mxu1 %v14624_v51  ;;  %v14702_v50 = vld [vmem:[%s15614_s14 + $0x201c] ss:$80 sps:$4 sm:$0xff]   ;;  %v14697_v51 = vld [vmem:[%s15614_s14 + $0x2010] ss:$80 sps:$4 sm:$0xff]  }
 0x5ed   : > { %9519 = vmatpush1.bf16.msra.mxu0 %v14619_v53  ;;  %9683 = vmatpush1.bf16.msra.mxu1 %v14622_v54  ;;  %v14700_v53 = vld [vmem:[%s15614_s14 + $0x2018] ss:$80 sps:$4 sm:$0xff]   ;;  %v14705_v54 = vld [vmem:[%s15614_s14 + $0x20b4] ss:$80 sps:$4 sm:$0xff]  }
 0x5ee   : > { %9520 = vmatprep.subr.bf16.mxu0 %v14627_v55  ;;  %9684 = vmatprep.subr.bf16.mxu1 %v14630_v56  ;;  %v14708_v55 = vld [vmem:[%s15614_s14 + $0x20bc] ss:$80 sps:$4 sm:$0xff]   ;;  %v14703_v56 = vld [vmem:[%s15614_s14 + $0x20b0] ss:$80 sps:$4 sm:$0xff]  }
 0x5f1   : > { %9521 = vmatpush1.bf16.msra.mxu0 %v14625_v57  ;;  %9685 = vmatpush1.bf16.msra.mxu1 %v14628_v59  ;;  %v14706_v57 = vld [vmem:[%s15614_s14 + $0x20b8] ss:$80 sps:$4 sm:$0xff]   ;;  %v14711_v59 = vld [vmem:[%s15614_s14 + $0x2154] ss:$80 sps:$4 sm:$0xff]  }
 0x5f2   : > { %9522 = vmatprep.subr.bf16.mxu0 %v14633_v60  ;;  %9686 = vmatprep.subr.bf16.mxu1 %v14636_v61  ;;  %v14714_v60 = vld [vmem:[%s15614_s14 + $0x215c] ss:$80 sps:$4 sm:$0xff]   ;;  %v14709_v61 = vld [vmem:[%s15614_s14 + $0x2150] ss:$80 sps:$4 sm:$0xff]  }
 0x5f5   : > { %9523 = vmatpush1.bf16.msra.mxu0 %v14631_v62  ;;  %9687 = vmatpush1.bf16.msra.mxu1 %v14634_v63  ;;  %v14712_v62 = vld [vmem:[%s15614_s14 + $0x2158] ss:$80 sps:$4 sm:$0xff]   ;;  %v14717_v63 = vld [vmem:[%s15614_s14 + $0x21f4] ss:$80 sps:$4 sm:$0xff]  }
 0x5f6   : > { %9524 = vmatprep.subr.bf16.mxu0 %v14639_v0  ;;  %9688 = vmatprep.subr.bf16.mxu1 %v14642_v2  ;;  %v14720_v0 = vld [vmem:[%s15614_s14 + $0x21fc] ss:$80 sps:$4 sm:$0xff]  }
 0x5f9   : > { %9525 = vmatpush1.bf16.msra.mxu0 %v14637_v3  ;;  %9689 = vmatpush1.bf16.msra.mxu1 %v14640_v4 }
 0x5fa   : > { %9526 = vmatprep.subr.bf16.mxu0 %v14645_v5  ;;  %9690 = vmatprep.subr.bf16.mxu1 %v14648_v6 }
 0x5fd   : > { %9527 = vmatpush1.bf16.msra.mxu0 %v14643_v7  ;;  %9691 = vmatpush1.bf16.msra.mxu1 %v14646_v8 }
 0x5fe   : > { %9528 = vmatprep.subr.bf16.mxu0 %v14651_v9  ;;  %9692 = vmatprep.subr.bf16.mxu1 %v14654_v10  ;;  %v14715_v10 = vld [vmem:[%s15614_s14 + $0x21f0] ss:$80 sps:$4 sm:$0xff]  }
 0x601   : > { %9529 = vmatpush1.bf16.msra.mxu0 %v14649_v11  ;;  %9693 = vmatpush1.bf16.msra.mxu1 %v14652_v12  ;;  %v14718_v11 = vld [vmem:[%s15614_s14 + $0x21f8] ss:$80 sps:$4 sm:$0xff]  }
 0x602   : > { %9530 = vmatprep.subr.bf16.mxu0 %v14657_v13  ;;  %9694 = vmatprep.subr.bf16.mxu1 %v14660_v14  ;;  %v14723_v14 = vld [vmem:[%s15614_s14 + $0x2294] ss:$80 sps:$4 sm:$0xff]  }
 0x605   : > { %9531 = vmatpush1.bf16.msra.mxu0 %v14655_v15  ;;  %9695 = vmatpush1.bf16.msra.mxu1 %v14658_v16  ;;  %v14726_v15 = vld [vmem:[%s15614_s14 + $0x229c] ss:$80 sps:$4 sm:$0xff]  }
 0x606   : > { %9532 = vmatprep.subr.bf16.mxu0 %v14663_v17  ;;  %9696 = vmatprep.subr.bf16.mxu1 %v14666_v18 }
 0x609   : > { %9533 = vmatpush1.bf16.msra.mxu0 %v14661_v19  ;;  %9697 = vmatpush1.bf16.msra.mxu1 %v14664_v21  ;;  %v14721_v19 = vld [vmem:[%s15614_s14 + $0x2290] ss:$80 sps:$4 sm:$0xff]   ;;  %v14724_v21 = vld [vmem:[%s15614_s14 + $0x2298] ss:$80 sps:$4 sm:$0xff]  }
 0x60a   : > { %9534 = vmatprep.subr.bf16.mxu0 %v14669_v22  ;;  %9698 = vmatprep.subr.bf16.mxu1 %v14672_v23  ;;  %v14729_v22 = vld [vmem:[%s15614_s14 + $0x2334] ss:$80 sps:$4 sm:$0xff]   ;;  %v14732_v23 = vld [vmem:[%s15614_s14 + $0x233c] ss:$80 sps:$4 sm:$0xff]  }
 0x60d   : > { %9535 = vmatpush1.bf16.msra.mxu0 %v14667_v24  ;;  %9699 = vmatpush1.bf16.msra.mxu1 %v14670_v28  ;;  %v14727_v24 = vld [vmem:[%s15614_s14 + $0x2330] ss:$80 sps:$4 sm:$0xff]   ;;  %v14730_v28 = vld [vmem:[%s15614_s14 + $0x2338] ss:$80 sps:$4 sm:$0xff]  }
 0x60e   : > { %9536 = vmatprep.subr.bf16.mxu0 %v14675_v29  ;;  %9700 = vmatprep.subr.bf16.mxu1 %v14678_v30  ;;  %v14735_v29 = vld [vmem:[%s15614_s14 + $0x23d4] ss:$80 sps:$4 sm:$0xff]   ;;  %v14738_v30 = vld [vmem:[%s15614_s14 + $0x23dc] ss:$80 sps:$4 sm:$0xff]  }
 0x611   : > { %9537 = vmatpush1.bf16.msra.mxu0 %v14673_v31  ;;  %9701 = vmatpush1.bf16.msra.mxu1 %v14676_v33  ;;  %v14733_v31 = vld [vmem:[%s15614_s14 + $0x23d0] ss:$80 sps:$4 sm:$0xff]   ;;  %v14736_v33 = vld [vmem:[%s15614_s14 + $0x23d8] ss:$80 sps:$4 sm:$0xff]  }
 0x612   : > { %9547 = vmatprep.subr.bf16.mxu0 %v14681_v34  ;;  %9711 = vmatprep.subr.bf16.mxu1 %v14684_v35  ;;  %v14741_v34 = vld [vmem:[%s15614_s14 + $0x2474] ss:$80 sps:$4 sm:$0xff]   ;;  %v14744_v35 = vld [vmem:[%s15614_s14 + $0x247c] ss:$80 sps:$4 sm:$0xff]  }
 0x614   : > { %9539 = vmatmul.mubr.bf16.vlgmr.msra.gmra.mrb[12].mxu0 %v15766_v26  ;;  %9703 = vmatmul.mubr.bf16.vlgmr.msra.gmra.mrb[12].mxu1 %v15766_v26 }
 0x615   : > { %9548 = vmatpush1.bf16.msra.mxu0 %v14679_v37  ;;  %9712 = vmatpush1.bf16.msra.mxu1 %v14682_v38  ;;  %v14739_v37 = vld [vmem:[%s15614_s14 + $0x2470] ss:$80 sps:$4 sm:$0xff]   ;;  %v14742_v38 = vld [vmem:[%s15614_s14 + $0x2478] ss:$80 sps:$4 sm:$0xff]  }
 0x616   : > { %9549 = vmatprep.subr.bf16.mxu0 %v14687_v39  ;;  %9713 = vmatprep.subr.bf16.mxu1 %v14690_v40  ;;  %v14747_v39 = vld [vmem:[%s15614_s14 + $0x2514] ss:$80 sps:$4 sm:$0xff]   ;;  %v14750_v40 = vld [vmem:[%s15614_s14 + $0x251c] ss:$80 sps:$4 sm:$0xff]  }
 0x617   : > { %12971 = vmatprep.mubr.msk.bf16.mxu0 %vm8375_vm1, %v15914_v46  ;;  %12973 = vmatprep.mubr.msk.bf16.mxu1 %vm8375_vm1, %v15914_v46 }
 0x619   : > { %9550 = vmatpush1.bf16.msra.mxu0 %v14685_v41  ;;  %9714 = vmatpush1.bf16.msra.mxu1 %v14688_v42  ;;  %v14745_v41 = vld [vmem:[%s15614_s14 + $0x2510] ss:$80 sps:$4 sm:$0xff]   ;;  %v14748_v42 = vld [vmem:[%s15614_s14 + $0x2518] ss:$80 sps:$4 sm:$0xff]  }
 0x61a   : > { %9551 = vmatprep.subr.bf16.mxu0 %v14693_v43  ;;  %9715 = vmatprep.subr.bf16.mxu1 %v14696_v45  ;;  %v14753_v43 = vld [vmem:[%s15614_s14 + $0x25b4] ss:$80 sps:$4 sm:$0xff]   ;;  %v14756_v45 = vld [vmem:[%s15614_s14 + $0x25bc] ss:$80 sps:$4 sm:$0xff]  }
 0x61d   : > { %9552 = vmatpush1.bf16.msra.mxu0 %v14691_v47  ;;  %9716 = vmatpush1.bf16.msra.mxu1 %v14694_v48  ;;  %v14751_v47 = vld [vmem:[%s15614_s14 + $0x25b0] ss:$80 sps:$4 sm:$0xff]   ;;  %v14754_v48 = vld [vmem:[%s15614_s14 + $0x25b8] ss:$80 sps:$4 sm:$0xff]  }
 0x61e   : > { %9553 = vmatprep.subr.bf16.mxu0 %v14699_v36  ;;  %9717 = vmatprep.subr.bf16.mxu1 %v14702_v50  ;;  %v14759_v36 = vld [vmem:[%s15614_s14 + $0x2654] ss:$80 sps:$4 sm:$0xff]   ;;  %v14762_v50 = vld [vmem:[%s15614_s14 + $0x265c] ss:$80 sps:$4 sm:$0xff]  }
 0x621   : > { %9554 = vmatpush1.bf16.msra.mxu0 %v14697_v51  ;;  %9718 = vmatpush1.bf16.msra.mxu1 %v14700_v53  ;;  %v2064_v51 = vld [vmem:[%s15614_s14 + $0x26f0] sm:$0xff]  ;;  %v2065_v53 = vld [vmem:[%s15614_s14 + $0x26f8] sm:$0xff] }
 0x622   : > { %9555 = vmatprep.subr.bf16.mxu0 %v14705_v54  ;;  %9719 = vmatprep.subr.bf16.mxu1 %v14708_v55  ;;  %v14757_v54 = vld [vmem:[%s15614_s14 + $0x2650] ss:$80 sps:$4 sm:$0xff]   ;;  %v14760_v55 = vld [vmem:[%s15614_s14 + $0x2658] ss:$80 sps:$4 sm:$0xff]  }
 0x625   : > { %9556 = vmatpush1.bf16.msra.mxu0 %v14703_v56  ;;  %9720 = vmatpush1.bf16.msra.mxu1 %v14706_v57  ;;  %v12951_v56 = vcombine.high %v2064_v51, %v2064_v51  ;;  %v12953_v57 = vcombine.high %v2065_v53, %v2065_v53 }
 0x626   : > { %9557 = vmatprep.subr.bf16.mxu0 %v14711_v59  ;;  %9721 = vmatprep.subr.bf16.mxu1 %v14714_v60  ;;  %v12950_v59 = vcombine.low %v2064_v51, %v2064_v51  ;;  %v12952_v60 = vcombine.low %v2065_v53, %v2065_v53  ;;  %v14835_v51 = vld [vmem:[%s15614_s14 + $0x724] ss:$80 sps:$4 sm:$0xff]   ;;  %v14838_v53 = vld [vmem:[%s15614_s14 + $0x72c] ss:$80 sps:$4 sm:$0xff]  }
 0x627   : > { %v9253_v2 = vpop.f32.mrb[8].mxu0  ;;  %v9417_v3 = vpop.f32.mrb[8].mxu1 }
 0x628   : > { %v9255_v4 = vpop.f32.mrb[9].mxu0  ;;  %v9419_v5 = vpop.f32.mrb[9].mxu1 }
 0x629   : > { %v10134_v6 = vcombine.low %v9253_v2, %v9255_v4  ;;  %v10135_v7 = vcombine.low %v9417_v3, %v9419_v5  ;;  %v9257_v8 = vpop.f32.mrb[10].mxu0  ;;  %v9421_v9 = vpop.f32.mrb[10].mxu1  ;;  %9558 = vmatpush1.bf16.msra.mxu0 %v14709_v61  ;;  %9722 = vmatpush1.bf16.msra.mxu1 %v14712_v62  ;;  %v8417_v61 = vsel %vm8379_vm2, %v12950_v59, 0  ;;  %v8423_v62 = vsel %vm8379_vm2, %v12952_v60, 0  ;;  %v14767_v2 = vld [vmem:[%s15614_s14 + $0x40] ss:$80 sps:$4 sm:$0xff]  }
 0x62a   : > { %v9258_v12 = vpop.f32.mrb[11].mxu0  ;;  %v9422_v13 = vpop.f32.mrb[11].mxu1  ;;  %9559 = vmatprep.subr.bf16.mxu0 %v14717_v63  ;;  %9723 = vmatprep.subr.bf16.mxu1 %v14720_v0  ;;  %v14769_v63 = vld [vmem:[%s15614_s14 + $0x44] ss:$80 sps:$4 sm:$0xff]   ;;  %v14772_v0 = vld [vmem:[%s15614_s14 + $0x4c] ss:$80 sps:$4 sm:$0xff]  }
 0x62b   : > { %v10142_v16 = vrot.slane %v10134_v6, %v16219_v58  ;;  %v10149_v17 = vrot.slane %v10135_v7, %v16219_v58  ;;  %v14770_v3 = vld [vmem:[%s15614_s14 + $0x48] ss:$80 sps:$4 sm:$0xff]   ;;  %v14775_v4 = vld [vmem:[%s15614_s14 + $0xe4] ss:$80 sps:$4 sm:$0xff]   ;;  %v14778_v5 = vld [vmem:[%s15614_s14 + $0xec] ss:$80 sps:$4 sm:$0xff]  }
 0x62c   : > { %v14773_v6 = vld [vmem:[%s15614_s14 + $0xe0] ss:$80 sps:$4 sm:$0xff]   ;;  %v14776_v7 = vld [vmem:[%s15614_s14 + $0xe8] ss:$80 sps:$4 sm:$0xff]   ;;  %v14781_v8 = vld [vmem:[%s15614_s14 + $0x184] ss:$80 sps:$4 sm:$0xff]  }
 0x62d   : > { %v10150_v18 = vcombine.low %v10142_v16, %v10149_v17  ;;  %9560 = vmatpush1.bf16.msra.mxu0 %v14715_v10  ;;  %9724 = vmatpush1.bf16.msra.mxu1 %v14718_v11  ;;  %v14784_v9 = vld [vmem:[%s15614_s14 + $0x18c] ss:$80 sps:$4 sm:$0xff]   ;;  %v14779_v10 = vld [vmem:[%s15614_s14 + $0x180] ss:$80 sps:$4 sm:$0xff]   ;;  %v14782_v11 = vld [vmem:[%s15614_s14 + $0x188] ss:$80 sps:$4 sm:$0xff]  }
 0x62e   : > { %9561 = vmatprep.subr.bf16.mxu0 %v14723_v14  ;;  %9725 = vmatprep.subr.bf16.mxu1 %v14726_v15  ;;  %v14787_v12 = vld [vmem:[%s15614_s14 + $0x224] ss:$80 sps:$4 sm:$0xff]   ;;  %v14790_v13 = vld [vmem:[%s15614_s14 + $0x22c] ss:$80 sps:$4 sm:$0xff]   ;;  %v14785_v14 = vld [vmem:[%s15614_s14 + $0x220] ss:$80 sps:$4 sm:$0xff]  }
 0x62f   : > { %10195 = vst [vmem:[%s16232_s6 + $0x10] sm:$0xff] %v10150_v18  ;;  %v14788_v15 = vld [vmem:[%s15614_s14 + $0x228] ss:$80 sps:$4 sm:$0xff]   ;;  %v14796_v16 = vld [vmem:[%s15614_s14 + $0x2cc] ss:$80 sps:$4 sm:$0xff]  }
 0x630   : > { %v14791_v17 = vld [vmem:[%s15614_s14 + $0x2c0] ss:$80 sps:$4 sm:$0xff]   ;;  %v14794_v18 = vld [vmem:[%s15614_s14 + $0x2c8] ss:$80 sps:$4 sm:$0xff]  }
 0x631   : > { %9562 = vmatpush1.bf16.msra.mxu0 %v14721_v19  ;;  %9726 = vmatpush1.bf16.msra.mxu1 %v14724_v21  ;;  %v14799_v19 = vld [vmem:[%s15614_s14 + $0x364] ss:$80 sps:$4 sm:$0xff]   ;;  %v14802_v21 = vld [vmem:[%s15614_s14 + $0x36c] ss:$80 sps:$4 sm:$0xff]   ;;  %v14839_v59 = vld [vmem:[%s15614_s14 + $0x7c0] ss:$80 sps:$4 sm:$0xff]  }
 0x632   : > { %9563 = vmatprep.subr.bf16.mxu0 %v14729_v22  ;;  %9727 = vmatprep.subr.bf16.mxu1 %v14732_v23  ;;  %v14797_v22 = vld [vmem:[%s15614_s14 + $0x360] ss:$80 sps:$4 sm:$0xff]   ;;  %v14800_v23 = vld [vmem:[%s15614_s14 + $0x368] ss:$80 sps:$4 sm:$0xff]  }
 0x633   : > { %v14842_v60 = vld [vmem:[%s15614_s14 + $0x7c8] ss:$80 sps:$4 sm:$0xff]  }
 0x635   : > { %9564 = vmatpush1.bf16.msra.mxu0 %v14727_v24  ;;  %9728 = vmatpush1.bf16.msra.mxu1 %v14730_v28  ;;  %v14805_v24 = vld [vmem:[%s15614_s14 + $0x404] ss:$80 sps:$4 sm:$0xff]   ;;  %v14808_v28 = vld [vmem:[%s15614_s14 + $0x40c] ss:$80 sps:$4 sm:$0xff]  }
 0x636   : > { %9565 = vmatprep.subr.bf16.mxu0 %v14735_v29  ;;  %9729 = vmatprep.subr.bf16.mxu1 %v14738_v30  ;;  %v14803_v29 = vld [vmem:[%s15614_s14 + $0x400] ss:$80 sps:$4 sm:$0xff]   ;;  %v14806_v30 = vld [vmem:[%s15614_s14 + $0x408] ss:$80 sps:$4 sm:$0xff]  }
 0x639   : > { %9566 = vmatpush1.bf16.msra.mxu0 %v14733_v31  ;;  %9730 = vmatpush1.bf16.msra.mxu1 %v14736_v33  ;;  %v14811_v31 = vld [vmem:[%s15614_s14 + $0x4a4] ss:$80 sps:$4 sm:$0xff]   ;;  %v14814_v33 = vld [vmem:[%s15614_s14 + $0x4ac] ss:$80 sps:$4 sm:$0xff]  }
 0x63a   : > { %9567 = vmatprep.subr.bf16.mxu0 %v14741_v34  ;;  %9731 = vmatprep.subr.bf16.mxu1 %v14744_v35  ;;  %v14809_v34 = vld [vmem:[%s15614_s14 + $0x4a0] ss:$80 sps:$4 sm:$0xff]   ;;  %v14812_v35 = vld [vmem:[%s15614_s14 + $0x4a8] ss:$80 sps:$4 sm:$0xff]  }
 0x63d   : > { %9568 = vmatpush1.bf16.msra.mxu0 %v14739_v37  ;;  %9732 = vmatpush1.bf16.msra.mxu1 %v14742_v38  ;;  %v14817_v37 = vld [vmem:[%s15614_s14 + $0x544] ss:$80 sps:$4 sm:$0xff]   ;;  %v14820_v38 = vld [vmem:[%s15614_s14 + $0x54c] ss:$80 sps:$4 sm:$0xff]  }
 0x63e   : > { %9569 = vmatprep.subr.bf16.mxu0 %v14747_v39  ;;  %9733 = vmatprep.subr.bf16.mxu1 %v14750_v40  ;;  %v14815_v39 = vld [vmem:[%s15614_s14 + $0x540] ss:$80 sps:$4 sm:$0xff]   ;;  %v14818_v40 = vld [vmem:[%s15614_s14 + $0x548] ss:$80 sps:$4 sm:$0xff]  }
 0x641   : > { %9570 = vmatpush1.bf16.msra.mxu0 %v14745_v41  ;;  %9734 = vmatpush1.bf16.msra.mxu1 %v14748_v42  ;;  %v14823_v41 = vld [vmem:[%s15614_s14 + $0x5e4] ss:$80 sps:$4 sm:$0xff]   ;;  %v14826_v42 = vld [vmem:[%s15614_s14 + $0x5ec] ss:$80 sps:$4 sm:$0xff]  }
 0x642   : > { %9571 = vmatprep.subr.bf16.mxu0 %v14753_v43  ;;  %9735 = vmatprep.subr.bf16.mxu1 %v14756_v45  ;;  %v14821_v43 = vld [vmem:[%s15614_s14 + $0x5e0] ss:$80 sps:$4 sm:$0xff]   ;;  %v14824_v45 = vld [vmem:[%s15614_s14 + $0x5e8] ss:$80 sps:$4 sm:$0xff]  }
 0x645   : > { %9572 = vmatpush1.bf16.msra.mxu0 %v14751_v47  ;;  %9736 = vmatpush1.bf16.msra.mxu1 %v14754_v48  ;;  %v14829_v47 = vld [vmem:[%s15614_s14 + $0x684] ss:$80 sps:$4 sm:$0xff]   ;;  %v14832_v48 = vld [vmem:[%s15614_s14 + $0x68c] ss:$80 sps:$4 sm:$0xff]  }
 0x646   : > { %9573 = vmatprep.subr.bf16.mxu0 %v14759_v36  ;;  %9737 = vmatprep.subr.bf16.mxu1 %v14762_v50  ;;  %v14827_v36 = vld [vmem:[%s15614_s14 + $0x680] ss:$80 sps:$4 sm:$0xff]   ;;  %v14830_v50 = vld [vmem:[%s15614_s14 + $0x688] ss:$80 sps:$4 sm:$0xff]  }
 0x649   : > { %9574 = vmatpush1.bf16.msra.mxu0 %v14757_v54  ;;  %9738 = vmatpush1.bf16.msra.mxu1 %v14760_v55  ;;  %v14833_v54 = vld [vmem:[%s15614_s14 + $0x720] ss:$80 sps:$4 sm:$0xff]   ;;  %v14836_v55 = vld [vmem:[%s15614_s14 + $0x728] ss:$80 sps:$4 sm:$0xff]  }
 0x64a   : > { %12970 = vmatprep.subr.msk.bf16.mxu0 %vm8379_vm2, %v12951_v56  ;;  %12972 = vmatprep.subr.msk.bf16.mxu1 %vm8379_vm2, %v12953_v57  ;;  %v14841_v56 = vld [vmem:[%s15614_s14 + $0x7c4] ss:$80 sps:$4 sm:$0xff]   ;;  %v14844_v57 = vld [vmem:[%s15614_s14 + $0x7cc] ss:$80 sps:$4 sm:$0xff]  }
 0x64d   : > { %9576 = vmatpush1.bf16.msra.mxu0 %v8417_v61  ;;  %9740 = vmatpush1.bf16.msra.mxu1 %v8423_v62  ;;  %v14847_v61 = vld [vmem:[%s15614_s14 + $0x864] ss:$80 sps:$4 sm:$0xff]   ;;  %v14850_v62 = vld [vmem:[%s15614_s14 + $0x86c] ss:$80 sps:$4 sm:$0xff]  }
 0x64e   : > { %9752 = vmatprep.subr.bf16.mxu0 %v14769_v63  ;;  %9916 = vmatprep.subr.bf16.mxu1 %v14772_v0  ;;  %v14845_v63 = vld [vmem:[%s15614_s14 + $0x860] ss:$80 sps:$4 sm:$0xff]   ;;  %v14848_v0 = vld [vmem:[%s15614_s14 + $0x868] ss:$80 sps:$4 sm:$0xff]  }
 0x650   : > { %9580 = vmatmul.mubr.bf16.vlgmr.msra.gmra.mrb[12].mxu0 %v15982_v52  ;;  %9744 = vmatmul.mubr.bf16.vlgmr.msra.gmra.mrb[12].mxu1 %v15982_v52 }
 0x651   : > { %9753 = vmatpush1.bf16.msra.mxu0 %v14767_v2  ;;  %9917 = vmatpush1.bf16.msra.mxu1 %v14770_v3  ;;  %v14853_v2 = vld [vmem:[%s15614_s14 + $0x904] ss:$80 sps:$4 sm:$0xff]   ;;  %v14856_v3 = vld [vmem:[%s15614_s14 + $0x90c] ss:$80 sps:$4 sm:$0xff]  }
 0x652   : > { %9754 = vmatprep.subr.bf16.mxu0 %v14775_v4  ;;  %9918 = vmatprep.subr.bf16.mxu1 %v14778_v5  ;;  %v14851_v4 = vld [vmem:[%s15614_s14 + $0x900] ss:$80 sps:$4 sm:$0xff]   ;;  %v14854_v5 = vld [vmem:[%s15614_s14 + $0x908] ss:$80 sps:$4 sm:$0xff]  }
 0x653   : > { %9784 = vmatprep.mubr.bf16.mxu0 %v15735_v1  ;;  %9948 = vmatprep.mubr.bf16.mxu1 %v15735_v1  ;;  %v14793_v1 = vld [vmem:[%s15614_s14 + $0x2c4] ss:$80 sps:$4 sm:$0xff]  }
 0x655   : > { %9755 = vmatpush1.bf16.msra.mxu0 %v14773_v6  ;;  %9919 = vmatpush1.bf16.msra.mxu1 %v14776_v7  ;;  %v14859_v6 = vld [vmem:[%s15614_s14 + $0x9a4] ss:$80 sps:$4 sm:$0xff]   ;;  %v14862_v7 = vld [vmem:[%s15614_s14 + $0x9ac] ss:$80 sps:$4 sm:$0xff]  }
 0x656   : > { %9756 = vmatprep.subr.bf16.mxu0 %v14781_v8  ;;  %9920 = vmatprep.subr.bf16.mxu1 %v14784_v9  ;;  %v14857_v8 = vld [vmem:[%s15614_s14 + $0x9a0] ss:$80 sps:$4 sm:$0xff]   ;;  %v14860_v9 = vld [vmem:[%s15614_s14 + $0x9a8] ss:$80 sps:$4 sm:$0xff]  }
 0x659   : > { %9757 = vmatpush1.bf16.msra.mxu0 %v14779_v10  ;;  %9921 = vmatpush1.bf16.msra.mxu1 %v14782_v11  ;;  %v14865_v10 = vld [vmem:[%s15614_s14 + $0xa44] ss:$80 sps:$4 sm:$0xff]   ;;  %v14868_v11 = vld [vmem:[%s15614_s14 + $0xa4c] ss:$80 sps:$4 sm:$0xff]  }
 0x65a   : > { %9758 = vmatprep.subr.bf16.mxu0 %v14787_v12  ;;  %9922 = vmatprep.subr.bf16.mxu1 %v14790_v13  ;;  %v14863_v12 = vld [vmem:[%s15614_s14 + $0xa40] ss:$80 sps:$4 sm:$0xff]   ;;  %v14866_v13 = vld [vmem:[%s15614_s14 + $0xa48] ss:$80 sps:$4 sm:$0xff]  }
 0x65d   : > { %9759 = vmatpush1.bf16.msra.mxu0 %v14785_v14  ;;  %9923 = vmatpush1.bf16.msra.mxu1 %v14788_v15  ;;  %v14871_v14 = vld [vmem:[%s15614_s14 + $0xae4] ss:$80 sps:$4 sm:$0xff]   ;;  %v14874_v15 = vld [vmem:[%s15614_s14 + $0xaec] ss:$80 sps:$4 sm:$0xff]  }
 0x65e   : > { %9760 = vmatprep.subr.bf16.mxu0 %v14793_v1  ;;  %9924 = vmatprep.subr.bf16.mxu1 %v14796_v16  ;;  %v14869_v1 = vld [vmem:[%s15614_s14 + $0xae0] ss:$80 sps:$4 sm:$0xff]   ;;  %v14872_v16 = vld [vmem:[%s15614_s14 + $0xae8] ss:$80 sps:$4 sm:$0xff]  }
 0x661   : > { %9761 = vmatpush1.bf16.msra.mxu0 %v14791_v17  ;;  %9925 = vmatpush1.bf16.msra.mxu1 %v14794_v18  ;;  %v14877_v17 = vld [vmem:[%s15614_s14 + $0xb84] ss:$80 sps:$4 sm:$0xff]   ;;  %v14880_v18 = vld [vmem:[%s15614_s14 + $0xb8c] ss:$80 sps:$4 sm:$0xff]  }
 0x662   : > { %9762 = vmatprep.subr.bf16.mxu0 %v14799_v19  ;;  %9926 = vmatprep.subr.bf16.mxu1 %v14802_v21  ;;  %v14878_v19 = vld [vmem:[%s15614_s14 + $0xb88] ss:$80 sps:$4 sm:$0xff]   ;;  %v14883_v21 = vld [vmem:[%s15614_s14 + $0xc24] ss:$80 sps:$4 sm:$0xff]  }
 0x665   : > { %9763 = vmatpush1.bf16.msra.mxu0 %v14797_v22  ;;  %9927 = vmatpush1.bf16.msra.mxu1 %v14800_v23  ;;  %v14886_v22 = vld [vmem:[%s15614_s14 + $0xc2c] ss:$80 sps:$4 sm:$0xff]   ;;  %v14881_v23 = vld [vmem:[%s15614_s14 + $0xc20] ss:$80 sps:$4 sm:$0xff]  }
 0x666   : > { %9764 = vmatprep.subr.bf16.mxu0 %v14805_v24  ;;  %9928 = vmatprep.subr.bf16.mxu1 %v14808_v28  ;;  %v14884_v24 = vld [vmem:[%s15614_s14 + $0xc28] ss:$80 sps:$4 sm:$0xff]   ;;  %v14892_v28 = vld [vmem:[%s15614_s14 + $0xccc] ss:$80 sps:$4 sm:$0xff]  }
 0x669   : > { %9765 = vmatpush1.bf16.msra.mxu0 %v14803_v29  ;;  %9929 = vmatpush1.bf16.msra.mxu1 %v14806_v30  ;;  %v14887_v29 = vld [vmem:[%s15614_s14 + $0xcc0] ss:$80 sps:$4 sm:$0xff]   ;;  %v14890_v30 = vld [vmem:[%s15614_s14 + $0xcc8] ss:$80 sps:$4 sm:$0xff]  }
 0x66a   : > { %9766 = vmatprep.subr.bf16.mxu0 %v14811_v31  ;;  %9930 = vmatprep.subr.bf16.mxu1 %v14814_v33  ;;  %v14895_v31 = vld [vmem:[%s15614_s14 + $0xd64] ss:$80 sps:$4 sm:$0xff]   ;;  %v14898_v33 = vld [vmem:[%s15614_s14 + $0xd6c] ss:$80 sps:$4 sm:$0xff]  }
 0x66d   : > { %9767 = vmatpush1.bf16.msra.mxu0 %v14809_v34  ;;  %9931 = vmatpush1.bf16.msra.mxu1 %v14812_v35  ;;  %v14893_v34 = vld [vmem:[%s15614_s14 + $0xd60] ss:$80 sps:$4 sm:$0xff]   ;;  %v14896_v35 = vld [vmem:[%s15614_s14 + $0xd68] ss:$80 sps:$4 sm:$0xff]  }
 0x66e   : > { %9768 = vmatprep.subr.bf16.mxu0 %v14817_v37  ;;  %9932 = vmatprep.subr.bf16.mxu1 %v14820_v38  ;;  %v14901_v37 = vld [vmem:[%s15614_s14 + $0xe04] ss:$80 sps:$4 sm:$0xff]   ;;  %v14904_v38 = vld [vmem:[%s15614_s14 + $0xe0c] ss:$80 sps:$4 sm:$0xff]  }
 0x671   : > { %9769 = vmatpush1.bf16.msra.mxu0 %v14815_v39  ;;  %9933 = vmatpush1.bf16.msra.mxu1 %v14818_v40  ;;  %v14899_v39 = vld [vmem:[%s15614_s14 + $0xe00] ss:$80 sps:$4 sm:$0xff]   ;;  %v14902_v40 = vld [vmem:[%s15614_s14 + $0xe08] ss:$80 sps:$4 sm:$0xff]  }
 0x672   : > { %9770 = vmatprep.subr.bf16.mxu0 %v14823_v41  ;;  %9934 = vmatprep.subr.bf16.mxu1 %v14826_v42  ;;  %v14907_v41 = vld [vmem:[%s15614_s14 + $0xea4] ss:$80 sps:$4 sm:$0xff]   ;;  %v14910_v42 = vld [vmem:[%s15614_s14 + $0xeac] ss:$80 sps:$4 sm:$0xff]  }
 0x675   : > { %9771 = vmatpush1.bf16.msra.mxu0 %v14821_v43  ;;  %9935 = vmatpush1.bf16.msra.mxu1 %v14824_v45  ;;  %v14905_v43 = vld [vmem:[%s15614_s14 + $0xea0] ss:$80 sps:$4 sm:$0xff]   ;;  %v14908_v45 = vld [vmem:[%s15614_s14 + $0xea8] ss:$80 sps:$4 sm:$0xff]  }
 0x676   : > { %9772 = vmatprep.subr.bf16.mxu0 %v14829_v47  ;;  %9936 = vmatprep.subr.bf16.mxu1 %v14832_v48  ;;  %v14913_v47 = vld [vmem:[%s15614_s14 + $0xf44] ss:$80 sps:$4 sm:$0xff]   ;;  %v14916_v48 = vld [vmem:[%s15614_s14 + $0xf4c] ss:$80 sps:$4 sm:$0xff]  }
 0x679   : > { %9773 = vmatpush1.bf16.msra.mxu0 %v14827_v36  ;;  %9937 = vmatpush1.bf16.msra.mxu1 %v14830_v50  ;;  %v14911_v36 = vld [vmem:[%s15614_s14 + $0xf40] ss:$80 sps:$4 sm:$0xff]   ;;  %v14914_v50 = vld [vmem:[%s15614_s14 + $0xf48] ss:$80 sps:$4 sm:$0xff]  }
 0x67a   : > { %9774 = vmatprep.subr.bf16.mxu0 %v14835_v51  ;;  %9938 = vmatprep.subr.bf16.mxu1 %v14838_v53  ;;  %v14919_v51 = vld [vmem:[%s15614_s14 + $0xfe4] ss:$80 sps:$4 sm:$0xff]   ;;  %v14922_v53 = vld [vmem:[%s15614_s14 + $0xfec] ss:$80 sps:$4 sm:$0xff]  }
 0x67d   : > { %9775 = vmatpush1.bf16.msra.mxu0 %v14833_v54  ;;  %9939 = vmatpush1.bf16.msra.mxu1 %v14836_v55  ;;  %v14917_v54 = vld [vmem:[%s15614_s14 + $0xfe0] ss:$80 sps:$4 sm:$0xff]   ;;  %v14920_v55 = vld [vmem:[%s15614_s14 + $0xfe8] ss:$80 sps:$4 sm:$0xff]  }
 0x67e   : > { %9776 = vmatprep.subr.bf16.mxu0 %v14841_v56  ;;  %9940 = vmatprep.subr.bf16.mxu1 %v14844_v57  ;;  %v14925_v56 = vld [vmem:[%s15614_s14 + $0x1084] ss:$80 sps:$4 sm:$0xff]   ;;  %v14928_v57 = vld [vmem:[%s15614_s14 + $0x108c] ss:$80 sps:$4 sm:$0xff]  }
 0x681   : > { %9777 = vmatpush1.bf16.msra.mxu0 %v14839_v59  ;;  %9941 = vmatpush1.bf16.msra.mxu1 %v14842_v60  ;;  %v14923_v59 = vld [vmem:[%s15614_s14 + $0x1080] ss:$80 sps:$4 sm:$0xff]   ;;  %v14926_v60 = vld [vmem:[%s15614_s14 + $0x1088] ss:$80 sps:$4 sm:$0xff]  }
 0x682   : > { %9778 = vmatprep.subr.bf16.mxu0 %v14847_v61  ;;  %9942 = vmatprep.subr.bf16.mxu1 %v14850_v62  ;;  %v14931_v61 = vld [vmem:[%s15614_s14 + $0x1124] ss:$80 sps:$4 sm:$0xff]   ;;  %v14934_v62 = vld [vmem:[%s15614_s14 + $0x112c] ss:$80 sps:$4 sm:$0xff]  }
 0x685   : > { %9779 = vmatpush1.bf16.msra.mxu0 %v14845_v63  ;;  %9943 = vmatpush1.bf16.msra.mxu1 %v14848_v0  ;;  %v14929_v63 = vld [vmem:[%s15614_s14 + $0x1120] ss:$80 sps:$4 sm:$0xff]   ;;  %v14932_v0 = vld [vmem:[%s15614_s14 + $0x1128] ss:$80 sps:$4 sm:$0xff]  }
 0x686   : > { %9780 = vmatprep.subr.bf16.mxu0 %v14853_v2  ;;  %9944 = vmatprep.subr.bf16.mxu1 %v14856_v3  ;;  %v14937_v2 = vld [vmem:[%s15614_s14 + $0x11c4] ss:$80 sps:$4 sm:$0xff]   ;;  %v14940_v3 = vld [vmem:[%s15614_s14 + $0x11cc] ss:$80 sps:$4 sm:$0xff]  }
 0x689   : > { %9781 = vmatpush1.bf16.msra.mxu0 %v14851_v4  ;;  %9945 = vmatpush1.bf16.msra.mxu1 %v14854_v5  ;;  %v14935_v4 = vld [vmem:[%s15614_s14 + $0x11c0] ss:$80 sps:$4 sm:$0xff]   ;;  %v14938_v5 = vld [vmem:[%s15614_s14 + $0x11c8] ss:$80 sps:$4 sm:$0xff]  }
 0x68a   : > { %9782 = vmatprep.subr.bf16.mxu0 %v14859_v6  ;;  %9946 = vmatprep.subr.bf16.mxu1 %v14862_v7  ;;  %v14943_v6 = vld [vmem:[%s15614_s14 + $0x1264] ss:$80 sps:$4 sm:$0xff]   ;;  %v14946_v7 = vld [vmem:[%s15614_s14 + $0x126c] ss:$80 sps:$4 sm:$0xff]  }
 0x68d   : > { %9783 = vmatpush1.bf16.msra.mxu0 %v14857_v8  ;;  %9947 = vmatpush1.bf16.msra.mxu1 %v14860_v9  ;;  %v14941_v8 = vld [vmem:[%s15614_s14 + $0x1260] ss:$80 sps:$4 sm:$0xff]   ;;  %v14944_v9 = vld [vmem:[%s15614_s14 + $0x1268] ss:$80 sps:$4 sm:$0xff]  }
 0x68e   : > { %9793 = vmatprep.subr.bf16.mxu0 %v14865_v10  ;;  %9957 = vmatprep.subr.bf16.mxu1 %v14868_v11  ;;  %v14949_v10 = vld [vmem:[%s15614_s14 + $0x1304] ss:$80 sps:$4 sm:$0xff]   ;;  %v14952_v11 = vld [vmem:[%s15614_s14 + $0x130c] ss:$80 sps:$4 sm:$0xff]  }
 0x690   : > { %9785 = vmatmul.mubr.bf16.vlgmr.msra.gmra.mrb[16].mxu0 %v15757_v20  ;;  %9949 = vmatmul.mubr.bf16.vlgmr.msra.gmra.mrb[16].mxu1 %v15757_v20  ;;  %v14875_v20 = vld [vmem:[%s15614_s14 + $0xb80] ss:$80 sps:$4 sm:$0xff]  }
 0x691   : > { %9794 = vmatpush1.bf16.msra.mxu0 %v14863_v12  ;;  %9958 = vmatpush1.bf16.msra.mxu1 %v14866_v13  ;;  %v14947_v12 = vld [vmem:[%s15614_s14 + $0x1300] ss:$80 sps:$4 sm:$0xff]   ;;  %v14950_v13 = vld [vmem:[%s15614_s14 + $0x1308] ss:$80 sps:$4 sm:$0xff]  }
 0x692   : > { %9795 = vmatprep.subr.bf16.mxu0 %v14871_v14  ;;  %9959 = vmatprep.subr.bf16.mxu1 %v14874_v15  ;;  %v14955_v14 = vld [vmem:[%s15614_s14 + $0x13a4] ss:$80 sps:$4 sm:$0xff]   ;;  %v14958_v15 = vld [vmem:[%s15614_s14 + $0x13ac] ss:$80 sps:$4 sm:$0xff]  }
 0x693   : > { %9825 = vmatprep.mubr.bf16.mxu0 %v15770_v27  ;;  %9989 = vmatprep.mubr.bf16.mxu1 %v15770_v27  ;;  %v14889_v27 = vld [vmem:[%s15614_s14 + $0xcc4] ss:$80 sps:$4 sm:$0xff]  }
 0x695   : > { %9796 = vmatpush1.bf16.msra.mxu0 %v14869_v1  ;;  %9960 = vmatpush1.bf16.msra.mxu1 %v14872_v16  ;;  %v14953_v1 = vld [vmem:[%s15614_s14 + $0x13a0] ss:$80 sps:$4 sm:$0xff]   ;;  %v14956_v16 = vld [vmem:[%s15614_s14 + $0x13a8] ss:$80 sps:$4 sm:$0xff]  }
 0x696   : > { %9797 = vmatprep.subr.bf16.mxu0 %v14877_v17  ;;  %9961 = vmatprep.subr.bf16.mxu1 %v14880_v18  ;;  %v14961_v17 = vld [vmem:[%s15614_s14 + $0x1444] ss:$80 sps:$4 sm:$0xff]   ;;  %v14964_v18 = vld [vmem:[%s15614_s14 + $0x144c] ss:$80 sps:$4 sm:$0xff]  }
 0x699   : > { %9798 = vmatpush1.bf16.msra.mxu0 %v14875_v20  ;;  %9962 = vmatpush1.bf16.msra.mxu1 %v14878_v19  ;;  %v14959_v20 = vld [vmem:[%s15614_s14 + $0x1440] ss:$80 sps:$4 sm:$0xff]   ;;  %v14962_v19 = vld [vmem:[%s15614_s14 + $0x1448] ss:$80 sps:$4 sm:$0xff]  }
 0x69a   : > { %9799 = vmatprep.subr.bf16.mxu0 %v14883_v21  ;;  %9963 = vmatprep.subr.bf16.mxu1 %v14886_v22  ;;  %v14967_v21 = vld [vmem:[%s15614_s14 + $0x14e4] ss:$80 sps:$4 sm:$0xff]   ;;  %v14970_v22 = vld [vmem:[%s15614_s14 + $0x14ec] ss:$80 sps:$4 sm:$0xff]  }
 0x69d   : > { %9800 = vmatpush1.bf16.msra.mxu0 %v14881_v23  ;;  %9964 = vmatpush1.bf16.msra.mxu1 %v14884_v24  ;;  %v14965_v23 = vld [vmem:[%s15614_s14 + $0x14e0] ss:$80 sps:$4 sm:$0xff]   ;;  %v14968_v24 = vld [vmem:[%s15614_s14 + $0x14e8] ss:$80 sps:$4 sm:$0xff]  }
 0x69e   : > { %9801 = vmatprep.subr.bf16.mxu0 %v14889_v27  ;;  %9965 = vmatprep.subr.bf16.mxu1 %v14892_v28  ;;  %v14973_v27 = vld [vmem:[%s15614_s14 + $0x1584] ss:$80 sps:$4 sm:$0xff]   ;;  %v14976_v28 = vld [vmem:[%s15614_s14 + $0x158c] ss:$80 sps:$4 sm:$0xff]  }
 0x6a1   : > { %9802 = vmatpush1.bf16.msra.mxu0 %v14887_v29  ;;  %9966 = vmatpush1.bf16.msra.mxu1 %v14890_v30  ;;  %v14974_v29 = vld [vmem:[%s15614_s14 + $0x1588] ss:$80 sps:$4 sm:$0xff]   ;;  %v14979_v30 = vld [vmem:[%s15614_s14 + $0x1624] ss:$80 sps:$4 sm:$0xff]  }
 0x6a2   : > { %9803 = vmatprep.subr.bf16.mxu0 %v14895_v31  ;;  %9967 = vmatprep.subr.bf16.mxu1 %v14898_v33  ;;  %v14982_v31 = vld [vmem:[%s15614_s14 + $0x162c] ss:$80 sps:$4 sm:$0xff]   ;;  %v14977_v33 = vld [vmem:[%s15614_s14 + $0x1620] ss:$80 sps:$4 sm:$0xff]  }
 0x6a5   : > { %9804 = vmatpush1.bf16.msra.mxu0 %v14893_v34  ;;  %9968 = vmatpush1.bf16.msra.mxu1 %v14896_v35  ;;  %v14980_v34 = vld [vmem:[%s15614_s14 + $0x1628] ss:$80 sps:$4 sm:$0xff]   ;;  %v14988_v35 = vld [vmem:[%s15614_s14 + $0x16cc] ss:$80 sps:$4 sm:$0xff]  }
 0x6a6   : > { %9805 = vmatprep.subr.bf16.mxu0 %v14901_v37  ;;  %9969 = vmatprep.subr.bf16.mxu1 %v14904_v38  ;;  %v14983_v37 = vld [vmem:[%s15614_s14 + $0x16c0] ss:$80 sps:$4 sm:$0xff]   ;;  %v14986_v38 = vld [vmem:[%s15614_s14 + $0x16c8] ss:$80 sps:$4 sm:$0xff]  }
 0x6a9   : > { %9806 = vmatpush1.bf16.msra.mxu0 %v14899_v39  ;;  %9970 = vmatpush1.bf16.msra.mxu1 %v14902_v40  ;;  %v14991_v39 = vld [vmem:[%s15614_s14 + $0x1764] ss:$80 sps:$4 sm:$0xff]   ;;  %v14994_v40 = vld [vmem:[%s15614_s14 + $0x176c] ss:$80 sps:$4 sm:$0xff]  }
 0x6aa   : > { %9807 = vmatprep.subr.bf16.mxu0 %v14907_v41  ;;  %9971 = vmatprep.subr.bf16.mxu1 %v14910_v42  ;;  %v14989_v41 = vld [vmem:[%s15614_s14 + $0x1760] ss:$80 sps:$4 sm:$0xff]   ;;  %v14992_v42 = vld [vmem:[%s15614_s14 + $0x1768] ss:$80 sps:$4 sm:$0xff]  }
 0x6ad   : > { %9808 = vmatpush1.bf16.msra.mxu0 %v14905_v43  ;;  %9972 = vmatpush1.bf16.msra.mxu1 %v14908_v45  ;;  %v14997_v43 = vld [vmem:[%s15614_s14 + $0x1804] ss:$80 sps:$4 sm:$0xff]   ;;  %v15000_v45 = vld [vmem:[%s15614_s14 + $0x180c] ss:$80 sps:$4 sm:$0xff]  }
 0x6ae   : > { %9809 = vmatprep.subr.bf16.mxu0 %v14913_v47  ;;  %9973 = vmatprep.subr.bf16.mxu1 %v14916_v48  ;;  %v14995_v47 = vld [vmem:[%s15614_s14 + $0x1800] ss:$80 sps:$4 sm:$0xff]   ;;  %v14998_v48 = vld [vmem:[%s15614_s14 + $0x1808] ss:$80 sps:$4 sm:$0xff]  }
 0x6b1   : > { %9810 = vmatpush1.bf16.msra.mxu0 %v14911_v36  ;;  %9974 = vmatpush1.bf16.msra.mxu1 %v14914_v50  ;;  %v15003_v36 = vld [vmem:[%s15614_s14 + $0x18a4] ss:$80 sps:$4 sm:$0xff]   ;;  %v15006_v50 = vld [vmem:[%s15614_s14 + $0x18ac] ss:$80 sps:$4 sm:$0xff]  }
 0x6b2   : > { %9811 = vmatprep.subr.bf16.mxu0 %v14919_v51  ;;  %9975 = vmatprep.subr.bf16.mxu1 %v14922_v53  ;;  %v15001_v51 = vld [vmem:[%s15614_s14 + $0x18a0] ss:$80 sps:$4 sm:$0xff]   ;;  %v15004_v53 = vld [vmem:[%s15614_s14 + $0x18a8] ss:$80 sps:$4 sm:$0xff]  }
 0x6b5   : > { %9812 = vmatpush1.bf16.msra.mxu0 %v14917_v54  ;;  %9976 = vmatpush1.bf16.msra.mxu1 %v14920_v55  ;;  %v15009_v54 = vld [vmem:[%s15614_s14 + $0x1944] ss:$80 sps:$4 sm:$0xff]   ;;  %v15012_v55 = vld [vmem:[%s15614_s14 + $0x194c] ss:$80 sps:$4 sm:$0xff]  }
 0x6b6   : > { %9813 = vmatprep.subr.bf16.mxu0 %v14925_v56  ;;  %9977 = vmatprep.subr.bf16.mxu1 %v14928_v57  ;;  %v15007_v56 = vld [vmem:[%s15614_s14 + $0x1940] ss:$80 sps:$4 sm:$0xff]   ;;  %v15010_v57 = vld [vmem:[%s15614_s14 + $0x1948] ss:$80 sps:$4 sm:$0xff]  }
 0x6b9   : > { %9814 = vmatpush1.bf16.msra.mxu0 %v14923_v59  ;;  %9978 = vmatpush1.bf16.msra.mxu1 %v14926_v60  ;;  %v15015_v59 = vld [vmem:[%s15614_s14 + $0x19e4] ss:$80 sps:$4 sm:$0xff]   ;;  %v15018_v60 = vld [vmem:[%s15614_s14 + $0x19ec] ss:$80 sps:$4 sm:$0xff]  }
 0x6ba   : > { %9815 = vmatprep.subr.bf16.mxu0 %v14931_v61  ;;  %9979 = vmatprep.subr.bf16.mxu1 %v14934_v62  ;;  %v15013_v61 = vld [vmem:[%s15614_s14 + $0x19e0] ss:$80 sps:$4 sm:$0xff]   ;;  %v15016_v62 = vld [vmem:[%s15614_s14 + $0x19e8] ss:$80 sps:$4 sm:$0xff]  }
 0x6bd   : > { %9816 = vmatpush1.bf16.msra.mxu0 %v14929_v63  ;;  %9980 = vmatpush1.bf16.msra.mxu1 %v14932_v0  ;;  %v15021_v63 = vld [vmem:[%s15614_s14 + $0x1a84] ss:$80 sps:$4 sm:$0xff]   ;;  %v15024_v0 = vld [vmem:[%s15614_s14 + $0x1a8c] ss:$80 sps:$4 sm:$0xff]  }
 0x6be   : > { %9817 = vmatprep.subr.bf16.mxu0 %v14937_v2  ;;  %9981 = vmatprep.subr.bf16.mxu1 %v14940_v3  ;;  %v15019_v2 = vld [vmem:[%s15614_s14 + $0x1a80] ss:$80 sps:$4 sm:$0xff]   ;;  %v15022_v3 = vld [vmem:[%s15614_s14 + $0x1a88] ss:$80 sps:$4 sm:$0xff]  }
 0x6c1   : > { %9818 = vmatpush1.bf16.msra.mxu0 %v14935_v4  ;;  %9982 = vmatpush1.bf16.msra.mxu1 %v14938_v5  ;;  %v15027_v4 = vld [vmem:[%s15614_s14 + $0x1b24] ss:$80 sps:$4 sm:$0xff]   ;;  %v15030_v5 = vld [vmem:[%s15614_s14 + $0x1b2c] ss:$80 sps:$4 sm:$0xff]  }
 0x6c2   : > { %9819 = vmatprep.subr.bf16.mxu0 %v14943_v6  ;;  %9983 = vmatprep.subr.bf16.mxu1 %v14946_v7  ;;  %v15025_v6 = vld [vmem:[%s15614_s14 + $0x1b20] ss:$80 sps:$4 sm:$0xff]   ;;  %v15028_v7 = vld [vmem:[%s15614_s14 + $0x1b28] ss:$80 sps:$4 sm:$0xff]  }
 0x6c5   : > { %9820 = vmatpush1.bf16.msra.mxu0 %v14941_v8  ;;  %9984 = vmatpush1.bf16.msra.mxu1 %v14944_v9  ;;  %v15033_v8 = vld [vmem:[%s15614_s14 + $0x1bc4] ss:$80 sps:$4 sm:$0xff]   ;;  %v15036_v9 = vld [vmem:[%s15614_s14 + $0x1bcc] ss:$80 sps:$4 sm:$0xff]  }
 0x6c6   : > { %9821 = vmatprep.subr.bf16.mxu0 %v14949_v10  ;;  %9985 = vmatprep.subr.bf16.mxu1 %v14952_v11  ;;  %v15031_v10 = vld [vmem:[%s15614_s14 + $0x1bc0] ss:$80 sps:$4 sm:$0xff]   ;;  %v15034_v11 = vld [vmem:[%s15614_s14 + $0x1bc8] ss:$80 sps:$4 sm:$0xff]  }
 0x6c9   : > { %9822 = vmatpush1.bf16.msra.mxu0 %v14947_v12  ;;  %9986 = vmatpush1.bf16.msra.mxu1 %v14950_v13  ;;  %v15039_v12 = vld [vmem:[%s15614_s14 + $0x1c64] ss:$80 sps:$4 sm:$0xff]   ;;  %v15042_v13 = vld [vmem:[%s15614_s14 + $0x1c6c] ss:$80 sps:$4 sm:$0xff]  }
 0x6ca   : > { %9823 = vmatprep.subr.bf16.mxu0 %v14955_v14  ;;  %9987 = vmatprep.subr.bf16.mxu1 %v14958_v15  ;;  %v15037_v14 = vld [vmem:[%s15614_s14 + $0x1c60] ss:$80 sps:$4 sm:$0xff]   ;;  %v15040_v15 = vld [vmem:[%s15614_s14 + $0x1c68] ss:$80 sps:$4 sm:$0xff]  }
 0x6cd   : > { %9824 = vmatpush1.bf16.msra.mxu0 %v14953_v1  ;;  %9988 = vmatpush1.bf16.msra.mxu1 %v14956_v16  ;;  %v15045_v1 = vld [vmem:[%s15614_s14 + $0x1d04] ss:$80 sps:$4 sm:$0xff]   ;;  %v15048_v16 = vld [vmem:[%s15614_s14 + $0x1d0c] ss:$80 sps:$4 sm:$0xff]  }
 0x6ce   : > { %9834 = vmatprep.subr.bf16.mxu0 %v14961_v17  ;;  %9998 = vmatprep.subr.bf16.mxu1 %v14964_v18  ;;  %v15043_v17 = vld [vmem:[%s15614_s14 + $0x1d00] ss:$80 sps:$4 sm:$0xff]   ;;  %v15046_v18 = vld [vmem:[%s15614_s14 + $0x1d08] ss:$80 sps:$4 sm:$0xff]  }
 0x6d0   : > { %9826 = vmatmul.mubr.bf16.vlgmr.msra.gmra.mrb[16].mxu0 %v15839_v32  ;;  %9990 = vmatmul.mubr.bf16.vlgmr.msra.gmra.mrb[16].mxu1 %v15839_v32  ;;  %v14971_v32 = vld [vmem:[%s15614_s14 + $0x1580] ss:$80 sps:$4 sm:$0xff]  }
 0x6d1   : > { %9835 = vmatpush1.bf16.msra.mxu0 %v14959_v20  ;;  %9999 = vmatpush1.bf16.msra.mxu1 %v14962_v19  ;;  %v15051_v20 = vld [vmem:[%s15614_s14 + $0x1da4] ss:$80 sps:$4 sm:$0xff]   ;;  %v15054_v19 = vld [vmem:[%s15614_s14 + $0x1dac] ss:$80 sps:$4 sm:$0xff]  }
 0x6d2   : > { %9836 = vmatprep.subr.bf16.mxu0 %v14967_v21  ;;  %10000 = vmatprep.subr.bf16.mxu1 %v14970_v22  ;;  %v15049_v21 = vld [vmem:[%s15614_s14 + $0x1da0] ss:$80 sps:$4 sm:$0xff]   ;;  %v15052_v22 = vld [vmem:[%s15614_s14 + $0x1da8] ss:$80 sps:$4 sm:$0xff]  }
 0x6d3   : > { %9866 = vmatprep.mubr.bf16.mxu0 %v15763_v25  ;;  %10030 = vmatprep.mubr.bf16.mxu1 %v15763_v25  ;;  %v14985_v25 = vld [vmem:[%s15614_s14 + $0x16c4] ss:$80 sps:$4 sm:$0xff]  }
 0x6d5   : > { %9837 = vmatpush1.bf16.msra.mxu0 %v14965_v23  ;;  %10001 = vmatpush1.bf16.msra.mxu1 %v14968_v24  ;;  %v15057_v23 = vld [vmem:[%s15614_s14 + $0x1e44] ss:$80 sps:$4 sm:$0xff]   ;;  %v15060_v24 = vld [vmem:[%s15614_s14 + $0x1e4c] ss:$80 sps:$4 sm:$0xff]  }
 0x6d6   : > { %9838 = vmatprep.subr.bf16.mxu0 %v14973_v27  ;;  %10002 = vmatprep.subr.bf16.mxu1 %v14976_v28  ;;  %v15055_v27 = vld [vmem:[%s15614_s14 + $0x1e40] ss:$80 sps:$4 sm:$0xff]   ;;  %v15058_v28 = vld [vmem:[%s15614_s14 + $0x1e48] ss:$80 sps:$4 sm:$0xff]  }
 0x6d9   : > { %9839 = vmatpush1.bf16.msra.mxu0 %v14971_v32  ;;  %10003 = vmatpush1.bf16.msra.mxu1 %v14974_v29  ;;  %v15063_v32 = vld [vmem:[%s15614_s14 + $0x1ee4] ss:$80 sps:$4 sm:$0xff]   ;;  %v15066_v29 = vld [vmem:[%s15614_s14 + $0x1eec] ss:$80 sps:$4 sm:$0xff]  }
 0x6da   : > { %9840 = vmatprep.subr.bf16.mxu0 %v14979_v30  ;;  %10004 = vmatprep.subr.bf16.mxu1 %v14982_v31  ;;  %v15061_v30 = vld [vmem:[%s15614_s14 + $0x1ee0] ss:$80 sps:$4 sm:$0xff]   ;;  %v15064_v31 = vld [vmem:[%s15614_s14 + $0x1ee8] ss:$80 sps:$4 sm:$0xff]  }
 0x6dd   : > { %9841 = vmatpush1.bf16.msra.mxu0 %v14977_v33  ;;  %10005 = vmatpush1.bf16.msra.mxu1 %v14980_v34  ;;  %v15069_v33 = vld [vmem:[%s15614_s14 + $0x1f84] ss:$80 sps:$4 sm:$0xff]   ;;  %v15072_v34 = vld [vmem:[%s15614_s14 + $0x1f8c] ss:$80 sps:$4 sm:$0xff]  }
 0x6de   : > { %9842 = vmatprep.subr.bf16.mxu0 %v14985_v25  ;;  %10006 = vmatprep.subr.bf16.mxu1 %v14988_v35  ;;  %v15070_v25 = vld [vmem:[%s15614_s14 + $0x1f88] ss:$80 sps:$4 sm:$0xff]   ;;  %v15075_v35 = vld [vmem:[%s15614_s14 + $0x2024] ss:$80 sps:$4 sm:$0xff]  }
 0x6e1   : > { %9843 = vmatpush1.bf16.msra.mxu0 %v14983_v37  ;;  %10007 = vmatpush1.bf16.msra.mxu1 %v14986_v38  ;;  %v15078_v37 = vld [vmem:[%s15614_s14 + $0x202c] ss:$80 sps:$4 sm:$0xff]   ;;  %v15073_v38 = vld [vmem:[%s15614_s14 + $0x2020] ss:$80 sps:$4 sm:$0xff]  }
 0x6e2   : > { %9844 = vmatprep.subr.bf16.mxu0 %v14991_v39  ;;  %10008 = vmatprep.subr.bf16.mxu1 %v14994_v40  ;;  %v15076_v39 = vld [vmem:[%s15614_s14 + $0x2028] ss:$80 sps:$4 sm:$0xff]   ;;  %v15084_v40 = vld [vmem:[%s15614_s14 + $0x20cc] ss:$80 sps:$4 sm:$0xff]  }
 0x6e5   : > { %9845 = vmatpush1.bf16.msra.mxu0 %v14989_v41  ;;  %10009 = vmatpush1.bf16.msra.mxu1 %v14992_v42  ;;  %v15079_v41 = vld [vmem:[%s15614_s14 + $0x20c0] ss:$80 sps:$4 sm:$0xff]   ;;  %v15082_v42 = vld [vmem:[%s15614_s14 + $0x20c8] ss:$80 sps:$4 sm:$0xff]  }
 0x6e6   : > { %9846 = vmatprep.subr.bf16.mxu0 %v14997_v43  ;;  %10010 = vmatprep.subr.bf16.mxu1 %v15000_v45  ;;  %v15087_v43 = vld [vmem:[%s15614_s14 + $0x2164] ss:$80 sps:$4 sm:$0xff]   ;;  %v15090_v45 = vld [vmem:[%s15614_s14 + $0x216c] ss:$80 sps:$4 sm:$0xff]  }
 0x6e9   : > { %9847 = vmatpush1.bf16.msra.mxu0 %v14995_v47  ;;  %10011 = vmatpush1.bf16.msra.mxu1 %v14998_v48  ;;  %v15085_v47 = vld [vmem:[%s15614_s14 + $0x2160] ss:$80 sps:$4 sm:$0xff]   ;;  %v15088_v48 = vld [vmem:[%s15614_s14 + $0x2168] ss:$80 sps:$4 sm:$0xff]  }
 0x6ea   : > { %9848 = vmatprep.subr.bf16.mxu0 %v15003_v36  ;;  %10012 = vmatprep.subr.bf16.mxu1 %v15006_v50  ;;  %v15093_v36 = vld [vmem:[%s15614_s14 + $0x2204] ss:$80 sps:$4 sm:$0xff]   ;;  %v15096_v50 = vld [vmem:[%s15614_s14 + $0x220c] ss:$80 sps:$4 sm:$0xff]  }
 0x6ed   : > { %9849 = vmatpush1.bf16.msra.mxu0 %v15001_v51  ;;  %10013 = vmatpush1.bf16.msra.mxu1 %v15004_v53 }
 0x6ee   : > { %9850 = vmatprep.subr.bf16.mxu0 %v15009_v54  ;;  %10014 = vmatprep.subr.bf16.mxu1 %v15012_v55 }
 0x6f1   : > { %9851 = vmatpush1.bf16.msra.mxu0 %v15007_v56  ;;  %10015 = vmatpush1.bf16.msra.mxu1 %v15010_v57 }
 0x6f2   : > { %9852 = vmatprep.subr.bf16.mxu0 %v15015_v59  ;;  %10016 = vmatprep.subr.bf16.mxu1 %v15018_v60 }
 0x6f5   : > { %9853 = vmatpush1.bf16.msra.mxu0 %v15013_v61  ;;  %10017 = vmatpush1.bf16.msra.mxu1 %v15016_v62  ;;  %v15091_v61 = vld [vmem:[%s15614_s14 + $0x2200] ss:$80 sps:$4 sm:$0xff]   ;;  %v15094_v62 = vld [vmem:[%s15614_s14 + $0x2208] ss:$80 sps:$4 sm:$0xff]  }
 0x6f6   : > { %9854 = vmatprep.subr.bf16.mxu0 %v15021_v63  ;;  %10018 = vmatprep.subr.bf16.mxu1 %v15024_v0 }
 0x6f9   : > { %9855 = vmatpush1.bf16.msra.mxu0 %v15019_v2  ;;  %10019 = vmatpush1.bf16.msra.mxu1 %v15022_v3  ;;  %v15099_v2 = vld [vmem:[%s15614_s14 + $0x22a4] ss:$80 sps:$4 sm:$0xff]   ;;  %v15102_v3 = vld [vmem:[%s15614_s14 + $0x22ac] ss:$80 sps:$4 sm:$0xff]  }
 0x6fa   : > { %9856 = vmatprep.subr.bf16.mxu0 %v15027_v4  ;;  %10020 = vmatprep.subr.bf16.mxu1 %v15030_v5 }
 0x6fd   : > { %9857 = vmatpush1.bf16.msra.mxu0 %v15025_v6  ;;  %10021 = vmatpush1.bf16.msra.mxu1 %v15028_v7  ;;  %v15097_v7 = vld [vmem:[%s15614_s14 + $0x22a0] ss:$80 sps:$4 sm:$0xff]  }
 0x6fe   : > { %9858 = vmatprep.subr.bf16.mxu0 %v15033_v8  ;;  %10022 = vmatprep.subr.bf16.mxu1 %v15036_v9  ;;  %v15100_v8 = vld [vmem:[%s15614_s14 + $0x22a8] ss:$80 sps:$4 sm:$0xff]   ;;  %v15105_v9 = vld [vmem:[%s15614_s14 + $0x2344] ss:$80 sps:$4 sm:$0xff]  }
 0x701   : > { %9859 = vmatpush1.bf16.msra.mxu0 %v15031_v10  ;;  %10023 = vmatpush1.bf16.msra.mxu1 %v15034_v11  ;;  %v15108_v10 = vld [vmem:[%s15614_s14 + $0x234c] ss:$80 sps:$4 sm:$0xff]   ;;  %v15103_v11 = vld [vmem:[%s15614_s14 + $0x2340] ss:$80 sps:$4 sm:$0xff]  }
 0x702   : > { %9860 = vmatprep.subr.bf16.mxu0 %v15039_v12  ;;  %10024 = vmatprep.subr.bf16.mxu1 %v15042_v13  ;;  %v15106_v12 = vld [vmem:[%s15614_s14 + $0x2348] ss:$80 sps:$4 sm:$0xff]   ;;  %v15111_v13 = vld [vmem:[%s15614_s14 + $0x23e4] ss:$80 sps:$4 sm:$0xff]  }
 0x705   : > { %9861 = vmatpush1.bf16.msra.mxu0 %v15037_v14  ;;  %10025 = vmatpush1.bf16.msra.mxu1 %v15040_v15  ;;  %v15114_v14 = vld [vmem:[%s15614_s14 + $0x23ec] ss:$80 sps:$4 sm:$0xff]   ;;  %v15109_v15 = vld [vmem:[%s15614_s14 + $0x23e0] ss:$80 sps:$4 sm:$0xff]  }
 0x706   : > { %9862 = vmatprep.subr.bf16.mxu0 %v15045_v1  ;;  %10026 = vmatprep.subr.bf16.mxu1 %v15048_v16  ;;  %v15112_v1 = vld [vmem:[%s15614_s14 + $0x23e8] ss:$80 sps:$4 sm:$0xff]   ;;  %v15117_v16 = vld [vmem:[%s15614_s14 + $0x2484] ss:$80 sps:$4 sm:$0xff]  }
 0x709   : > { %9863 = vmatpush1.bf16.msra.mxu0 %v15043_v17  ;;  %10027 = vmatpush1.bf16.msra.mxu1 %v15046_v18  ;;  %v15120_v17 = vld [vmem:[%s15614_s14 + $0x248c] ss:$80 sps:$4 sm:$0xff]   ;;  %v15115_v18 = vld [vmem:[%s15614_s14 + $0x2480] ss:$80 sps:$4 sm:$0xff]  }
 0x70a   : > { %9864 = vmatprep.subr.bf16.mxu0 %v15051_v20  ;;  %10028 = vmatprep.subr.bf16.mxu1 %v15054_v19  ;;  %v15118_v20 = vld [vmem:[%s15614_s14 + $0x2488] ss:$80 sps:$4 sm:$0xff]   ;;  %v15123_v19 = vld [vmem:[%s15614_s14 + $0x2524] ss:$80 sps:$4 sm:$0xff]  }
 0x70d   : > { %9865 = vmatpush1.bf16.msra.mxu0 %v15049_v21  ;;  %10029 = vmatpush1.bf16.msra.mxu1 %v15052_v22  ;;  %v15126_v21 = vld [vmem:[%s15614_s14 + $0x252c] ss:$80 sps:$4 sm:$0xff]   ;;  %v15121_v22 = vld [vmem:[%s15614_s14 + $0x2520] ss:$80 sps:$4 sm:$0xff]  }
 0x70e   : > { %9875 = vmatprep.subr.bf16.mxu0 %v15057_v23  ;;  %10039 = vmatprep.subr.bf16.mxu1 %v15060_v24  ;;  %v15124_v23 = vld [vmem:[%s15614_s14 + $0x2528] ss:$80 sps:$4 sm:$0xff]   ;;  %v15129_v24 = vld [vmem:[%s15614_s14 + $0x25c4] ss:$80 sps:$4 sm:$0xff]  }
 0x710   : > { %9867 = vmatmul.mubr.bf16.vlgmr.msra.gmra.mrb[16].mxu0 %v15766_v26  ;;  %10031 = vmatmul.mubr.bf16.vlgmr.msra.gmra.mrb[16].mxu1 %v15766_v26  ;;  %v15067_v26 = vld [vmem:[%s15614_s14 + $0x1f80] ss:$80 sps:$4 sm:$0xff]  }
 0x711   : > { %9876 = vmatpush1.bf16.msra.mxu0 %v15055_v27  ;;  %10040 = vmatpush1.bf16.msra.mxu1 %v15058_v28  ;;  %v15132_v27 = vld [vmem:[%s15614_s14 + $0x25cc] ss:$80 sps:$4 sm:$0xff]   ;;  %v15127_v28 = vld [vmem:[%s15614_s14 + $0x25c0] ss:$80 sps:$4 sm:$0xff]  }
 0x712   : > { %9877 = vmatprep.subr.bf16.mxu0 %v15063_v32  ;;  %10041 = vmatprep.subr.bf16.mxu1 %v15066_v29  ;;  %v15130_v32 = vld [vmem:[%s15614_s14 + $0x25c8] ss:$80 sps:$4 sm:$0xff]   ;;  %v15135_v29 = vld [vmem:[%s15614_s14 + $0x2664] ss:$80 sps:$4 sm:$0xff]  }
 0x713   : > { %12975 = vmatprep.mubr.msk.bf16.mxu0 %vm8375_vm1, %v15914_v46  ;;  %12977 = vmatprep.mubr.msk.bf16.mxu1 %vm8375_vm1, %v15914_v46  ;;  %v15081_v46 = vld [vmem:[%s15614_s14 + $0x20c4] ss:$80 sps:$4 sm:$0xff]  }
 0x715   : > { %9878 = vmatpush1.bf16.msra.mxu0 %v15061_v30  ;;  %10042 = vmatpush1.bf16.msra.mxu1 %v15064_v31  ;;  %v15138_v30 = vld [vmem:[%s15614_s14 + $0x266c] ss:$80 sps:$4 sm:$0xff]   ;;  %v2066_v31 = vld [vmem:[%s15614_s14 + $0x2700] sm:$0xff] }
 0x716   : > { %9879 = vmatprep.subr.bf16.mxu0 %v15069_v33  ;;  %10043 = vmatprep.subr.bf16.mxu1 %v15072_v34  ;;  %v2067_v33 = vld [vmem:[%s15614_s14 + $0x2708] sm:$0xff]  ;;  %v15133_v34 = vld [vmem:[%s15614_s14 + $0x2660] ss:$80 sps:$4 sm:$0xff]  }
 0x719   : > { %9880 = vmatpush1.bf16.msra.mxu0 %v15067_v26  ;;  %10044 = vmatpush1.bf16.msra.mxu1 %v15070_v25  ;;  %v15136_v26 = vld [vmem:[%s15614_s14 + $0x2668] ss:$80 sps:$4 sm:$0xff]   ;;  %v12955_v25 = vcombine.high %v2066_v31, %v2066_v31 }
 0x71a   : > { %9881 = vmatprep.subr.bf16.mxu0 %v15075_v35  ;;  %10045 = vmatprep.subr.bf16.mxu1 %v15078_v37  ;;  %v12957_v35 = vcombine.high %v2067_v33, %v2067_v33  ;;  %v12954_v37 = vcombine.low %v2066_v31, %v2066_v31 }
 0x71d   : > { %9882 = vmatpush1.bf16.msra.mxu0 %v15073_v38  ;;  %10046 = vmatpush1.bf16.msra.mxu1 %v15076_v39  ;;  %v12956_v38 = vcombine.low %v2067_v33, %v2067_v33  ;;  %v8429_v39 = vsel %vm8379_vm2, %v12954_v37, 0 }
 0x71e   : > { %9883 = vmatprep.subr.bf16.mxu0 %v15081_v46  ;;  %10047 = vmatprep.subr.bf16.mxu1 %v15084_v40 }
 0x71f   : > { %v8435_v46 = vsel %vm8379_vm2, %v12956_v38, 0 }
 0x721   : > { %9884 = vmatpush1.bf16.msra.mxu0 %v15079_v41  ;;  %10048 = vmatpush1.bf16.msra.mxu1 %v15082_v42 }
 0x722   : > { %9885 = vmatprep.subr.bf16.mxu0 %v15087_v43  ;;  %10049 = vmatprep.subr.bf16.mxu1 %v15090_v45 }
 0x723   : > { %v9581_v51 = vpop.f32.mrb[12].mxu0  ;;  %v9745_v53 = vpop.f32.mrb[12].mxu1 }
 0x724   : > { %v9583_v54 = vpop.f32.mrb[13].mxu0  ;;  %v9747_v55 = vpop.f32.mrb[13].mxu1 }
 0x725   : > { %v10151_v56 = vcombine.low %v9581_v51, %v9583_v54  ;;  %v10152_v57 = vcombine.low %v9745_v53, %v9747_v55  ;;  %v9585_v59 = vpop.f32.mrb[14].mxu0  ;;  %v9749_v60 = vpop.f32.mrb[14].mxu1  ;;  %9886 = vmatpush1.bf16.msra.mxu0 %v15085_v47  ;;  %10050 = vmatpush1.bf16.msra.mxu1 %v15088_v48 }
 0x726   : > { %v9586_v63 = vpop.f32.mrb[15].mxu0  ;;  %v9750_v0 = vpop.f32.mrb[15].mxu1  ;;  %9887 = vmatprep.subr.bf16.mxu0 %v15093_v36  ;;  %10051 = vmatprep.subr.bf16.mxu1 %v15096_v50  ;;  %v17101_v59 = vand.u32 (!%p12979_p7), 127, %v2073_v44 }
 0x727   : > { %v10159_v4 = vrot.slane %v10151_v56, %v16219_v58  ;;  %v10166_v5 = vrot.slane %v10152_v57, %v16219_v58 }
 0x729   : > { %v10167_v6 = vcombine.low %v10159_v4, %v10166_v5  ;;  %9888 = vmatpush1.bf16.msra.mxu0 %v15091_v61  ;;  %10052 = vmatpush1.bf16.msra.mxu1 %v15094_v62 }
 0x72a   : > { %9889 = vmatprep.subr.bf16.mxu0 %v15099_v2  ;;  %10053 = vmatprep.subr.bf16.mxu1 %v15102_v3 }
 0x72b   : > { %10196 = vst [vmem:[%s16232_s6 + $0x18] sm:$0xff] %v10167_v6 }
 0x72d   : > { %9890 = vmatpush1.bf16.msra.mxu0 %v15097_v7  ;;  %10054 = vmatpush1.bf16.msra.mxu1 %v15100_v8 }
 0x72e   : > { %9891 = vmatprep.subr.bf16.mxu0 %v15105_v9  ;;  %10055 = vmatprep.subr.bf16.mxu1 %v15108_v10 }
 0x731   : > { %9892 = vmatpush1.bf16.msra.mxu0 %v15103_v11  ;;  %10056 = vmatpush1.bf16.msra.mxu1 %v15106_v12 }
 0x732   : > { %9893 = vmatprep.subr.bf16.mxu0 %v15111_v13  ;;  %10057 = vmatprep.subr.bf16.mxu1 %v15114_v14 }
 0x735   : > { %9894 = vmatpush1.bf16.msra.mxu0 %v15109_v15  ;;  %10058 = vmatpush1.bf16.msra.mxu1 %v15112_v1 }
 0x736   : > { %9895 = vmatprep.subr.bf16.mxu0 %v15117_v16  ;;  %10059 = vmatprep.subr.bf16.mxu1 %v15120_v17 }
 0x739   : > { %9896 = vmatpush1.bf16.msra.mxu0 %v15115_v18  ;;  %10060 = vmatpush1.bf16.msra.mxu1 %v15118_v20 }
 0x73a   : > { %9897 = vmatprep.subr.bf16.mxu0 %v15123_v19  ;;  %10061 = vmatprep.subr.bf16.mxu1 %v15126_v21 }
 0x73d   : > { %9898 = vmatpush1.bf16.msra.mxu0 %v15121_v22  ;;  %10062 = vmatpush1.bf16.msra.mxu1 %v15124_v23 }
 0x73e   : > { %9899 = vmatprep.subr.bf16.mxu0 %v15129_v24  ;;  %10063 = vmatprep.subr.bf16.mxu1 %v15132_v27 }
 0x741   : > { %9900 = vmatpush1.bf16.msra.mxu0 %v15127_v28  ;;  %10064 = vmatpush1.bf16.msra.mxu1 %v15130_v32 }
 0x742   : > { %9901 = vmatprep.subr.bf16.mxu0 %v15135_v29  ;;  %10065 = vmatprep.subr.bf16.mxu1 %v15138_v30 }
 0x745   : > { %9902 = vmatpush1.bf16.msra.mxu0 %v15133_v34  ;;  %10066 = vmatpush1.bf16.msra.mxu1 %v15136_v26 }
 0x746   : > { %12974 = vmatprep.subr.msk.bf16.mxu0 %vm8379_vm2, %v12955_v25  ;;  %12976 = vmatprep.subr.msk.bf16.mxu1 %vm8379_vm2, %v12957_v35 }
 0x749   : > { %9904 = vmatpush1.bf16.msra.mxu0 %v8429_v39  ;;  %10068 = vmatpush1.bf16.msra.mxu1 %v8435_v46 }
 0x74c   : > { %9908 = vmatmul.mubr.bf16.vlgmr.msra.gmra.mrb[16].mxu0 %v15982_v52  ;;  %10072 = vmatmul.mubr.bf16.vlgmr.msra.gmra.mrb[16].mxu1 %v15982_v52 }
 0x81f   : > { %v9909_v40 = vpop.f32.mrb[16].mxu0  ;;  %v10073_v41 = vpop.f32.mrb[16].mxu1 }
 0x820   : > { %v9911_v42 = vpop.f32.mrb[17].mxu0  ;;  %v10075_v43 = vpop.f32.mrb[17].mxu1 }
 0x821   : > { %v10168_v45 = vcombine.low %v9909_v40, %v9911_v42  ;;  %v10169_v47 = vcombine.low %v10073_v41, %v10075_v43  ;;  %v9913_v48 = vpop.f32.mrb[18].mxu0  ;;  %v10077_v36 = vpop.f32.mrb[18].mxu1  ;;  %10201 = sbr.rel (%p12979_p7) target bundleno = 2591 (0xa1f), region = 60 }
 0x822   : > { %v9914_v50 = vpop.f32.mrb[19].mxu0  ;;  %v10078_v51 = vpop.f32.mrb[19].mxu1 }
 0x823   : > { %v10176_v53 = vrot.slane %v10168_v45, %v16219_v58  ;;  %v10183_v54 = vrot.slane %v10169_v47, %v16219_v58 }
 0x825   : > { %v10184_v55 = vcombine.low %v10176_v53, %v10183_v54 }
 0x827   : > { %10197 = vst [vmem:[%s16232_s6 + $0x20] sm:$0xff] %v10184_v55 }
 0x82e   : > { %v17094_v52 = vld [vmem:[#allocation3] sm:$0xff]  ;;  %v17096_v56 = vld [vmem:[#allocation3 + $0x8] sm:$0xff]  ;;  %v17098_v57 = vld [vmem:[#allocation3 + $0x10] sm:$0xff] }
 0x82f   : > { %v17103_v60 = vld [vmem:[#allocation3 + $0x18] sm:$0xff]  ;;  %v10212_v61 = vcombine.high %v17094_v52, %v17094_v52  ;;  %v10219_v62 = vrot.slane %v17094_v52, %v16219_v58  ;;  %v10229_v63 = vcombine.high %v17096_v56, %v17096_v56  ;;  %v10236_v0 = vrot.slane %v17096_v56, %v16219_v58  ;;  %v17113_v2 = vld [vmem:[#allocation3 + $0x20] sm:$0xff]  ;;  %v17148_v51 = vld [vmem:[#allocation3 + $0x50] sm:$0xff] }
 0x830   : > { %v10246_v44 = vcombine.high %v17098_v57, %v17098_v57  ;;  %v10253_v3 = vrot.slane %v17098_v57, %v16219_v58  ;;  %v10263_v4 = vcombine.high %v17103_v60, %v17103_v60  ;;  %v10270_v5 = vrot.slane %v17103_v60, %v16219_v58  ;;  %v17150_v53 = vld [vmem:[#allocation3 + $0x58] sm:$0xff] }
 0x831   : > { %v10226_v6 = vrot.slane %v10212_v61, %v16219_v58  ;;  %v10227_v7 = vcombine.high %v10219_v62, %v10219_v62  ;;  %v10243_v8 = vrot.slane %v10229_v63, %v16219_v58  ;;  %v10244_v9 = vcombine.high %v10236_v0, %v10236_v0  ;;  %v17155_v63 = vld [vmem:[#allocation3 + $0x60] sm:$0xff] }
 0x832   : > { %v10260_v10 = vrot.slane %v10246_v44, %v16219_v58  ;;  %v10261_v11 = vcombine.high %v10253_v3, %v10253_v3  ;;  %v10277_v12 = vrot.slane %v10263_v4, %v16219_v58  ;;  %v10278_v13 = vcombine.high %v10270_v5, %v10270_v5 }
 0x833   : > { %v10228_v14 = vcombine.high %v10226_v6, %v10226_v6  ;;  %v10245_v15 = vcombine.high %v10243_v8, %v10243_v8  ;;  %v10280_v1 = vcombine.high %v17113_v2, %v17113_v2  ;;  %v10287_v16 = vrot.slane %v17113_v2, %v16219_v58 }
 0x834   : > { %v10262_v17 = vcombine.high %v10260_v10, %v10260_v10  ;;  %v10279_v18 = vcombine.high %v10277_v12, %v10277_v12  ;;  %v10318_v20 = vsel %vm10317_vm3, %v10219_v62, -inf  ;;  %v10319_v19 = vsel %vm10317_vm3, %v10227_v7, -inf }
 0x835   : > { %v10294_v21 = vrot.slane %v10280_v1, %v16219_v58  ;;  %v10295_v22 = vcombine.high %v10287_v16, %v10287_v16  ;;  %v10320_v23 = vsel %vm10317_vm3, %v10226_v6, -inf  ;;  %v10321_v24 = vsel %vm10317_vm3, %v10228_v14, -inf  ;;  %v17158_v6 = vld [vmem:[#allocation3 + $0x68] sm:$0xff] }
 0x836   : > { %v10322_v27 = vsel %vm10317_vm3, %v10236_v0, -inf  ;;  %v10324_v28 = vsel %vm10317_vm3, %v10244_v9, -inf  ;;  %v10326_v32 = vsel %vm10317_vm3, %v10243_v8, -inf  ;;  %v10328_v29 = vsel %vm10317_vm3, %v10245_v15, -inf  ;;  %v10522_v15 = vld [vmem:[#allocation3 + $0x70] sm:$0xff] }
 0x837   : > { %v10296_v30 = vcombine.high %v10294_v21, %v10294_v21  ;;  %v10323_v31 = vmax.f32 %v10318_v20, %v10322_v27  ;;  %v10325_v33 = vmax.f32 %v10319_v19, %v10324_v28  ;;  %v10327_v34 = vmax.f32 %v10320_v23, %v10326_v32 }
 0x838   : > { %v10329_v26 = vmax.f32 %v10321_v24, %v10328_v29  ;;  %v10330_v25 = vsel %vm10317_vm3, %v10253_v3, -inf  ;;  %v10332_v35 = vsel %vm10317_vm3, %v10261_v11, -inf  ;;  %v10334_v37 = vsel %vm10317_vm3, %v10260_v10, -inf }
 0x839   : > { %v10331_v38 = vmax.f32 %v10323_v31, %v10330_v25  ;;  %v10333_v39 = vmax.f32 %v10325_v33, %v10332_v35  ;;  %v10335_v46 = vmax.f32 %v10327_v34, %v10334_v37  ;;  %v10336_v40 = vsel %vm10317_vm3, %v10262_v17, -inf }
 0x83a   : > { %v10337_v41 = vmax.f32 %v10329_v26, %v10336_v40  ;;  %v10338_v42 = vsel %vm10317_vm3, %v10270_v5, -inf  ;;  %v10340_v43 = vsel %vm10317_vm3, %v10278_v13, -inf  ;;  %v10342_v45 = vsel %vm10317_vm3, %v10277_v12, -inf }
 0x83b   : > { %v10339_v47 = vmax.f32 %v10331_v38, %v10338_v42  ;;  %v10341_v48 = vmax.f32 %v10333_v39, %v10340_v43  ;;  %v10343_v36 = vmax.f32 %v10335_v46, %v10342_v45  ;;  %v10344_v50 = vsel %vm10317_vm3, %v10279_v18, -inf }
 0x83c   : > { %v10345_v54 = vmax.f32 %v10337_v41, %v10344_v50  ;;  %v10346_v55 = vsel %vm10317_vm3, %v10287_v16, -inf  ;;  %v10348_v61 = vsel %vm10317_vm3, %v10295_v22, -inf  ;;  %v10350_v62 = vsel %vm10317_vm3, %v10294_v21, -inf }
 0x83d   : > { %v10347_v0 = vmax.f32 %v10339_v47, %v10346_v55  ;;  %v10349_v44 = vmax.f32 %v10341_v48, %v10348_v61  ;;  %v10351_v3 = vmax.f32 %v10343_v36, %v10350_v62  ;;  %v10352_v4 = vsel %vm10317_vm3, %v10296_v30, -inf }
 0x83e   : > { %v10353_v5 = vmax.f32 %v10345_v54, %v10352_v4  ;;  %v10528_v7 = vcombine.high %v17148_v51, %v17148_v51  ;;  %v10535_v8 = vrot.slane %v17148_v51, %v16219_v58  ;;  %v10545_v9 = vcombine.high %v17150_v53, %v17150_v53 }
 0x83f   : > { %v10354_v10 = vmax.f32 %v10347_v0, %v10349_v44  ;;  %v10552_v11 = vrot.slane %v17150_v53, %v16219_v58  ;;  %v10562_v12 = vcombine.high %v17155_v63, %v17155_v63  ;;  %v10569_v13 = vrot.slane %v17155_v63, %v16219_v58 }
 0x840   : > { %v10355_v14 = vmax.f32 %v10351_v3, %v10353_v5  ;;  %v10542_v1 = vrot.slane %v10528_v7, %v16219_v58  ;;  %v10543_v16 = vcombine.high %v10535_v8, %v10535_v8  ;;  %v10559_v17 = vrot.slane %v10545_v9, %v16219_v58 }
 0x841   : > { %v10560_v18 = vcombine.high %v10552_v11, %v10552_v11  ;;  %v10576_v20 = vrot.slane %v10562_v12, %v16219_v58  ;;  %v10577_v19 = vcombine.high %v10569_v13, %v10569_v13  ;;  %v10579_v21 = vcombine.high %v17158_v6, %v17158_v6  ;;  %v17200_v12 = vld [vmem:[#allocation3 + $0x30] sm:$0xff] }
 0x842   : > { %v10356_v22 = vmax.f32 %v10354_v10, %v10355_v14  ;;  %v10544_v23 = vcombine.high %v10542_v1, %v10542_v1  ;;  %v10561_v24 = vcombine.high %v10559_v17, %v10559_v17  ;;  %v10586_v27 = vrot.slane %v17158_v6, %v16219_v58 }
 0x843   : > { %v10578_v28 = vcombine.high %v10576_v20, %v10576_v20  ;;  %v10593_v32 = vrot.slane %v10579_v21, %v16219_v58  ;;  %v10596_v29 = vcombine.high %v10522_v15, %v10522_v15  ;;  %v10603_v30 = vrot.slane %v10522_v15, %v16219_v58 }
 0x844   : > { %10357 = vmax.xlane.f32.xlu0 %v10356_v22  ;;  %v10594_v31 = vcombine.high %v10586_v27, %v10586_v27  ;;  %v10633_v33 = vsel %vm10317_vm3, %v10535_v8, -inf  ;;  %v10634_v34 = vsel %vm10317_vm3, %v10543_v16, -inf  ;;  %v10635_v26 = vsel %vm10317_vm3, %v10542_v1, -inf  ;;  %v17205_v16 = vld [vmem:[#allocation3 + $0x38] sm:$0xff]  ;;  %v17208_v22 = vld [vmem:[#allocation3 + $0x40] sm:$0xff] }
 0x845   : > { %v10595_v25 = vcombine.high %v10593_v32, %v10593_v32  ;;  %v10610_v35 = vrot.slane %v10596_v29, %v16219_v58  ;;  %v10611_v37 = vcombine.high %v10603_v30, %v10603_v30  ;;  %v10636_v38 = vsel %vm10317_vm3, %v10544_v23, -inf }
 0x846   : > { %v10637_v39 = vsel %vm10317_vm3, %v10552_v11, -inf  ;;  %v10639_v46 = vsel %vm10317_vm3, %v10560_v18, -inf  ;;  %v10641_v40 = vsel %vm10317_vm3, %v10559_v17, -inf  ;;  %v10643_v41 = vsel %vm10317_vm3, %v10561_v24, -inf  ;;  %v17198_v11 = vld [vmem:[#allocation3 + $0x28] sm:$0xff] }
 0x847   : > { %v10612_v42 = vcombine.high %v10610_v35, %v10610_v35  ;;  %v10638_v43 = vmax.f32 %v10633_v33, %v10637_v39  ;;  %v10640_v45 = vmax.f32 %v10634_v34, %v10639_v46  ;;  %v10642_v47 = vmax.f32 %v10635_v26, %v10641_v40  ;;  %v17222_v33 = vld [vmem:[#allocation3 + $0x48] sm:$0xff] }
 0x848   : > { %v10644_v48 = vmax.f32 %v10636_v38, %v10643_v41  ;;  %v10645_v36 = vsel %vm10317_vm3, %v10569_v13, -inf  ;;  %v10647_v50 = vsel %vm10317_vm3, %v10577_v19, -inf  ;;  %v10649_v54 = vsel %vm10317_vm3, %v10576_v20, -inf }
 0x849   : > { %v10646_v55 = vmax.f32 %v10638_v43, %v10645_v36  ;;  %v10648_v61 = vmax.f32 %v10640_v45, %v10647_v50  ;;  %v10650_v62 = vmax.f32 %v10642_v47, %v10649_v54  ;;  %v10651_v0 = vsel %vm10317_vm3, %v10578_v28, -inf }
 0x84a   : > { %v10652_v44 = vmax.f32 %v10644_v48, %v10651_v0  ;;  %v10653_v3 = vsel %vm10317_vm3, %v10586_v27, -inf  ;;  %v10655_v4 = vsel %vm10317_vm3, %v10594_v31, -inf  ;;  %v10657_v5 = vsel %vm10317_vm3, %v10593_v32, -inf }
 0x84b   : > { %v10654_v7 = vmax.f32 %v10646_v55, %v10653_v3  ;;  %v10656_v8 = vmax.f32 %v10648_v61, %v10655_v4  ;;  %v10658_v9 = vmax.f32 %v10650_v62, %v10657_v5  ;;  %v10659_v10 = vsel %vm10317_vm3, %v10595_v25, -inf }
 0x84c   : > { %v10660_v13 = vmax.f32 %v10652_v44, %v10659_v10  ;;  %v10661_v14 = vsel %vm10317_vm3, %v10603_v30, -inf  ;;  %v10663_v15 = vsel %vm10317_vm3, %v10611_v37, -inf  ;;  %v10665_v1 = vsel %vm10317_vm3, %v10610_v35, -inf }
 0x84d   : > { %v10662_v17 = vmax.f32 %v10654_v7, %v10661_v14  ;;  %v10664_v18 = vmax.f32 %v10656_v8, %v10663_v15  ;;  %v10666_v20 = vmax.f32 %v10658_v9, %v10665_v1  ;;  %v10667_v19 = vsel %vm10317_vm3, %v10612_v42, -inf }
 0x84e   : > { %v10668_v21 = vmax.f32 %v10660_v13, %v10667_v19  ;;  %v10370_v23 = vcombine.high %v17198_v11, %v17198_v11  ;;  %v10377_v24 = vrot.slane %v17198_v11, %v16219_v58  ;;  %v10387_v27 = vcombine.high %v17200_v12, %v17200_v12 }
 0x84f   : > { %v10669_v28 = vmax.f32 %v10662_v17, %v10664_v18  ;;  %v10394_v32 = vrot.slane %v17200_v12, %v16219_v58  ;;  %v10404_v29 = vcombine.high %v17205_v16, %v17205_v16  ;;  %v10411_v30 = vrot.slane %v17205_v16, %v16219_v58 }
 0x850   : > { %v10670_v31 = vmax.f32 %v10666_v20, %v10668_v21  ;;  %v10384_v34 = vrot.slane %v10370_v23, %v16219_v58  ;;  %v10385_v26 = vcombine.high %v10377_v24, %v10377_v24  ;;  %v10401_v25 = vrot.slane %v10387_v27, %v16219_v58 }
 0x851   : > { %v10402_v35 = vcombine.high %v10394_v32, %v10394_v32  ;;  %v10418_v37 = vrot.slane %v10404_v29, %v16219_v58  ;;  %v10419_v38 = vcombine.high %v10411_v30, %v10411_v30  ;;  %v10421_v39 = vcombine.high %v17208_v22, %v17208_v22 }
 0x852   : > { %v10671_v46 = vmax.f32 %v10669_v28, %v10670_v31  ;;  %v10386_v40 = vcombine.high %v10384_v34, %v10384_v34  ;;  %v10403_v41 = vcombine.high %v10401_v25, %v10401_v25  ;;  %v10428_v42 = vrot.slane %v17208_v22, %v16219_v58 }
 0x853   : > { %v10420_v43 = vcombine.high %v10418_v37, %v10418_v37  ;;  %v10435_v45 = vrot.slane %v10421_v39, %v16219_v58  ;;  %v10438_v47 = vcombine.high %v17222_v33, %v17222_v33  ;;  %v10445_v48 = vrot.slane %v17222_v33, %v16219_v58  ;;  %v10678_v39 = vld [vmem:[#allocation3 + $0x88] sm:$0xff] }
 0x854   : > { %10672 = vmax.xlane.f32.xlu1 %v10671_v46  ;;  %v10436_v36 = vcombine.high %v10428_v42, %v10428_v42  ;;  %v10475_v50 = vsel %vm10317_vm3, %v10377_v24, -inf  ;;  %v10476_v54 = vsel %vm10317_vm3, %v10385_v26, -inf  ;;  %v10477_v55 = vsel %vm10317_vm3, %v10384_v34, -inf  ;;  %v10676_v34 = vld [vmem:[#allocation3 + $0x78] sm:$0xff] }
 0x855   : > { %v10437_v61 = vcombine.high %v10435_v45, %v10435_v45  ;;  %v10452_v62 = vrot.slane %v10438_v47, %v16219_v58  ;;  %v10453_v0 = vcombine.high %v10445_v48, %v10445_v48  ;;  %v10478_v44 = vsel %vm10317_vm3, %v10386_v40, -inf }
 0x856   : > { %v10479_v3 = vsel %vm10317_vm3, %v10394_v32, -inf  ;;  %v10481_v4 = vsel %vm10317_vm3, %v10402_v35, -inf  ;;  %v10483_v5 = vsel %vm10317_vm3, %v10401_v25, -inf  ;;  %v10485_v7 = vsel %vm10317_vm3, %v10403_v41, -inf }
 0x857   : > { %v10454_v8 = vcombine.high %v10452_v62, %v10452_v62  ;;  %v10480_v9 = vmax.f32 %v10475_v50, %v10479_v3  ;;  %v10482_v10 = vmax.f32 %v10476_v54, %v10481_v4  ;;  %v10484_v13 = vmax.f32 %v10477_v55, %v10483_v5  ;;  %v17273_v3 = vld [vmem:[#allocation3 + $0x98] sm:$0xff] }
 0x858   : > { %v10486_v14 = vmax.f32 %v10478_v44, %v10485_v7  ;;  %v10487_v15 = vsel %vm10317_vm3, %v10411_v30, -inf  ;;  %v10489_v1 = vsel %vm10317_vm3, %v10419_v38, -inf  ;;  %v10491_v17 = vsel %vm10317_vm3, %v10418_v37, -inf  ;;  %v10677_v38 = vld [vmem:[#allocation3 + $0x80] sm:$0xff] }
 0x859   : > { %v10488_v18 = vmax.f32 %v10480_v9, %v10487_v15  ;;  %v10490_v20 = vmax.f32 %v10482_v10, %v10489_v1  ;;  %v10492_v19 = vmax.f32 %v10484_v13, %v10491_v17  ;;  %v10493_v21 = vsel %vm10317_vm3, %v10420_v43, -inf }
 0x85a   : > { %v10494_v23 = vmax.f32 %v10486_v14, %v10493_v21  ;;  %v10495_v24 = vsel %vm10317_vm3, %v10428_v42, -inf  ;;  %v10497_v27 = vsel %vm10317_vm3, %v10436_v36, -inf  ;;  %v10499_v28 = vsel %vm10317_vm3, %v10435_v45, -inf }
 0x85b   : > { %v10496_v32 = vmax.f32 %v10488_v18, %v10495_v24  ;;  %v10498_v29 = vmax.f32 %v10490_v20, %v10497_v27  ;;  %v10500_v31 = vmax.f32 %v10492_v19, %v10499_v28  ;;  %v10501_v30 = vsel %vm10317_vm3, %v10437_v61, -inf }
 0x85c   : > { %v10502_v26 = vmax.f32 %v10494_v23, %v10501_v30  ;;  %v10503_v25 = vsel %vm10317_vm3, %v10445_v48, -inf  ;;  %v10505_v35 = vsel %vm10317_vm3, %v10453_v0, -inf  ;;  %v10507_v37 = vsel %vm10317_vm3, %v10452_v62, -inf  ;;  %v17261_v48 = vld [vmem:[#allocation3 + $0x90] sm:$0xff] }
 0x85d   : > { %v10504_v46 = vmax.f32 %v10496_v32, %v10503_v25  ;;  %v10506_v40 = vmax.f32 %v10498_v29, %v10505_v35  ;;  %v10508_v41 = vmax.f32 %v10500_v31, %v10507_v37  ;;  %v10509_v42 = vsel %vm10317_vm3, %v10454_v8, -inf }
 0x85e   : > { %v10510_v43 = vmax.f32 %v10502_v26, %v10509_v42  ;;  %v10700_v45 = vadd.s32 2304, %v17101_v59  ;;  %v10747_v47 = vcombine.high %v10676_v34, %v10676_v34  ;;  %v17259_v36 = vrot.slane %v10676_v34, %v16219_v58 }
 0x85f   : > { %v10511_v50 = vmax.f32 %v10504_v46, %v10506_v40  ;;  %v10764_v54 = vcombine.high %v10677_v38, %v10677_v38  ;;  %v17264_v55 = vrot.slane %v10677_v38, %v16219_v58  ;;  %v10781_v61 = vcombine.high %v10678_v39, %v10678_v39 }
 0x860   : > { %v10512_v62 = vmax.f32 %v10508_v41, %v10510_v43  ;;  %v10720_v0 = vadd.s32 7680, %v10700_v45  ;;  %v17267_v44 = vrot.slane %v10747_v47, %v16219_v58  ;;  %v17271_v59 = vcombine.high %v17259_v36, %v17259_v36 }
 0x861   : > { %v17276_v4 = vrot.slane %v10764_v54, %v16219_v58  ;;  %v17280_v5 = vcombine.high %v17264_v55, %v17264_v55  ;;  %v17283_v7 = vrot.slane %v10678_v39, %v16219_v58  ;;  %v17286_v8 = vrot.slane %v10781_v61, %v16219_v58 }
 0x862   : > { %v10513_v9 = vmax.f32 %v10511_v50, %v10512_v62  ;;  %vm10740_vm4 = vcmp.lt.s32.totalorder %v10720_v0, 10001  ;;  %v17290_v10 = vcombine.high %v17267_v44, %v17267_v44  ;;  %v10798_v13 = vcombine.high %v17261_v48, %v17261_v48 }
 0x863   : > { %v17296_v14 = vcombine.high %v17276_v4, %v17276_v4  ;;  %v17300_v15 = vcombine.high %v17283_v7, %v17283_v7  ;;  %v17304_v1 = vcombine.high %v17286_v8, %v17286_v8  ;;  %v17308_v17 = vrot.slane %v17261_v48, %v16219_v58 }
 0x864   : > { %10514 = vmax.xlane.f32.xlu0 %v10513_v9  ;;  %v17311_v18 = vrot.slane %v10798_v13, %v16219_v58  ;;  %v10815_v20 = vcombine.high %v17273_v3, %v17273_v3  ;;  %v17317_v19 = vrot.slane %v17273_v3, %v16219_v58  ;;  %v10872_v21 = vsel %vm10317_vm3, %v17259_v36, -inf }
 0x865   : > { %v17323_v23 = vcombine.high %v17308_v17, %v17308_v17  ;;  %v10873_v24 = vsel %vm10317_vm3, %v17271_v59, -inf  ;;  %v10874_v27 = vsel %vm10317_vm3, %v17267_v44, -inf  ;;  %v10875_v28 = vsel %vm10317_vm3, %v17290_v10, -inf }
 0x866   : > { %v17333_v32 = vcombine.high %v17311_v18, %v17311_v18  ;;  %v10829_v29 = vrot.slane %v10815_v20, %v16219_v58  ;;  %v17338_v31 = vcombine.high %v17317_v19, %v17317_v19  ;;  %v10876_v30 = vsel %vm10317_vm3, %v17264_v55, -inf }
 0x867   : > { %v10877_v34 = vmax.f32 %v10872_v21, %v10876_v30  ;;  %v10878_v26 = vsel %vm10317_vm3, %v17280_v5, -inf  ;;  %v10880_v25 = vsel %vm10317_vm3, %v17276_v4, -inf  ;;  %v10882_v35 = vsel %vm10317_vm3, %v17296_v14, -inf }
 0x868   : > { %v17349_v37 = vsel %vm10740_vm4, %v10829_v29, -1e+30  ;;  %v10879_v38 = vmax.f32 %v10873_v24, %v10878_v26  ;;  %v10881_v39 = vmax.f32 %v10874_v27, %v10880_v25  ;;  %v10883_v46 = vmax.f32 %v10875_v28, %v10882_v35 }
 0x869   : > { %v10884_v40 = vsel %vm10317_vm3, %v17283_v7, -inf  ;;  %v10886_v41 = vsel %vm10317_vm3, %v17300_v15, -inf  ;;  %v10888_v42 = vsel %vm10317_vm3, %v17286_v8, -inf  ;;  %v10890_v43 = vsel %vm10317_vm3, %v17304_v1, -inf }
 0x86a   : > { %v10885_v45 = vmax.f32 %v10877_v34, %v10884_v40  ;;  %v10887_v47 = vmax.f32 %v10879_v38, %v10886_v41  ;;  %v10889_v50 = vmax.f32 %v10881_v39, %v10888_v42  ;;  %v10891_v54 = vmax.f32 %v10883_v46, %v10890_v43 }
 0x86b   : > { %v10892_v61 = vsel %vm10317_vm3, %v17308_v17, -inf  ;;  %v10894_v62 = vsel %vm10317_vm3, %v17323_v23, -inf  ;;  %v10896_v0 = vsel %vm10317_vm3, %v17311_v18, -inf  ;;  %v10898_v9 = vsel %vm10317_vm3, %v17333_v32, -inf }
 0x86c   : > { %v10893_v13 = vmax.f32 %v10885_v45, %v10892_v61  ;;  %v10895_v20 = vmax.f32 %v10887_v47, %v10894_v62  ;;  %v10897_v21 = vmax.f32 %v10889_v50, %v10896_v0  ;;  %v10899_v24 = vmax.f32 %v10891_v54, %v10898_v9 }
 0x86d   : > { %v10900_v27 = vsel %vm10317_vm3, %v17317_v19, -inf  ;;  %v10902_v28 = vsel %vm10317_vm3, %v17338_v31, -inf  ;;  %v10904_v29 = vsel %vm10317_vm3, %v17349_v37, -inf  ;;  %v15422_v30 = vmov -inf  }
 0x86e   : > { %v10906_v34 = vsel %vm10317_vm3, -1e+30, %v15422_v30  ;;  %v10901_v26 = vmax.f32 %v10893_v13, %v10900_v27  ;;  %v10903_v25 = vmax.f32 %v10895_v20, %v10902_v28  ;;  %v10905_v35 = vmax.f32 %v10897_v21, %v10904_v29 }
 0x86f   : > { %v10907_v38 = vmax.f32 %v10899_v24, %v10906_v34  ;;  %v15423_v43 = vmov 269488144  }
 0x870   : > { %v10908_v39 = vmax.f32 %v10901_v26, %v10903_v25  ;;  %v10916_v45 = vunpack.c.l.s4 %v15423_v43 }
 0x871   : > { %v10909_v46 = vmax.f32 %v10905_v35, %v10907_v38 }
 0x872   : > { %v10917_v54 = vunpack.c.0.s8 %v10916_v45 }
 0x873   : > { %v10910_v40 = vmax.f32 %v10908_v39, %v10909_v46 }
 0x874   : > { %v17375_v62 = vsub.s32 %v10917_v54, %v15716_v49 }
 0x875   : > { %10911 = vmax.xlane.f32.xlu1 %v10910_v40 }
 0x8d1   : > { %v10358_v41 = vpop.xlane.xlu0 %10357 }
 0x8e1   : > { %v10673_v50 = vpop.xlane.xlu1 %10672 }
 0x8f1   : > { %v10515_v42 = vpop.xlane.xlu0 %10514 }
 0x8f2   : > { %v10516_v47 = vmax.f32 %v10358_v41, %v10515_v42 }
 0x8f4   : > { %v10674_v61 = vmax.f32 %v10516_v47, %v10673_v50 }
 0x902   : > { %v10912_v0 = vpop.xlane.xlu1 %10911 }
 0x903   : > { %v17377_v9 = vmax.f32 %v10674_v61, %v10912_v0 }
 0x905   : > { %v17381_v13 = vrot.slane %v17377_v9, %v17375_v62  ;;  %v11426_v25 = vsub.f32 %v17267_v44, %v17377_v9  ;;  %v11429_v35 = vsub.f32 %v17280_v5, %v17377_v9  ;;  %v11432_v5 = vsub.f32 %v17283_v7, %v17377_v9 }
 0x906   : > { %v11434_v45 = vsub.f32 %v17286_v8, %v17377_v9  ;;  %v11435_v47 = vsub.f32 %v17304_v1, %v17377_v9  ;;  %v11437_v7 = vsub.f32 %v17323_v23, %v17377_v9  ;;  %v11439_v50 = vsub.f32 %v17333_v32, %v17377_v9 }
 0x907   : > { %v11090_v20 = vsub.f32 %v17198_v11, %v17381_v13  ;;  %v11091_v21 = vsub.f32 %v17200_v12, %v17381_v13  ;;  %v11092_v49 = vsub.f32 %v17205_v16, %v17381_v13  ;;  %v10923_v28 = vsub.f32 %v17094_v52, %v17381_v13 }
 0x908   : > { %v11093_v29 = vsub.f32 %v17208_v22, %v17381_v13  ;;  %v11094_v30 = vsub.f32 %v17222_v33, %v17381_v13  ;;  %v10924_v12 = vsub.f32 %v17096_v56, %v17381_v13  ;;  %v10925_v34 = vsub.f32 %v17098_v57, %v17381_v13 }
 0x909   : > { %v11095_v24 = vmul.f32 1.442695, %v11090_v20  ;;  %v11097_v27 = vmul.f32 1.442695, %v11091_v21  ;;  %v11099_v11 = vmul.f32 1.442695, %v11092_v49  ;;  %v10926_v16 = vsub.f32 %v17103_v60, %v17381_v13 }
 0x90a   : > { %v10928_v26 = vmul.f32 1.442695, %v10923_v28  ;;  %v11424_v52 = vsub.f32 %v17259_v36, %v17377_v9  ;;  %v10927_v22 = vsub.f32 %v17113_v2, %v17381_v13  ;;  %v11425_v33 = vsub.f32 %v17271_v59, %v17377_v9 }
 0x90b   : > { %15163 = vpow2.f32 %v11095_v24  ;;  %v11427_v56 = vsub.f32 %v17290_v10, %v17377_v9  ;;  %v11101_v57 = vmul.f32 1.442695, %v11093_v29  ;;  %v11428_v60 = vsub.f32 %v17264_v55, %v17377_v9 }
 0x90c   : > { %15165 = vpow2.f32 %v11097_v27  ;;  %v11430_v36 = vsub.f32 %v17276_v4, %v17377_v9  ;;  %v11103_v38 = vmul.f32 1.442695, %v11094_v30  ;;  %v10930_v59 = vmul.f32 1.442695, %v10924_v12 }
 0x90d   : > { %15167 = vpow2.f32 %v11099_v11  ;;  %v10932_v39 = vmul.f32 1.442695, %v10925_v34  ;;  %v10934_v10 = vmul.f32 1.442695, %v10926_v16  ;;  %v10936_v40 = vmul.f32 1.442695, %v10927_v22 }
 0x90e   : > { %15169 = vpow2.f32 %v10928_v26  ;;  %v11431_v55 = vsub.f32 %v17296_v14, %v17377_v9  ;;  %v11433_v4 = vsub.f32 %v17300_v15, %v17377_v9  ;;  %v11436_v14 = vsub.f32 %v17308_v17, %v17377_v9 }
 0x90f   : > { %15171 = vpow2.f32 %v11101_v57  ;;  %v11438_v15 = vsub.f32 %v17311_v18, %v17377_v9  ;;  %v11440_v8 = vsub.f32 %v17317_v19, %v17377_v9  ;;  %v11441_v1 = vsub.f32 %v17338_v31, %v17377_v9 }
 0x910   : > { %15173 = vpow2.f32 %v11103_v38  ;;  %v11442_v17 = vsub.f32 %v17349_v37, %v17377_v9  ;;  %v11444_v61 = vmul.f32 1.442695, %v11424_v52  ;;  %v11446_v24 = vmul.f32 1.442695, %v11425_v33 }
 0x911   : > { %15175 = vpow2.f32 %v10930_v59  ;;  %v11448_v27 = vmul.f32 1.442695, %v11426_v25  ;;  %v17446_v49 = vmul.f32 1.442695, %v11427_v56  ;;  %v17449_v29 = vmul.f32 1.442695, %v11428_v60 }
 0x912   : > { %15177 = vpow2.f32 %v10932_v39  ;;  %v17451_v30 = vmul.f32 1.442695, %v11429_v35  ;;  %v17453_v34 = vmul.f32 1.442695, %v11430_v36  ;;  %v17455_v16 = vmul.f32 1.442695, %v11431_v55 }
 0x913   : > { %15179 = vpow2.f32 %v10934_v10  ;;  %v17459_v25 = vmul.f32 1.442695, %v11432_v5  ;;  %v17461_v57 = vmul.f32 1.442695, %v11433_v4  ;;  %v17463_v60 = vmul.f32 1.442695, %v11434_v45 }
 0x914   : > { %15181 = vpow2.f32 %v10936_v40  ;;  %v17466_v36 = vmul.f32 1.442695, %v11435_v47  ;;  %v17473_v4 = vmul.f32 1.442695, %v11437_v7 }
 0x915   : > { %v15164_v2 = vpop.eup %15163  ;;  %15183 = vpow2.f32 %v11444_v61 }
 0x916   : > { %v11110_v46 = vcombine.high %v15164_v2, %v15164_v2  ;;  %v11117_v44 = vrot.slane %v15164_v2, %v16219_v58  ;;  %v15166_v41 = vpop.eup %15165  ;;  %v17468_v2 = vmul.f32 1.442695, %v11436_v14  ;;  %15185 = vpow2.f32 %v11446_v24 }
 0x917   : > { %v11127_v54 = vcombine.high %v15166_v41, %v15166_v41  ;;  %v11134_v0 = vrot.slane %v15166_v41, %v16219_v58  ;;  %v15168_v11 = vpop.eup %15167  ;;  %15187 = vpow2.f32 %v11448_v27 }
 0x918   : > { %v11124_v42 = vrot.slane %v11110_v46, %v16219_v58  ;;  %v11125_v43 = vcombine.high %v11117_v44, %v11117_v44  ;;  %v11215_v18 = vsel %vm10317_vm3, %v11117_v44, 0.0  ;;  %v15170_v26 = vpop.eup %15169  ;;  %v11144_v59 = vcombine.high %v15168_v11, %v15168_v11 }
 0x919   : > { %v11141_v52 = vrot.slane %v11127_v54, %v16219_v58  ;;  %v11142_v22 = vcombine.high %v11134_v0, %v11134_v0  ;;  %v11222_v35 = vsel %vm10317_vm3, %v11134_v0, 0.0  ;;  %v15172_v38 = vpop.eup %15171  ;;  %v10943_v46 = vcombine.high %v15170_v26, %v15170_v26 }
 0x91a   : > { %v11126_v23 = vcombine.high %v11124_v42, %v11124_v42  ;;  %v11216_v20 = vsel %vm10317_vm3, %v11125_v43, 0.0  ;;  %v11218_v28 = vsel %vm10317_vm3, %v11124_v42, 0.0  ;;  %v10950_v44 = vrot.slane %v15170_v26, %v16219_v58  ;;  %v15174_v10 = vpop.eup %15173 }
 0x91b   : > { %v11217_v21 = vadd.f32 %v11216_v20, %v11215_v18  ;;  %v11143_v55 = vcombine.high %v11141_v52, %v11141_v52  ;;  %v11151_v40 = vrot.slane %v15168_v11, %v16219_v58  ;;  %v11224_v5 = vsel %vm10317_vm3, %v11142_v22, 0.0  ;;  %v15176_v41 = vpop.eup %15175 }
 0x91c   : > { %v11220_v33 = vsel %vm10317_vm3, %v11126_v23, 0.0  ;;  %v10957_v43 = vrot.slane %v10943_v46, %v16219_v58  ;;  %v10958_v45 = vcombine.high %v10950_v44, %v10950_v44  ;;  %v11161_v47 = vcombine.high %v15172_v38, %v15172_v38  ;;  %v15178_v7 = vpop.eup %15177 }
 0x91d   : > { %v11219_v12 = vadd.f32 %v11218_v28, %v11217_v21  ;;  %v11226_v14 = vsel %vm10317_vm3, %v11141_v52, 0.0  ;;  %v17477_v54 = vmul.f32 1.442695, %v11438_v15  ;;  %v11158_v61 = vrot.slane %v11144_v59, %v16219_v58  ;;  %v17483_v24 = vpop.eup %15179 }
 0x91e   : > { %v11168_v23 = vrot.slane %v15172_v38, %v16219_v58  ;;  %v11178_v0 = vcombine.high %v15174_v10, %v15174_v10  ;;  %v11159_v20 = vcombine.high %v11151_v40, %v11151_v40  ;;  %v11228_v21 = vsel %vm10317_vm3, %v11143_v55, 0.0 }
 0x91f   : > { %v11221_v56 = vadd.f32 %v11220_v33, %v11219_v12  ;;  %v10960_v28 = vcombine.high %v15176_v41, %v15176_v41  ;;  %v10967_v11 = vrot.slane %v15176_v41, %v16219_v58  ;;  %v10959_v26 = vcombine.high %v10957_v43, %v10957_v43 }
 0x920   : > { %v11048_v15 = vsel %vm10317_vm3, %v10950_v44, 0.0  ;;  %v11049_v27 = vsel %vm10317_vm3, %v10958_v45, 0.0  ;;  %v11175_v52 = vrot.slane %v11161_v47, %v16219_v58  ;;  %v11185_v22 = vrot.slane %v15174_v10, %v16219_v58 }
 0x921   : > { %v11223_v39 = vadd.f32 %v11222_v35, %v11221_v56  ;;  %v11230_v33 = vsel %vm10317_vm3, %v11151_v40, 0.0  ;;  %v11050_v56 = vadd.f32 %v11049_v27, %v11048_v15  ;;  %v17490_v35 = vpop.eup %15181  ;;  %v11160_v38 = vcombine.high %v11158_v61, %v11158_v61 }
 0x922   : > { %v17493_v59 = vrot.slane %v11178_v0, %v16219_v58  ;;  %v11051_v46 = vsel %vm10317_vm3, %v10957_v43, 0.0  ;;  %v15184_v55 = vpop.eup %15183  ;;  %v11176_v44 = vcombine.high %v11168_v23, %v11168_v23  ;;  %v17500_v10 = vmul.f32 1.442695, %v11439_v50 }
 0x923   : > { %v11225_v42 = vadd.f32 %v11224_v5, %v11223_v39  ;;  %v11232_v5 = vsel %vm10317_vm3, %v11159_v20, 0.0  ;;  %v11052_v41 = vadd.f32 %v11051_v46, %v11050_v56  ;;  %v10975_v45 = vcombine.high %v10967_v11, %v10967_v11 }
 0x924   : > { %v11053_v47 = vsel %vm10317_vm3, %v10959_v26, 0.0  ;;  %v11193_v0 = vcombine.high %v11185_v22, %v11185_v22  ;;  %v11234_v43 = vsel %vm10317_vm3, %v11158_v61, 0.0  ;;  %v11194_v20 = vcombine.high %v17493_v59, %v17493_v59 }
 0x925   : > { %v11227_v18 = vadd.f32 %v11226_v14, %v11225_v42  ;;  %v10974_v42 = vrot.slane %v10960_v28, %v16219_v58  ;;  %v11177_v14 = vcombine.high %v11175_v52, %v11175_v52  ;;  %v11236_v32 = vsel %vm10317_vm3, %v11160_v38, 0.0 }
 0x926   : > { %v11055_v50 = vsel %vm10317_vm3, %v10967_v11, 0.0  ;;  %v11238_v28 = vsel %vm10317_vm3, %v11168_v23, 0.0  ;;  %v10977_v27 = vcombine.high %v15178_v7, %v15178_v7  ;;  %v10984_v26 = vrot.slane %v15178_v7, %v16219_v58 }
 0x927   : > { %v11229_v12 = vadd.f32 %v11228_v21, %v11227_v18  ;;  %v11054_v18 = vadd.f32 %v11053_v47, %v11052_v41  ;;  %v15186_v21 = vpop.eup %15185  ;;  %v11057_v61 = vsel %vm10317_vm3, %v10975_v45, 0.0  ;;  %15189 = vpow2.f32 %v17446_v49 }
 0x928   : > { %v15188_v15 = vpop.eup %15187  ;;  %15191 = vpow2.f32 %v17449_v29  ;;  %v11484_v38 = vsel %vm10317_vm3, %v15184_v55, 0.0  ;;  %v11485_v11 = vsel %vm10317_vm3, %v15186_v21, 0.0  ;;  %v11240_v23 = vsel %vm10317_vm3, %v11176_v44, 0.0 }
 0x929   : > { %v11231_v39 = vadd.f32 %v11230_v33, %v11229_v12  ;;  %v11056_v33 = vadd.f32 %v11055_v50, %v11054_v18  ;;  %v11059_v41 = vsel %vm10317_vm3, %v10974_v42, 0.0  ;;  %15193 = vpow2.f32 %v17451_v30 }
 0x92a   : > { %v11242_v7 = vsel %vm10317_vm3, %v11175_v52, 0.0  ;;  %v10992_v45 = vcombine.high %v10984_v26, %v10984_v26  ;;  %15195 = vpow2.f32 %v17453_v34  ;;  %v11486_v55 = vadd.f32 %v11485_v11, %v11484_v38 }
 0x92b   : > { %v11233_v40 = vadd.f32 %v11232_v5, %v11231_v39  ;;  %v10976_v39 = vcombine.high %v10974_v42, %v10974_v42  ;;  %v11058_v46 = vadd.f32 %v11057_v61, %v11056_v33  ;;  %v11246_v44 = vsel %vm10317_vm3, %v11185_v22, 0.0 }
 0x92c   : > { %v11248_v42 = vsel %vm10317_vm3, %v11193_v0, 0.0  ;;  %v10994_v52 = vcombine.high %v17483_v24, %v17483_v24  ;;  %v11063_v21 = vsel %vm10317_vm3, %v10984_v26, 0.0  ;;  %15197 = vpow2.f32 %v17455_v16 }
 0x92d   : > { %v11235_v12 = vadd.f32 %v11234_v43, %v11233_v40  ;;  %v10991_v40 = vrot.slane %v10977_v27, %v16219_v58  ;;  %v11060_v49 = vadd.f32 %v11059_v41, %v11058_v46  ;;  %v11061_v29 = vsel %vm10317_vm3, %v10976_v39, 0.0 }
 0x92e   : > { %v11244_v43 = vsel %vm10317_vm3, %v11177_v14, 0.0  ;;  %v11001_v34 = vrot.slane %v17483_v24, %v16219_v58  ;;  %v11487_v14 = vsel %vm10317_vm3, %v15188_v15, 0.0  ;;  %v11065_v22 = vsel %vm10317_vm3, %v10992_v45, 0.0 }
 0x92f   : > { %v11237_v56 = vadd.f32 %v11236_v32, %v11235_v12  ;;  %v11062_v18 = vadd.f32 %v11061_v29, %v11060_v49  ;;  %v10993_v12 = vcombine.high %v10991_v40, %v10991_v40  ;;  %15199 = vpow2.f32 %v17459_v25 }
 0x930   : > { %v11488_v0 = vadd.f32 %v11487_v14, %v11486_v55  ;;  %v11252_v27 = vsel %vm10317_vm3, %v11194_v20, 0.0  ;;  %v11257_v16 = vsub.f32 %v17148_v51, %v17381_v13  ;;  %v11067_v15 = vsel %vm10317_vm3, %v10991_v40, 0.0 }
 0x931   : > { %v11239_v5 = vadd.f32 %v11238_v28, %v11237_v56  ;;  %v11064_v32 = vadd.f32 %v11063_v21, %v11062_v18  ;;  %v11250_v28 = vsel %vm10317_vm3, %v17493_v59, 0.0  ;;  %v15190_v33 = vpop.eup %15189  ;;  %v11008_v56 = vrot.slane %v10994_v52, %v16219_v58 }
 0x932   : > { %15201 = vpow2.f32 %v17461_v57  ;;  %v15192_v39 = vpop.eup %15191  ;;  %v11009_v25 = vcombine.high %v11001_v34, %v11001_v34  ;;  %v11011_v61 = vcombine.high %v17490_v35, %v17490_v35  ;;  %v11489_v20 = vsel %vm10317_vm3, %v15190_v33, 0.0 }
 0x933   : > { %v11241_v47 = vadd.f32 %v11240_v23, %v11239_v5  ;;  %v11066_v26 = vadd.f32 %v11065_v22, %v11064_v32  ;;  %v15194_v46 = vpop.eup %15193  ;;  %v11069_v51 = vsel %vm10317_vm3, %v10993_v12, 0.0  ;;  %15203 = vpow2.f32 %v17463_v60 }
 0x934   : > { %v11490_v11 = vadd.f32 %v11489_v20, %v11488_v0  ;;  %v11491_v23 = vsel %vm10317_vm3, %v15192_v39, 0.0  ;;  %v11258_v57 = vsub.f32 %v17150_v53, %v17381_v13  ;;  %v11262_v41 = vmul.f32 1.442695, %v11257_v16 }
 0x935   : > { %v11243_v30 = vadd.f32 %v11242_v7, %v11241_v47  ;;  %v11068_v59 = vadd.f32 %v11067_v15, %v11066_v26  ;;  %v15196_v7 = vpop.eup %15195  ;;  %v11071_v45 = vsel %vm10317_vm3, %v11001_v34, 0.0  ;;  %15205 = vpow2.f32 %v17466_v36 }
 0x936   : > { %v11492_v49 = vadd.f32 %v11491_v23, %v11490_v11  ;;  %v11010_v47 = vcombine.high %v11008_v56, %v11008_v56  ;;  %v11018_v29 = vrot.slane %v17490_v35, %v16219_v58  ;;  %v11493_v55 = vsel %vm10317_vm3, %v15194_v46, 0.0 }
 0x937   : > { %v11245_v50 = vadd.f32 %v11244_v43, %v11243_v30  ;;  %v11070_v5 = vadd.f32 %v11069_v51, %v11068_v59  ;;  %v15198_v43 = vpop.eup %15197  ;;  %15207 = vpow2.f32 %v17468_v2  ;;  %v11495_v30 = vsel %vm10317_vm3, %v15196_v7, 0.0 }
 0x938   : > { %v11494_v53 = vadd.f32 %v11493_v55, %v11492_v49  ;;  %15209 = vpow2.f32 %v11262_v41  ;;  %v11264_v36 = vmul.f32 1.442695, %v11258_v57  ;;  %v11075_v21 = vsel %vm10317_vm3, %v11008_v56, 0.0 }
 0x939   : > { %v11247_v24 = vadd.f32 %v11246_v44, %v11245_v50  ;;  %v11072_v60 = vadd.f32 %v11071_v45, %v11070_v5  ;;  %v15200_v52 = vpop.eup %15199  ;;  %15211 = vpow2.f32 %v17473_v4  ;;  %v11476_v35 = vmul.f32 1.442695, %v11440_v8 }
 0x93a   : > { %v11496_v12 = vadd.f32 %v11495_v30, %v11494_v53  ;;  %v11025_v34 = vrot.slane %v11011_v61, %v16219_v58  ;;  %15213 = vpow2.f32 %v17477_v54  ;;  %v11497_v32 = vsel %vm10317_vm3, %v15198_v43, 0.0 }
 0x93b   : > { %v11249_v38 = vadd.f32 %v11248_v42, %v11247_v24  ;;  %v11073_v42 = vsel %vm10317_vm3, %v11009_v25, 0.0  ;;  %v11026_v50 = vcombine.high %v11018_v29, %v11018_v29  ;;  %v11077_v22 = vsel %vm10317_vm3, %v11010_v47, 0.0 }
 0x93c   : > { %v11074_v18 = vadd.f32 %v11073_v42, %v11072_v60  ;;  %v15202_v14 = vpop.eup %15201  ;;  %15215 = vpow2.f32 %v17500_v10  ;;  %v11498_v0 = vadd.f32 %v11497_v32, %v11496_v12  ;;  %v11499_v19 = vsel %vm10317_vm3, %v15200_v52, 0.0 }
 0x93d   : > { %v11251_v40 = vadd.f32 %v11250_v28, %v11249_v38  ;;  %v11443_v28 = vsub.f32 -1e+30, %v17377_v9  ;;  %15217 = vpow2.f32 %v11264_v36  ;;  %v15204_v8 = vpop.eup %15203  ;;  %v11478_v54 = vmul.f32 1.442695, %v11441_v1 }
 0x93e   : > { %v11076_v2 = vadd.f32 %v11075_v21, %v11074_v18  ;;  %v11500_v26 = vadd.f32 %v11499_v19, %v11498_v0  ;;  %v11259_v16 = vsub.f32 %v17155_v63, %v17381_v13  ;;  %v11027_v33 = vcombine.high %v11025_v34, %v11025_v34 }
 0x93f   : > { %v11253_v44 = vadd.f32 %v11252_v27, %v11251_v40  ;;  %v11079_v27 = vsel %vm10317_vm3, %v11018_v29, 0.0  ;;  %v11501_v24 = vsel %vm10317_vm3, %v15202_v14, 0.0  ;;  %v15206_v56 = vpop.eup %15205  ;;  %v11081_v15 = vsel %vm10317_vm3, %v11026_v50, 0.0 }
 0x940   : > { %v11078_v4 = vadd.f32 %v11077_v22, %v11076_v2  ;;  %15219 = vpow2.f32 %v11476_v35  ;;  %v11480_v39 = vmul.f32 1.442695, %v11442_v17  ;;  %v11502_v25 = vadd.f32 %v11501_v24, %v11500_v26 }
 0x941   : > { %11254 = vadd.xlane.f32.xlu1 %v11253_v44  ;;  %v11482_v31 = vmul.f32 1.442695, %v11443_v28  ;;  %v11503_v1 = vsel %vm10317_vm3, %v15204_v8, 0.0  ;;  %v15208_v59 = vpop.eup %15207  ;;  %v11083_v63 = vsel %vm10317_vm3, %v11025_v34, 0.0  ;;  %15221 = vpow2.f32 %v11478_v54 }
 0x942   : > { %v11080_v10 = vadd.f32 %v11079_v27, %v11078_v4  ;;  %v11504_v20 = vadd.f32 %v11503_v1, %v11502_v25  ;;  %v11266_v46 = vmul.f32 1.442695, %v11259_v16  ;;  %v15210_v38 = vpop.eup %15209  ;;  %v11085_v11 = vsel %vm10317_vm3, %v11027_v33, 0.0  ;;  %v15235_v4 = vld [vmem:[#allocation3 + $0x70] sm:$0xff] }
 0x943   : > { %v11505_v5 = vsel %vm10317_vm3, %v15206_v56, 0.0  ;;  %v15212_v23 = vpop.eup %15211  ;;  %15223 = vpow2.f32 %v11480_v39  ;;  %v11277_v17 = vcombine.high %v15210_v38, %v15210_v38  ;;  %v11284_v57 = vrot.slane %v15210_v38, %v16219_v58 }
 0x944   : > { %v11082_v61 = vadd.f32 %v11081_v15, %v11080_v10  ;;  %v11506_v37 = vadd.f32 %v11505_v5, %v11504_v20  ;;  %v15214_v41 = vpop.eup %15213  ;;  %15225 = vpow2.f32 %v11482_v31  ;;  %v11507_v40 = vsel %vm10317_vm3, %v15208_v59, 0.0 }
 0x945   : > { %v11260_v47 = vsub.f32 %v17158_v6, %v17381_v13  ;;  %15227 = vpow2.f32 %v11266_v46  ;;  %v11509_v60 = vsel %vm10317_vm3, %v15212_v23, 0.0  ;;  %v11291_v55 = vrot.slane %v11277_v17, %v16219_v58 }
 0x946   : > { %v11084_v51 = vadd.f32 %v11083_v63, %v11082_v61  ;;  %v15216_v45 = vpop.eup %15215  ;;  %v11508_v49 = vadd.f32 %v11507_v40, %v11506_v37  ;;  %v11292_v43 = vcombine.high %v11284_v57, %v11284_v57  ;;  %v11511_v42 = vsel %vm10317_vm3, %v15214_v41, 0.0 }
 0x947   : > { %v15218_v29 = vpop.eup %15217  ;;  %v11513_v30 = vsel %vm10317_vm3, %v15216_v45, 0.0  ;;  %v11268_v36 = vmul.f32 1.442695, %v11260_v47  ;;  %v11293_v21 = vcombine.high %v11291_v55, %v11291_v55  ;;  %v11382_v35 = vsel %vm10317_vm3, %v11284_v57, 0.0 }
 0x948   : > { %v11086_v7 = vadd.f32 %v11085_v11, %v11084_v51  ;;  %v11510_v44 = vadd.f32 %v11509_v60, %v11508_v49  ;;  %v11294_v52 = vcombine.high %v15218_v29, %v15218_v29  ;;  %v11301_v6 = vrot.slane %v15218_v29, %v16219_v58 }
 0x949   : > { %v11383_v12 = vsel %vm10317_vm3, %v11292_v43, 0.0  ;;  %v11385_v50 = vsel %vm10317_vm3, %v11291_v55, 0.0  ;;  %v11261_v28 = vsub.f32 %v15235_v4, %v17381_v13  ;;  %15229 = vpow2.f32 %v11268_v36 }
 0x94a   : > { %11087 = vadd.xlane.f32.xlu0 %v11086_v7  ;;  %v15220_v53 = vpop.eup %15219  ;;  %v11512_v18 = vadd.f32 %v11511_v42, %v11510_v44  ;;  %v11384_v32 = vadd.f32 %v11383_v12, %v11382_v35  ;;  %v11308_v54 = vrot.slane %v11294_v52, %v16219_v58  ;;  %v11309_v26 = vcombine.high %v11301_v6, %v11301_v6 }
 0x94b   : > { %v15222_v34 = vpop.eup %15221  ;;  %v11515_v14 = vsel %vm10317_vm3, %v15220_v53, 0.0  ;;  %v11387_v16 = vsel %vm10317_vm3, %v11293_v21, 0.0  ;;  %v11389_v15 = vsel %vm10317_vm3, %v11301_v6, 0.0  ;;  %v11270_v25 = vmul.f32 1.442695, %v11261_v28 }
 0x94c   : > { %v11514_v2 = vadd.f32 %v11513_v30, %v11512_v18  ;;  %v11386_v19 = vadd.f32 %v11385_v50, %v11384_v32  ;;  %v11517_v27 = vsel %vm10317_vm3, %v15222_v34, 0.0  ;;  %v11310_v31 = vcombine.high %v11308_v54, %v11308_v54 }
 0x94d   : > { %v15224_v22 = vpop.eup %15223  ;;  %v11391_v63 = vsel %vm10317_vm3, %v11309_v26, 0.0  ;;  %v11393_v38 = vsel %vm10317_vm3, %v11308_v54, 0.0  ;;  %15231 = vpow2.f32 %v11270_v25 }
 0x94e   : > { %v11516_v0 = vadd.f32 %v11515_v14, %v11514_v2  ;;  %v15226_v8 = vpop.eup %15225  ;;  %v11388_v24 = vadd.f32 %v11387_v16, %v11386_v19  ;;  %v11519_v56 = vsel %vm10317_vm3, %v15224_v22, 0.0  ;;  %v11395_v23 = vsel %vm10317_vm3, %v11310_v31, 0.0  ;;  %v11563_v31 = vld [vmem:[#allocation3 + $0x50] sm:$0xff] }
 0x94f   : > { %v15228_v33 = vpop.eup %15227  ;;  %v11521_v13 = vsel %vm10317_vm3, %v15226_v8, 0.0 }
 0x950   : > { %v11518_v10 = vadd.f32 %v11517_v27, %v11516_v0  ;;  %v11390_v61 = vadd.f32 %v11389_v15, %v11388_v24  ;;  %v11311_v1 = vcombine.high %v15228_v33, %v15228_v33  ;;  %v11318_v59 = vrot.slane %v15228_v33, %v16219_v58 }
 0x952   : > { %v11520_v39 = vadd.f32 %v11519_v56, %v11518_v10  ;;  %v11392_v46 = vadd.f32 %v11391_v63, %v11390_v61  ;;  %v11325_v11 = vrot.slane %v11311_v1, %v16219_v58  ;;  %v11326_v5 = vcombine.high %v11318_v59, %v11318_v59  ;;  %v11564_v1 = vld [vmem:[#allocation3 + $0x58] sm:$0xff]  ;;  %v11566_v63 = vld [vmem:[#allocation3 + $0x68] sm:$0xff] }
 0x953   : > { %v15230_v37 = vpop.eup %15229  ;;  %v11397_v57 = vsel %vm10317_vm3, %v11318_v59, 0.0  ;;  %v11565_v59 = vld [vmem:[#allocation3 + $0x60] sm:$0xff] }
 0x954   : > { %v11522_v20 = vadd.f32 %v11521_v13, %v11520_v39  ;;  %v11394_v51 = vadd.f32 %v11393_v38, %v11392_v46  ;;  %v11327_v7 = vcombine.high %v11325_v11, %v11325_v11  ;;  %v11328_v40 = vcombine.high %v15230_v37, %v15230_v37  ;;  %v15236_v38 = vld [vmem:[#allocation3] sm:$0xff] }
 0x955   : > { %v11335_v45 = vrot.slane %v15230_v37, %v16219_v58  ;;  %v11399_v49 = vsel %vm10317_vm3, %v11326_v5, 0.0  ;;  %v11401_v29 = vsel %vm10317_vm3, %v11325_v11, 0.0  ;;  %v15237_v11 = vld [vmem:[#allocation3 + $0x8] sm:$0xff]  ;;  %v15239_v37 = vld [vmem:[#allocation3 + $0x18] sm:$0xff] }
 0x956   : > { %11523 = vadd.xlane.f32.xlu1 %v11522_v20  ;;  %v11396_v17 = vadd.f32 %v11395_v23, %v11394_v51  ;;  %v11342_v55 = vrot.slane %v11328_v40, %v16219_v58  ;;  %v11403_v44 = vsel %vm10317_vm3, %v11327_v7, 0.0  ;;  %v11567_v20 = vld [vmem:[#allocation3 + $0x70] sm:$0xff] }
 0x957   : > { %v11343_v43 = vcombine.high %v11335_v45, %v11335_v45  ;;  %v15232_v42 = vpop.eup %15231  ;;  %v11405_v18 = vsel %vm10317_vm3, %v11335_v45, 0.0  ;;  %v15238_v23 = vld [vmem:[#allocation3 + $0x10] sm:$0xff] }
 0x958   : > { %v11398_v41 = vadd.f32 %v11397_v57, %v11396_v17  ;;  %v11344_v36 = vcombine.high %v11342_v55, %v11342_v55  ;;  %v11345_v52 = vcombine.high %v15232_v42, %v15232_v42  ;;  %v11352_v21 = vrot.slane %v15232_v42, %v16219_v58  ;;  %v15242_v40 = vld [vmem:[#allocation3 + $0x30] sm:$0xff] }
 0x959   : > { %v11407_v6 = vsel %vm10317_vm3, %v11343_v43, 0.0  ;;  %v11409_v12 = vsel %vm10317_vm3, %v11342_v55, 0.0  ;;  %v15245_v55 = vld [vmem:[#allocation3 + $0x48] sm:$0xff] }
 0x95a   : > { %v11400_v47 = vadd.f32 %v11399_v49, %v11398_v41  ;;  %v11359_v2 = vrot.slane %v11345_v52, %v16219_v58  ;;  %v11360_v32 = vcombine.high %v11352_v21, %v11352_v21  ;;  %v11411_v14 = vsel %vm10317_vm3, %v11344_v36, 0.0  ;;  %v15241_v41 = vld [vmem:[#allocation3 + $0x28] sm:$0xff]  ;;  %v15243_v49 = vld [vmem:[#allocation3 + $0x38] sm:$0xff] }
 0x95b   : > { %v11413_v22 = vsel %vm10317_vm3, %v11352_v21, 0.0  ;;  %v15246_v52 = vld [vmem:[#allocation3 + $0x78] sm:$0xff] }
 0x95c   : > { %v11402_v60 = vadd.f32 %v11401_v29, %v11400_v47  ;;  %v11361_v4 = vcombine.high %v11359_v2, %v11359_v2  ;;  %v11415_v28 = vsel %vm10317_vm3, %v11360_v32, 0.0  ;;  %v11417_v8 = vsel %vm10317_vm3, %v11359_v2, 0.0  ;;  %v15244_v29 = vld [vmem:[#allocation3 + $0x40] sm:$0xff] }
 0x95e   : > { %v11404_v53 = vadd.f32 %v11403_v44, %v11402_v60  ;;  %v11419_v54 = vsel %vm10317_vm3, %v11361_v4, 0.0 }
 0x960   : > { %v11406_v30 = vadd.f32 %v11405_v18, %v11404_v53 }
 0x962   : > { %v11408_v35 = vadd.f32 %v11407_v6, %v11406_v30  ;;  %v15247_v6 = vld [vmem:[#allocation3 + $0x80] sm:$0xff] }
 0x964   : > { %v11410_v34 = vadd.f32 %v11409_v12, %v11408_v35  ;;  %v15248_v12 = vld [vmem:[#allocation3 + $0x88] sm:$0xff] }
 0x966   : > { %v11412_v50 = vadd.f32 %v11411_v14, %v11410_v34 }
 0x968   : > { %v11414_v0 = vadd.f32 %v11413_v22, %v11412_v50 }
 0x96a   : > { %v11416_v19 = vadd.f32 %v11415_v28, %v11414_v0 }
 0x96c   : > { %v11418_v27 = vadd.f32 %v11417_v8, %v11416_v19 }
 0x96e   : > { %v11420_v26 = vadd.f32 %v11419_v54, %v11418_v27 }
 0x970   : > { %11421 = vadd.xlane.f32.xlu0 %v11420_v26 }
 0x9ce   : > { %v11255_v58 = vpop.xlane.xlu1 %11254 }
 0x9d7   : > { %v11088_v16 = vpop.xlane.xlu0 %11087 }
 0x9d8   : > { %v11256_v33 = vadd.f32 %v11255_v58, %v11088_v16 }
 0x9e3   : > { %v11524_v56 = vpop.xlane.xlu1 %11523 }
 0x9fd   : > { %v11422_v10 = vpop.xlane.xlu0 %11421 }
 0x9fe   : > { %v11423_v24 = vadd.f32 %v11422_v10, %v11256_v33 }
 0xa00   : > { %v11525_v15 = vadd.f32 %v11524_v56, %v11423_v24 }
 0xa02   : > { %15233 = vlog2.f32 %v11525_v15 }
 0xa0c   : > { %v15234_v39 = vpop.eup %15233 }
 0xa0d   : > { %v11527_v13 = vmul.f32 0.6931472, %v15234_v39 }
 0xa0f   : > { %v11528_v25 = vadd.f32 %v11527_v13, %v17377_v9 }
 0xa11   : > { %v11536_v61 = vrot.slane %v11528_v25, %v17375_v62  ;;  %v15240_v62 = vld [vmem:[#allocation3 + $0x20] sm:$0xff] }
 0xa13   : > { %v11538_v51 = vsub.f32 %v15236_v38, %v11536_v61  ;;  %v11539_v5 = vsub.f32 %v15237_v11, %v11536_v61  ;;  %v11540_v9 = vsub.f32 %v15238_v23, %v11536_v61  ;;  %v11541_v17 = vsub.f32 %v15239_v37, %v11536_v61 }
 0xa14   : > { %v11542_v57 = vsub.f32 %v15240_v62, %v11536_v61  ;;  %v11553_v7 = vsub.f32 %v15241_v41, %v11536_v61  ;;  %v11554_v45 = vsub.f32 %v15242_v40, %v11536_v61  ;;  %v11555_v47 = vsub.f32 %v15243_v49, %v11536_v61 }
 0xa15   : > { %11543 = vst [vmem:[#allocation10] sm:$0xff] %v11538_v51  ;;  %11544 = vst [vmem:[#allocation10 + $0x8] sm:$0xff] %v11539_v5  ;;  %v11556_v60 = vsub.f32 %v15244_v29, %v11536_v61  ;;  %v11557_v43 = vsub.f32 %v15245_v55, %v11536_v61  ;;  %v11568_v44 = vsub.f32 %v11563_v31, %v11536_v61 }
 0xa16   : > { %11545 = vst [vmem:[#allocation10 + $0x10] sm:$0xff] %v11540_v9  ;;  %11546 = vst [vmem:[#allocation10 + $0x18] sm:$0xff] %v11541_v17  ;;  %v11569_v42 = vsub.f32 %v11564_v1, %v11536_v61  ;;  %v11570_v18 = vsub.f32 %v11565_v59, %v11536_v61  ;;  %v11571_v30 = vsub.f32 %v11566_v63, %v11536_v61 }
 0xa17   : > { %11547 = vst [vmem:[#allocation10 + $0x20] sm:$0xff] %v11542_v57  ;;  %11558 = vst [vmem:[#allocation10 + $0x28] sm:$0xff] %v11553_v7  ;;  %v11572_v36 = vsub.f32 %v11567_v20, %v11536_v61  ;;  %v11583_v21 = vsub.f32 %v15246_v52, %v11536_v61  ;;  %v11584_v35 = vsub.f32 %v15247_v6, %v11536_v61 }
 0xa18   : > { %11559 = vst [vmem:[#allocation10 + $0x30] sm:$0xff] %v11554_v45  ;;  %11560 = vst [vmem:[#allocation10 + $0x38] sm:$0xff] %v11555_v47  ;;  %v11585_v34 = vsub.f32 %v15248_v12, %v11536_v61  ;;  %v11586_v2 = vsub.f32 %v17261_v48, %v11536_v61  ;;  %v11587_v32 = vsub.f32 %v17273_v3, %v11536_v61 }
 0xa19   : > { %11561 = vst [vmem:[#allocation10 + $0x40] sm:$0xff] %v11556_v60  ;;  %11562 = vst [vmem:[#allocation10 + $0x48] sm:$0xff] %v11557_v43 }
 0xa1a   : > { %11573 = vst [vmem:[#allocation10 + $0x50] sm:$0xff] %v11568_v44  ;;  %11574 = vst [vmem:[#allocation10 + $0x58] sm:$0xff] %v11569_v42 }
 0xa1b   : > { %11575 = vst [vmem:[#allocation10 + $0x60] sm:$0xff] %v11570_v18  ;;  %11576 = vst [vmem:[#allocation10 + $0x68] sm:$0xff] %v11571_v30 }
 0xa1c   : > { %11577 = vst [vmem:[#allocation10 + $0x70] sm:$0xff] %v11572_v36  ;;  %11588 = vst [vmem:[#allocation10 + $0x78] sm:$0xff] %v11583_v21 }
 0xa1d   : > { %11589 = vst [vmem:[#allocation10 + $0x80] sm:$0xff] %v11584_v35  ;;  %11590 = vst [vmem:[#allocation10 + $0x88] sm:$0xff] %v11585_v34 }
 0xa1e   : > { %11591 = vst [vmem:[#allocation10 + $0x90] sm:$0xff] %v11586_v2  ;;  %11596 = vst.msk [vmem:[#allocation10 + $0x98] sm:$0x3f] %vm17637_vm8, %v11587_v32 }
 0xa1f PF: > { %p13213_p11 = scmp.eq.s32.totalorder %s15474_s22, 3  ;;  %s15424_s14 = smov [#allocation10]  }
 0xa20   : > { %s11604_s16 = sshll.u32 %s15424_s14, 4  ;;  %s11605_s16 = int_to_ptr.vmem [resolvable:$true] %s11604_s16 }
 0xa21   : > { %s15335_s17 = scalar_lea.vmem %s11605_s16, 2528  ;;  %p15342_p10 = scmp.lt.s32.totalorder %s11605_s16, %s11605_s16 }
 0xa22   : > { %p15336_p13 = scmp.ne.s32.totalorder %s11605_s16, %s15335_s17  ;;  %p15343_p0 = scmp.lt.s32.totalorder %s15335_s17, %s15335_s17 }
 0xa24   : > { %p15337_p12 = pnand %p15336_p13, %p13213_p11  ;;  %p15344_p5 = por %p15343_p0, %p15342_p10 }
 0xa26   : > { %p15338_p8 = pneg %p15337_p12 }
 0xa28   : > { %p15345_p9 = pnand %p15344_p5, %p15338_p8 }
 0xa2a   : > { %15348 = shalt.err (!%p15345_p9)
}
 0xa2b   : > { %s15349_s24 = scalar_lea.hbm %s17686_s5, 2528 }
 0xa2c   : > { %p15350_p1 = scmp.ne.s32.totalorder %s17686_s5, %s15349_s24  ;;  %p15355_p2 = scmp.lt.u32.totalorder %s15349_s24, %s17686_s5 }
 0xa2e   : > { %p15351_p3 = pnand %p15350_p1, %p13213_p11 }
 0xa30   : > { %p15352_p6 = pneg %p15351_p3 }
 0xa32   : > { %p15357_p4 = pnand %p15355_p2, %p15352_p6 }
 0xa34   : > { %15360 = shalt.err (!%p15357_p4)
}
 0xa35   : > { %13194 = dma.vmem_to_hbm [thread:$0]  (%p13213_p11), %s11605_s16, 2528, %s17686_s5, [#allocation6]  }
 0xa36   : > { %15390 = dma.done.wait (%p13213_p11), [#allocation6], 2528  }
 0xa37   : > { %15392 = vsyncadd (%p13213_p11), [#allocation6], 4294964768 }
 0xa38 PF: > { %p15_p7 = scmp.ge.s32.totalorder %s15477_s23, 6   ;;  %s17708_s18 = smov %s15399_s19 }
 0xa39   : > { %s17709_s19 = smov %s15403_s20  ;;  %s17710_s20 = smov %s15487_s26 }
 0xa3a   : > { %s17711_s21 = smov %s15477_s23  ;;  %17 = sbr.rel (!%p15_p7) target bundleno = 4 (0x4), region = 96 }
 0xa41   :  { %11617 = vsyncpa [#allocation5], 1 }
 0xa42   :  { %11619 = vsyncpa [#allocation5 + $0x1], 1 }
 0xa43   :  { %11620 = vsyncpa [#allocation8], 1 }
 0xa44   :  { %11621 = vsyncpa [#allocation6], 1 }
 0xa45   :  { %11623 = vsyncpa [#allocation6 + $0x1], 1 }

</bundles_post_ra>
